<compile_context>
chip_gen: v5e
topology: v5e:2x2
jax: 0.10.0
libtpu: 0.0.40
codegen_flags: <defaults>
</compile_context>

<pallas_src>
import functools
import math

import jax
import jax.numpy as jnp
from jax.experimental import pallas as pl
from jax.experimental.pallas import tpu as pltpu


def _attn_kernel(x_ref, out_ref, aw_ref, *, scale):
    # One grid step handles one b1 slice: a (B2, H, S, D) slab.  q = k = v = x.
    _, B2, H, S, D = x_ref.shape
    x = x_ref[0]                                   # (B2, H, S, D)
    # Leading-dim-only reshape (minor two dims untouched) -> free, no relayout.
    xf = x.reshape(B2 * H, S, D)                   # (N, S, D), N = B2*H
    q = xf * scale                                 # fold 1/sqrt(D) into one operand

    # qk[n, s, t] = sum_d q[n, s, d] * x[n, t, d]   (no explicit transpose)
    qk = jnp.einsum("nsd,ntd->nst", q, xf, preferred_element_type=jnp.float32)
    # NOTE: the uniform -10000 mask is deliberately NOT added here; softmax is
    # shift-invariant for a uniform constant, so the result is identical.

    # Numerically stable softmax over the last dim.
    mx = jnp.max(qk, axis=-1, keepdims=True)
    e = jnp.exp(qk - mx)
    denom = jnp.sum(e, axis=-1, keepdims=True)
    aw = e * pl.reciprocal(denom)                  # exact reciprocal, (N,S,1) only

    aw_ref[0] = aw.reshape(B2, H, S, S).astype(aw_ref.dtype)
    out = jnp.einsum("nst,ntd->nsd", aw, xf, preferred_element_type=jnp.float32)
    out_ref[0] = out.reshape(B2, H, S, D).astype(out_ref.dtype)


def attention_pallas(x):
    """x: (B1, B2, H, S, D) shared q/k/v parameter."""
    B1, B2, H, S, D = x.shape
    scale = 1.0 / math.sqrt(D)
    kernel = functools.partial(_attn_kernel, scale=scale)

    x_spec = pl.BlockSpec((1, B2, H, S, D), lambda i: (i, 0, 0, 0, 0))
    out_spec = pl.BlockSpec((1, B2, H, S, D), lambda i: (i, 0, 0, 0, 0))
    aw_spec = pl.BlockSpec((1, B2, H, S, S), lambda i: (i, 0, 0, 0, 0))

    out, aw = pl.pallas_call(
        kernel,
        out_shape=(
            jax.ShapeDtypeStruct((B1, B2, H, S, D), jnp.float32),
            jax.ShapeDtypeStruct((B1, B2, H, S, S), jnp.float32),
        ),
        grid_spec=pltpu.PrefetchScalarGridSpec(
            num_scalar_prefetch=0,
            grid=(B1,),
            in_specs=[x_spec],
            out_specs=[out_spec, aw_spec],
        ),
        compiler_params=pltpu.CompilerParams(
            # One parallel batch axis (>= 2 steps) so v7x's two TensorCores
            # can split the work; each step writes a distinct output block.
            dimension_semantics=("parallel",)
        ),
    )(x)
    return out, aw


def model_forward(l1, q_param):
    # l1 = self.pos(l1)
    # TODO(synk): PosEncoding is not defined in the reference module and its
    # result never feeds the outputs, so the l1 path is intentionally skipped.
    del l1

    B1, B2, H, S, D = q_param.shape

    # attn_mask = -10000 * (triu(ones, 1) + tril(ones))  -> -10000 everywhere.
    # Returned for module parity, but folded out of the kernel (uniform const).
    attn_mask = jnp.full((H, H, S, S), -10000.0, dtype=jnp.float32)

    output, attn_weight = attention_pallas(q_param)
    return output, attn_weight, attn_mask


def _reference(q_param):
    # Pure-JAX reference.  The uniform -10000 mask cancels exactly in softmax,
    # so it is omitted here too (identical math, better conditioned).
    q = k = v = q_param
    D = q.shape[-1]
    qk = jnp.einsum("abhsd,abhtd->abhst", q, k) / math.sqrt(D)
    aw = jax.nn.softmax(qk, axis=-1)
    out = jnp.einsum("abhst,abhtd->abhsd", aw, v)
    return out, aw


if __name__ == "__main__":
    key = jax.random.PRNGKey(0)
    kq, kl = jax.random.split(key)

    # Small deterministic shapes consistent with the module structure
    # (original: q (8, 8, 4, 64, 64), l1 (4, 8, 64, 64)).
    B1, B2, H, S, D = 2, 4, 4, 64, 64
    q_param = jax.random.normal(kq, (B1, B2, H, S, D), dtype=jnp.float32)
    l1 = jax.random.normal(kl, (H, B2, S, D), dtype=jnp.float32)

    output, attn_weight, attn_mask = model_forward(l1, q_param)
    jax.block_until_ready((output, attn_weight, attn_mask))

    # Correctness check against a pure-JAX reference.
    ref_out, ref_aw = _reference(q_param)
    assert attn_mask.shape == (H, H, S, S)
    assert bool(jnp.allclose(attn_mask, -10000.0))
    assert bool(jnp.allclose(attn_weight, ref_aw, atol=5e-4, rtol=1e-3))
    assert bool(jnp.allclose(output, ref_out, atol=5e-3, rtol=1e-3))

    print("KERNEL_OK")
</pallas_src>

<mosaic_0001>
module attributes {stable_mosaic.version = 11 : i64} {
  func.func @_attn_kernel(%arg0: i32, %arg1: memref<1x4x4x64x64xf32, #tpu.memory_space<vmem>>, %arg2: memref<1x4x4x64x64xf32, #tpu.memory_space<vmem>>, %arg3: memref<1x4x4x64x64xf32, #tpu.memory_space<vmem>>) attributes {dimension_semantics = [#tpu.dimension_semantics<parallel>], iteration_bounds = array<i64: 2>, scalar_prefetch = 0 : i64, scratch_operands = 0 : i64, tpu.core_type = #tpu.core_type<tc>, window_params = [{transform_indices = @transform_0, window_bounds = array<i64: 1, 4, 4, 64, 64>}, {transform_indices = @transform_1, window_bounds = array<i64: 1, 4, 4, 64, 64>}, {transform_indices = @transform_2, window_bounds = array<i64: 1, 4, 4, 64, 64>}]} {
    %c0 = arith.constant 0 : index
    %c0_0 = arith.constant 0 : index
    %c0_1 = arith.constant 0 : index
    %c0_2 = arith.constant 0 : index
    %c0_3 = arith.constant 0 : index
    %0 = vector.load %arg1[%c0, %c0_0, %c0_1, %c0_2, %c0_3] : memref<1x4x4x64x64xf32, #tpu.memory_space<vmem>>, vector<1x4x4x64x64xf32>
    %1 = vector.shape_cast %0 : vector<1x4x4x64x64xf32> to vector<4x4x64x64xf32>
    %2 = vector.shape_cast %1 : vector<4x4x64x64xf32> to vector<16x64x64xf32>
    %cst = arith.constant 1.250000e-01 : f32
    %3 = vector.broadcast %cst : f32 to vector<16x64x64xf32>
    %4 = arith.mulf %2, %3 : vector<16x64x64xf32>
    "tpu.trace_start"() <{level = 10 : i32, message = "nsd,ntd->nst"}> : () -> ()
    %cst_4 = arith.constant dense<0.000000e+00> : vector<16x64x64xf32>
    %5 = tpu.matmul %4, %2, %cst_4 {dimension_numbers = #tpu.dot_dimension_numbers<[2], [2], [1], [1], [0, 0, 0, 1, 1, 1], [0], [0]>} : vector<16x64x64xf32>, vector<16x64x64xf32>, vector<16x64x64xf32> -> vector<16x64x64xf32>
    "tpu.trace_stop"() : () -> ()
    %cst_5 = arith.constant dense<0xFF800000> : vector<16x64xf32>
    %6 = vector.multi_reduction <maximumf>, %5, %cst_5 [2] : vector<16x64x64xf32> to vector<16x64xf32>
    %7 = vector.shape_cast %6 : vector<16x64xf32> to vector<16x64x1xf32>
    %8 = vector.broadcast %7 : vector<16x64x1xf32> to vector<16x64x64xf32>
    %9 = arith.subf %5, %8 : vector<16x64x64xf32>
    %10 = math.exp %9 : vector<16x64x64xf32>
    %cst_6 = arith.constant dense<0.000000e+00> : vector<16x64xf32>
    %11 = vector.multi_reduction <add>, %10, %cst_6 [2] : vector<16x64x64xf32> to vector<16x64xf32>
    %12 = vector.shape_cast %11 : vector<16x64xf32> to vector<16x64x1xf32>
    %13 = tpu.reciprocal %12 : vector<16x64x1xf32> -> vector<16x64x1xf32>
    %14 = vector.broadcast %13 : vector<16x64x1xf32> to vector<16x64x64xf32>
    %15 = arith.mulf %10, %14 : vector<16x64x64xf32>
    %16 = vector.shape_cast %15 : vector<16x64x64xf32> to vector<4x4x64x64xf32>
    %c0_7 = arith.constant 0 : index
    %c0_8 = arith.constant 0 : index
    %c0_9 = arith.constant 0 : index
    %c0_10 = arith.constant 0 : index
    %c0_11 = arith.constant 0 : index
    %17 = vector.load %arg3[%c0_7, %c0_8, %c0_9, %c0_10, %c0_11] : memref<1x4x4x64x64xf32, #tpu.memory_space<vmem>>, vector<1x4x4x64x64xf32>
    %18 = vector.shape_cast %17 : vector<1x4x4x64x64xf32> to vector<4x4x64x64xf32>
    %19 = vector.shape_cast %16 : vector<4x4x64x64xf32> to vector<1x4x4x64x64xf32>
    tpu.vector_store %arg3[%c0_7, %c0_8, %c0_9, %c0_10, %c0_11], %19 {strides = array<i32>} : memref<1x4x4x64x64xf32, #tpu.memory_space<vmem>>, vector<1x4x4x64x64xf32>,
    "tpu.trace_start"() <{level = 10 : i32, message = "nst,ntd->nsd"}> : () -> ()
    %cst_12 = arith.constant dense<0.000000e+00> : vector<16x64x64xf32>
    %20 = tpu.matmul %15, %2, %cst_12 {dimension_numbers = #tpu.dot_dimension_numbers<[2], [1], [1], [2], [0, 0, 0, 1, 1, 2], [0], [0]>} : vector<16x64x64xf32>, vector<16x64x64xf32>, vector<16x64x64xf32> -> vector<16x64x64xf32>
    "tpu.trace_stop"() : () -> ()
    %21 = vector.shape_cast %20 : vector<16x64x64xf32> to vector<4x4x64x64xf32>
    %c0_13 = arith.constant 0 : index
    %c0_14 = arith.constant 0 : index
    %c0_15 = arith.constant 0 : index
    %c0_16 = arith.constant 0 : index
    %c0_17 = arith.constant 0 : index
    %22 = vector.load %arg2[%c0_13, %c0_14, %c0_15, %c0_16, %c0_17] : memref<1x4x4x64x64xf32, #tpu.memory_space<vmem>>, vector<1x4x4x64x64xf32>
    %23 = vector.shape_cast %22 : vector<1x4x4x64x64xf32> to vector<4x4x64x64xf32>
    %24 = vector.shape_cast %21 : vector<4x4x64x64xf32> to vector<1x4x4x64x64xf32>
    tpu.vector_store %arg2[%c0_13, %c0_14, %c0_15, %c0_16, %c0_17], %24 {strides = array<i32>} : memref<1x4x4x64x64xf32, #tpu.memory_space<vmem>>, vector<1x4x4x64x64xf32>,
    return
  }
  func.func @transform_0(%arg0: i32) -> (i32, i32, i32, i32, i32) {
    %c0_i32 = arith.constant 0 : i32
    %c0_i32_0 = arith.constant 0 : i32
    %c0_i32_1 = arith.constant 0 : i32
    %c0_i32_2 = arith.constant 0 : i32
    %c0_i32_3 = arith.constant 0 : i32
    return %arg0, %c0_i32, %c0_i32_0, %c0_i32_1, %c0_i32_2 : i32, i32, i32, i32, i32
  }
  func.func @transform_1(%arg0: i32) -> (i32, i32, i32, i32, i32) {
    %c0_i32 = arith.constant 0 : i32
    %c0_i32_0 = arith.constant 0 : i32
    %c0_i32_1 = arith.constant 0 : i32
    %c0_i32_2 = arith.constant 0 : i32
    %c0_i32_3 = arith.constant 0 : i32
    return %arg0, %c0_i32, %c0_i32_0, %c0_i32_1, %c0_i32_2 : i32, i32, i32, i32, i32
  }
  func.func @transform_2(%arg0: i32) -> (i32, i32, i32, i32, i32) {
    %c0_i32 = arith.constant 0 : i32
    %c0_i32_0 = arith.constant 0 : i32
    %c0_i32_1 = arith.constant 0 : i32
    %c0_i32_2 = arith.constant 0 : i32
    %c0_i32_3 = arith.constant 0 : i32
    return %arg0, %c0_i32, %c0_i32_0, %c0_i32_1, %c0_i32_2 : i32, i32, i32, i32, i32
  }
}

</mosaic_0001>

<bundles_post_ra>
// kernel: tpu_custom_call.1
= control target key start
LH: loop header
LB: loop body
LE: loop exit
PB: predicated region body
PF: predicated region fallthrough
CT: control target
= control target key end

     0   :  { %8 = vsyncpa [#allocation3], 0  ;;  %s14201_s0 = inlined_call_operand.hbm [shape: f32[2,4,4,64,64], index: 0, kind: input, shape index: {}]   ;;  %s14202_s1 = inlined_call_operand.hbm [shape: f32[2,4,4,64,64], index: 1, kind: output, shape index: {0}]   ;;  %s14203_s2 = inlined_call_operand.hbm [shape: f32[2,4,4,64,64], index: 2, kind: output, shape index: {1}]  }
   0x1   :  { %10 = vsyncpa [#allocation3 + $0x1], 0 }
   0x2   :  { %11 = vsyncpa [#allocation4], 0 }
   0x3   :  { %13 = vsyncpa [#allocation4 + $0x1], 0 }
   0x4   :  { %14 = vsyncpa [#allocation7], 0 }
   0x5   :  { %16 = vsyncpa [#allocation7 + $0x1], 0  ;;  %s7617_s9 = smov 0   ;;  %s7619_s10 = smov 0  }
   0x6   :  { %s7621_s11 = smov 0   ;;  %s7623_s12 = smov 0  }
   0x7 LB: > { %s7638_s13 = sadd.s32 4294967295, %s7596_s12   ;;  %s6368_s14 = sadd.s32 4294967294, %s7596_s12   ;;  %s7596_s12 = sphi %s7623_s12, %s15187_s12   ;;  %s7592_s11 = sphi %s7621_s11, %s15186_s11   ;;  %s7588_s10 = sphi %s7619_s10, %s15185_s10   ;;  %s7584_s9 = sphi %s7617_s9, %s15184_s9  }
   0x8   : > { %s7642_s15 = sadd.s32 1, %s7596_s12   ;;  %s29_s16 = sadd.s32 1, %s7592_s11 }
   0x9   : > { %s26_s17 = ssub.s32 %s7596_s12, %s7642_s15  ;;  %p36_p0 = scmp.ne.s32.totalorder %s7592_s11, %s7588_s10 }
   0xa   : > { %p27_p1 = scmp.eq.s32.totalorder %s26_s17, 0  ;;  %p37_p2 = scmp.eq.s32.totalorder %s7596_s12, 0 }
   0xb   : > { %p42_p3 = scmp.ne.s32.totalorder %s7588_s10, %s7584_s9  ;;  %p43_p4 = scmp.eq.s32.totalorder %s7638_s13, 0 }
   0xc   : > { %s7654_s18 = scalar_select %p27_p1, %s7592_s11, %s29_s16  }
   0xd   : > { %p7656_p5 = por %p37_p2, %p36_p0  ;;  %p7660_p6 = por %p43_p4, %p42_p3 }
   0xe   : > { %p66_p7 = scmp.eq.s32.totalorder %s7638_s13, 1  ;;  %p72_p8 = scmp.eq.s32.totalorder %s6368_s14, 1 }
   0xf   : > { %p6790_p10 = scmp.lt.s32.totalorder %s7596_s12, 2  ;;  %s118_s23 = sand.u32 1, %s7592_s11  }
  0x10   : > { %p7667_p11 = por %p66_p7, %p36_p0  ;;  %p7671_p12 = por %p72_p8, %p42_p3 }
  0x11   : > { %s6770_s24 = sshll.u32 %s7596_s12, 10  ;;  %s6371_s25 = sshll.u32 %s118_s23, 10 }
  0x12   : > { %s127_s28 = scalar_lea.hbm %s14201_s0, %s6770_s24  ;;  %s122_s30 = scalar_lea.vmem [#allocation2], %s6371_s25 }
  0x13   : > { %s128_s29 = sshll.u32 %s127_s28, 4  ;;  %s130_s3 = sshll.u32 %s122_s30, 4  ;;  %s129_s29 = int_to_ptr.hbm [resolvable:$true] %s128_s29  ;;  %s131_s3 = int_to_ptr.vmem [resolvable:$true] %s130_s3 }
  0x14   : > { %p7682_p13 = pnand %p6790_p10, %p7656_p5  ;;  %p6374_p0 = scmp.ge.s32.totalorder %s7596_s12, 1 }
  0x15   : > { %p138_p1 = scmp.lt.s32.totalorder %s7596_s12, 3  ;;  %s119_s5 = scalar_lea.sflag [#allocation3], %s118_s23 }
  0x16   : > { %s7468_s6 = sshra.s32 %s129_s29, 4  ;;  %p7472_p3 = pneg %p7682_p13  ;;  %s7469_s6 = int_to_ptr.hbm [resolvable:$true] %s7468_s6 }
  0x17   : > { %s7470_s7 = scalar_lea.hbm %s7469_s6, 1024  ;;  %s7475_s16 = scalar_lea.hbm %s14201_s0, 2048 }
  0x18   : > { %p7471_p2 = scmp.ne.s32.totalorder %s7469_s6, %s7470_s7  ;;  %p7476_p5 = scmp.lt.s32.totalorder %s7469_s6, %s14201_s0 }
  0x19   : > { %p7477_p8 = scmp.lt.s32.totalorder %s7475_s16, %s7470_s7 }
  0x1a   : > { %p7473_p4 = pnand %p7472_p3, %p7471_p2 }
  0x1b   : > { %p7478_p10 = por %p7477_p8, %p7476_p5 }
  0x1c   : > { %p7474_p7 = pneg %p7473_p4 }
  0x1e   : > { %p7479_p9 = pnand %p7478_p10, %p7474_p7 }
  0x20   : > { %7482 = shalt.err (!%p7479_p9)
}
  0x21   : > { %s7598_s23 = smov 128   ;;  %s7599_s24 = smov 8  }
  0x22   : > { %6782 = dma.hbm_to_vmem [thread:$0]  (!%p7682_p13), %s129_s29, 16384, %s131_s3, %s119_s5, %s7598_s23, %s7598_s23, %s7599_s24  }
  0x23   : > { %p139_p2 = pnand %p6374_p0, %p138_p1 }
  0x25   : > { %142 = sbr.rel (%p139_p2) target bundleno = 1262 (0x4ee), region = 24 }
  0x2a   : > { %s7703_s25 = sand.u32 1, %s7588_s10  }
  0x2b   : > { %s7706_s26 = sshll.u32 %s7703_s25, 10  ;;  %s145_s27 = scalar_lea.sflag [#allocation3], %s7703_s25 }
  0x2c   : > { %s7710_s28 = scalar_lea.vmem [#allocation2], %s7706_s26 }
  0x2d   : > { %7571 = dma.done.wait (%p7660_p6), %s145_s27, 16384  }
  0x2e   : > { %7573 = vsyncadd (%p7660_p6), %s145_s27, 4294950912  ;;  %vm431_vm0 = vcmask 523264   ;;  %v7717_v0 = vld [vmem:[%s7710_s28 + $0x38] sm:$0xff]  ;;  %v7737_v4 = vld [vmem:[%s7710_s28 + $0x30] sm:$0xff]  ;;  %s9294_s20 = scalar_lea.vmem [#allocation6], %s7706_s26  ;;  %s10388_s29 = scalar_lea.vmem [#allocation5], %s7706_s26 }
  0x2f   : > { %v7720_v1 = vld [vmem:[%s7710_s28 + $0x78] sm:$0xff]  ;;  %6378 = vmatpush.xpose.msk.msra.mxu0 %vm431_vm0, %v7717_v0  ;;  %v7740_v5 = vld [vmem:[%s7710_s28 + $0x70] sm:$0xff]  ;;  %v7757_v8 = vld [vmem:[%s7710_s28 + $0x28] sm:$0xff]  ;;  %s6771_s30 = sshll.u32 %s7638_s13, 10  ;;  %s6259_s6 = sshll.u32 %s9294_s20, 4  ;;  %s6260_s6 = int_to_ptr.vmem [resolvable:$true] %s6259_s6 }
  0x30   : > { %v7723_v2 = vld [vmem:[%s7710_s28 + $0xb8] sm:$0xff]  ;;  %6394 = vmatpush.xpose.msk.msra.mxu1 %vm431_vm0, %v7720_v1  ;;  %v7743_v6 = vld [vmem:[%s7710_s28 + $0xb0] sm:$0xff]  ;;  %v7760_v9 = vld [vmem:[%s7710_s28 + $0x68] sm:$0xff]  ;;  %s6258_s5 = scalar_lea.hbm %s14203_s2, %s6771_s30  ;;  %s6230_s8 = scalar_lea.sflag [#allocation7], %s7703_s25 }
  0x31   : > { %v7730_v3 = vld [vmem:[%s7710_s28 + $0xf8] sm:$0xff]  ;;  %6410 = vmatpush.xpose.msk.msra.mxu2 %vm431_vm0, %v7723_v2  ;;  %v7746_v7 = vld [vmem:[%s7710_s28 + $0xf0] sm:$0xff]  ;;  %v7763_v10 = vld [vmem:[%s7710_s28 + $0xa8] sm:$0xff]  ;;  %s6261_s7 = sshll.u32 %s6258_s5, 4  ;;  %s7518_s23 = scalar_lea.hbm %s14203_s2, 2048  ;;  %s6262_s7 = int_to_ptr.hbm [resolvable:$true] %s6261_s7 }
  0x32   : > { %6426 = vmatpush.xpose.msk.msra.mxu3 %vm431_vm0, %v7730_v3  ;;  %v7766_v11 = vld [vmem:[%s7710_s28 + $0xe8] sm:$0xff]  ;;  %v7777_v12 = vld [vmem:[%s7710_s28 + $0x20] sm:$0xff]  ;;  %v7797_v16 = vld [vmem:[%s7710_s28 + $0x18] sm:$0xff]  ;;  %s7512_s14 = sshra.s32 %s6262_s7, 4  ;;  %s7513_s14 = int_to_ptr.hbm [resolvable:$true] %s7512_s14 }
  0x33   : > { %6379 = vmatpush.xpose.msk.msra.mxu0 %vm431_vm0, %v7737_v4  ;;  %v7780_v13 = vld [vmem:[%s7710_s28 + $0x60] sm:$0xff]  ;;  %v7800_v17 = vld [vmem:[%s7710_s28 + $0x58] sm:$0xff]  ;;  %v7817_v20 = vld [vmem:[%s7710_s28 + $0x10] sm:$0xff]  ;;  %s7514_s16 = scalar_lea.hbm %s7513_s14, 1024  ;;  %p7519_p0 = scmp.lt.s32.totalorder %s7513_s14, %s14203_s2 }
  0x34   : > { %6395 = vmatpush.xpose.msk.msra.mxu1 %vm431_vm0, %v7740_v5  ;;  %v7783_v14 = vld [vmem:[%s7710_s28 + $0xa0] sm:$0xff]  ;;  %v7803_v18 = vld [vmem:[%s7710_s28 + $0x98] sm:$0xff]  ;;  %v7820_v21 = vld [vmem:[%s7710_s28 + $0x50] sm:$0xff]  ;;  %v305_v56 = vmul.f32 0.125, %v7817_v20  ;;  %p7515_p6 = scmp.ne.s32.totalorder %s7513_s14, %s7514_s16  ;;  %p7520_p1 = scmp.lt.s32.totalorder %s7518_s23, %s7514_s16 }
  0x35   : > { %6411 = vmatpush.xpose.msk.msra.mxu2 %vm431_vm0, %v7743_v6  ;;  %v7786_v15 = vld [vmem:[%s7710_s28 + $0xe0] sm:$0xff]  ;;  %v7806_v19 = vld [vmem:[%s7710_s28 + $0xd8] sm:$0xff]  ;;  %v7823_v22 = vld [vmem:[%s7710_s28 + $0x90] sm:$0xff]  ;;  %v313_v57 = vmul.f32 0.125, %v7820_v21 }
  0x36   : > { %6427 = vmatpush.xpose.msk.msra.mxu3 %vm431_vm0, %v7746_v7  ;;  %v7826_v23 = vld [vmem:[%s7710_s28 + $0xd0] sm:$0xff]  ;;  %v176_v24 = vld [vmem:[%s7710_s28 + $0x8] sm:$0xff]  ;;  %v175_v28 = vld [vmem:[%s7710_s28] sm:$0xff]  ;;  %v321_v61 = vmul.f32 0.125, %v7823_v22  ;;  %p7516_p9 = pnand %p7515_p6, %p7667_p11  ;;  %p7521_p3 = por %p7520_p1, %p7519_p0 }
  0x37   : > { %6380 = vmatpush.xpose.msk.msra.mxu0 %vm431_vm0, %v7757_v8  ;;  %v184_v25 = vld [vmem:[%s7710_s28 + $0x48] sm:$0xff]  ;;  %v183_v29 = vld [vmem:[%s7710_s28 + $0x40] sm:$0xff]  ;;  %v303_v32 = vmul.f32 0.125, %v175_v28  ;;  %v7849_v34 = vld [vmem:[%s7710_s28 + $0x1b8] sm:$0xff]  ;;  %v304_v44 = vmul.f32 0.125, %v176_v24  ;;  %v329_v60 = vmul.f32 0.125, %v7826_v23 }
  0x38   : > { %6396 = vmatpush.xpose.msk.msra.mxu1 %vm431_vm0, %v7760_v9  ;;  %v192_v26 = vld [vmem:[%s7710_s28 + $0x88] sm:$0xff]  ;;  %v191_v30 = vld [vmem:[%s7710_s28 + $0x80] sm:$0xff]  ;;  %v311_v33 = vmul.f32 0.125, %v183_v29  ;;  %v7852_v35 = vld [vmem:[%s7710_s28 + $0x138] sm:$0xff]  ;;  %v312_v45 = vmul.f32 0.125, %v184_v25  ;;  %p7517_p13 = pneg %p7516_p9 }
  0x39   : > { %6412 = vmatpush.xpose.msk.msra.mxu2 %vm431_vm0, %v7763_v10  ;;  %v200_v27 = vld [vmem:[%s7710_s28 + $0xc8] sm:$0xff]  ;;  %v199_v31 = vld [vmem:[%s7710_s28 + $0xc0] sm:$0xff]  ;;  %v319_v36 = vmul.f32 0.125, %v191_v30  ;;  %v7863_v38 = vld [vmem:[%s7710_s28 + $0x1f8] sm:$0xff]  ;;  %v320_v48 = vmul.f32 0.125, %v192_v26 }
  0x3a   : > { %6428 = vmatpush.xpose.msk.msra.mxu3 %vm431_vm0, %v7766_v11  ;;  %v327_v37 = vmul.f32 0.125, %v199_v31  ;;  %v7866_v39 = vld [vmem:[%s7710_s28 + $0x178] sm:$0xff]  ;;  %v7871_v40 = vld [vmem:[%s7710_s28 + $0x1b0] sm:$0xff]  ;;  %v7893_v46 = vld [vmem:[%s7710_s28 + $0x1a8] sm:$0xff]  ;;  %v328_v49 = vmul.f32 0.125, %v200_v27  ;;  %p7522_p4 = pnand %p7521_p3, %p7517_p13 }
  0x3b   : > { %6381 = vmatpush.xpose.msk.msra.mxu0 %vm431_vm0, %v7777_v12  ;;  %v7874_v41 = vld [vmem:[%s7710_s28 + $0x130] sm:$0xff]  ;;  %v7896_v47 = vld [vmem:[%s7710_s28 + $0x128] sm:$0xff]  ;;  %v7915_v52 = vld [vmem:[%s7710_s28 + $0x1a0] sm:$0xff] }
  0x3c   : > { %6397 = vmatpush.xpose.msk.msra.mxu1 %vm431_vm0, %v7780_v13  ;;  %v7887_v42 = vld [vmem:[%s7710_s28 + $0x1f0] sm:$0xff]  ;;  %v7907_v50 = vld [vmem:[%s7710_s28 + $0x1e8] sm:$0xff]  ;;  %v7918_v53 = vld [vmem:[%s7710_s28 + $0x120] sm:$0xff] }
  0x3d   : > { %6413 = vmatpush.xpose.msk.msra.mxu2 %vm431_vm0, %v7783_v14  ;;  %v7890_v43 = vld [vmem:[%s7710_s28 + $0x170] sm:$0xff]  ;;  %v7910_v51 = vld [vmem:[%s7710_s28 + $0x168] sm:$0xff]  ;;  %v7931_v54 = vld [vmem:[%s7710_s28 + $0x1e0] sm:$0xff] }
  0x3e   : > { %6429 = vmatpush.xpose.msk.msra.mxu3 %vm431_vm0, %v7786_v15  ;;  %v7934_v55 = vld [vmem:[%s7710_s28 + $0x160] sm:$0xff]  ;;  %v7939_v58 = vld [vmem:[%s7710_s28 + $0x198] sm:$0xff]  ;;  %v7960_v63 = vld [vmem:[%s7710_s28 + $0x190] sm:$0xff] }
  0x3f   : > { %6382 = vmatpush.xpose.msk.msra.mxu0 %vm431_vm0, %v7797_v16  ;;  %v7942_v59 = vld [vmem:[%s7710_s28 + $0x118] sm:$0xff] }
  0x40   : > { %6398 = vmatpush.xpose.msk.msra.mxu1 %vm431_vm0, %v7800_v17  ;;  %v7955_v62 = vld [vmem:[%s7710_s28 + $0x1d8] sm:$0xff] }
  0x41   : > { %6414 = vmatpush.xpose.msk.msra.mxu2 %vm431_vm0, %v7803_v18 }
  0x42   : > { %6430 = vmatpush.xpose.msk.msra.mxu3 %vm431_vm0, %v7806_v19 }
  0x43   : > { %6383 = vmatpush.xpose.msk.msra.mxu0 %vm431_vm0, %v7817_v20  ;;  %v7965_v20 = vld [vmem:[%s7710_s28 + $0x110] sm:$0xff] }
  0x44   : > { %6399 = vmatpush.xpose.msk.msra.mxu1 %vm431_vm0, %v7820_v21  ;;  %v7968_v21 = vld [vmem:[%s7710_s28 + $0x158] sm:$0xff] }
  0x45   : > { %6415 = vmatpush.xpose.msk.msra.mxu2 %vm431_vm0, %v7823_v22  ;;  %v7979_v22 = vld [vmem:[%s7710_s28 + $0x1d0] sm:$0xff] }
  0x46   : > { %6431 = vmatpush.xpose.msk.msra.mxu3 %vm431_vm0, %v7826_v23  ;;  %v306_v23 = vmul.f32 0.125, %v7797_v16  ;;  %v7997_v16 = vld [vmem:[%s7710_s28 + $0x108] sm:$0xff] }
  0x47   : > { %6384 = vmatpush.xpose.msk.msra.mxu0 %vm431_vm0, %v176_v24  ;;  %v314_v24 = vmul.f32 0.125, %v7800_v17  ;;  %v8000_v17 = vld [vmem:[%s7710_s28 + $0x150] sm:$0xff] }
  0x48   : > { %6400 = vmatpush.xpose.msk.msra.mxu1 %vm431_vm0, %v184_v25  ;;  %v7984_v25 = vld [vmem:[%s7710_s28 + $0x188] sm:$0xff] }
  0x49   : > { %6416 = vmatpush.xpose.msk.msra.mxu2 %vm431_vm0, %v192_v26  ;;  %v322_v26 = vmul.f32 0.125, %v7803_v18  ;;  %v223_v18 = vld [vmem:[%s7710_s28 + $0x180] sm:$0xff] }
  0x4a   : > { %6432 = vmatpush.xpose.msk.msra.mxu3 %vm431_vm0, %v200_v27  ;;  %v330_v27 = vmul.f32 0.125, %v7806_v19  ;;  %v8008_v19 = vld [vmem:[%s7710_s28 + $0x1c8] sm:$0xff] }
  0x4b   : > { %6385 = vmatpush.xpose.msk.msra.mxu0 %vm431_vm0, %v175_v28  ;;  %v207_v28 = vld [vmem:[%s7710_s28 + $0x100] sm:$0xff] }
  0x4c   : > { %6401 = vmatpush.xpose.msk.msra.mxu1 %vm431_vm0, %v183_v29  ;;  %v216_v29 = vld [vmem:[%s7710_s28 + $0x148] sm:$0xff] }
  0x4d   : > { %6417 = vmatpush.xpose.msk.msra.mxu2 %vm431_vm0, %v191_v30  ;;  %v307_v30 = vmul.f32 0.125, %v7777_v12  ;;  %v215_v12 = vld [vmem:[%s7710_s28 + $0x140] sm:$0xff] }
  0x4e   : > { %6433 = vmatpush.xpose.msk.msra.mxu3 %vm431_vm0, %v199_v31  ;;  %6386 = vmatmul.msk.f32.vlgmr.msra.gmra.mxu0 %vm431_vm0, %v303_v32  ;;  %v315_v31 = vmul.f32 0.125, %v7780_v13  ;;  %v323_v32 = vmul.f32 0.125, %v7783_v14  ;;  %v308_v13 = vmul.f32 0.125, %v7757_v8  ;;  %v316_v14 = vmul.f32 0.125, %v7760_v9 }
  0x4f   : > { %6442 = vmatpush.xpose.msk.msrb.mxu0 %vm431_vm0, %v7852_v35  ;;  %6402 = vmatmul.msk.f32.vlgmr.msra.gmra.mxu1 %vm431_vm0, %v311_v33  ;;  %v331_v33 = vmul.f32 0.125, %v7786_v15  ;;  %v324_v15 = vmul.f32 0.125, %v7763_v10  ;;  %v325_v8 = vmul.f32 0.125, %v7743_v6  ;;  %v333_v9 = vmul.f32 0.125, %v7746_v7  ;;  %v8046_v10 = vld [vmem:[%s7710_s28 + $0x278] sm:$0xff] }
  0x50   : > { %6418 = vmatmul.msk.f32.vlgmr.msra.gmra.mxu2 %vm431_vm0, %v319_v36  ;;  %6458 = vmatpush.xpose.msk.msrb.mxu1 %vm431_vm0, %v7866_v39  ;;  %v231_v36 = vld [vmem:[%s7710_s28 + $0x1c0] sm:$0xff]  ;;  %v326_v6 = vmul.f32 0.125, %v7723_v2  ;;  %v334_v7 = vmul.f32 0.125, %v7730_v3  ;;  %v8075_v2 = vld [vmem:[%s7710_s28 + $0x230] sm:$0xff]  ;;  %v335_v3 = vmul.f32 0.125, %v207_v28 }
  0x51   : > { %6474 = vmatpush.xpose.msk.msrb.mxu2 %vm431_vm0, %v7849_v34  ;;  %6434 = vmatmul.msk.f32.vlgmr.msra.gmra.mxu3 %vm431_vm0, %v327_v37  ;;  %v332_v37 = vmul.f32 0.125, %v7766_v11  ;;  %v8059_v11 = vld [vmem:[%s7710_s28 + $0x238] sm:$0xff] }
  0x52   : > { %6490 = vmatpush.xpose.msk.msrb.mxu3 %vm431_vm0, %v7863_v38 }
  0x53   : > { %6443 = vmatpush.xpose.msk.msrb.mxu0 %vm431_vm0, %v7874_v41 }
  0x54   : > { %6459 = vmatpush.xpose.msk.msrb.mxu1 %vm431_vm0, %v7890_v43 }
  0x55   : > { %6475 = vmatpush.xpose.msk.msrb.mxu2 %vm431_vm0, %v7871_v40 }
  0x56   : > { %6491 = vmatpush.xpose.msk.msrb.mxu3 %vm431_vm0, %v7887_v42  ;;  %6387 = vmatmul.msk.f32.gmra.mxu0 %vm431_vm0, %v304_v44  ;;  %v309_v44 = vmul.f32 0.125, %v7737_v4  ;;  %v310_v4 = vmul.f32 0.125, %v7717_v0  ;;  %v8069_v0 = vld [vmem:[%s7710_s28 + $0x2b8] sm:$0xff] }
  0x57   : > { %6444 = vmatpush.xpose.msk.msrb.mxu0 %vm431_vm0, %v7896_v47  ;;  %6403 = vmatmul.msk.f32.gmra.mxu1 %vm431_vm0, %v312_v45  ;;  %v317_v45 = vmul.f32 0.125, %v7740_v5  ;;  %v318_v5 = vmul.f32 0.125, %v7720_v1  ;;  %v8072_v1 = vld [vmem:[%s7710_s28 + $0x2f8] sm:$0xff] }
  0x58   : > { %6419 = vmatmul.msk.f32.gmra.mxu2 %vm431_vm0, %v320_v48  ;;  %6460 = vmatpush.xpose.msk.msrb.mxu1 %vm431_vm0, %v7910_v51  ;;  %v8062_v48 = vld [vmem:[%s7710_s28 + $0x270] sm:$0xff] }
  0x59   : > { %6476 = vmatpush.xpose.msk.msrb.mxu2 %vm431_vm0, %v7893_v46  ;;  %6435 = vmatmul.msk.f32.gmra.mxu3 %vm431_vm0, %v328_v49  ;;  %v343_v49 = vmul.f32 0.125, %v215_v12 }
  0x5a   : > { %6492 = vmatpush.xpose.msk.msrb.mxu3 %vm431_vm0, %v7907_v50 }
  0x5b   : > { %6445 = vmatpush.xpose.msk.msrb.mxu0 %vm431_vm0, %v7918_v53 }
  0x5c   : > { %6461 = vmatpush.xpose.msk.msrb.mxu1 %vm431_vm0, %v7934_v55 }
  0x5d   : > { %6477 = vmatpush.xpose.msk.msrb.mxu2 %vm431_vm0, %v7915_v52 }
  0x5e   : > { %6493 = vmatpush.xpose.msk.msrb.mxu3 %vm431_vm0, %v7931_v54  ;;  %6388 = vmatmul.msk.f32.gmra.mxu0 %vm431_vm0, %v305_v56  ;;  %v351_v56 = vmul.f32 0.125, %v223_v18 }
  0x5f   : > { %6446 = vmatpush.xpose.msk.msrb.mxu0 %vm431_vm0, %v7942_v59  ;;  %6404 = vmatmul.msk.f32.gmra.mxu1 %vm431_vm0, %v313_v57  ;;  %v359_v57 = vmul.f32 0.125, %v231_v36 }
  0x60   : > { %6420 = vmatmul.msk.f32.gmra.mxu2 %vm431_vm0, %v321_v61  ;;  %6462 = vmatpush.xpose.msk.msrb.mxu1 %vm431_vm0, %v7968_v21  ;;  %v344_v61 = vmul.f32 0.125, %v216_v29 }
  0x61   : > { %6478 = vmatpush.xpose.msk.msrb.mxu2 %vm431_vm0, %v7939_v58  ;;  %6436 = vmatmul.msk.f32.gmra.mxu3 %vm431_vm0, %v329_v60  ;;  %v336_v60 = vmul.f32 0.125, %v7997_v16 }
  0x62   : > { %6494 = vmatpush.xpose.msk.msrb.mxu3 %vm431_vm0, %v7955_v62 }
  0x63   : > { %6447 = vmatpush.xpose.msk.msrb.mxu0 %vm431_vm0, %v7965_v20 }
  0x64   : > { %6463 = vmatpush.xpose.msk.msrb.mxu1 %vm431_vm0, %v8000_v17 }
  0x65   : > { %6479 = vmatpush.xpose.msk.msrb.mxu2 %vm431_vm0, %v7960_v63 }
  0x66   : > { %6495 = vmatpush.xpose.msk.msrb.mxu3 %vm431_vm0, %v7979_v22  ;;  %6389 = vmatmul.msk.f32.gmra.mxu0 %vm431_vm0, %v306_v23  ;;  %v352_v23 = vmul.f32 0.125, %v7984_v25 }
  0x67   : > { %6405 = vmatmul.msk.f32.gmra.mxu1 %vm431_vm0, %v314_v24  ;;  %6448 = vmatpush.xpose.msk.msrb.mxu0 %vm431_vm0, %v7997_v16  ;;  %v360_v24 = vmul.f32 0.125, %v8008_v19  ;;  %v361_v16 = vmul.f32 0.125, %v7979_v22  ;;  %v339_v22 = vmul.f32 0.125, %v7918_v53  ;;  %v347_v53 = vmul.f32 0.125, %v7934_v55 }
  0x68   : > { %6421 = vmatmul.msk.f32.gmra.mxu2 %vm431_vm0, %v322_v26  ;;  %6464 = vmatpush.xpose.msk.msrb.mxu1 %vm431_vm0, %v216_v29  ;;  %v337_v26 = vmul.f32 0.125, %v7965_v20  ;;  %v354_v20 = vmul.f32 0.125, %v7939_v58  ;;  %v363_v58 = vmul.f32 0.125, %v7931_v54  ;;  %v356_v54 = vmul.f32 0.125, %v7893_v46  ;;  %v8143_v29 = vld [vmem:[%s7710_s28 + $0x220] sm:$0xff]  ;;  %v8156_v46 = vld [vmem:[%s7710_s28 + $0x2e8] sm:$0xff] }
  0x69   : > { %6480 = vmatpush.xpose.msk.msrb.mxu2 %vm431_vm0, %v7984_v25  ;;  %6437 = vmatmul.msk.f32.gmra.mxu3 %vm431_vm0, %v330_v27  ;;  %v345_v27 = vmul.f32 0.125, %v8000_v17  ;;  %v338_v25 = vmul.f32 0.125, %v7942_v59  ;;  %v362_v17 = vmul.f32 0.125, %v7955_v62  ;;  %v8113_v59 = vld [vmem:[%s7710_s28 + $0x268] sm:$0xff]  ;;  %v340_v55 = vmul.f32 0.125, %v7896_v47  ;;  %v8176_v47 = vld [vmem:[%s7710_s28 + $0x2a0] sm:$0xff] }
  0x6a   : > { %6496 = vmatpush.xpose.msk.msrb.mxu3 %vm431_vm0, %v8008_v19  ;;  %v355_v19 = vmul.f32 0.125, %v7915_v52  ;;  %v8117_v62 = vld [vmem:[%s7710_s28 + $0x228] sm:$0xff]  ;;  %v8132_v52 = vld [vmem:[%s7710_s28 + $0x2f0] sm:$0xff] }
  0x6b   : > { %6449 = vmatpush.xpose.msk.msrb.mxu0 %vm431_vm0, %v207_v28  ;;  %v8120_v28 = vld [vmem:[%s7710_s28 + $0x2b0] sm:$0xff] }
  0x6c   : > { %6465 = vmatpush.xpose.msk.msrb.mxu1 %vm431_vm0, %v215_v12  ;;  %v8169_v12 = vld [vmem:[%s7710_s28 + $0x218] sm:$0xff] }
  0x6d   : > { %6481 = vmatpush.xpose.msk.msrb.mxu2 %vm431_vm0, %v223_v18  ;;  %v353_v18 = vmul.f32 0.125, %v7960_v63  ;;  %v346_v63 = vmul.f32 0.125, %v7968_v21  ;;  %v8140_v21 = vld [vmem:[%s7710_s28 + $0x260] sm:$0xff] }
  0x6e   : > { %6390 = vmatmul.msk.f32.gmra.mxu0 %vm431_vm0, %v307_v30  ;;  %6497 = vmatpush.xpose.msk.msrb.mxu3 %vm431_vm0, %v231_v36  ;;  %v8146_v30 = vld [vmem:[%s7710_s28 + $0x2a8] sm:$0xff]  ;;  %v357_v36 = vmul.f32 0.125, %v7871_v40  ;;  %v8184_v40 = vld [vmem:[%s7710_s28 + $0x2e0] sm:$0xff] }
  0x6f   : > { %6406 = vmatmul.msk.f32.gmra.mxu1 %vm431_vm0, %v315_v31  ;;  %6506 = vmatpush.xpose.msk.msra.mxu0 %vm431_vm0, %v8059_v11  ;;  %v348_v31 = vmul.f32 0.125, %v7910_v51  ;;  %v365_v51 = vmul.f32 0.125, %v7887_v42 }
  0x70   : > { %6422 = vmatmul.msk.f32.gmra.mxu2 %vm431_vm0, %v323_v32  ;;  %6522 = vmatpush.xpose.msk.msra.mxu1 %vm431_vm0, %v8046_v10  ;;  %v364_v32 = vmul.f32 0.125, %v7907_v50  ;;  %v341_v50 = vmul.f32 0.125, %v7874_v41 }
  0x71   : > { %6438 = vmatmul.msk.f32.gmra.mxu3 %vm431_vm0, %v331_v33  ;;  %6538 = vmatpush.xpose.msk.msra.mxu2 %vm431_vm0, %v8069_v0  ;;  %v8165_v33 = vld [vmem:[%s7710_s28 + $0x258] sm:$0xff] }
  0x72   : > { %6554 = vmatpush.xpose.msk.msra.mxu3 %vm431_vm0, %v8072_v1 }
  0x73   : > { %6507 = vmatpush.xpose.msk.msra.mxu0 %vm431_vm0, %v8075_v2 }
  0x74   : > { %6523 = vmatpush.xpose.msk.msra.mxu1 %vm431_vm0, %v8062_v48 }
  0x75   : > { %6539 = vmatpush.xpose.msk.msra.mxu2 %vm431_vm0, %v8120_v28 }
  0x76   : > { %6391 = vmatmul.msk.f32.gmra.mxu0 %vm431_vm0, %v308_v13  ;;  %6555 = vmatpush.xpose.msk.msra.mxu3 %vm431_vm0, %v8132_v52  ;;  %v8192_v13 = vld [vmem:[%s7710_s28 + $0x250] sm:$0xff] }
  0x77   : > { %6407 = vmatmul.msk.f32.gmra.mxu1 %vm431_vm0, %v316_v14  ;;  %6508 = vmatpush.xpose.msk.msra.mxu0 %vm431_vm0, %v8117_v62  ;;  %v8195_v14 = vld [vmem:[%s7710_s28 + $0x210] sm:$0xff] }
  0x78   : > { %6423 = vmatmul.msk.f32.gmra.mxu2 %vm431_vm0, %v324_v15  ;;  %6524 = vmatpush.xpose.msk.msra.mxu1 %vm431_vm0, %v8113_v59  ;;  %v8198_v15 = vld [vmem:[%s7710_s28 + $0x298] sm:$0xff] }
  0x79   : > { %6439 = vmatmul.msk.f32.gmra.mxu3 %vm431_vm0, %v332_v37  ;;  %6540 = vmatpush.xpose.msk.msra.mxu2 %vm431_vm0, %v8146_v30  ;;  %v8205_v37 = vld [vmem:[%s7710_s28 + $0x2d8] sm:$0xff] }
  0x7a   : > { %6556 = vmatpush.xpose.msk.msra.mxu3 %vm431_vm0, %v8156_v46 }
  0x7b   : > { %6509 = vmatpush.xpose.msk.msra.mxu0 %vm431_vm0, %v8143_v29 }
  0x7c   : > { %6525 = vmatpush.xpose.msk.msra.mxu1 %vm431_vm0, %v8140_v21 }
  0x7d   : > { %6541 = vmatpush.xpose.msk.msra.mxu2 %vm431_vm0, %v8176_v47 }
  0x7e   : > { %6392 = vmatmul.msk.f32.gmra.mxu0 %vm431_vm0, %v309_v44  ;;  %6557 = vmatpush.xpose.msk.msra.mxu3 %vm431_vm0, %v8184_v40  ;;  %v349_v44 = vmul.f32 0.125, %v7890_v43  ;;  %v8234_v43 = vld [vmem:[%s7710_s28 + $0x290] sm:$0xff] }
  0x7f   : > { %6408 = vmatmul.msk.f32.gmra.mxu1 %vm431_vm0, %v317_v45  ;;  %6510 = vmatpush.xpose.msk.msra.mxu0 %vm431_vm0, %v8169_v12 }
  0x80   : > { %6424 = vmatmul.msk.f32.gmra.mxu2 %vm431_vm0, %v325_v8  ;;  %6526 = vmatpush.xpose.msk.msra.mxu1 %vm431_vm0, %v8165_v33 }
  0x81   : > { %6440 = vmatmul.msk.f32.gmra.mxu3 %vm431_vm0, %v333_v9  ;;  %6542 = vmatpush.xpose.msk.msra.mxu2 %vm431_vm0, %v8198_v15  ;;  %v342_v9 = vmul.f32 0.125, %v7852_v35 }
  0x82   : > { %6558 = vmatpush.xpose.msk.msra.mxu3 %vm431_vm0, %v8205_v37 }
  0x83   : > { %6511 = vmatpush.xpose.msk.msra.mxu0 %vm431_vm0, %v8195_v14 }
  0x84   : > { %6527 = vmatpush.xpose.msk.msra.mxu1 %vm431_vm0, %v8192_v13 }
  0x85   : > { %6543 = vmatpush.xpose.msk.msra.mxu2 %vm431_vm0, %v8234_v43 }
  0x86   : > { %6393 = vmatmul.msk.f32.gmra.mxu0 %vm431_vm0, %v310_v4  ;;  %v358_v4 = vmul.f32 0.125, %v7849_v34 }
  0x87   : > { %6409 = vmatmul.msk.f32.gmra.mxu1 %vm431_vm0, %v318_v5  ;;  %v8224_v5 = vld [vmem:[%s7710_s28 + $0x248] sm:$0xff] }
  0x88   : > { %6425 = vmatmul.msk.f32.gmra.mxu2 %vm431_vm0, %v326_v6  ;;  %v366_v6 = vmul.f32 0.125, %v7863_v38  ;;  %6528 = vmatpush.xpose.msk.msra.mxu1 %vm431_vm0, %v8224_v5 }
  0x89   : > { %6441 = vmatmul.msk.f32.gmra.mxu3 %vm431_vm0, %v334_v7  ;;  %v8228_v7 = vld [vmem:[%s7710_s28 + $0x208] sm:$0xff] }
  0x8a   : > { %6512 = vmatpush.xpose.msk.msra.mxu0 %vm431_vm0, %v8228_v7 }
  0x8e   : > { %6450 = vmatmul.msk.f32.vlgmr.msrb.gmra.mxu0 %vm431_vm0, %v335_v3  ;;  %v8237_v3 = vld [vmem:[%s7710_s28 + $0x2d0] sm:$0xff] }
  0x8f   : > { %6466 = vmatmul.msk.f32.vlgmr.msrb.gmra.mxu1 %vm431_vm0, %v343_v49  ;;  %6559 = vmatpush.xpose.msk.msra.mxu3 %vm431_vm0, %v8237_v3 }
  0x90   : > { %6482 = vmatmul.msk.f32.vlgmr.msrb.gmra.mxu2 %vm431_vm0, %v351_v56 }
  0x91   : > { %6498 = vmatmul.msk.f32.vlgmr.msrb.gmra.mxu3 %vm431_vm0, %v359_v57 }
  0x96   : > { %6451 = vmatmul.msk.f32.gmra.mxu0 %vm431_vm0, %v336_v60  ;;  %v350_v60 = vmul.f32 0.125, %v7866_v39 }
  0x97   : > { %6467 = vmatmul.msk.f32.gmra.mxu1 %vm431_vm0, %v344_v61  ;;  %v247_v61 = vld [vmem:[%s7710_s28 + $0x240] sm:$0xff] }
  0x98   : > { %6483 = vmatmul.msk.f32.gmra.mxu2 %vm431_vm0, %v352_v23  ;;  %v256_v23 = vld [vmem:[%s7710_s28 + $0x288] sm:$0xff]  ;;  %6529 = vmatpush.xpose.msk.msra.mxu1 %vm431_vm0, %v247_v61 }
  0x99   : > { %6499 = vmatmul.msk.f32.gmra.mxu3 %vm431_vm0, %v360_v24  ;;  %v239_v24 = vld [vmem:[%s7710_s28 + $0x200] sm:$0xff]  ;;  %6544 = vmatpush.xpose.msk.msra.mxu2 %vm431_vm0, %v256_v23 }
  0x9a   : > { %6513 = vmatpush.xpose.msk.msra.mxu0 %vm431_vm0, %v239_v24 }
  0x9e   : > { %6452 = vmatmul.msk.f32.gmra.mxu0 %vm431_vm0, %v337_v26  ;;  %v367_v26 = vmul.f32 0.125, %v239_v24 }
  0x9f   : > { %6468 = vmatmul.msk.f32.gmra.mxu1 %vm431_vm0, %v345_v27  ;;  %v8267_v27 = vld [vmem:[%s7710_s28 + $0x2c8] sm:$0xff] }
  0xa0   : > { %6484 = vmatmul.msk.f32.gmra.mxu2 %vm431_vm0, %v353_v18  ;;  %v255_v18 = vld [vmem:[%s7710_s28 + $0x280] sm:$0xff]  ;;  %6560 = vmatpush.xpose.msk.msra.mxu3 %vm431_vm0, %v8267_v27 }
  0xa1   : > { %6500 = vmatmul.msk.f32.gmra.mxu3 %vm431_vm0, %v361_v16  ;;  %v383_v39 = vmul.f32 0.125, %v255_v18  ;;  %6545 = vmatpush.xpose.msk.msra.mxu2 %vm431_vm0, %v255_v18  ;;  %v376_v18 = vmul.f32 0.125, %v8224_v5 }
  0xa6   : > { %6453 = vmatmul.msk.f32.gmra.mxu0 %vm431_vm0, %v338_v25 }
  0xa7   : > { %6469 = vmatmul.msk.f32.gmra.mxu1 %vm431_vm0, %v346_v63 }
  0xa8   : > { %6485 = vmatmul.msk.f32.gmra.mxu2 %vm431_vm0, %v354_v20 }
  0xa9   : > { %6501 = vmatmul.msk.f32.gmra.mxu3 %vm431_vm0, %v362_v17  ;;  %v375_v17 = vmul.f32 0.125, %v247_v61 }
  0xae   : > { %6454 = vmatmul.msk.f32.gmra.mxu0 %vm431_vm0, %v339_v22 }
  0xaf   : > { %6470 = vmatmul.msk.f32.gmra.mxu1 %vm431_vm0, %v347_v53  ;;  %v263_v53 = vld [vmem:[%s7710_s28 + $0x2c0] sm:$0xff] }
  0xb0   : > { %6486 = vmatmul.msk.f32.gmra.mxu2 %vm431_vm0, %v355_v19  ;;  %6561 = vmatpush.xpose.msk.msra.mxu3 %vm431_vm0, %v263_v53 }
  0xb1   : > { %6502 = vmatmul.msk.f32.gmra.mxu3 %vm431_vm0, %v363_v58 }
  0xb6   : > { %6455 = vmatmul.msk.f32.gmra.mxu0 %vm431_vm0, %v340_v55 }
  0xb7   : > { %6471 = vmatmul.msk.f32.gmra.mxu1 %vm431_vm0, %v348_v31 }
  0xb8   : > { %6487 = vmatmul.msk.f32.gmra.mxu2 %vm431_vm0, %v356_v54  ;;  %v391_v54 = vmul.f32 0.125, %v263_v53 }
  0xb9   : > { %6503 = vmatmul.msk.f32.gmra.mxu3 %vm431_vm0, %v364_v32 }
  0xbe   : > { %6456 = vmatmul.msk.f32.gmra.mxu0 %vm431_vm0, %v341_v50 }
  0xbf   : > { %6472 = vmatmul.msk.f32.gmra.mxu1 %vm431_vm0, %v349_v44 }
  0xc0   : > { %6488 = vmatmul.msk.f32.gmra.mxu2 %vm431_vm0, %v357_v36 }
  0xc1   : > { %6504 = vmatmul.msk.f32.gmra.mxu3 %vm431_vm0, %v365_v51 }
  0xc6   : > { %6457 = vmatmul.msk.f32.gmra.mxu0 %vm431_vm0, %v342_v9 }
  0xc7   : > { %6473 = vmatmul.msk.f32.gmra.mxu1 %vm431_vm0, %v350_v60 }
  0xc8   : > { %6489 = vmatmul.msk.f32.gmra.mxu2 %vm431_vm0, %v358_v4 }
  0xc9   : > { %6505 = vmatmul.msk.f32.gmra.mxu3 %vm431_vm0, %v366_v6  ;;  %v384_v6 = vmul.f32 0.125, %v256_v23 }
  0xcb   : > { %v8212_v41 = vpop.f32.mrf.mxu0 }
  0xcc   : > { %v8214_v42 = vpop.f32.mrf.mxu1  ;;  %v1856_v8 = vsel %vm431_vm0, %v8212_v41, -inf }
  0xcd   : > { %v1880_v45 = vsel %vm431_vm0, %v8214_v42, -inf  ;;  %1857 = vmax.xlane.f32.xlu0 %v1856_v8 }
  0xce   : > { %1881 = vmax.xlane.f32.xlu2 %v1880_v45  ;;  %6514 = vmatmul.msk.f32.vlgmr.msra.gmra.mxu0 %vm431_vm0, %v367_v26  ;;  %v368_v26 = vmul.f32 0.125, %v8228_v7 }
  0xcf   : > { %6530 = vmatmul.msk.f32.vlgmr.msra.gmra.mxu1 %vm431_vm0, %v375_v17 }
  0xd0   : > { %6546 = vmatmul.msk.f32.vlgmr.msra.gmra.mxu2 %vm431_vm0, %v383_v39 }
  0xd1   : > { %6562 = vmatmul.msk.f32.vlgmr.msra.gmra.mxu3 %vm431_vm0, %v391_v54 }
  0xd3   : > { %v8248_v34 = vpop.f32.mrf.mxu2  ;;  %v8256_v56 = vpop.f32.mrf.mxu0 }
  0xd4   : > { %v8250_v35 = vpop.f32.mrf.mxu3  ;;  %v1904_v38 = vsel %vm431_vm0, %v8248_v34, -inf  ;;  %v8258_v57 = vpop.f32.mrf.mxu1  ;;  %v1859_v20 = vsel %vm431_vm0, %v8256_v56, -inf }
  0xd5   : > { %v1928_v49 = vsel %vm431_vm0, %v8250_v35, -inf  ;;  %1905 = vmax.xlane.f32.xlu1 %v1904_v38  ;;  %v1883_v32 = vsel %vm431_vm0, %v8258_v57, -inf }
  0xd6   : > { %1929 = vmax.xlane.f32.xlu0 %v1928_v49  ;;  %6515 = vmatmul.msk.f32.gmra.mxu0 %vm431_vm0, %v368_v26 }
  0xd7   : > { %6531 = vmatmul.msk.f32.gmra.mxu1 %vm431_vm0, %v376_v18 }
  0xd8   : > { %6547 = vmatmul.msk.f32.gmra.mxu2 %vm431_vm0, %v384_v6 }
  0xdb   : > { %v8274_v16 = vpop.f32.mrf.mxu2  ;;  %v8286_v19 = vpop.f32.mrf.mxu0 }
  0xdc   : > { %v8276_v25 = vpop.f32.mrf.mxu3  ;;  %v1907_v22 = vsel %vm431_vm0, %v8274_v16, -inf  ;;  %v8288_v58 = vpop.f32.mrf.mxu1  ;;  %v1862_v55 = vsel %vm431_vm0, %v8286_v19, -inf }
  0xdd   : > { %v1931_v63 = vsel %vm431_vm0, %v8276_v25, -inf  ;;  %1908 = vmax.xlane.f32.xlu2 %v1907_v22  ;;  %v1886_v8 = vsel %vm431_vm0, %v8288_v58, -inf }
  0xde   : > { %1932 = vmax.xlane.f32.xlu1 %v1931_v63  ;;  %1860 = vmax.xlane.f32.xlu0 %v1859_v20  ;;  %v392_v63 = vmul.f32 0.125, %v8267_v27  ;;  %v369_v27 = vmul.f32 0.125, %v8195_v14  ;;  %v377_v14 = vmul.f32 0.125, %v8192_v13 }
  0xe0   : > { %6563 = vmatmul.msk.f32.gmra.mxu3 %vm431_vm0, %v392_v63  ;;  %6516 = vmatmul.msk.f32.gmra.mxu0 %vm431_vm0, %v369_v27  ;;  %v370_v27 = vmul.f32 0.125, %v8169_v12 }
  0xe1   : > { %6532 = vmatmul.msk.f32.gmra.mxu1 %vm431_vm0, %v377_v14 }
  0xe3   : > { %v8301_v36 = vpop.f32.mrf.mxu2  ;;  %v8305_v51 = vpop.f32.mrf.mxu0 }
  0xe4   : > { %v8297_v31 = vpop.f32.mrf.mxu3  ;;  %v8307_v44 = vpop.f32.mrf.mxu1  ;;  %v1910_v9 = vsel %vm431_vm0, %v8301_v36, -inf  ;;  %v1865_v60 = vsel %vm431_vm0, %v8305_v51, -inf }
  0xe5   : > { %v1934_v50 = vsel %vm431_vm0, %v8297_v31, -inf  ;;  %v1889_v45 = vsel %vm431_vm0, %v8307_v44, -inf }
  0xe6   : > { %1935 = vmax.xlane.f32.xlu2 %v1934_v50  ;;  %1863 = vmax.xlane.f32.xlu1 %v1862_v55 }
  0xe7   : > { %1884 = vmax.xlane.f32.xlu0 %v1883_v32 }
  0xe8   : > { %6517 = vmatmul.msk.f32.gmra.mxu0 %vm431_vm0, %v370_v27 }
  0xeb   : > { %v8315_v4 = vpop.f32.mrf.mxu2  ;;  %v8317_v38 = vpop.f32.mrf.mxu0 }
  0xec   : > { %v8319_v49 = vpop.f32.mrf.mxu3  ;;  %v1868_v61 = vsel %vm431_vm0, %v8317_v38, -inf  ;;  %v8334_v39 = vpop.f32.mrf.mxu1  ;;  %v1913_v5 = vsel %vm431_vm0, %v8315_v4, -inf }
  0xed   : > { %v1937_v24 = vsel %vm431_vm0, %v8319_v49, -inf  ;;  %v1892_v17 = vsel %vm431_vm0, %v8334_v39, -inf }
  0xee   : > { %1890 = vmax.xlane.f32.xlu2 %v1889_v45  ;;  %1887 = vmax.xlane.f32.xlu1 %v1886_v8  ;;  %v385_v45 = vmul.f32 0.125, %v8234_v43 }
  0xef   : > { %1911 = vmax.xlane.f32.xlu0 %v1910_v9 }
  0xf0   : > { %6548 = vmatmul.msk.f32.gmra.mxu2 %vm431_vm0, %v385_v45 }
  0xf3   : > { %v8331_v23 = vpop.f32.mrf.mxu2  ;;  %v8345_v22 = vpop.f32.mrf.mxu0 }
  0xf4   : > { %v1916_v20 = vsel %vm431_vm0, %v8331_v23, -inf  ;;  %v8342_v7 = vpop.f32.mrf.mxu3  ;;  %v1871_v55 = vsel %vm431_vm0, %v8345_v22, -inf  ;;  %v8356_v50 = vpop.f32.mrf.mxu1 }
  0xf5   : > { %v1940_v54 = vsel %vm431_vm0, %v8342_v7, -inf  ;;  %v1895_v6 = vsel %vm431_vm0, %v8356_v50, -inf }
  0xf6   : > { %1866 = vmax.xlane.f32.xlu1 %v1865_v60  ;;  %1869 = vmax.xlane.f32.xlu2 %v1868_v61 }
  0xf7   : > { %1938 = vmax.xlane.f32.xlu0 %v1937_v24  ;;  %v393_v24 = vmul.f32 0.125, %v8237_v3 }
  0xf9   : > { %6564 = vmatmul.msk.f32.gmra.mxu3 %vm431_vm0, %v393_v24 }
  0xfb   : > { %v8347_v53 = vpop.f32.mrf.mxu2  ;;  %v8362_v9 = vpop.f32.mrf.mxu0 }
  0xfc   : > { %14407 = vst [vmem:[#allocation11_spill] sm:$0xff] %v8347_v53  ;;  %v1919_v32 = vsel %vm431_vm0, %v8347_v53, -inf  ;;  %v8360_v8 = vpop.f32.mrf.mxu3  ;;  %v1874_v61 = vsel %vm431_vm0, %v8362_v9, -inf  ;;  %v8377_v26 = vpop.f32.mrf.mxu1 }
  0xfd   : > { %14408 = vst [vmem:[#allocation12_spill] sm:$0xff] %v8360_v8  ;;  %v1943_v60 = vsel %vm431_vm0, %v8360_v8, -inf  ;;  %v1898_v13 = vsel %vm431_vm0, %v8377_v26, -inf  ;;  %v8641_v8 = vld [vmem:[%s7710_s28 + $0x358] sm:$0xff] }
  0xfe   : > { %1914 = vmax.xlane.f32.xlu1 %v1913_v5  ;;  %1917 = vmax.xlane.f32.xlu2 %v1916_v20  ;;  %14409 = vst [vmem:[#allocation13_spill] sm:$0xff] %v8362_v9 }
  0xff   : > { %1893 = vmax.xlane.f32.xlu0 %v1892_v17  ;;  %14411 = vst [vmem:[#allocation15_spill] sm:$0xff] %v8377_v26 }
 0x103   : > { %v8373_v43 = vpop.f32.mrf.mxu2  ;;  %v8388_v5 = vpop.f32.mrf.mxu0 }
 0x104   : > { %14410 = vst [vmem:[#allocation14_spill] sm:$0xff] %v8373_v43  ;;  %v8379_v18 = vpop.f32.mrf.mxu3  ;;  %v1922_v20 = vsel %vm431_vm0, %v8373_v43, -inf  ;;  %v8392_v63 = vpop.f32.mrf.mxu1 }
 0x105   : > { %14412 = vst [vmem:[#allocation16_spill] sm:$0xff] %v8379_v18  ;;  %v1946_v17 = vsel %vm431_vm0, %v8379_v18, -inf }
 0x106   : > { %1941 = vmax.xlane.f32.xlu1 %v1940_v54  ;;  %1872 = vmax.xlane.f32.xlu2 %v1871_v55  ;;  %14413 = vst [vmem:[#allocation17_spill] sm:$0xff] %v8388_v5  ;;  %v1877_v55 = vsel %vm431_vm0, %v8388_v5, -inf }
 0x107   : > { %1920 = vmax.xlane.f32.xlu0 %v1919_v32  ;;  %14415 = vst [vmem:[#allocation19_spill] sm:$0xff] %v8392_v63  ;;  %v1901_v32 = vsel %vm431_vm0, %v8392_v63, -inf  ;;  %v8576_v63 = vld [vmem:[%s7710_s28 + $0x320] sm:$0xff] }
 0x10b   : > { %v8390_v3 = vpop.f32.mrf.mxu2 }
 0x10c   : > { %14414 = vst [vmem:[#allocation18_spill] sm:$0xff] %v8390_v3  ;;  %v1925_v54 = vsel %vm431_vm0, %v8390_v3, -inf  ;;  %v8401_v45 = vpop.f32.mrf.mxu3 }
 0x10d   : > { %14416 = vst [vmem:[#allocation20_spill] sm:$0xff] %v8401_v45  ;;  %v1949_v12 = vsel %vm431_vm0, %v8401_v45, -inf }
 0x10e   : > { %1896 = vmax.xlane.f32.xlu1 %v1895_v6  ;;  %1944 = vmax.xlane.f32.xlu2 %v1943_v60  ;;  %v378_v6 = vmul.f32 0.125, %v8165_v33  ;;  %v386_v60 = vmul.f32 0.125, %v8198_v15  ;;  %v8418_v33 = vpop.f32.mrf.mxu1  ;;  %v394_v15 = vmul.f32 0.125, %v8205_v37 }
 0x10f   : > { %1875 = vmax.xlane.f32.xlu0 %v1874_v61  ;;  %v8406_v61 = vpop.f32.mrf.mxu0  ;;  %14419 = vst [vmem:[#allocation23_spill] sm:$0xff] %v8418_v33 }
 0x110   : > { %14417 = vst [vmem:[#allocation21_spill] sm:$0xff] %v8406_v61  ;;  %6533 = vmatmul.msk.f32.gmra.mxu1 %vm431_vm0, %v378_v6  ;;  %6549 = vmatmul.msk.f32.gmra.mxu2 %vm431_vm0, %v386_v60  ;;  %v1952_v24 = vsel %vm431_vm0, %v8406_v61, -inf  ;;  %v387_v60 = vmul.f32 0.125, %v8176_v47 }
 0x111   : > { %6565 = vmatmul.msk.f32.gmra.mxu3 %vm431_vm0, %v394_v15 }
 0x113   : > { %v8408_v14 = vpop.f32.mrf.mxu2 }
 0x114   : > { %14418 = vst [vmem:[#allocation22_spill] sm:$0xff] %v8408_v14 }
 0x116   : > { %1923 = vmax.xlane.f32.xlu1 %v1922_v20  ;;  %1899 = vmax.xlane.f32.xlu2 %v1898_v13  ;;  %v2000_v20 = vsel %vm431_vm0, %v8408_v14, -inf  ;;  %v8421_v13 = vpop.f32.mrf.mxu3  ;;  %v8434_v37 = vpop.f32.mrf.mxu1  ;;  %v373_v14 = vmul.f32 0.125, %v8075_v2 }
 0x117   : > { %1947 = vmax.xlane.f32.xlu0 %v1946_v17  ;;  %14420 = vst [vmem:[#allocation24_spill] sm:$0xff] %v8421_v13  ;;  %v8423_v17 = vpop.f32.mrf.mxu0 }
 0x118   : > { %14421 = vst [vmem:[#allocation25_spill] sm:$0xff] %v8423_v17  ;;  %6550 = vmatmul.msk.f32.gmra.mxu2 %vm431_vm0, %v387_v60 }
 0x119   : > { %14423 = vst [vmem:[#allocation27_spill] sm:$0xff] %v8434_v37 }
 0x11b   : > { %v8432_v27 = vpop.f32.mrf.mxu2 }
 0x11c   : > { %14422 = vst [vmem:[#allocation26_spill] sm:$0xff] %v8432_v27 }
 0x11e   : > { %1926 = vmax.xlane.f32.xlu2 %v1925_v54  ;;  %1878 = vmax.xlane.f32.xlu1 %v1877_v55  ;;  %v1976_v54 = vsel %vm431_vm0, %v8418_v33, -inf  ;;  %v2024_v55 = vsel %vm431_vm0, %v8421_v13, -inf  ;;  %v8436_v6 = vpop.f32.mrf.mxu3 }
 0x11f   : > { %1902 = vmax.xlane.f32.xlu0 %v1901_v32  ;;  %v1955_v32 = vsel %vm431_vm0, %v8423_v17, -inf  ;;  %14424 = vst [vmem:[#allocation28_spill] sm:$0xff] %v8436_v6  ;;  %v8446_v15 = vpop.f32.mrf.mxu0 }
 0x120   : > { %14425 = vst [vmem:[#allocation29_spill] sm:$0xff] %v8446_v15 }
 0x123   : > { %v8450_v47 = vpop.f32.mrf.mxu2 }
 0x124   : > { %14426 = vst [vmem:[#allocation30_spill] sm:$0xff] %v8450_v47  ;;  %v2006_v60 = vsel %vm431_vm0, %v8450_v47, -inf  ;;  %v388_v47 = vmul.f32 0.125, %v8146_v30 }
 0x126   : > { %1950 = vmax.xlane.f32.xlu1 %v1949_v12  ;;  %1953 = vmax.xlane.f32.xlu2 %v1952_v24  ;;  %v2003_v12 = vsel %vm431_vm0, %v8432_v27, -inf  ;;  %v1979_v24 = vsel %vm431_vm0, %v8434_v37, -inf }
 0x127   : > { %2001 = vmax.xlane.f32.xlu0 %v2000_v20  ;;  %v2027_v20 = vsel %vm431_vm0, %v8436_v6, -inf  ;;  %6551 = vmatmul.msk.f32.gmra.mxu2 %vm431_vm0, %v388_v47  ;;  %v8514_v47 = vld [vmem:[%s7710_s28 + $0x330] sm:$0xff] }
 0x12e   : > { %1977 = vmax.xlane.f32.xlu1 %v1976_v54  ;;  %2025 = vmax.xlane.f32.xlu2 %v2024_v55  ;;  %v371_v54 = vmul.f32 0.125, %v8143_v29  ;;  %v379_v55 = vmul.f32 0.125, %v8140_v21  ;;  %v8462_v21 = vpop.f32.mrf.mxu3 }
 0x12f   : > { %1956 = vmax.xlane.f32.xlu0 %v1955_v32  ;;  %v8454_v32 = vpop.f32.mrf.mxu1  ;;  %14428 = vst [vmem:[#allocation32_spill] sm:$0xff] %v8462_v21 }
 0x130   : > { %6518 = vmatmul.msk.f32.gmra.mxu0 %vm431_vm0, %v371_v54  ;;  %6534 = vmatmul.msk.f32.gmra.mxu1 %vm431_vm0, %v379_v55  ;;  %14427 = vst [vmem:[#allocation31_spill] sm:$0xff] %v8454_v32  ;;  %v1982_v29 = vsel %vm431_vm0, %v8454_v32, -inf  ;;  %v8467_v54 = vpop.f32.mrf.mxu2 }
 0x131   : > { %14430 = vst [vmem:[#allocation34_spill] sm:$0xff] %v8467_v54 }
 0x136   : > { %2004 = vmax.xlane.f32.xlu1 %v2003_v12  ;;  %1980 = vmax.xlane.f32.xlu2 %v1979_v24  ;;  %v1958_v12 = vsel %vm431_vm0, %v8446_v15, -inf  ;;  %v8464_v24 = vpop.f32.mrf.mxu0  ;;  %v2030_v15 = vsel %vm431_vm0, %v8462_v21, -inf  ;;  %v8487_v21 = vld [vmem:[%s7710_s28 + $0x338] sm:$0xff] }
 0x137   : > { %2028 = vmax.xlane.f32.xlu0 %v2027_v20  ;;  %14429 = vst [vmem:[#allocation33_spill] sm:$0xff] %v8464_v24  ;;  %v395_v20 = vmul.f32 0.125, %v8184_v40  ;;  %v8480_v40 = vpop.f32.mrf.mxu3  ;;  %6570 = vmatpush.xpose.msk.msrb.mxu0 %vm431_vm0, %v8487_v21 }
 0x138   : > { %14432 = vst [vmem:[#allocation36_spill] sm:$0xff] %v8480_v40  ;;  %v2033_v30 = vsel %vm431_vm0, %v8480_v40, -inf }
 0x139   : > { %6566 = vmatmul.msk.f32.gmra.mxu3 %vm431_vm0, %v395_v20  ;;  %v372_v20 = vmul.f32 0.125, %v8117_v62 }
 0x13b   : > { %6519 = vmatmul.msk.f32.gmra.mxu0 %vm431_vm0, %v372_v20 }
 0x13c   : > { %6571 = vmatpush.xpose.msk.msrb.mxu0 %vm431_vm0, %v8514_v47 }
 0x13e   : > { %2007 = vmax.xlane.f32.xlu2 %v2006_v60  ;;  %1959 = vmax.xlane.f32.xlu1 %v1958_v12  ;;  %v1961_v60 = vsel %vm431_vm0, %v8464_v24, -inf  ;;  %v2009_v12 = vsel %vm431_vm0, %v8467_v54, -inf  ;;  %v8482_v32 = vpop.f32.mrf.mxu0  ;;  %v380_v54 = vmul.f32 0.125, %v8113_v59 }
 0x13f   : > { %1983 = vmax.xlane.f32.xlu0 %v1982_v29  ;;  %v8478_v29 = vpop.f32.mrf.mxu1  ;;  %14433 = vst [vmem:[#allocation37_spill] sm:$0xff] %v8482_v32  ;;  %v8510_v20 = vpop.f32.mrf.mxu3 }
 0x140   : > { %v8469_v55 = vpop.xlane.xlu0 %1857  ;;  %14431 = vst [vmem:[#allocation35_spill] sm:$0xff] %v8478_v29  ;;  %v1985_v62 = vsel %vm431_vm0, %v8478_v29, -inf  ;;  %6535 = vmatmul.msk.f32.gmra.mxu1 %vm431_vm0, %v380_v54  ;;  %v8517_v29 = vld [vmem:[%s7710_s28 + $0x378] sm:$0xff]  ;;  %v396_v54 = vmul.f32 0.125, %v8156_v46  ;;  %v8544_v46 = vld [vmem:[%s7710_s28 + $0x328] sm:$0xff] }
 0x141   : > { %v8489_v6 = vpop.xlane.xlu2 %1881  ;;  %14436 = vst [vmem:[#allocation40_spill] sm:$0xff] %v8510_v20  ;;  %6586 = vmatpush.xpose.msk.msrb.mxu1 %vm431_vm0, %v8517_v29  ;;  %6572 = vmatpush.xpose.msk.msrb.mxu0 %vm431_vm0, %v8544_v46 }
 0x142   : > { %14437 = vst [vmem:[#allocation41_spill] sm:$0xff] %v8517_v29  ;;  %6567 = vmatmul.msk.f32.gmra.mxu3 %vm431_vm0, %v396_v54 }
 0x143   : > { %6520 = vmatmul.msk.f32.gmra.mxu0 %vm431_vm0, %v373_v14 }
 0x145   : > { %6573 = vmatpush.xpose.msk.msrb.mxu0 %vm431_vm0, %v8576_v63 }
 0x146   : > { %2031 = vmax.xlane.f32.xlu1 %v2030_v15  ;;  %1962 = vmax.xlane.f32.xlu2 %v1961_v60  ;;  %v1964_v60 = vsel %vm431_vm0, %v8482_v32, -inf  ;;  %v2036_v32 = vsel %vm431_vm0, %v8510_v20, -inf  ;;  %v8537_v27 = vpop.f32.mrf.mxu0 }
 0x147   : > { %2010 = vmax.xlane.f32.xlu0 %v2009_v12  ;;  %v8505_v12 = vpop.f32.mrf.mxu2  ;;  %v8508_v37 = vpop.f32.mrf.mxu1  ;;  %14438 = vst [vmem:[#allocation42_spill] sm:$0xff] %v8537_v27 }
 0x148   : > { %v8491_v24 = vpop.xlane.xlu1 %1905  ;;  %14434 = vst [vmem:[#allocation38_spill] sm:$0xff] %v8505_v12  ;;  %v8565_v20 = vpop.f32.mrf.mxu3 }
 0x149   : > { %v8495_v15 = vpop.xlane.xlu0 %1929  ;;  %14435 = vst [vmem:[#allocation39_spill] sm:$0xff] %v8508_v37 }
 0x14a   : > { %14441 = vst [vmem:[#allocation45_spill] sm:$0xff] %v8565_v20 }
 0x14e   : > { %1986 = vmax.xlane.f32.xlu1 %v1985_v62  ;;  %2034 = vmax.xlane.f32.xlu2 %v2033_v30  ;;  %v2012_v30 = vsel %vm431_vm0, %v8505_v12, -inf  ;;  %v8547_v12 = vld [vmem:[%s7710_s28 + $0x370] sm:$0xff]  ;;  %v8568_v61 = vpop.f32.mrf.mxu0 }
 0x14f   : > { %1965 = vmax.xlane.f32.xlu0 %v1964_v60  ;;  %v1988_v60 = vsel %vm431_vm0, %v8508_v37, -inf  ;;  %v8539_v17 = vpop.f32.mrf.mxu2  ;;  %v8541_v13 = vpop.f32.mrf.mxu1  ;;  %6587 = vmatpush.xpose.msk.msrb.mxu1 %vm431_vm0, %v8547_v12  ;;  %14442 = vst [vmem:[#allocation46_spill] sm:$0xff] %v8568_v61 }
 0x150   : > { %v8521_v62 = vpop.xlane.xlu2 %1908  ;;  %14439 = vst [vmem:[#allocation43_spill] sm:$0xff] %v8539_v17  ;;  %v2015_v54 = vsel %vm431_vm0, %v8539_v17, -inf  ;;  %v381_v17 = vmul.f32 0.125, %v8062_v48  ;;  %v2039_v48 = vsel %vm431_vm0, %v8565_v20, -inf  ;;  %v8601_v5 = vpop.f32.mrf.mxu3  ;;  %v8610_v20 = vld [vmem:[%s7710_s28 + $0x360] sm:$0xff] }
 0x151   : > { %v8519_v40 = vpop.xlane.xlu1 %1932  ;;  %v8527_v59 = vpop.xlane.xlu0 %1860  ;;  %14440 = vst [vmem:[#allocation44_spill] sm:$0xff] %v8541_v13 }
 0x152   : > { %6536 = vmatmul.msk.f32.gmra.mxu1 %vm431_vm0, %v381_v17  ;;  %14445 = vst [vmem:[#allocation49_spill] sm:$0xff] %v8601_v5  ;;  %v397_v17 = vmul.f32 0.125, %v8132_v52 }
 0x154   : > { %6568 = vmatmul.msk.f32.gmra.mxu3 %vm431_vm0, %v397_v17 }
 0x156   : > { %2013 = vmax.xlane.f32.xlu1 %v2012_v30  ;;  %1989 = vmax.xlane.f32.xlu2 %v1988_v60  ;;  %v1967_v30 = vsel %vm431_vm0, %v8537_v27, -inf  ;;  %v1991_v60 = vsel %vm431_vm0, %v8541_v13, -inf  ;;  %v389_v27 = vmul.f32 0.125, %v8120_v28  ;;  %v8579_v13 = vld [vmem:[%s7710_s28 + $0x368] sm:$0xff]  ;;  %v1970_v28 = vsel %vm431_vm0, %v8568_v61, -inf  ;;  %v8603_v3 = vpop.f32.mrf.mxu0 }
 0x157   : > { %2037 = vmax.xlane.f32.xlu0 %v2036_v32  ;;  %v8570_v45 = vpop.f32.mrf.mxu2  ;;  %6588 = vmatpush.xpose.msk.msrb.mxu1 %vm431_vm0, %v8579_v13  ;;  %14446 = vst [vmem:[#allocation50_spill] sm:$0xff] %v8603_v3 }
 0x158   : > { %14443 = vst [vmem:[#allocation47_spill] sm:$0xff] %v8570_v45  ;;  %6552 = vmatmul.msk.f32.gmra.mxu2 %vm431_vm0, %v389_v27  ;;  %v2018_v14 = vsel %vm431_vm0, %v8570_v45, -inf  ;;  %v8607_v27 = vld [vmem:[%s7710_s28 + $0x318] sm:$0xff]  ;;  %v1973_v45 = vsel %vm431_vm0, %v8603_v3, -inf  ;;  %v8635_v17 = vpop.f32.mrf.mxu3 }
 0x159   : > { %v8549_v33 = vpop.xlane.xlu2 %1935  ;;  %v8551_v37 = vpop.xlane.xlu1 %1863  ;;  %6574 = vmatpush.xpose.msk.msrb.mxu0 %vm431_vm0, %v8607_v27  ;;  %14449 = vst [vmem:[#allocation53_spill] sm:$0xff] %v8635_v17  ;;  %v2045_v3 = vsel %vm431_vm0, %v8635_v17, -inf }
 0x15a   : > { %v8557_v32 = vpop.xlane.xlu0 %1884 }
 0x15b   : > { %6589 = vmatpush.xpose.msk.msrb.mxu1 %vm431_vm0, %v8610_v20 }
 0x15e   : > { %2016 = vmax.xlane.f32.xlu2 %v2015_v54  ;;  %1968 = vmax.xlane.f32.xlu1 %v1967_v30 }
 0x15f   : > { %1992 = vmax.xlane.f32.xlu0 %v1991_v60  ;;  %v8599_v60 = vpop.f32.mrf.mxu1  ;;  %v8633_v26 = vpop.f32.mrf.mxu2  ;;  %6590 = vmatpush.xpose.msk.msrb.mxu1 %vm431_vm0, %v8641_v8 }
 0x160   : > { %14444 = vst [vmem:[#allocation48_spill] sm:$0xff] %v8599_v60  ;;  %v1994_v52 = vsel %vm431_vm0, %v8599_v60, -inf  ;;  %v8638_v60 = vld [vmem:[%s7710_s28 + $0x310] sm:$0xff] }
 0x161   : > { %v8581_v54 = vpop.xlane.xlu2 %1890  ;;  %v8583_v30 = vpop.xlane.xlu1 %1887  ;;  %14448 = vst [vmem:[#allocation52_spill] sm:$0xff] %v8633_v26  ;;  %6575 = vmatpush.xpose.msk.msrb.mxu0 %vm431_vm0, %v8638_v60 }
 0x162   : > { %v8589_v2 = vpop.xlane.xlu0 %1911 }
 0x166   : > { %2040 = vmax.xlane.f32.xlu1 %v2039_v48  ;;  %1971 = vmax.xlane.f32.xlu2 %v1970_v28  ;;  %v2042_v28 = vsel %vm431_vm0, %v8601_v5, -inf }
 0x167   : > { %2019 = vmax.xlane.f32.xlu0 %v2018_v14  ;;  %v2248_v14 = vsub.f32 %v8214_v42, %v8489_v6  ;;  %v8631_v43 = vpop.f32.mrf.mxu1  ;;  %v390_v6 = vmul.f32 0.125, %v8069_v0  ;;  %v2264_v0 = vsub.f32 %v8250_v35, %v8495_v15  ;;  %v2249_v15 = vsub.f32 %v8258_v57, %v8557_v32 }
 0x168   : > { %14447 = vst [vmem:[#allocation51_spill] sm:$0xff] %v8631_v43 }
 0x169   : > { %v8612_v18 = vpop.xlane.xlu1 %1866  ;;  %v8614_v61 = vpop.xlane.xlu2 %1869  ;;  %v2384_v9 = vmul.f32 1.442695, %v2248_v14  ;;  %v2240_v14 = vsub.f32 %v8212_v41, %v8469_v55  ;;  %6553 = vmatmul.msk.f32.gmra.mxu2 %vm431_vm0, %v390_v6  ;;  %v272_v41 = vld [vmem:[%s7710_s28 + $0x308] sm:$0xff]  ;;  %v8674_v55 = vld [vmem:[%s7710_s28 + $0x350] sm:$0xff]  ;;  %v2416_v6 = vmul.f32 1.442695, %v2264_v0 }
 0x16a   : > { %v8620_v48 = vpop.xlane.xlu0 %1938  ;;  %6576 = vmatpush.xpose.msk.msrb.mxu0 %vm431_vm0, %v272_v41  ;;  %6591 = vmatpush.xpose.msk.msrb.mxu1 %vm431_vm0, %v8674_v55  ;;  %v2386_v0 = vmul.f32 1.442695, %v2249_v15 }
 0x16b   : > { %6828 = vpow2.f32 %v2384_v9  ;;  %v2368_v53 = vmul.f32 1.442695, %v2240_v14  ;;  %v8667_v9 = vpop.f32.mrf.mxu0  ;;  %v8698_v14 = vpop.f32.mrf.mxu2 }
 0x16c   : > { %14450 = vst [vmem:[#allocation54_spill] sm:$0xff] %v8667_v9  ;;  %v2096_v15 = vsel %vm431_vm0, %v8698_v14, -inf }
 0x16d   : > { %6830 = vpow2.f32 %v2368_v53  ;;  %14453 = vst [vmem:[#allocation57_spill] sm:$0xff] %v8698_v14  ;;  %v398_v53 = vmul.f32 0.125, %v8072_v1  ;;  %v7340_v1 = vld [vmem:[%s7710_s28 + $0x38] sm:$0xff]  ;;  %v8729_v14 = vpop.f32.mrf.mxu3 }
 0x16e   : > { %1995 = vmax.xlane.f32.xlu1 %v1994_v52  ;;  %2043 = vmax.xlane.f32.xlu2 %v2042_v28  ;;  %v2021_v52 = vsel %vm431_vm0, %v8633_v26, -inf  ;;  %v1997_v28 = vsel %vm431_vm0, %v8631_v43, -inf  ;;  %v374_v26 = vmul.f32 0.125, %v8059_v11  ;;  %v382_v43 = vmul.f32 0.125, %v8046_v10  ;;  %14456 = vst [vmem:[#allocation60_spill] sm:$0xff] %v8729_v14 }
 0x16f   : > { %1974 = vmax.xlane.f32.xlu0 %v1973_v45  ;;  %v8669_v29 = vpop.f32.mrf.mxu1  ;;  %6832 = vpow2.f32 %v2416_v6  ;;  %6569 = vmatmul.msk.f32.gmra.mxu3 %vm431_vm0, %v398_v53 }
 0x170   : > { %14451 = vst [vmem:[#allocation55_spill] sm:$0xff] %v8669_v29  ;;  %6521 = vmatmul.msk.f32.gmra.mxu0 %vm431_vm0, %v374_v26  ;;  %6537 = vmatmul.msk.f32.gmra.mxu1 %vm431_vm0, %v382_v43  ;;  %v2048_v26 = vsel %vm431_vm0, %v8667_v9, -inf  ;;  %v2072_v43 = vsel %vm431_vm0, %v8669_v29, -inf }
 0x171   : > { %v8643_v5 = vpop.xlane.xlu1 %1914  ;;  %v8645_v42 = vpop.xlane.xlu2 %1917 }
 0x172   : > { %v8651_v45 = vpop.xlane.xlu0 %1893  ;;  %v8682_v10 = vpop.eup %6828 }
 0x173   : > { %14452 = vst [vmem:[#allocation56_spill] sm:$0xff] %v8682_v10 }
 0x176   : > { %2022 = vmax.xlane.f32.xlu1 %v2021_v52  ;;  %1998 = vmax.xlane.f32.xlu2 %v1997_v28  ;;  %v2648_v52 = vsel %vm431_vm0, %v8682_v10, 0.0  ;;  %v7363_v10 = vld [vmem:[%s7710_s28 + $0x160] sm:$0xff] }
 0x177   : > { %2046 = vmax.xlane.f32.xlu0 %v2045_v3  ;;  %v2256_v3 = vsub.f32 %v8248_v34, %v8491_v24  ;;  %v271_v34 = vld [vmem:[%s7710_s28 + $0x300] sm:$0xff]  ;;  %v8703_v24 = vld [vmem:[%s7710_s28 + $0x348] sm:$0xff] }
 0x178   : > { %v399_v32 = vmul.f32 0.125, %v271_v34  ;;  %6577 = vmatpush.xpose.msk.msrb.mxu0 %vm431_vm0, %v271_v34  ;;  %6592 = vmatpush.xpose.msk.msrb.mxu1 %vm431_vm0, %v8703_v24  ;;  %v7341_v34 = vld [vmem:[%s7710_s28 + $0x30] sm:$0xff] }
 0x179   : > { %v8676_v17 = vpop.xlane.xlu1 %1941  ;;  %v8678_v35 = vpop.xlane.xlu2 %1872  ;;  %v2400_v28 = vmul.f32 1.442695, %v2256_v3 }
 0x17a   : > { %v8684_v11 = vpop.xlane.xlu0 %1920 }
 0x17b   : > { %6834 = vpow2.f32 %v2400_v28  ;;  %6578 = vmatmul.msk.f32.vlgmr.msrb.gmra.mxu0 %vm431_vm0, %v399_v32  ;;  %v400_v28 = vmul.f32 0.125, %v272_v41  ;;  %v2265_v41 = vsub.f32 %v8276_v25, %v8519_v40  ;;  %v7346_v25 = vld [vmem:[%s7710_s28 + $0x70] sm:$0xff] }
 0x17c   : > { %5088 = vmatpush.msra.mxu0 %v7340_v1  ;;  %6836 = vpow2.f32 %v2386_v0  ;;  %v7342_v1 = vld [vmem:[%s7710_s28 + $0x28] sm:$0xff]  ;;  %v279_v0 = vld [vmem:[%s7710_s28 + $0x340] sm:$0xff]  ;;  %v7347_v40 = vld [vmem:[%s7710_s28 + $0x10] sm:$0xff] }
 0x17d   : > { %v407_v9 = vmul.f32 0.125, %v279_v0  ;;  %6593 = vmatpush.xpose.msk.msrb.mxu1 %vm431_vm0, %v279_v0  ;;  %v2241_v0 = vsub.f32 %v8256_v56, %v8527_v59  ;;  %v2418_v59 = vmul.f32 1.442695, %v2265_v41  ;;  %v7349_v41 = vld [vmem:[%s7710_s28 + $0x8] sm:$0xff] }
 0x17e   : > { %2649 = vadd.xlane.f32.xlu2 %v2648_v52  ;;  %2049 = vmax.xlane.f32.xlu1 %v2048_v26  ;;  %v8712_v26 = vpop.eup %6830 }
 0x17f   : > { %2073 = vmax.xlane.f32.xlu0 %v2072_v43  ;;  %14454 = vst [vmem:[#allocation58_spill] sm:$0xff] %v8712_v26  ;;  %v8718_v43 = vpop.eup %6832  ;;  %v2624_v52 = vsel %vm431_vm0, %v8712_v26, 0.0  ;;  %5089 = vmatpush.msra.mxu0 %v7341_v34  ;;  %v7345_v26 = vld [vmem:[%s7710_s28 + $0x18] sm:$0xff]  ;;  %6838 = vpow2.f32 %v2418_v59  ;;  %v8796_v59 = vld [vmem:[%s7710_s28 + $0x3f0] sm:$0xff] }
 0x180   : > { %14455 = vst [vmem:[#allocation59_spill] sm:$0xff] %v8718_v43  ;;  %v2696_v53 = vsel %vm431_vm0, %v8718_v43, 0.0  ;;  %v2120_v43 = vsel %vm431_vm0, %v8729_v14, -inf  ;;  %6594 = vmatmul.msk.f32.vlgmr.msrb.gmra.mxu1 %vm431_vm0, %v407_v9  ;;  %v8762_v9 = vpop.f32.mrf.mxu0  ;;  %v7352_v14 = vld [vmem:[%s7710_s28 + $0x58] sm:$0xff] }
 0x181   : > { %v8705_v6 = vpop.xlane.xlu1 %1896  ;;  %v8707_v57 = vpop.xlane.xlu2 %1944  ;;  %5090 = vmatpush.msra.mxu0 %v7342_v1  ;;  %14459 = vst [vmem:[#allocation63_spill] sm:$0xff] %v8762_v9 }
 0x182   : > { %v8714_v3 = vpop.xlane.xlu0 %1875 }
 0x183   : > { %6579 = vmatmul.msk.f32.gmra.mxu0 %vm431_vm0, %v400_v28  ;;  %v8766_v28 = vpop.f32.mrf.mxu1 }
 0x184   : > { %14460 = vst [vmem:[#allocation64_spill] sm:$0xff] %v8766_v28 }
 0x186   : > { %2097 = vmax.xlane.f32.xlu2 %v2096_v15  ;;  %2625 = vadd.xlane.f32.xlu1 %v2624_v52  ;;  %v7343_v15 = vld [vmem:[%s7710_s28 + $0x20] sm:$0xff]  ;;  %v8738_v52 = vpop.eup %6834 }
 0x187   : > { %2697 = vadd.xlane.f32.xlu0 %v2696_v53  ;;  %5091 = vmatpush.msra.mxu0 %v7343_v15  ;;  %14457 = vst [vmem:[#allocation61_spill] sm:$0xff] %v8738_v52  ;;  %v7344_v53 = vld [vmem:[%s7710_s28 + $0x78] sm:$0xff]  ;;  %v8743_v1 = vpop.eup %6836  ;;  %v2257_v15 = vsub.f32 %v8274_v16, %v8521_v62  ;;  %v7348_v16 = vld [vmem:[%s7710_s28 + $0x68] sm:$0xff]  ;;  %v2370_v62 = vmul.f32 1.442695, %v2241_v0 }
 0x188   : > { %5153 = vmatpush.msra.mxu1 %v7344_v53  ;;  %14458 = vst [vmem:[#allocation62_spill] sm:$0xff] %v8743_v1  ;;  %v2672_v53 = vsel %vm431_vm0, %v8738_v52, 0.0  ;;  %v2651_v56 = vsel %vm431_vm0, %v8743_v1, 0.0  ;;  %v7353_v1 = vld [vmem:[%s7710_s28 + $0x138] sm:$0xff]  ;;  %v8880_v52 = vld [vmem:[%s7710_s28 + $0x3a0] sm:$0xff] }
 0x189   : > { %v8732_v32 = vpop.xlane.xlu1 %1923  ;;  %v8734_v29 = vpop.xlane.xlu2 %1899  ;;  %5092 = vmatpush.msra.mxu0 %v7345_v26  ;;  %v401_v26 = vmul.f32 0.125, %v8638_v60  ;;  %v7350_v60 = vld [vmem:[%s7710_s28 + $0x60] sm:$0xff]  ;;  %6840 = vpow2.f32 %v2370_v62  ;;  %v409_v62 = vmul.f32 0.125, %v8674_v55 }
 0x18a   : > { %v8740_v34 = vpop.xlane.xlu0 %1947  ;;  %5154 = vmatpush.msra.mxu1 %v7346_v25  ;;  %v8768_v25 = vpop.f32.mrf.mxu2 }
 0x18b   : > { %5093 = vmatpush.msra.mxu0 %v7347_v40  ;;  %14461 = vst [vmem:[#allocation65_spill] sm:$0xff] %v8768_v25  ;;  %v2402_v40 = vmul.f32 1.442695, %v2257_v15  ;;  %v2051_v15 = vsel %vm431_vm0, %v8762_v9, -inf  ;;  %v8838_v9 = vld [vmem:[%s7710_s28 + $0x3e0] sm:$0xff] }
 0x18c   : > { %5155 = vmatpush.msra.mxu1 %v7348_v16  ;;  %6580 = vmatmul.msk.f32.gmra.mxu0 %vm431_vm0, %v401_v26  ;;  %v8811_v26 = vld [vmem:[%s7710_s28 + $0x3e8] sm:$0xff] }
 0x18d   : > { %5094 = vmatpush.msra.mxu0 %v7349_v41  ;;  %v2075_v41 = vsel %vm431_vm0, %v8766_v28, -inf  ;;  %6842 = vpow2.f32 %v2402_v40  ;;  %v7356_v40 = vld [vmem:[%s7710_s28 + $0x130] sm:$0xff] }
 0x18e   : > { %2673 = vadd.xlane.f32.xlu2 %v2672_v53  ;;  %2121 = vmax.xlane.f32.xlu1 %v2120_v43  ;;  %v408_v43 = vmul.f32 0.125, %v8703_v24  ;;  %v8772_v53 = vld [vmem:[%s7710_s28 + $0x3f8] sm:$0xff]  ;;  %v7351_v24 = vld [vmem:[%s7710_s28] sm:$0xff] }
 0x18f   : > { %2652 = vadd.xlane.f32.xlu0 %v2651_v56  ;;  %6618 = vmatpush.xpose.msk.msrb.mxu3 %vm431_vm0, %v8772_v53 }
 0x190   : > { %5156 = vmatpush.msra.mxu1 %v7350_v60  ;;  %5095 = vmatpush.msra.mxu0 %v7351_v24  ;;  %v2250_v60 = vsub.f32 %v8288_v58, %v8583_v30  ;;  %v2099_v24 = vsel %vm431_vm0, %v8768_v25, -inf  ;;  %v8804_v58 = vld [vmem:[%s7710_s28 + $0x3b8] sm:$0xff] }
 0x191   : > { %v8775_v56 = vpop.xlane.xlu2 %1926  ;;  %v8777_v16 = vpop.xlane.xlu1 %1878  ;;  %6595 = vmatmul.msk.f32.gmra.mxu1 %vm431_vm0, %v408_v43  ;;  %6602 = vmatpush.xpose.msk.msrb.mxu2 %vm431_vm0, %v8804_v58  ;;  %v7355_v43 = vld [vmem:[%s7710_s28 + $0x48] sm:$0xff]  ;;  %v7359_v25 = vld [vmem:[%s7710_s28 + $0x178] sm:$0xff] }
 0x192   : > { %v8782_v0 = vpop.xlane.xlu0 %1902  ;;  %5157 = vmatpush.msra.mxu1 %v7352_v14  ;;  %5348 = vmatpush.msrb.mxu0 %v7353_v1  ;;  %v7354_v14 = vld [vmem:[%s7710_s28 + $0x50] sm:$0xff]  ;;  %v2388_v30 = vmul.f32 1.442695, %v2250_v60  ;;  %v402_v1 = vmul.f32 0.125, %v8607_v27 }
 0x193   : > { %6619 = vmatpush.xpose.msk.msrb.mxu3 %vm431_vm0, %v8796_v59  ;;  %v8828_v60 = vld [vmem:[%s7710_s28 + $0x3b0] sm:$0xff] }
 0x194   : > { %5158 = vmatpush.msra.mxu1 %v7354_v14  ;;  %5349 = vmatpush.msrb.mxu0 %v7356_v40  ;;  %v7357_v14 = vld [vmem:[%s7710_s28 + $0x40] sm:$0xff]  ;;  %6844 = vpow2.f32 %v2388_v30 }
 0x195   : > { %6603 = vmatpush.xpose.msk.msrb.mxu2 %vm431_vm0, %v8828_v60  ;;  %6581 = vmatmul.msk.f32.gmra.mxu0 %vm431_vm0, %v402_v1  ;;  %v410_v1 = vmul.f32 0.125, %v8641_v8 }
 0x196   : > { %2076 = vmax.xlane.f32.xlu1 %v2075_v41  ;;  %2052 = vmax.xlane.f32.xlu2 %v2051_v15  ;;  %v8815_v41 = vpop.eup %6838 }
 0x197   : > { %2100 = vmax.xlane.f32.xlu0 %v2099_v24  ;;  %5159 = vmatpush.msra.mxu1 %v7355_v43  ;;  %14462 = vst [vmem:[#allocation66_spill] sm:$0xff] %v8815_v41  ;;  %v8823_v27 = vpop.eup %6840  ;;  %v7358_v43 = vld [vmem:[%s7710_s28 + $0x128] sm:$0xff] }
 0x198   : > { %6620 = vmatpush.xpose.msk.msrb.mxu3 %vm431_vm0, %v8811_v26  ;;  %14463 = vst [vmem:[#allocation67_spill] sm:$0xff] %v8823_v27  ;;  %5350 = vmatpush.msrb.mxu0 %v7358_v43  ;;  %v8832_v40 = vpop.eup %6842  ;;  %v2699_v43 = vsel %vm431_vm0, %v8815_v41, 0.0  ;;  %v2627_v28 = vsel %vm431_vm0, %v8823_v27, 0.0 }
 0x199   : > { %v8817_v15 = vpop.xlane.xlu1 %1950  ;;  %v8819_v24 = vpop.xlane.xlu2 %1953  ;;  %5160 = vmatpush.msra.mxu1 %v7357_v14  ;;  %14464 = vst [vmem:[#allocation68_spill] sm:$0xff] %v8832_v40  ;;  %v2242_v14 = vsub.f32 %v8286_v19, %v8551_v37  ;;  %v2675_v30 = vsel %vm431_vm0, %v8832_v40, 0.0  ;;  %v8854_v19 = vld [vmem:[%s7710_s28 + $0x3a8] sm:$0xff]  ;;  %v403_v37 = vmul.f32 0.125, %v8576_v63  ;;  %v7362_v40 = vld [vmem:[%s7710_s28 + $0x120] sm:$0xff] }
 0x19a   : > { %v8825_v55 = vpop.xlane.xlu0 %2001  ;;  %6596 = vmatmul.msk.f32.gmra.mxu1 %vm431_vm0, %v409_v62  ;;  %6604 = vmatpush.xpose.msk.msrb.mxu2 %vm431_vm0, %v8854_v19  ;;  %v8860_v62 = vpop.f32.mrf.mxu3 }
 0x19b   : > { %5413 = vmatpush.msrb.mxu1 %v7359_v25  ;;  %v7360_v25 = vld [vmem:[%s7710_s28 + $0x170] sm:$0xff]  ;;  %14465 = vst [vmem:[#allocation69_spill] sm:$0xff] %v8860_v62  ;;  %5351 = vmatpush.msrb.mxu0 %v7362_v40  ;;  %v8875_v8 = vpop.eup %6844  ;;  %v2266_v40 = vsub.f32 %v8297_v31, %v8549_v33  ;;  %v7365_v33 = vld [vmem:[%s7710_s28 + $0x158] sm:$0xff] }
 0x19c   : > { %6621 = vmatpush.xpose.msk.msrb.mxu3 %vm431_vm0, %v8838_v9  ;;  %14469 = vst [vmem:[#allocation73_spill] sm:$0xff] %v8875_v8  ;;  %v2654_v31 = vsel %vm431_vm0, %v8875_v8, 0.0 }
 0x19d   : > { %5414 = vmatpush.msrb.mxu1 %v7360_v25  ;;  %v7361_v25 = vld [vmem:[%s7710_s28 + $0x168] sm:$0xff]  ;;  %6582 = vmatmul.msk.f32.gmra.mxu0 %vm431_vm0, %v403_v37  ;;  %v404_v37 = vmul.f32 0.125, %v8544_v46 }
 0x19e   : > { %2700 = vadd.xlane.f32.xlu1 %v2699_v43  ;;  %2628 = vadd.xlane.f32.xlu2 %v2627_v28  ;;  %v8862_v43 = vpop.f32.mrf.mxu0  ;;  %v8865_v28 = vld [vmem:[%s7710_s28 + $0x3d8] sm:$0xff] }
 0x19f   : > { %2676 = vadd.xlane.f32.xlu0 %v2675_v30  ;;  %14466 = vst [vmem:[#allocation70_spill] sm:$0xff] %v8862_v43  ;;  %5415 = vmatpush.msrb.mxu1 %v7361_v25  ;;  %v2372_v30 = vmul.f32 1.442695, %v2242_v14  ;;  %v7364_v25 = vld [vmem:[%s7710_s28 + $0x118] sm:$0xff]  ;;  %v2123_v14 = vsel %vm431_vm0, %v8860_v62, -inf }
 0x1a0   : > { %6622 = vmatpush.xpose.msk.msrb.mxu3 %vm431_vm0, %v8865_v28  ;;  %5352 = vmatpush.msrb.mxu0 %v7364_v25  ;;  %v8913_v25 = vpop.f32.mrf.mxu2 }
 0x1a1   : > { %v8869_v27 = vpop.xlane.xlu1 %1977  ;;  %v8871_v41 = vpop.xlane.xlu2 %2025  ;;  %5416 = vmatpush.msrb.mxu1 %v7363_v10  ;;  %6605 = vmatpush.xpose.msk.msrb.mxu2 %vm431_vm0, %v8880_v52  ;;  %6846 = vpow2.f32 %v2372_v30  ;;  %14472 = vst [vmem:[#allocation76_spill] sm:$0xff] %v8913_v25 }
 0x1a2   : > { %14467 = vst [vmem:[#allocation71_spill] sm:$0xff] %v8869_v27  ;;  %v8877_v63 = vpop.xlane.xlu0 %1956  ;;  %v8895_v27 = vld [vmem:[%s7710_s28 + $0x3d0] sm:$0xff]  ;;  %6597 = vmatmul.msk.f32.gmra.mxu1 %vm431_vm0, %v410_v1  ;;  %v411_v1 = vmul.f32 0.125, %v8610_v20  ;;  %v8911_v30 = vpop.f32.mrf.mxu1  ;;  %v7368_v20 = vld [vmem:[%s7710_s28 + $0x148] sm:$0xff] }
 0x1a3   : > { %14468 = vst [vmem:[#allocation72_spill] sm:$0xff] %v8871_v41  ;;  %v2054_v41 = vsel %vm431_vm0, %v8862_v43, -inf  ;;  %5417 = vmatpush.msrb.mxu1 %v7365_v33  ;;  %v7369_v43 = vld [vmem:[%s7710_s28 + $0x108] sm:$0xff]  ;;  %v2078_v8 = vsel %vm431_vm0, %v8911_v30, -inf }
 0x1a4   : > { %14470 = vst [vmem:[#allocation74_spill] sm:$0xff] %v8877_v63  ;;  %v2258_v63 = vsub.f32 %v8301_v36, %v8589_v2  ;;  %6623 = vmatpush.xpose.msk.msrb.mxu3 %vm431_vm0, %v8895_v27  ;;  %v8905_v36 = vld [vmem:[%s7710_s28 + $0x398] sm:$0xff]  ;;  %v2420_v2 = vmul.f32 1.442695, %v2266_v40  ;;  %v7367_v40 = vld [vmem:[%s7710_s28 + $0x110] sm:$0xff] }
 0x1a5   : > { %6606 = vmatpush.xpose.msk.msrb.mxu2 %vm431_vm0, %v8905_v36  ;;  %14471 = vst [vmem:[#allocation75_spill] sm:$0xff] %v8911_v30  ;;  %5353 = vmatpush.msrb.mxu0 %v7367_v40  ;;  %v2102_v40 = vsel %vm431_vm0, %v8913_v25, -inf }
 0x1a6   : > { %2655 = vadd.xlane.f32.xlu1 %v2654_v31  ;;  %2124 = vmax.xlane.f32.xlu2 %v2123_v14  ;;  %v2404_v10 = vmul.f32 1.442695, %v2258_v63  ;;  %v296_v14 = vld [vmem:[%s7710_s28 + $0x3c8] sm:$0xff]  ;;  %v7366_v31 = vld [vmem:[%s7710_s28 + $0x150] sm:$0xff]  ;;  %6848 = vpow2.f32 %v2420_v2 }
 0x1a7   : > { %2055 = vmax.xlane.f32.xlu0 %v2054_v41  ;;  %5418 = vmatpush.msrb.mxu1 %v7366_v31  ;;  %v8926_v63 = vld [vmem:[%s7710_s28 + $0x390] sm:$0xff]  ;;  %v8930_v62 = vpop.eup %6846  ;;  %v2251_v31 = vsub.f32 %v8307_v44, %v8581_v54  ;;  %v288_v2 = vld [vmem:[%s7710_s28 + $0x388] sm:$0xff] }
 0x1a8   : > { %6624 = vmatpush.xpose.msk.msrb.mxu3 %vm431_vm0, %v296_v14  ;;  %5354 = vmatpush.msrb.mxu0 %v7369_v43  ;;  %14473 = vst [vmem:[#allocation77_spill] sm:$0xff] %v8930_v62  ;;  %6850 = vpow2.f32 %v2404_v10  ;;  %v7370_v43 = vld [vmem:[%s7710_s28 + $0x140] sm:$0xff]  ;;  %v2630_v44 = vsel %vm431_vm0, %v8930_v62, 0.0  ;;  %v405_v10 = vmul.f32 0.125, %v8514_v47  ;;  %v424_v62 = vmul.f32 0.125, %v296_v14 }
 0x1a9   : > { %v8918_v41 = vpop.xlane.xlu1 %2004  ;;  %v8920_v33 = vpop.xlane.xlu2 %1980  ;;  %5419 = vmatpush.msrb.mxu1 %v7368_v20  ;;  %6607 = vmatpush.xpose.msk.msrb.mxu2 %vm431_vm0, %v8926_v63  ;;  %v295_v20 = vld [vmem:[%s7710_s28 + $0x3c0] sm:$0xff]  ;;  %v2390_v30 = vmul.f32 1.442695, %v2251_v31 }
 0x1aa   : > { %v8923_v46 = vpop.xlane.xlu0 %2028  ;;  %6598 = vmatmul.msk.f32.gmra.mxu1 %vm431_vm0, %v411_v1  ;;  %6583 = vmatmul.msk.f32.gmra.mxu0 %vm431_vm0, %v404_v37  ;;  %v423_v54 = vmul.f32 0.125, %v295_v20  ;;  %v412_v37 = vmul.f32 0.125, %v8579_v13  ;;  %v8951_v1 = vpop.f32.mrf.mxu3  ;;  %v287_v13 = vld [vmem:[%s7710_s28 + $0x380] sm:$0xff] }
 0x1ab   : > { %5420 = vmatpush.msrb.mxu1 %v7370_v43  ;;  %14474 = vst [vmem:[#allocation78_spill] sm:$0xff] %v8951_v1  ;;  %v7372_v43 = vld [vmem:[%s7710_s28 + $0xf8] sm:$0xff]  ;;  %6852 = vpow2.f32 %v2390_v30  ;;  %v2126_v25 = vsel %vm431_vm0, %v8951_v1, -inf  ;;  %v7380_v1 = vld [vmem:[%s7710_s28 + $0xa0] sm:$0xff] }
 0x1ac   : > { %6625 = vmatpush.xpose.msk.msrb.mxu3 %vm431_vm0, %v295_v20 }
 0x1ad   : > { %6608 = vmatpush.xpose.msk.msrb.mxu2 %vm431_vm0, %v288_v2 }
 0x1ae   : > { %2103 = vmax.xlane.f32.xlu1 %v2102_v40  ;;  %2079 = vmax.xlane.f32.xlu2 %v2078_v8  ;;  %v7371_v8 = vld [vmem:[%s7710_s28 + $0x100] sm:$0xff]  ;;  %v8955_v40 = vpop.eup %6848 }
 0x1af   : > { %2631 = vadd.xlane.f32.xlu0 %v2630_v44  ;;  %6626 = vmatmul.msk.f32.vlgmr.msrb.gmra.mxu3 %vm431_vm0, %v423_v54  ;;  %v8962_v44 = vpop.eup %6850  ;;  %v7373_v54 = vld [vmem:[%s7710_s28 + $0xf0] sm:$0xff] }
 0x1b0   : > { %5355 = vmatpush.msrb.mxu0 %v7371_v8  ;;  %5283 = vmatpush.msra.mxu3 %v7372_v43  ;;  %v2243_v8 = vsub.f32 %v8305_v51, %v8612_v18  ;;  %v415_v43 = vmul.f32 0.125, %v287_v13  ;;  %v2678_v30 = vsel %vm431_vm0, %v8962_v44, 0.0  ;;  %v7374_v51 = vld [vmem:[%s7710_s28 + $0xe8] sm:$0xff]  ;;  %v7375_v18 = vld [vmem:[%s7710_s28 + $0xb8] sm:$0xff] }
 0x1b1   : > { %v8957_v20 = vpop.xlane.xlu2 %2007  ;;  %v8959_v31 = vpop.xlane.xlu1 %1959  ;;  %6609 = vmatpush.xpose.msk.msrb.mxu2 %vm431_vm0, %v287_v13 }
 0x1b2   : > { %v8964_v47 = vpop.xlane.xlu0 %1983  ;;  %5284 = vmatpush.msra.mxu3 %v7373_v54  ;;  %6599 = vmatmul.msk.f32.gmra.mxu1 %vm431_vm0, %v412_v37  ;;  %v2702_v54 = vsel %vm431_vm0, %v8955_v40, 0.0  ;;  %v2374_v14 = vmul.f32 1.442695, %v2243_v8  ;;  %v7376_v37 = vld [vmem:[%s7710_s28 + $0xb0] sm:$0xff]  ;;  %v8991_v13 = vpop.eup %6852  ;;  %v7377_v8 = vld [vmem:[%s7710_s28 + $0xe0] sm:$0xff] }
 0x1b3   : > { %14475 = vst [vmem:[#allocation79_spill] sm:$0xff] %v8964_v47  ;;  %6584 = vmatmul.msk.f32.gmra.mxu0 %vm431_vm0, %v405_v10  ;;  %v2267_v47 = vsub.f32 %v8319_v49, %v8620_v48  ;;  %v413_v49 = vmul.f32 0.125, %v8547_v12  ;;  %v8985_v48 = vpop.f32.mrf.mxu0  ;;  %v8987_v10 = vpop.f32.mrf.mxu1 }
 0x1b4   : > { %5285 = vmatpush.msra.mxu3 %v7374_v51  ;;  %6610 = vmatmul.msk.f32.vlgmr.msrb.gmra.mxu2 %vm431_vm0, %v415_v43  ;;  %14476 = vst [vmem:[#allocation80_spill] sm:$0xff] %v8985_v48  ;;  %v7378_v43 = vld [vmem:[%s7710_s28 + $0xa8] sm:$0xff]  ;;  %v416_v51 = vmul.f32 0.125, %v288_v2  ;;  %6854 = vpow2.f32 %v2374_v14  ;;  %v2252_v2 = vsub.f32 %v8334_v39, %v8651_v45  ;;  %v2657_v14 = vsel %vm431_vm0, %v8991_v13, 0.0 }
 0x1b5   : > { %5218 = vmatpush.msra.mxu2 %v7375_v18  ;;  %14477 = vst [vmem:[#allocation81_spill] sm:$0xff] %v8987_v10  ;;  %v7379_v18 = vld [vmem:[%s7710_s28 + $0xd8] sm:$0xff] }
 0x1b6   : > { %2679 = vadd.xlane.f32.xlu1 %v2678_v30  ;;  %2703 = vadd.xlane.f32.xlu2 %v2702_v54  ;;  %v2422_v30 = vmul.f32 1.442695, %v2267_v47  ;;  %v2259_v47 = vsub.f32 %v8315_v4, %v8643_v5  ;;  %v9017_v5 = vpop.f32.mrf.mxu2  ;;  %v2392_v39 = vmul.f32 1.442695, %v2252_v2  ;;  %v426_v2 = vmul.f32 0.125, %v8865_v28  ;;  %v7388_v28 = vld [vmem:[%s7710_s28 + $0x80] sm:$0xff] }
 0x1b7   : > { %2127 = vmax.xlane.f32.xlu0 %v2126_v25  ;;  %6627 = vmatmul.msk.f32.gmra.mxu3 %vm431_vm0, %v424_v62  ;;  %v2057_v62 = vsel %vm431_vm0, %v8985_v48, -inf  ;;  %14478 = vst [vmem:[#allocation82_spill] sm:$0xff] %v9017_v5 }
 0x1b8   : > { %5219 = vmatpush.msra.mxu2 %v7376_v37  ;;  %5286 = vmatpush.msra.mxu3 %v7377_v8  ;;  %v2081_v37 = vsel %vm431_vm0, %v8987_v10, -inf  ;;  %v425_v8 = vmul.f32 0.125, %v8895_v27  ;;  %6856 = vpow2.f32 %v2422_v30  ;;  %v2406_v4 = vmul.f32 1.442695, %v2259_v47  ;;  %v7382_v27 = vld [vmem:[%s7710_s28 + $0x98] sm:$0xff] }
 0x1b9   : > { %v8993_v54 = vpop.xlane.xlu1 %2031  ;;  %v8995_v25 = vpop.xlane.xlu2 %1962  ;;  %v2105_v47 = vsel %vm431_vm0, %v9017_v5, -inf  ;;  %v2260_v5 = vsub.f32 %v8331_v23, %v8645_v42  ;;  %v406_v23 = vmul.f32 0.125, %v8487_v21 }
 0x1ba   : > { %v8998_v12 = vpop.xlane.xlu0 %2010  ;;  %5220 = vmatpush.msra.mxu2 %v7378_v43  ;;  %5287 = vmatpush.msra.mxu3 %v7379_v18  ;;  %v7381_v43 = vld [vmem:[%s7710_s28 + $0xd0] sm:$0xff]  ;;  %v9026_v30 = vpop.eup %6854  ;;  %6858 = vpow2.f32 %v2406_v4 }
 0x1bb   : > { %6600 = vmatmul.msk.f32.gmra.mxu1 %vm431_vm0, %v413_v49  ;;  %v7383_v49 = vld [vmem:[%s7710_s28 + $0xc8] sm:$0xff]  ;;  %6860 = vpow2.f32 %v2392_v39  ;;  %v9045_v4 = vpop.f32.mrf.mxu3  ;;  %6585 = vmatmul.msk.f32.gmra.mxu0 %vm431_vm0, %v406_v23  ;;  %v2253_v23 = vsub.f32 %v8356_v50, %v8705_v6 }
 0x1bc   : > { %5221 = vmatpush.msra.mxu2 %v7380_v1  ;;  %5288 = vmatpush.msra.mxu3 %v7381_v43  ;;  %v7387_v43 = vld [vmem:[%s7710_s28 + $0x1f8] sm:$0xff]  ;;  %14479 = vst [vmem:[#allocation83_spill] sm:$0xff] %v9045_v4  ;;  %v7401_v50 = vld [vmem:[%s7710_s28 + $0x188] sm:$0xff] }
 0x1bd   : > { %6611 = vmatmul.msk.f32.gmra.mxu2 %vm431_vm0, %v416_v51  ;;  %v7384_v51 = vld [vmem:[%s7710_s28 + $0x90] sm:$0xff] }
 0x1be   : > { %2658 = vadd.xlane.f32.xlu2 %v2657_v14  ;;  %2058 = vmax.xlane.f32.xlu1 %v2057_v62  ;;  %v9031_v18 = vpop.eup %6856  ;;  %v7386_v14 = vld [vmem:[%s7710_s28 + $0x88] sm:$0xff] }
 0x1bf   : > { %2082 = vmax.xlane.f32.xlu0 %v2081_v37  ;;  %6628 = vmatmul.msk.f32.gmra.mxu3 %vm431_vm0, %v425_v8  ;;  %v417_v37 = vmul.f32 0.125, %v8926_v63  ;;  %v7385_v8 = vld [vmem:[%s7710_s28 + $0xc0] sm:$0xff]  ;;  %v2705_v63 = vsel %vm431_vm0, %v9031_v18, 0.0 }
 0x1c0   : > { %5222 = vmatpush.msra.mxu2 %v7382_v27  ;;  %5289 = vmatpush.msra.mxu3 %v7383_v49  ;;  %v2633_v27 = vsel %vm431_vm0, %v9026_v30, 0.0 }
 0x1c1   : > { %v9021_v45 = vpop.xlane.xlu1 %1986  ;;  %v9023_v1 = vpop.xlane.xlu2 %2034 }
 0x1c2   : > { %v9028_v62 = vpop.xlane.xlu0 %1965  ;;  %5223 = vmatpush.msra.mxu2 %v7384_v51  ;;  %5290 = vmatpush.msra.mxu3 %v7385_v8  ;;  %v7389_v51 = vld [vmem:[%s7710_s28 + $0x1b8] sm:$0xff]  ;;  %v9055_v8 = vpop.eup %6858 }
 0x1c4   : > { %5224 = vmatpush.msra.mxu2 %v7386_v14  ;;  %5543 = vmatpush.msrb.mxu3 %v7387_v43  ;;  %v9059_v14 = vpop.eup %6860  ;;  %v418_v43 = vmul.f32 0.125, %v8905_v36  ;;  %v7394_v36 = vld [vmem:[%s7710_s28 + $0x1e0] sm:$0xff] }
 0x1c5   : > { %6612 = vmatmul.msk.f32.gmra.mxu2 %vm431_vm0, %v417_v37 }
 0x1c6   : > { %2106 = vmax.xlane.f32.xlu2 %v2105_v47  ;;  %2634 = vadd.xlane.f32.xlu1 %v2633_v27  ;;  %v7390_v47 = vld [vmem:[%s7710_s28 + $0x1f0] sm:$0xff]  ;;  %v2129_v27 = vsel %vm431_vm0, %v9045_v4, -inf }
 0x1c7   : > { %2706 = vadd.xlane.f32.xlu0 %v2705_v63  ;;  %6629 = vmatmul.msk.f32.gmra.mxu3 %vm431_vm0, %v426_v2  ;;  %v2244_v2 = vsub.f32 %v8317_v38, %v8614_v61  ;;  %v7391_v63 = vld [vmem:[%s7710_s28 + $0x1b0] sm:$0xff]  ;;  %v2681_v38 = vsel %vm431_vm0, %v9055_v8, 0.0  ;;  %v7393_v61 = vld [vmem:[%s7710_s28 + $0x1a8] sm:$0xff] }
 0x1c8   : > { %5225 = vmatpush.msra.mxu2 %v7388_v28  ;;  %5544 = vmatpush.msrb.mxu3 %v7390_v47  ;;  %v7392_v28 = vld [vmem:[%s7710_s28 + $0x1e8] sm:$0xff]  ;;  %v427_v47 = vmul.f32 0.125, %v8838_v9  ;;  %v9083_v9 = vpop.f32.mrf.mxu1 }
 0x1c9   : > { %v9049_v39 = vpop.xlane.xlu1 %2013  ;;  %v9051_v49 = vpop.xlane.xlu2 %1989  ;;  %14481 = vst [vmem:[#allocation85_spill] sm:$0xff] %v9083_v9 }
 0x1ca   : > { %5478 = vmatpush.msrb.mxu2 %v7389_v51  ;;  %v9057_v37 = vpop.xlane.xlu0 %2037  ;;  %5545 = vmatpush.msrb.mxu3 %v7392_v28  ;;  %v2268_v51 = vsub.f32 %v8342_v7, %v8676_v17  ;;  %v2376_v7 = vmul.f32 1.442695, %v2244_v2  ;;  %v9079_v17 = vpop.f32.mrf.mxu0 }
 0x1cb   : > { %14480 = vst [vmem:[#allocation84_spill] sm:$0xff] %v9079_v17  ;;  %v9085_v28 = vpop.f32.mrf.mxu2 }
 0x1cc   : > { %5479 = vmatpush.msrb.mxu2 %v7391_v63  ;;  %5546 = vmatpush.msrb.mxu3 %v7394_v36  ;;  %v2660_v63 = vsel %vm431_vm0, %v9059_v14, 0.0  ;;  %v2424_v42 = vmul.f32 1.442695, %v2268_v51  ;;  %14482 = vst [vmem:[#allocation86_spill] sm:$0xff] %v9085_v28  ;;  %v7397_v51 = vld [vmem:[%s7710_s28 + $0x198] sm:$0xff]  ;;  %6862 = vpow2.f32 %v2376_v7  ;;  %v2060_v36 = vsel %vm431_vm0, %v9079_v17, -inf }
 0x1cd   : > { %6613 = vmatmul.msk.f32.gmra.mxu2 %vm431_vm0, %v418_v43  ;;  %v7396_v43 = vld [vmem:[%s7710_s28 + $0x1d8] sm:$0xff]  ;;  %v2108_v7 = vsel %vm431_vm0, %v9085_v28, -inf  ;;  %v14492_v28 = vld [vmem:[#allocation12_spill] sm:$0xff] }
 0x1ce   : > { %5480 = vmatpush.msrb.mxu2 %v7393_v61  ;;  %2682 = vadd.xlane.f32.xlu2 %v2681_v38  ;;  %v2408_v38 = vmul.f32 1.442695, %v2260_v5  ;;  %v2084_v5 = vsel %vm431_vm0, %v9083_v9, -inf  ;;  %6864 = vpow2.f32 %v2424_v42  ;;  %v2394_v42 = vmul.f32 1.442695, %v2253_v23 }
 0x1cf   : > { %2130 = vmax.xlane.f32.xlu1 %v2129_v27  ;;  %2661 = vadd.xlane.f32.xlu0 %v2660_v63  ;;  %v7395_v27 = vld [vmem:[%s7710_s28 + $0x1a0] sm:$0xff]  ;;  %v7398_v63 = vld [vmem:[%s7710_s28 + $0x1d0] sm:$0xff]  ;;  %v429_v23 = vmul.f32 0.125, %v8796_v59  ;;  %v9140_v59 = vpop.f32.mrf.mxu3 }
 0x1d0   : > { %6630 = vmatmul.msk.f32.gmra.mxu3 %vm431_vm0, %v427_v47  ;;  %5481 = vmatpush.msrb.mxu2 %v7395_v27  ;;  %v419_v47 = vmul.f32 0.125, %v8880_v52  ;;  %v428_v27 = vmul.f32 0.125, %v8811_v26  ;;  %6866 = vpow2.f32 %v2408_v38  ;;  %v7400_v52 = vld [vmem:[%s7710_s28 + $0x1c8] sm:$0xff]  ;;  %v7402_v38 = vld [vmem:[%s7710_s28 + $0x1c0] sm:$0xff] }
 0x1d1   : > { %v9089_v2 = vpop.xlane.xlu2 %2016  ;;  %v9091_v61 = vpop.xlane.xlu1 %1968  ;;  %5547 = vmatpush.msrb.mxu3 %v7396_v43  ;;  %v7399_v43 = vld [vmem:[%s7710_s28 + $0x190] sm:$0xff]  ;;  %6868 = vpow2.f32 %v2394_v42 }
 0x1d2   : > { %v9095_v21 = vpop.xlane.xlu0 %1992  ;;  %5482 = vmatpush.msrb.mxu2 %v7397_v51  ;;  %v9114_v6 = vpop.eup %6862 }
 0x1d3   : > { %5548 = vmatpush.msrb.mxu3 %v7398_v63  ;;  %14483 = vst [vmem:[#allocation87_spill] sm:$0xff] %v9114_v6  ;;  %v9168_v4 = vpop.f32.mrf.mxu2 }
 0x1d4   : > { %5483 = vmatpush.msrb.mxu2 %v7399_v43  ;;  %v9121_v63 = vpop.eup %6864  ;;  %14494 = vst [vmem:[#allocation12_spill] sm:$0xff] %v9168_v4 }
 0x1d5   : > { %5549 = vmatpush.msrb.mxu3 %v7400_v52  ;;  %6614 = vmatmul.msk.f32.gmra.mxu2 %vm431_vm0, %v419_v47  ;;  %14484 = vst [vmem:[#allocation88_spill] sm:$0xff] %v9121_v63  ;;  %v2708_v43 = vsel %vm431_vm0, %v9121_v63, 0.0  ;;  %v2636_v52 = vsel %vm431_vm0, %v9114_v6, 0.0 }
 0x1d6   : > { %2061 = vmax.xlane.f32.xlu2 %v2060_v36  ;;  %5484 = vmatpush.msrb.mxu2 %v7401_v50  ;;  %v7403_v36 = vld [vmem:[%s7710_s28 + $0x180] sm:$0xff]  ;;  %v9126_v47 = vpop.eup %6866  ;;  %v14486_v50 = vld [vmem:[#allocation41_spill] sm:$0xff] }
 0x1d7   : > { %2085 = vmax.xlane.f32.xlu1 %v2084_v5  ;;  %2109 = vmax.xlane.f32.xlu0 %v2108_v7  ;;  %14485 = vst [vmem:[#allocation89_spill] sm:$0xff] %v9126_v47  ;;  %v2245_v7 = vsub.f32 %v8345_v22, %v8678_v35  ;;  %v2684_v42 = vsel %vm431_vm0, %v9126_v47, 0.0  ;;  %v9195_v10 = vpop.f32.mrf.mxu3  ;;  %v14530_v47 = vld [vmem:[#allocation24_spill] sm:$0xff] }
 0x1d8   : > { %6631 = vmatmul.msk.f32.gmra.mxu3 %vm431_vm0, %v428_v27  ;;  %5485 = vmatpush.msrb.mxu2 %v7403_v36  ;;  %v420_v27 = vmul.f32 0.125, %v8854_v19  ;;  %14487 = vst [vmem:[#allocation41_spill] sm:$0xff] %v9140_v59  ;;  %v9142_v19 = vpop.f32.mrf.mxu0 }
 0x1d9   : > { %v9116_v26 = vpop.xlane.xlu1 %2040  ;;  %v9118_v51 = vpop.xlane.xlu2 %1971  ;;  %5550 = vmatpush.msrb.mxu3 %v7402_v38  ;;  %v414_v38 = vmul.f32 0.125, %v14486_v50  ;;  %14488 = vst [vmem:[#allocation90_spill] sm:$0xff] %v9142_v19  ;;  %v2378_v22 = vmul.f32 1.442695, %v2245_v7  ;;  %v14491_v50 = vld [vmem:[#allocation11_spill] sm:$0xff]  ;;  %v2063_v7 = vsel %vm431_vm0, %v9142_v19, -inf }
 0x1da   : > { %v9123_v5 = vpop.xlane.xlu0 %2019 }
 0x1db   : > { %6601 = vmatmul.msk.f32.gmra.mxu1 %vm431_vm0, %v414_v38  ;;  %v2261_v38 = vsub.f32 %v14491_v50, %v8684_v11  ;;  %6870 = vpow2.f32 %v2378_v22  ;;  %v430_v11 = vmul.f32 0.125, %v8772_v53  ;;  %v2111_v53 = vsel %vm431_vm0, %v9168_v4, -inf  ;;  %v14502_v4 = vld [vmem:[#allocation16_spill] sm:$0xff] }
 0x1dd   : > { %6615 = vmatmul.msk.f32.gmra.mxu2 %vm431_vm0, %v420_v27  ;;  %v2269_v27 = vsub.f32 %v14492_v28, %v8707_v57  ;;  %v2410_v9 = vmul.f32 1.442695, %v2261_v38  ;;  %v14499_v38 = vld [vmem:[#allocation15_spill] sm:$0xff] }
 0x1de   : > { %2637 = vadd.xlane.f32.xlu2 %v2636_v52  ;;  %14503 = vst [vmem:[#allocation15_spill] sm:$0xff] %v9195_v10 }
 0x1df   : > { %2709 = vadd.xlane.f32.xlu1 %v2708_v43  ;;  %2685 = vadd.xlane.f32.xlu0 %v2684_v42  ;;  %v9150_v43 = vpop.eup %6868  ;;  %v2132_v42 = vsel %vm431_vm0, %v9140_v59, -inf  ;;  %v2426_v50 = vmul.f32 1.442695, %v2269_v27  ;;  %v9166_v59 = vpop.f32.mrf.mxu1  ;;  %6872 = vpow2.f32 %v2410_v9  ;;  %v14500_v27 = vld [vmem:[#allocation13_spill] sm:$0xff] }
 0x1e0   : > { %6632 = vmatmul.msk.f32.gmra.mxu3 %vm431_vm0, %v429_v23  ;;  %14489 = vst [vmem:[#allocation91_spill] sm:$0xff] %v9150_v43  ;;  %v421_v23 = vmul.f32 0.125, %v8828_v60  ;;  %v2663_v17 = vsel %vm431_vm0, %v9150_v43, 0.0  ;;  %v2087_v22 = vsel %vm431_vm0, %v9166_v59, -inf }
 0x1e1   : > { %v9146_v35 = vpop.xlane.xlu1 %1995  ;;  %v9148_v36 = vpop.xlane.xlu2 %2043  ;;  %14493 = vst [vmem:[#allocation11_spill] sm:$0xff] %v9166_v59  ;;  %6874 = vpow2.f32 %v2426_v50  ;;  %v2270_v59 = vsub.f32 %v14502_v4, %v8740_v34  ;;  %v2135_v4 = vsel %vm431_vm0, %v9195_v10, -inf }
 0x1e2   : > { %v9152_v52 = vpop.xlane.xlu0 %1974 }
 0x1e3   : > { %14490 = vst [vmem:[#allocation92_spill] sm:$0xff] %v9152_v52  ;;  %v2428_v34 = vmul.f32 1.442695, %v2270_v59  ;;  %v14509_v59 = vld [vmem:[#allocation17_spill] sm:$0xff] }
 0x1e5   : > { %6616 = vmatmul.msk.f32.gmra.mxu2 %vm431_vm0, %v421_v23  ;;  %v2246_v23 = vsub.f32 %v14500_v27, %v8714_v3 }
 0x1e6   : > { %2133 = vmax.xlane.f32.xlu2 %v2132_v42  ;;  %v2254_v42 = vsub.f32 %v14499_v38, %v8734_v29 }
 0x1e7   : > { %2664 = vadd.xlane.f32.xlu1 %v2663_v17  ;;  %2064 = vmax.xlane.f32.xlu0 %v2063_v7  ;;  %v9178_v17 = vpop.eup %6870  ;;  %v422_v7 = vmul.f32 0.125, %v8804_v58  ;;  %v2380_v3 = vmul.f32 1.442695, %v2246_v23  ;;  %v14508_v23 = vld [vmem:[#allocation18_spill] sm:$0xff]  ;;  %v9223_v10 = vpop.f32.mrf.mxu1 }
 0x1e8   : > { %6633 = vmatmul.msk.f32.gmra.mxu3 %vm431_vm0, %v430_v11  ;;  %14498 = vst [vmem:[#allocation96_spill] sm:$0xff] %v9178_v17  ;;  %v14501_v11 = vld [vmem:[#allocation14_spill] sm:$0xff]  ;;  %v2639_v9 = vsel %vm431_vm0, %v9178_v17, 0.0  ;;  %v2396_v50 = vmul.f32 1.442695, %v2254_v42  ;;  %v9198_v29 = vpop.eup %6872 }
 0x1e9   : > { %v9171_v57 = vpop.xlane.xlu1 %2022  ;;  %v9173_v60 = vpop.xlane.xlu2 %1998  ;;  %v2262_v19 = vsub.f32 %v14501_v11, %v8732_v32  ;;  %14504 = vst [vmem:[#allocation13_spill] sm:$0xff] %v9198_v29  ;;  %v2687_v42 = vsel %vm431_vm0, %v9198_v29, 0.0 }
 0x1ea   : > { %14495 = vst [vmem:[#allocation93_spill] sm:$0xff] %v9171_v57  ;;  %v9176_v28 = vpop.xlane.xlu0 %2046 }
 0x1eb   : > { %14496 = vst [vmem:[#allocation94_spill] sm:$0xff] %v9173_v60 }
 0x1ec   : > { %14497 = vst [vmem:[#allocation95_spill] sm:$0xff] %v9176_v28 }
 0x1ed   : > { %6617 = vmatmul.msk.f32.gmra.mxu2 %vm431_vm0, %v422_v7  ;;  %v2247_v7 = vsub.f32 %v14509_v59, %v8777_v16  ;;  %14512 = vst [vmem:[#allocation17_spill] sm:$0xff] %v9223_v10 }
 0x1ee   : > { %2088 = vmax.xlane.f32.xlu2 %v2087_v22  ;;  %v2412_v22 = vmul.f32 1.442695, %v2262_v19  ;;  %v2263_v19 = vsub.f32 %v14508_v23, %v8775_v56 }
 0x1ef   : > { %2112 = vmax.xlane.f32.xlu1 %v2111_v53  ;;  %2640 = vadd.xlane.f32.xlu0 %v2639_v9  ;;  %v9204_v53 = vpop.eup %6874  ;;  %v14510_v9 = vld [vmem:[#allocation19_spill] sm:$0xff] }
 0x1f0   : > { %14506 = vst [vmem:[#allocation16_spill] sm:$0xff] %v9204_v53  ;;  %v2711_v27 = vsel %vm431_vm0, %v9204_v53, 0.0 }
 0x1f1   : > { %v9200_v58 = vpop.xlane.xlu2 %2649  ;;  %v9202_v32 = vpop.xlane.xlu1 %2049 }
 0x1f2   : > { %14505 = vst [vmem:[#allocation14_spill] sm:$0xff] %v9202_v32  ;;  %6876 = vrcp.f32 %v9200_v58  ;;  %v9207_v38 = vpop.xlane.xlu0 %2073  ;;  %v3131_v53 = vand.u32 2147483648, %v9200_v58  ;;  %vm3125_vm2 = vweird.f32 %v9200_v58  ;;  %v14526_v32 = vld [vmem:[#allocation23_spill] sm:$0xff] }
 0x1f3   : > { %14507 = vst [vmem:[#allocation97_spill] sm:$0xff] %v9207_v38  ;;  %6878 = vpow2.f32 %v2396_v50  ;;  %v2255_v50 = vsub.f32 %v14510_v9, %v8782_v0  ;;  %v2382_v0 = vmul.f32 1.442695, %v2247_v7  ;;  %v3129_v7 = vand.u32 2147483647, %v9200_v58  ;;  %v14525_v38 = vld [vmem:[#allocation71_spill] sm:$0xff] }
 0x1f4   : > { %6880 = vpow2.f32 %v2380_v3  ;;  %v9221_v3 = vpop.f32.mrf.mxu0  ;;  %v3132_v43 = vor.u32 1.1754944e-38, %v3131_v53 }
 0x1f5   : > { %6882 = vpow2.f32 %v2412_v22  ;;  %14511 = vst [vmem:[#allocation18_spill] sm:$0xff] %v9221_v3  ;;  %v2066_v23 = vsel %vm431_vm0, %v9221_v3, -inf  ;;  %v2398_v9 = vmul.f32 1.442695, %v2255_v50  ;;  %v14518_v3 = vld [vmem:[#allocation20_spill] sm:$0xff]  ;;  %vm3130_vm4 = vcmp.eq.f32.partialorder %v3129_v7, 8.507059e+37 }
 0x1f6   : > { %2712 = vadd.xlane.f32.xlu2 %v2711_v27  ;;  %6884 = vpow2.f32 %v2428_v34  ;;  %v2414_v34 = vmul.f32 1.442695, %v2263_v19  ;;  %v2090_v19 = vsel %vm431_vm0, %v9223_v10, -inf }
 0x1f7   : > { %2688 = vadd.xlane.f32.xlu1 %v2687_v42  ;;  %2136 = vmax.xlane.f32.xlu0 %v2135_v4 }
 0x1f8   : > { %v6877_v11 = vpop.eup %6876 }
 0x1f9   : > { %v3121_v22 = vmul.f32 %v6877_v11, %v9200_v58  ;;  %v9226_v48 = vpop.xlane.xlu2 %2097  ;;  %v9228_v56 = vpop.xlane.xlu1 %2625  ;;  %vm3126_vm1 = vweird.f32 %v6877_v11 }
 0x1fa   : > { %14513 = vst [vmem:[#allocation19_spill] sm:$0xff] %v9226_v48  ;;  %v9230_v42 = vpop.eup %6878  ;;  %6886 = vrcp.f32 %v9228_v56  ;;  %v9233_v16 = vpop.xlane.xlu0 %2697  ;;  %v2271_v48 = vsub.f32 %v14518_v3, %v8817_v15  ;;  %vm3127_vm3 = vmor %vm3125_vm2, %vm3126_vm1  ;;  %v14520_v15 = vld [vmem:[#allocation21_spill] sm:$0xff]  ;;  %vm3013_vm7 = vweird.f32 %v9228_v56 }
 0x1fb   : > { %14514 = vst [vmem:[#allocation98_spill] sm:$0xff] %v9230_v42  ;;  %v9235_v4 = vpop.eup %6880  ;;  %v3122_v27 = vsub.f32 1.0, %v3121_v22  ;;  %6888 = vrcp.f32 %v9233_v16  ;;  %v2666_v22 = vsel %vm431_vm0, %v9230_v42, 0.0  ;;  %v9257_v42 = vpop.f32.mrf.mxu2  ;;  %vm3349_vm9 = vweird.f32 %v9233_v16 }
 0x1fc   : > { %14515 = vst [vmem:[#allocation99_spill] sm:$0xff] %v9235_v4  ;;  %v9240_v59 = vpop.eup %6882  ;;  %6890 = vpow2.f32 %v2414_v34  ;;  %v2642_v50 = vsel %vm431_vm0, %v9235_v4, 0.0  ;;  %v2114_v4 = vsel %vm431_vm0, %v9257_v42, -inf }
 0x1fd   : > { %14516 = vst [vmem:[#allocation100_spill] sm:$0xff] %v9240_v59  ;;  %v9245_v29 = vpop.eup %6884  ;;  %v3123_v17 = vmul.f32 %v6877_v11, %v3122_v27  ;;  %6892 = vpow2.f32 %v2382_v0  ;;  %v9263_v0 = vsel %vm431_vm0, %v9240_v59, 0.0 }
 0x1fe   : > { %14517 = vst [vmem:[#allocation101_spill] sm:$0xff] %v9245_v29  ;;  %2667 = vadd.xlane.f32.xlu2 %v2666_v22  ;;  %6894 = vpow2.f32 %v2398_v9  ;;  %v2714_v34 = vsel %vm431_vm0, %v9245_v29, 0.0 }
 0x1ff   : > { %2067 = vmax.xlane.f32.xlu1 %v2066_v23  ;;  %v3124_v10 = vadd.f32 %v6877_v11, %v3123_v17  ;;  %2091 = vmax.xlane.f32.xlu0 %v2090_v19  ;;  %14519 = vst [vmem:[#allocation20_spill] sm:$0xff] %v9257_v42  ;;  %v2272_v17 = vsub.f32 %v14520_v15, %v8819_v24  ;;  %v14522_v19 = vld [vmem:[#allocation22_spill] sm:$0xff]  ;;  %v14529_v42 = vld [vmem:[#allocation72_spill] sm:$0xff] }
 0x200   : > { %v9255_v27 = vpop.eup %6886  ;;  %v2288_v22 = vsub.f32 %v14522_v19, %v8825_v55  ;;  %v2280_v55 = vsub.f32 %v14526_v32, %v14525_v38  ;;  %v3355_v32 = vand.u32 2147483648, %v9233_v16  ;;  %v2296_v28 = vsub.f32 %v14530_v47, %v14529_v42 }
 0x201   : > { %v9265_v23 = vpop.eup %6888  ;;  %v3128_v58 = vsel %vm3127_vm3, %v6877_v11, %v3124_v10  ;;  %v3009_v3 = vmul.f32 %v9255_v27, %v9228_v56  ;;  %v9271_v53 = vpop.xlane.xlu2 %2673  ;;  %v2430_v10 = vmul.f32 1.442695, %v2271_v48  ;;  %v14523_v11 = vld [vmem:[#allocation56_spill] sm:$0xff]  ;;  %vm3014_vm5 = vweird.f32 %v9255_v27 }
 0x202   : > { %v9273_v9 = vpop.xlane.xlu1 %2121  ;;  %v3133_v59 = vsel %vm3130_vm4, %v3132_v43, %v3128_v58  ;;  %v3345_v29 = vmul.f32 %v9265_v23, %v9233_v16  ;;  %6896 = vrcp.f32 %v9271_v53  ;;  %v9280_v24 = vpop.xlane.xlu0 %2652  ;;  %v3019_v43 = vand.u32 2147483648, %v9228_v56  ;;  %vm3015_vm8 = vmor %vm3013_vm7, %vm3014_vm5 }
 0x203   : > { %14521 = vst [vmem:[#allocation21_spill] sm:$0xff] %v9273_v9  ;;  %v4808_v7 = vmul.f32 %v14523_v11, %v3133_v59  ;;  %v3010_v15 = vsub.f32 1.0, %v3009_v3  ;;  %v9285_v9 = vpop.eup %6890  ;;  %6898 = vrcp.f32 %v9280_v24  ;;  %v3017_v59 = vand.u32 2147483647, %v9228_v56 }
 0x204   : > { %14524 = vst [vmem:[#allocation22_spill] sm:$0xff] %v9285_v9  ;;  %v3346_v58 = vsub.f32 1.0, %v3345_v29  ;;  %v9291_v19 = vpop.eup %6892  ;;  %v2432_v38 = vmul.f32 1.442695, %v2272_v17  ;;  %vm3350_vm6 = vweird.f32 %v9265_v23  ;;  %v3353_v11 = vand.u32 2147483647, %v9233_v16 }
 0x205   : > { %14527 = vst [vmem:[#allocation56_spill] sm:$0xff] %v9291_v19  ;;  %v3011_v48 = vmul.f32 %v9255_v27, %v3010_v15  ;;  %6642 = vmatmul.msk.f32.vlgmr.msra.gmra.mxu1 %vm431_vm0, %v4808_v7  ;;  %v9303_v29 = vpop.eup %6894  ;;  %v2464_v15 = vmul.f32 1.442695, %v2288_v22  ;;  %v7404_v17 = vld [vmem:[%s7710_s28 + $0x278] sm:$0xff]  ;;  %v2448_v57 = vmul.f32 1.442695, %v2280_v55  ;;  %vm3351_vm11 = vmor %vm3349_vm9, %vm3350_vm6  ;;  %6900 = vpow2.f32 %v2430_v10 }
 0x206   : > { %4936 = vst.msk [vmem:[%s9294_s20 + $0x40] sm:$0xff] %vm431_vm0, %v4808_v7  ;;  %v3347_v3 = vmul.f32 %v9265_v23, %v3346_v58  ;;  %2115 = vmax.xlane.f32.xlu2 %v2114_v4  ;;  %v9312_v7 = vpop.f32.mrf.mxu3  ;;  %5673 = vmatpush.msra.mxu1 %v7404_v17  ;;  %v3020_v4 = vor.u32 1.1754944e-38, %v3019_v43  ;;  %vm3018_vm10 = vcmp.eq.f32.partialorder %v3017_v59, 8.507059e+37  ;;  %v3356_v56 = vor.u32 1.1754944e-38, %v3355_v32  ;;  %v7405_v55 = vld [vmem:[%s7710_s28 + $0x270] sm:$0xff]  ;;  %v14535_v59 = vld [vmem:[#allocation58_spill] sm:$0xff] }
 0x207   : > { %14528 = vst [vmem:[#allocation71_spill] sm:$0xff] %v9303_v29  ;;  %2643 = vadd.xlane.f32.xlu1 %v2642_v50  ;;  %v3012_v60 = vadd.f32 %v9255_v27, %v3011_v48  ;;  %2715 = vadd.xlane.f32.xlu0 %v2714_v34  ;;  %vm3354_vm12 = vcmp.eq.f32.partialorder %v3353_v11, 8.507059e+37  ;;  %v2138_v48 = vsel %vm431_vm0, %v9312_v7, -inf  ;;  %v3241_v11 = vand.u32 2147483647, %v9271_v53 }
 0x208   : > { %14531 = vst [vmem:[#allocation23_spill] sm:$0xff] %v9312_v7  ;;  %v9315_v58 = vpop.eup %6896  ;;  %v3348_v50 = vadd.f32 %v9265_v23, %v3347_v3  ;;  %5674 = vmatpush.msra.mxu1 %v7405_v55  ;;  %6902 = vpow2.f32 %v2432_v38  ;;  %v9351_v10 = vmul.f32 1.442695, %v2296_v28  ;;  %v2669_v38 = vsel %vm431_vm0, %v9303_v29, 0.0 }
 0x209   : > { %v3016_v47 = vsel %vm3015_vm8, %v9255_v27, %v3012_v60  ;;  %v3233_v42 = vmul.f32 %v9315_v58, %v9271_v53  ;;  %v9328_v22 = vpop.xlane.xlu2 %2052  ;;  %v9331_v43 = vpop.eup %6898  ;;  %vm3238_vm13 = vweird.f32 %v9315_v58  ;;  %6904 = vpow2.f32 %v2464_v15 }
 0x20a   : > { %v9326_v34 = vpop.xlane.xlu1 %2076  ;;  %14533 = vst [vmem:[#allocation24_spill] sm:$0xff] %v9328_v22  ;;  %v3021_v16 = vsel %vm3018_vm10, %v3020_v4, %v3016_v47  ;;  %v3352_v60 = vsel %vm3351_vm11, %v9265_v23, %v3348_v50  ;;  %v9334_v27 = vpop.xlane.xlu0 %2100  ;;  %v3135_v55 = vmul.f32 %v9331_v43, %v9280_v24  ;;  %v7406_v22 = vld [vmem:[%s7710_s28 + $0x268] sm:$0xff]  ;;  %v14536_v4 = vld [vmem:[#allocation59_spill] sm:$0xff]  ;;  %v3243_v50 = vand.u32 2147483648, %v9271_v53 }
 0x20b   : > { %14532 = vst [vmem:[#allocation72_spill] sm:$0xff] %v9326_v34  ;;  %v4800_v32 = vmul.f32 %v14535_v59, %v3021_v16  ;;  %v3357_v3 = vsel %vm3354_vm12, %v3356_v56, %v3352_v60  ;;  %v3234_v17 = vsub.f32 1.0, %v3233_v42  ;;  %5675 = vmatpush.msra.mxu1 %v7406_v22  ;;  %v7407_v42 = vld [vmem:[%s7710_s28 + $0x260] sm:$0xff]  ;;  %v14537_v22 = vld [vmem:[#allocation74_spill] sm:$0xff]  ;;  %v14538_v16 = vld [vmem:[#allocation25_spill] sm:$0xff]  ;;  %6906 = vpow2.f32 %v2448_v57  ;;  %v9364_v15 = vpop.f32.mrf.mxu1 }
 0x20c   : > { %14534 = vst [vmem:[#allocation102_spill] sm:$0xff] %v9334_v27  ;;  %v4824_v23 = vmul.f32 %v14536_v4, %v3357_v3  ;;  %v3136_v56 = vsub.f32 1.0, %v3135_v55  ;;  %v2273_v60 = vsub.f32 %v14538_v16, %v14537_v22  ;;  %vm3237_vm14 = vweird.f32 %v9271_v53  ;;  %v9381_v55 = vpop.f32.mrf.mxu2  ;;  %v7408_v4 = vld [vmem:[%s7710_s28 + $0x238] sm:$0xff]  ;;  %v9396_v22 = vpop.eup %6900  ;;  %v14548_v16 = vld [vmem:[#allocation27_spill] sm:$0xff] }
 0x20d   : > { %4928 = vst.msk [vmem:[%s9294_s20] sm:$0xff] %vm431_vm0, %v4800_v32  ;;  %v3235_v47 = vmul.f32 %v9315_v58, %v3234_v17  ;;  %6634 = vmatmul.msk.f32.vlgmr.msra.gmra.mxu0 %vm431_vm0, %v4800_v32  ;;  %5676 = vmatpush.msra.mxu1 %v7407_v42  ;;  %vm9370_vm15 = vmor %vm3237_vm14, %vm3238_vm13  ;;  %vm9374_vm1 = vcmp.eq.f32.partialorder %v3241_v11, 8.507059e+37  ;;  %v3244_v53 = vor.u32 1.1754944e-38, %v3243_v50  ;;  %v3145_v3 = vand.u32 2147483648, %v9280_v24  ;;  %v9379_v17 = vpop.f32.mrf.mxu0  ;;  %v7410_v42 = vld [vmem:[%s7710_s28 + $0x258] sm:$0xff]  ;;  %v7412_v32 = vld [vmem:[%s7710_s28 + $0x2f0] sm:$0xff] }
 0x20e   : > { %4952 = vst.msk [vmem:[%s9294_s20 + $0xc0] sm:$0xff] %vm431_vm0, %v4824_v23  ;;  %2691 = vadd.xlane.f32.xlu2 %v9263_v0  ;;  %v3137_v28 = vmul.f32 %v9331_v43, %v3136_v56  ;;  %6658 = vmatmul.msk.f32.vlgmr.msra.gmra.mxu3 %vm431_vm0, %v4824_v23  ;;  %v14540_v0 = vld [vmem:[#allocation26_spill] sm:$0xff]  ;;  %vm3140_vm2 = vweird.f32 %v9331_v43  ;;  %v3143_v56 = vand.u32 2147483647, %v9280_v24  ;;  %vm3139_vm3 = vweird.f32 %v9280_v24 }
 0x20f   : > { %2139 = vmax.xlane.f32.xlu1 %v2138_v48  ;;  %v3236_v59 = vadd.f32 %v9315_v58, %v3235_v47  ;;  %2670 = vadd.xlane.f32.xlu0 %v2669_v38  ;;  %14539 = vst [vmem:[#allocation58_spill] sm:$0xff] %v9364_v15  ;;  %v2289_v48 = vsub.f32 %v14540_v0, %v8918_v41  ;;  %v7409_v41 = vld [vmem:[%s7710_s28 + $0x2f8] sm:$0xff]  ;;  %v7411_v0 = vld [vmem:[%s7710_s28 + $0x230] sm:$0xff]  ;;  %v2069_v57 = vsel %vm431_vm0, %v9379_v17, -inf  ;;  %vm9421_vm4 = vmor %vm3139_vm3, %vm3140_vm2  ;;  %v2117_v24 = vsel %vm431_vm0, %v9381_v55, -inf }
 0x210   : > { %14545 = vst [vmem:[#allocation59_spill] sm:$0xff] %v9379_v17  ;;  %5608 = vmatpush.msra.mxu0 %v7408_v4  ;;  %5803 = vmatpush.msra.mxu3 %v7409_v41  ;;  %v3138_v47 = vadd.f32 %v9331_v43, %v3137_v28  ;;  %v2281_v38 = vsub.f32 %v14548_v16, %v8920_v33  ;;  %v2093_v28 = vsel %vm431_vm0, %v9364_v15, -inf  ;;  %v9409_v4 = vpop.eup %6902  ;;  %v14550_v41 = vld [vmem:[#allocation61_spill] sm:$0xff]  ;;  %vm3144_vm5 = vcmp.eq.f32.partialorder %v3143_v56, 8.507059e+37  ;;  %v14556_v17 = vld [vmem:[#allocation62_spill] sm:$0xff]  ;;  %v7424_v15 = vld [vmem:[%s7710_s28 + $0x240] sm:$0xff] }
 0x211   : > { %14546 = vst [vmem:[#allocation74_spill] sm:$0xff] %v9381_v55  ;;  %v3240_v23 = vsel %vm9370_vm15, %v9315_v58, %v3236_v59  ;;  %v9391_v50 = vpop.xlane.xlu2 %2628  ;;  %5677 = vmatpush.msra.mxu1 %v7410_v42  ;;  %v2434_v42 = vmul.f32 1.442695, %v2273_v60  ;;  %v2466_v60 = vmul.f32 1.442695, %v2289_v48  ;;  %v14555_v55 = vld [vmem:[#allocation28_spill] sm:$0xff] }
 0x212   : > { %v9389_v11 = vpop.xlane.xlu1 %2700  ;;  %14547 = vst [vmem:[#allocation25_spill] sm:$0xff] %v9396_v22  ;;  %v3245_v58 = vsel %vm9374_vm1, %v3244_v53, %v3240_v23  ;;  %v9403_v59 = vpop.xlane.xlu0 %2676  ;;  %5609 = vmatpush.msra.mxu0 %v7411_v0  ;;  %5804 = vmatpush.msra.mxu3 %v7412_v32  ;;  %v7413_v53 = vld [vmem:[%s7710_s28 + $0x250] sm:$0xff]  ;;  %v7414_v0 = vld [vmem:[%s7710_s28 + $0x228] sm:$0xff]  ;;  %v2450_v48 = vmul.f32 1.442695, %v2281_v38  ;;  %v7417_v16 = vld [vmem:[%s7710_s28 + $0x2b8] sm:$0xff]  ;;  %vm3027_vm10 = vweird.f32 %v9391_v50 }
 0x213   : > { %6908 = vrcp.f32 %v9389_v11  ;;  %14549 = vst [vmem:[#allocation26_spill] sm:$0xff] %v9409_v4  ;;  %v4816_v33 = vmul.f32 %v14550_v41, %v3245_v58  ;;  %5678 = vmatpush.msra.mxu1 %v7413_v53  ;;  %v9417_v23 = vpop.eup %6904  ;;  %v3146_v58 = vor.u32 1.1754944e-38, %v3145_v3  ;;  %v7415_v32 = vld [vmem:[%s7710_s28 + $0x2e8] sm:$0xff]  ;;  %v3142_v3 = vsel %vm9421_vm4, %v9331_v43, %v3138_v47 }
 0x214   : > { %6910 = vrcp.f32 %v9391_v50  ;;  %14551 = vst [vmem:[#allocation27_spill] sm:$0xff] %v9417_v23  ;;  %5610 = vmatpush.msra.mxu0 %v7414_v0  ;;  %5805 = vmatpush.msra.mxu3 %v7415_v32  ;;  %v9430_v41 = vpop.eup %6906  ;;  %v7416_v53 = vld [vmem:[%s7710_s28 + $0x248] sm:$0xff]  ;;  %v2297_v0 = vsub.f32 %v14555_v55, %v8923_v46  ;;  %v2717_v47 = vsel %vm431_vm0, %v9396_v22, 0.0  ;;  %v2645_v46 = vsel %vm431_vm0, %v9291_v19, 0.0  ;;  %v7418_v55 = vld [vmem:[%s7710_s28 + $0x220] sm:$0xff]  ;;  %v7425_v22 = vld [vmem:[%s7710_s28 + $0x210] sm:$0xff] }
 0x215   : > { %6912 = vrcp.f32 %v9403_v59  ;;  %14554 = vst [vmem:[#allocation61_spill] sm:$0xff] %v9430_v41  ;;  %6650 = vmatmul.msk.f32.vlgmr.msra.gmra.mxu2 %vm431_vm0, %v4816_v33  ;;  %5679 = vmatpush.msra.mxu1 %v7416_v53  ;;  %v3147_v32 = vsel %vm3144_vm5, %v3146_v58, %v3142_v3  ;;  %v9471_v58 = vsel %vm431_vm0, %v9409_v4, 0.0  ;;  %v14558_v53 = vld [vmem:[#allocation30_spill] sm:$0xff]  ;;  %v14561_v4 = vld [vmem:[#allocation79_spill] sm:$0xff]  ;;  %v3367_v7 = vand.u32 2147483647, %v9389_v11 }
 0x216   : > { %4944 = vst.msk [vmem:[%s9294_s20 + $0x80] sm:$0xff] %vm431_vm0, %v4816_v33  ;;  %2070 = vmax.xlane.f32.xlu2 %v2069_v57  ;;  %6914 = vpow2.f32 %v9351_v10  ;;  %v4809_v33 = vmul.f32 %v14556_v17, %v3147_v32  ;;  %5738 = vmatpush.msra.mxu2 %v7417_v16  ;;  %v2693_v10 = vsel %vm431_vm0, %v9285_v9, 0.0  ;;  %v7419_v17 = vld [vmem:[%s7710_s28 + $0x2e0] sm:$0xff]  ;;  %v9476_v3 = vmul.f32 1.442695, %v2297_v0  ;;  %v9500_v9 = vpop.f32.mrf.mxu3 }
 0x217   : > { %2094 = vmax.xlane.f32.xlu1 %v2093_v28  ;;  %2118 = vmax.xlane.f32.xlu0 %v2117_v24  ;;  %6916 = vpow2.f32 %v2434_v42  ;;  %v9467_v42 = vsel %vm431_vm0, %v9417_v23, 0.0  ;;  %v7420_v24 = vld [vmem:[%s7710_s28 + $0x2b0] sm:$0xff]  ;;  %v2290_v32 = vsub.f32 %v14558_v53, %v8957_v20  ;;  %v9491_v20 = vsel %vm431_vm0, %v9430_v41, 0.0  ;;  %v7423_v53 = vld [vmem:[%s7710_s28 + $0x2a8] sm:$0xff]  ;;  %14563 = vst [vmem:[#allocation30_spill] sm:$0xff] %v9500_v9  ;;  %v7427_v23 = vld [vmem:[%s7710_s28 + $0x2a0] sm:$0xff] }
 0x218   : > { %5611 = vmatpush.msra.mxu0 %v7418_v55  ;;  %5806 = vmatpush.msra.mxu3 %v7419_v17  ;;  %6918 = vpow2.f32 %v2466_v60  ;;  %4937 = vst.msk [vmem:[%s9294_s20 + $0x48] sm:$0xff] %vm431_vm0, %v4809_v33  ;;  %v7421_v55 = vld [vmem:[%s7710_s28 + $0x218] sm:$0xff]  ;;  %v7426_v41 = vld [vmem:[%s7710_s28 + $0x2d0] sm:$0xff]  ;;  %vm3363_vm8 = vweird.f32 %v9389_v11  ;;  %vm3368_vm12 = vcmp.eq.f32.partialorder %v3367_v7, 8.507059e+37  ;;  %v7433_v7 = vld [vmem:[%s7710_s28 + $0x288] sm:$0xff]  ;;  %vm3251_vm15 = vweird.f32 %v9403_v59 }
 0x219   : > { %v9444_v43 = vpop.eup %6908  ;;  %6643 = vmatmul.msk.f32.gmra.mxu1 %vm431_vm0, %v4809_v33  ;;  %v9463_v57 = vpop.xlane.xlu2 %2124  ;;  %5739 = vmatpush.msra.mxu2 %v7420_v24  ;;  %v7422_v17 = vld [vmem:[%s7710_s28 + $0x2d8] sm:$0xff] }
 0x21a   : > { %v9454_v56 = vpop.eup %6910  ;;  %v3359_v38 = vmul.f32 %v9444_v43, %v9389_v11  ;;  %v9461_v28 = vpop.xlane.xlu1 %2655  ;;  %14557 = vst [vmem:[#allocation28_spill] sm:$0xff] %v9463_v57  ;;  %5612 = vmatpush.msra.mxu0 %v7421_v55  ;;  %5807 = vmatpush.msra.mxu3 %v7422_v17  ;;  %v14560_v55 = vld [vmem:[#allocation29_spill] sm:$0xff]  ;;  %v14562_v17 = vld [vmem:[#allocation31_spill] sm:$0xff]  ;;  %vm3364_vm6 = vweird.f32 %v9444_v43 }
 0x21b   : > { %v9474_v60 = vpop.eup %6912  ;;  %v3023_v33 = vmul.f32 %v9454_v56, %v9391_v50  ;;  %6920 = vrcp.f32 %v9461_v28  ;;  %v9483_v16 = vpop.xlane.xlu0 %2055  ;;  %5740 = vmatpush.msra.mxu2 %v7423_v53  ;;  %5680 = vmatpush.msra.mxu1 %v7424_v15  ;;  %vm3028_vm7 = vweird.f32 %v9454_v56  ;;  %vm9529_vm9 = vmor %vm3363_vm8, %vm3364_vm6  ;;  %vm3153_vm4 = vweird.f32 %v9461_v28 }
 0x21c   : > { %14559 = vst [vmem:[#allocation62_spill] sm:$0xff] %v9483_v16  ;;  %6922 = vpow2.f32 %v2450_v48  ;;  %v3360_v24 = vsub.f32 1.0, %v3359_v38  ;;  %v3247_v0 = vmul.f32 %v9474_v60, %v9403_v59  ;;  %v3369_v48 = vand.u32 2147483648, %v9389_v11  ;;  %5613 = vmatpush.msra.mxu0 %v7425_v22  ;;  %5808 = vmatpush.msra.mxu3 %v7426_v41  ;;  %v9504_v19 = vpop.eup %6914  ;;  %vm9544_vm11 = vmor %vm3027_vm10, %vm3028_vm7 }
 0x21d   : > { %v3024_v38 = vsub.f32 1.0, %v3023_v33  ;;  %5741 = vmatpush.msra.mxu2 %v7427_v23  ;;  %v9510_v29 = vpop.eup %6916  ;;  %v9512_v33 = vmul.f32 1.442695, %v2290_v32  ;;  %v3033_v41 = vand.u32 2147483648, %v9391_v50  ;;  %v3031_v23 = vand.u32 2147483647, %v9391_v50 }
 0x21e   : > { %v3361_v53 = vmul.f32 %v9444_v43, %v3360_v24  ;;  %v3248_v15 = vsub.f32 1.0, %v3247_v0  ;;  %14564 = vst [vmem:[#allocation29_spill] sm:$0xff] %v9510_v29  ;;  %2646 = vadd.xlane.f32.xlu2 %v2645_v46  ;;  %v9517_v24 = vpop.eup %6918  ;;  %v2141_v0 = vsel %vm431_vm0, %v9500_v9, -inf  ;;  %v3370_v11 = vor.u32 1.1754944e-38, %v3369_v48  ;;  %v7429_v9 = vld [vmem:[%s7710_s28 + $0x208] sm:$0xff] }
 0x21f   : > { %v3025_v22 = vmul.f32 %v9454_v56, %v3024_v38  ;;  %2718 = vadd.xlane.f32.xlu1 %v2717_v47  ;;  %14565 = vst [vmem:[#allocation79_spill] sm:$0xff] %v9517_v24  ;;  %2694 = vadd.xlane.f32.xlu0 %v2693_v10  ;;  %v7428_v38 = vld [vmem:[%s7710_s28 + $0x298] sm:$0xff]  ;;  %v3257_v46 = vand.u32 2147483648, %v9403_v59  ;;  %v3034_v6 = vor.u32 1.1754944e-38, %v3033_v41  ;;  %vm3252_vm13 = vweird.f32 %v9474_v60 }
 0x220   : > { %v3362_v32 = vadd.f32 %v9444_v43, %v3361_v53  ;;  %5742 = vmatpush.msra.mxu2 %v7428_v38  ;;  %v9536_v53 = vpop.f32.mrf.mxu0  ;;  %5614 = vmatpush.msra.mxu0 %v7429_v9  ;;  %v7430_v38 = vld [vmem:[%s7710_s28 + $0x2c8] sm:$0xff]  ;;  %v3249_v50 = vmul.f32 %v9474_v60, %v3248_v15  ;;  %vm3032_vm14 = vcmp.eq.f32.partialorder %v3031_v23, 8.507059e+37  ;;  %v14574_v41 = vld [vmem:[#allocation66_spill] sm:$0xff]  ;;  %v14576_v23 = vld [vmem:[#allocation67_spill] sm:$0xff] }
 0x221   : > { %v9525_v16 = vpop.eup %6920  ;;  %v3026_v10 = vadd.f32 %v9454_v56, %v3025_v22  ;;  %14568 = vst [vmem:[#allocation31_spill] sm:$0xff] %v9536_v53  ;;  %5809 = vmatpush.msra.mxu3 %v7430_v38  ;;  %v9553_v34 = vpop.xlane.xlu2 %2079  ;;  %v7431_v38 = vld [vmem:[%s7710_s28 + $0x290] sm:$0xff]  ;;  %vm9585_vm2 = vmor %vm3251_vm15, %vm3252_vm13 }
 0x222   : > { %v9540_v57 = vpop.eup %6922  ;;  %v3149_v22 = vmul.f32 %v9525_v16, %v9461_v28  ;;  %v9551_v27 = vpop.xlane.xlu1 %2103  ;;  %14573 = vst [vmem:[#allocation105_spill] sm:$0xff] %v9553_v34  ;;  %v3366_v9 = vsel %vm9529_vm9, %v9444_v43, %v3362_v32  ;;  %5743 = vmatpush.msra.mxu2 %v7431_v38  ;;  %v7432_v34 = vld [vmem:[%s7710_s28 + $0x200] sm:$0xff]  ;;  %vm3154_vm1 = vweird.f32 %v9525_v16  ;;  %v3258_v38 = vor.u32 1.1754944e-38, %v3257_v46 }
 0x223   : > { %14569 = vst [vmem:[#allocation103_spill] sm:$0xff] %v9540_v57  ;;  %v9559_v63 = vpop.xlane.xlu0 %2631  ;;  %v3030_v15 = vsel %vm9544_vm11, %v9454_v56, %v3026_v10  ;;  %v3371_v52 = vsel %vm3368_vm12, %v3370_v11, %v3366_v9  ;;  %5615 = vmatpush.msra.mxu0 %v7432_v34  ;;  %v7434_v43 = vld [vmem:[%s7710_s28 + $0x2c0] sm:$0xff]  ;;  %v2144_v34 = vsel %vm431_vm0, %v9536_v53, -inf  ;;  %v9574_v11 = vpop.f32.mrf.mxu1  ;;  %vm9611_vm5 = vmor %vm3153_vm4, %vm3154_vm1 }
 0x224   : > { %14572 = vst [vmem:[#allocation104_spill] sm:$0xff] %v9551_v27  ;;  %v3255_v27 = vand.u32 2147483647, %v9403_v59  ;;  %v3150_v47 = vsub.f32 1.0, %v3149_v22  ;;  %6924 = vrcp.f32 %v9559_v63  ;;  %5744 = vmatpush.msra.mxu2 %v7433_v7  ;;  %5810 = vmatpush.msra.mxu3 %v7434_v43  ;;  %v3035_v56 = vsel %vm3032_vm14, %v3034_v6, %v3030_v15  ;;  %v7435_v9 = vld [vmem:[%s7710_s28 + $0x280] sm:$0xff]  ;;  %v14577_v6 = vld [vmem:[#allocation32_spill] sm:$0xff] }
 0x225   : > { %v4825_v32 = vmul.f32 %v14574_v41, %v3371_v52  ;;  %14575 = vst [vmem:[#allocation66_spill] sm:$0xff] %v9574_v11  ;;  %v4801_v48 = vmul.f32 %v14576_v23, %v3035_v56  ;;  %v3250_v22 = vadd.f32 %v9474_v60, %v3249_v50  ;;  %v2298_v59 = vsub.f32 %v14577_v6, %v8993_v54 }
 0x226   : > { %v3151_v10 = vmul.f32 %v9525_v16, %v3150_v47  ;;  %5745 = vmatpush.msra.mxu2 %v7435_v9  ;;  %v3159_v15 = vand.u32 2147483648, %v9461_v28  ;;  %vm3256_vm3 = vcmp.eq.f32.partialorder %v3255_v27, 8.507059e+37  ;;  %2142 = vmax.xlane.f32.xlu2 %v2141_v0  ;;  %v3157_v50 = vand.u32 2147483647, %v9461_v28  ;;  %v14581_v47 = vld [vmem:[#allocation33_spill] sm:$0xff] }
 0x227   : > { %4953 = vst.msk [vmem:[%s9294_s20 + $0xc8] sm:$0xff] %vm431_vm0, %v4825_v32  ;;  %6659 = vmatmul.msk.f32.gmra.mxu3 %vm431_vm0, %v4825_v32  ;;  %2745 = vadd.xlane.f32.xlu1 %v9491_v20  ;;  %v3254_v54 = vsel %vm9585_vm2, %v9474_v60, %v3250_v22  ;;  %6926 = vpow2.f32 %v9476_v3  ;;  %v14580_v27 = vsub.f32 %v14560_v55, %v8959_v31  ;;  %v14585_v31 = vld [vmem:[#allocation34_spill] sm:$0xff]  ;;  %v14586_v55 = vld [vmem:[#allocation68_spill] sm:$0xff]  ;;  %v14588_v22 = vld [vmem:[#allocation35_spill] sm:$0xff]  ;;  %v2168_v6 = vsel %vm431_vm0, %v9574_v11, -inf }
 0x228   : > { %4929 = vst.msk [vmem:[%s9294_s20 + $0x8] sm:$0xff] %vm431_vm0, %v4801_v48  ;;  %6635 = vmatmul.msk.f32.gmra.mxu0 %vm431_vm0, %v4801_v48  ;;  %v3152_v46 = vadd.f32 %v9525_v16, %v3151_v10  ;;  %v2275_v7 = vsub.f32 %v14581_v47, %v8995_v25  ;;  %v3259_v60 = vsel %vm3256_vm3, %v3258_v38, %v3254_v54  ;;  %v9615_v43 = vpop.f32.mrf.mxu0  ;;  %6928 = vpow2.f32 %v9512_v33 }
 0x229   : > { %v2436_v20 = vmul.f32 1.442695, %v14580_v27  ;;  %2145 = vmax.xlane.f32.xlu0 %v2144_v34  ;;  %14584 = vst [vmem:[#allocation67_spill] sm:$0xff] %v9615_v43  ;;  %v2291_v3 = vsub.f32 %v14585_v31, %v8998_v12  ;;  %v4817_v25 = vmul.f32 %v14586_v55, %v3259_v60  ;;  %v9625_v41 = vpop.xlane.xlu2 %2703  ;;  %v14587_v34 = vsub.f32 %v14562_v17, %v14561_v4 }
 0x22a   : > { %v9617_v28 = vpop.eup %6924  ;;  %v9623_v56 = vpop.xlane.xlu1 %2679  ;;  %v3156_v32 = vsel %vm9611_vm5, %v9525_v16, %v3152_v46  ;;  %v3160_v23 = vor.u32 1.1754944e-38, %v3159_v15  ;;  %v2484_v48 = vmul.f32 1.442695, %v2298_v59  ;;  %v2283_v9 = vsub.f32 %v14588_v22, %v9021_v45  ;;  %v14590_v45 = vld [vmem:[#allocation36_spill] sm:$0xff]  ;;  %v14591_v15 = vld [vmem:[#allocation73_spill] sm:$0xff] }
 0x22b   : > { %v2452_v10 = vmul.f32 1.442695, %v14587_v34  ;;  %v3037_v33 = vmul.f32 %v9617_v28, %v9559_v63  ;;  %6930 = vrcp.f32 %v9623_v56  ;;  %v9636_v12 = vpop.xlane.xlu0 %2127  ;;  %4945 = vst.msk [vmem:[%s9294_s20 + $0x88] sm:$0xff] %vm431_vm0, %v4817_v25  ;;  %6651 = vmatmul.msk.f32.gmra.mxu2 %vm431_vm0, %v4817_v25  ;;  %vm3158_vm6 = vcmp.eq.f32.partialorder %v3157_v50, 8.507059e+37  ;;  %v9646_v52 = vpop.f32.mrf.mxu1  ;;  %v14593_v50 = vld [vmem:[#allocation37_spill] sm:$0xff] }
 0x22c   : > { %6932 = vrcp.f32 %v9625_v41  ;;  %v2438_v4 = vmul.f32 1.442695, %v2275_v7  ;;  %v3161_v17 = vsel %vm3158_vm6, %v3160_v23, %v3156_v32  ;;  %14589 = vst [vmem:[#allocation32_spill] sm:$0xff] %v9646_v52  ;;  %v2470_v59 = vmul.f32 1.442695, %v2291_v3 }
 0x22d   : > { %v3038_v16 = vsub.f32 1.0, %v3037_v33  ;;  %6934 = vpow2.f32 %v2436_v20  ;;  %v2299_v38 = vsub.f32 %v14590_v45, %v9023_v1  ;;  %v4810_v54 = vmul.f32 %v14591_v15, %v3161_v17  ;;  %v9651_v46 = vpop.eup %6926 }
 0x22e   : > { %14592 = vst [vmem:[#allocation33_spill] sm:$0xff] %v9651_v46  ;;  %6936 = vpow2.f32 %v2452_v10  ;;  %v2276_v27 = vsub.f32 %v14593_v50, %v9028_v62  ;;  %v2792_v7 = vsel %vm431_vm0, %v9504_v19, 0.0  ;;  %v9659_v20 = vpop.eup %6928  ;;  %v2454_v0 = vmul.f32 1.442695, %v2283_v9  ;;  %2169 = vmax.xlane.f32.xlu2 %v2168_v6  ;;  %v14597_v9 = vld [vmem:[#allocation38_spill] sm:$0xff] }
 0x22f   : > { %v3039_v47 = vmul.f32 %v9617_v28, %v3038_v16  ;;  %2769 = vadd.xlane.f32.xlu1 %v9467_v42  ;;  %14594 = vst [vmem:[#allocation34_spill] sm:$0xff] %v9659_v20  ;;  %6938 = vpow2.f32 %v2484_v48  ;;  %6644 = vmatmul.msk.f32.gmra.mxu1 %vm431_vm0, %v4810_v54  ;;  %v9666_v1 = vsel %vm431_vm0, %v9517_v24, 0.0  ;;  %v9670_v62 = vsel %vm431_vm0, %v9510_v29, 0.0 }
 0x230   : > { %4938 = vst.msk [vmem:[%s9294_s20 + $0x50] sm:$0xff] %vm431_vm0, %v4810_v54  ;;  %6940 = vpow2.f32 %v2438_v4  ;;  %vm3042_vm7 = vweird.f32 %v9617_v28  ;;  %v3047_v60 = vand.u32 2147483648, %v9559_v63  ;;  %v2486_v55 = vmul.f32 1.442695, %v2299_v38  ;;  %v9695_v48 = vpop.f32.mrf.mxu0 }
 0x231   : > { %v9672_v42 = vpop.eup %6930  ;;  %2721 = vadd.xlane.f32.xlu0 %v9471_v58  ;;  %v3040_v31 = vadd.f32 %v9617_v28, %v3039_v47  ;;  %6942 = vpow2.f32 %v2470_v59  ;;  %v9682_v32 = vpop.xlane.xlu2 %2658  ;;  %v3045_v10 = vand.u32 2147483647, %v9559_v63  ;;  %v9687_v23 = vmul.f32 1.442695, %v2276_v27  ;;  %14595 = vst [vmem:[#allocation68_spill] sm:$0xff] %v9695_v48  ;;  %v14601_v59 = vld [vmem:[#allocation39_spill] sm:$0xff] }
 0x232   : > { %v9678_v3 = vpop.eup %6932  ;;  %v3261_v25 = vmul.f32 %v9672_v42, %v9623_v56  ;;  %v9684_v34 = vpop.xlane.xlu1 %2058  ;;  %vm3041_vm8 = vweird.f32 %v9559_v63  ;;  %6944 = vrcp.f32 %v9682_v32  ;;  %v2292_v4 = vsub.f32 %v14597_v9, %v9049_v39 }
 0x233   : > { %v3373_v58 = vmul.f32 %v9678_v3, %v9625_v41  ;;  %v9693_v33 = vpop.xlane.xlu0 %2082  ;;  %v9697_v22 = vpop.eup %6934  ;;  %6946 = vpow2.f32 %v2454_v0  ;;  %vm9703_vm9 = vmor %vm3041_vm8, %vm3042_vm7  ;;  %v2147_v17 = vsel %vm431_vm0, %v9615_v43, -inf  ;;  %v2284_v45 = vsub.f32 %v14601_v59, %v9051_v49  ;;  %v14607_v59 = vld [vmem:[#allocation40_spill] sm:$0xff]  ;;  %v14630_v43 = vld [vmem:[#allocation46_spill] sm:$0xff] }
 0x234   : > { %14596 = vst [vmem:[#allocation35_spill] sm:$0xff] %v9697_v22  ;;  %v3262_v63 = vsub.f32 1.0, %v3261_v25  ;;  %v9709_v6 = vpop.eup %6936  ;;  %v3048_v38 = vor.u32 1.1754944e-38, %v3047_v60  ;;  %v3044_v39 = vsel %vm9703_vm9, %v9617_v28, %v3040_v31  ;;  %vm3266_vm10 = vweird.f32 %v9672_v42  ;;  %v9727_v60 = vpop.f32.mrf.mxu1 }
 0x235   : > { %14600 = vst [vmem:[#allocation36_spill] sm:$0xff] %v9709_v6  ;;  %v3374_v15 = vsub.f32 1.0, %v3373_v58  ;;  %v9716_v54 = vpop.eup %6938  ;;  %vm3046_vm11 = vcmp.eq.f32.partialorder %v3045_v10, 8.507059e+37  ;;  %v2171_v27 = vsel %vm431_vm0, %v9646_v52, -inf  ;;  %vm3265_vm12 = vweird.f32 %v9623_v56  ;;  %v14606_v10 = vld [vmem:[#allocation77_spill] sm:$0xff] }
 0x236   : > { %14602 = vst [vmem:[#allocation73_spill] sm:$0xff] %v9716_v54  ;;  %v3263_v50 = vmul.f32 %v9672_v42, %v3262_v63  ;;  %v9722_v47 = vpop.eup %6940  ;;  %v3271_v49 = vand.u32 2147483648, %v9623_v56  ;;  %v3049_v28 = vsel %vm3046_vm11, %v3048_v38, %v3044_v39  ;;  %v3383_v25 = vand.u32 2147483648, %v9625_v41  ;;  %2793 = vadd.xlane.f32.xlu2 %v2792_v7  ;;  %vm9741_vm13 = vmor %vm3265_vm12, %vm3266_vm10 }
 0x237   : > { %14603 = vst [vmem:[#allocation37_spill] sm:$0xff] %v9722_v47  ;;  %v3375_v0 = vmul.f32 %v9678_v3, %v3374_v15  ;;  %2148 = vmax.xlane.f32.xlu1 %v2147_v17  ;;  %v9729_v31 = vpop.eup %6942  ;;  %v4802_v58 = vmul.f32 %v14606_v10, %v3049_v28  ;;  %v3269_v16 = vand.u32 2147483647, %v9623_v56  ;;  %v2300_v17 = vsub.f32 %v14607_v59, %v9057_v37 }
 0x238   : > { %14604 = vst [vmem:[#allocation38_spill] sm:$0xff] %v9727_v60  ;;  %v3264_v9 = vadd.f32 %v9672_v42, %v3263_v50  ;;  %v9735_v63 = vpop.eup %6944  ;;  %vm3378_vm14 = vweird.f32 %v9678_v3  ;;  %v3381_v15 = vand.u32 2147483647, %v9625_v41  ;;  %6948 = vpow2.f32 %v2486_v55 }
 0x239   : > { %14605 = vst [vmem:[#allocation39_spill] sm:$0xff] %v9729_v31  ;;  %2172 = vmax.xlane.f32.xlu0 %v2171_v27  ;;  %v3376_v7 = vadd.f32 %v9678_v3, %v3375_v0  ;;  %v9748_v39 = vpop.eup %6946  ;;  %v2472_v56 = vmul.f32 1.442695, %v2292_v4  ;;  %v3163_v37 = vmul.f32 %v9735_v63, %v9682_v32  ;;  %6636 = vmatmul.msk.f32.gmra.mxu0 %vm431_vm0, %v4802_v58  ;;  %v9755_v50 = vpop.xlane.xlu2 %2106  ;;  %v2456_v0 = vmul.f32 1.442695, %v2284_v45 }
 0x23a   : > { %14610 = vst [vmem:[#allocation77_spill] sm:$0xff] %v9748_v39  ;;  %v9757_v28 = vpop.xlane.xlu1 %2634  ;;  %v3268_v27 = vsel %vm9741_vm13, %v9672_v42, %v3264_v9  ;;  %v3272_v10 = vor.u32 1.1754944e-38, %v3271_v49  ;;  %vm3377_vm15 = vweird.f32 %v9625_v41  ;;  %v3384_v4 = vor.u32 1.1754944e-38, %v3383_v25  ;;  %v9770_v45 = vpop.f32.mrf.mxu0 }
 0x23b   : > { %4930 = vst.msk [vmem:[%s9294_s20 + $0x10] sm:$0xff] %vm431_vm0, %v4802_v58  ;;  %6950 = vrcp.f32 %v9757_v28  ;;  %v9764_v55 = vpop.xlane.xlu0 %2706  ;;  %vm3379_vm1 = vmor %vm3377_vm15, %vm3378_vm14  ;;  %v3164_v58 = vsub.f32 1.0, %v3163_v37  ;;  %vm3270_vm2 = vcmp.eq.f32.partialorder %v3269_v16, 8.507059e+37  ;;  %v2488_v59 = vmul.f32 1.442695, %v2300_v17 }
 0x23c   : > { %6952 = vrcp.f32 %v9764_v55  ;;  %v3273_v52 = vsel %vm3270_vm2, %v3272_v10, %v3268_v27  ;;  %v3380_v42 = vsel %vm3379_vm1, %v9678_v3, %v3376_v7  ;;  %vm3382_vm3 = vcmp.eq.f32.partialorder %v3381_v15, 8.507059e+37  ;;  %14611 = vst [vmem:[#allocation40_spill] sm:$0xff] %v9770_v45  ;;  %v9823_v10 = vpop.f32.mrf.mxu3 }
 0x23d   : > { %v3165_v41 = vmul.f32 %v9735_v63, %v3164_v58  ;;  %vm3168_vm4 = vweird.f32 %v9735_v63  ;;  %v4818_v49 = vmul.f32 %v8962_v44, %v3273_v52  ;;  %v3385_v9 = vsel %vm3382_vm3, %v3384_v4, %v3380_v42 }
 0x23e   : > { %6954 = vpow2.f32 %v9687_v23  ;;  %v3173_v25 = vand.u32 2147483648, %v9682_v32  ;;  %v4826_v16 = vmul.f32 %v8955_v40, %v3385_v9  ;;  %v2795_v3 = vsel %vm431_vm0, %v9651_v46, 0.0  ;;  %v9781_v17 = vpop.eup %6948  ;;  %2772 = vadd.xlane.f32.xlu2 %v9666_v1  ;;  %v9801_v23 = vpop.f32.mrf.mxu1 }
 0x23f   : > { %2724 = vadd.xlane.f32.xlu1 %v9670_v62  ;;  %14612 = vst [vmem:[#allocation106_spill] sm:$0xff] %v9781_v17  ;;  %6956 = vpow2.f32 %v2472_v56  ;;  %vm3167_vm5 = vweird.f32 %v9682_v32  ;;  %6652 = vmatmul.msk.f32.gmra.mxu2 %vm431_vm0, %v4818_v49  ;;  %v3166_v44 = vadd.f32 %v9735_v63, %v3165_v41  ;;  %v3171_v40 = vand.u32 2147483647, %v9682_v32  ;;  %v14620_v62 = vld [vmem:[#allocation42_spill] sm:$0xff] }
 0x240   : > { %4946 = vst.msk [vmem:[%s9294_s20 + $0x90] sm:$0xff] %vm431_vm0, %v4818_v49  ;;  %6958 = vpow2.f32 %v2456_v0  ;;  %vm9794_vm6 = vmor %vm3167_vm5, %vm3168_vm4  ;;  %6660 = vmatmul.msk.f32.gmra.mxu3 %vm431_vm0, %v4826_v16  ;;  %v9816_v56 = vsel %vm431_vm0, %v9540_v57, 0.0  ;;  %v3174_v37 = vor.u32 1.1754944e-38, %v3173_v25  ;;  %v9827_v4 = vsel %vm431_vm0, %v9716_v54, 0.0 }
 0x241   : > { %v9790_v52 = vpop.eup %6950  ;;  %4954 = vst.msk [vmem:[%s9294_s20 + $0xd0] sm:$0xff] %vm431_vm0, %v4826_v16  ;;  %2796 = vadd.xlane.f32.xlu0 %v2795_v3  ;;  %6960 = vpow2.f32 %v2488_v59  ;;  %v9807_v38 = vpop.xlane.xlu2 %2682  ;;  %v3170_v15 = vsel %vm9794_vm6, %v9735_v63, %v3166_v44  ;;  %v14616_v63 = vld [vmem:[#allocation43_spill] sm:$0xff]  ;;  %vm3172_vm7 = vcmp.eq.f32.partialorder %v3171_v40, 8.507059e+37  ;;  %v2174_v9 = vsel %vm431_vm0, %v9727_v60, -inf }
 0x242   : > { %14615 = vst [vmem:[#allocation107_spill] sm:$0xff] %v9801_v23  ;;  %v9803_v1 = vpop.eup %6952  ;;  %v3051_v32 = vmul.f32 %v9790_v52, %v9757_v28  ;;  %v9809_v7 = vpop.xlane.xlu1 %2130  ;;  %6962 = vrcp.f32 %v9807_v38  ;;  %v2293_v58 = vsub.f32 %v14616_v63, %v9089_v2  ;;  %v3175_v49 = vsel %vm3172_vm7, %v3174_v37, %v3170_v15 }
 0x243   : > { %v3387_v27 = vmul.f32 %v9803_v1, %v9764_v55  ;;  %v9821_v0 = vpop.xlane.xlu0 %2661  ;;  %v2153_v25 = vsel %vm431_vm0, %v9770_v45, -inf  ;;  %vm3056_vm8 = vweird.f32 %v9790_v52  ;;  %v3061_v2 = vand.u32 2147483648, %v9757_v28 }
 0x244   : > { %v3052_v59 = vsub.f32 1.0, %v3051_v32  ;;  %6964 = vrcp.f32 %v9821_v0  ;;  %v9832_v42 = vpop.eup %6954  ;;  %v4811_v44 = vmul.f32 %v8991_v13, %v3175_v49  ;;  %v2277_v32 = vsub.f32 %v14620_v62, %v9091_v61 }
 0x245   : > { %14617 = vst [vmem:[#allocation43_spill] sm:$0xff] %v9832_v42  ;;  %v3388_v41 = vsub.f32 1.0, %v3387_v27  ;;  %v9838_v16 = vpop.eup %6956  ;;  %v2150_v37 = vsel %vm431_vm0, %v9695_v48, -inf  ;;  %v9851_v27 = vpop.f32.mrf.mxu0  ;;  %v3059_v63 = vand.u32 2147483647, %v9757_v28  ;;  %vm3055_vm9 = vweird.f32 %v9757_v28 }
 0x246   : > { %14618 = vst [vmem:[#allocation108_spill] sm:$0xff] %v9838_v16  ;;  %v3053_v3 = vmul.f32 %v9790_v52, %v3052_v59  ;;  %v9844_v40 = vpop.eup %6958  ;;  %vm3392_vm10 = vweird.f32 %v9803_v1  ;;  %v3397_v13 = vand.u32 2147483648, %v9764_v55  ;;  %6645 = vmatmul.msk.f32.gmra.mxu1 %vm431_vm0, %v4811_v44  ;;  %2151 = vmax.xlane.f32.xlu2 %v2150_v37  ;;  %v2474_v49 = vmul.f32 1.442695, %v2293_v58  ;;  %vm9869_vm11 = vmor %vm3055_vm9, %vm3056_vm8  ;;  %v9875_v37 = vpop.f32.mrf.mxu2 }
 0x247   : > { %14619 = vst [vmem:[#allocation109_spill] sm:$0xff] %v9844_v40  ;;  %v3389_v15 = vmul.f32 %v9803_v1, %v3388_v41  ;;  %2175 = vmax.xlane.f32.xlu1 %v2174_v9  ;;  %v9854_v59 = vpop.eup %6960  ;;  %v14623_v9 = vld [vmem:[#allocation44_spill] sm:$0xff]  ;;  %v3062_v54 = vor.u32 1.1754944e-38, %v3061_v2  ;;  %vm3391_vm12 = vweird.f32 %v9764_v55  ;;  %vm3060_vm14 = vcmp.eq.f32.partialorder %v3059_v63, 8.507059e+37  ;;  %v9901_v60 = vpop.f32.mrf.mxu1 }
 0x248   : > { %14621 = vst [vmem:[#allocation42_spill] sm:$0xff] %v9851_v27  ;;  %v3054_v61 = vadd.f32 %v9790_v52, %v3053_v3  ;;  %v9863_v41 = vpop.eup %6962  ;;  %v2285_v62 = vsub.f32 %v14623_v9, %v9095_v21  ;;  %vm9893_vm13 = vmor %vm3391_vm12, %vm3392_vm10  ;;  %v2278_v11 = vsub.f32 %v14630_v43, %v9118_v51  ;;  %v9911_v63 = vpop.f32.mrf.mxu3  ;;  %vm3279_vm2 = vweird.f32 %v9807_v38 }
 0x249   : > { %14622 = vst [vmem:[#allocation110_spill] sm:$0xff] %v9854_v59  ;;  %2154 = vmax.xlane.f32.xlu0 %v2153_v25  ;;  %v3390_v57 = vadd.f32 %v9803_v1, %v3389_v15  ;;  %v3275_v21 = vmul.f32 %v9863_v41, %v9807_v38  ;;  %v9884_v9 = vpop.xlane.xlu2 %2061  ;;  %v14626_v15 = vld [vmem:[#allocation45_spill] sm:$0xff]  ;;  %vm3280_vm1 = vweird.f32 %v9863_v41  ;;  %6966 = vpow2.f32 %v2474_v49 }
 0x24a   : > { %4939 = vst.msk [vmem:[%s9294_s20 + $0x58] sm:$0xff] %vm431_vm0, %v4811_v44  ;;  %v3395_v44 = vand.u32 2147483647, %v9764_v55  ;;  %v9877_v3 = vpop.eup %6964  ;;  %v9882_v58 = vpop.xlane.xlu1 %2085  ;;  %v3058_v25 = vsel %vm9869_vm11, %v9790_v52, %v3054_v61  ;;  %v2301_v45 = vsub.f32 %v14626_v15, %v9116_v26  ;;  %v2156_v52 = vsel %vm431_vm0, %v9851_v27, -inf  ;;  %vm9933_vm3 = vmor %vm3279_vm2, %vm3280_vm1 }
 0x24b   : > { %v3177_v55 = vmul.f32 %v9877_v3, %v9821_v0  ;;  %v9899_v48 = vpop.xlane.xlu0 %2109  ;;  %14629 = vst [vmem:[#allocation44_spill] sm:$0xff] %v9901_v60  ;;  %v3398_v61 = vor.u32 1.1754944e-38, %v3397_v13  ;;  %v3276_v26 = vsub.f32 1.0, %v3275_v21  ;;  %v3063_v28 = vsel %vm3060_vm14, %v3062_v54, %v3058_v25 }
 0x24c   : > { %v3394_v15 = vsel %vm9893_vm13, %v9803_v1, %v3390_v57  ;;  %v4803_v46 = vmul.f32 %v9026_v30, %v3063_v28  ;;  %vm3396_vm15 = vcmp.eq.f32.partialorder %v3395_v44, 8.507059e+37  ;;  %v2180_v54 = vsel %vm431_vm0, %v9901_v60, -inf }
 0x24d   : > { %v3178_v53 = vsub.f32 1.0, %v3177_v55  ;;  %v3277_v24 = vmul.f32 %v9863_v41, %v3276_v26  ;;  %v3399_v13 = vsel %vm3396_vm15, %v3398_v61, %v3394_v15  ;;  %v3285_v21 = vand.u32 2147483648, %v9807_v38  ;;  %v9925_v43 = vpop.f32.mrf.mxu0 }
 0x24e   : > { %4931 = vst.msk [vmem:[%s9294_s20 + $0x18] sm:$0xff] %vm431_vm0, %v4803_v46  ;;  %6637 = vmatmul.msk.f32.gmra.mxu0 %vm431_vm0, %v4803_v46  ;;  %v2177_v30 = vsel %vm431_vm0, %v9801_v23, -inf  ;;  %v4827_v51 = vmul.f32 %v9031_v18, %v3399_v13  ;;  %v3187_v1 = vand.u32 2147483648, %v9821_v0  ;;  %v2442_v25 = vmul.f32 1.442695, %v2277_v32  ;;  %v14634_v32 = vld [vmem:[#allocation47_spill] sm:$0xff]  ;;  %v9956_v49 = vpop.f32.mrf.mxu2 }
 0x24f   : > { %v3179_v57 = vmul.f32 %v9877_v3, %v3178_v53  ;;  %2157 = vmax.xlane.f32.xlu1 %v2156_v52  ;;  %14631 = vst [vmem:[#allocation45_spill] sm:$0xff] %v9925_v43  ;;  %2178 = vmax.xlane.f32.xlu2 %v2177_v30  ;;  %v3278_v44 = vadd.f32 %v9863_v41, %v3277_v24  ;;  %v3283_v53 = vand.u32 2147483647, %v9807_v38  ;;  %vm3182_vm4 = vweird.f32 %v9877_v3  ;;  %v9974_v30 = vpop.eup %6966 }
 0x250   : > { %4955 = vst.msk [vmem:[%s9294_s20 + $0xd8] sm:$0xff] %vm431_vm0, %v4827_v51  ;;  %6661 = vmatmul.msk.f32.gmra.mxu3 %vm431_vm0, %v4827_v51  ;;  %v3185_v24 = vand.u32 2147483647, %v9821_v0  ;;  %v2458_v38 = vmul.f32 1.442695, %v2285_v62  ;;  %v2294_v2 = vsub.f32 %v14634_v32, %v9123_v5  ;;  %v3286_v28 = vor.u32 1.1754944e-38, %v3285_v21 }
 0x251   : > { %2181 = vmax.xlane.f32.xlu0 %v2180_v54  ;;  %v3180_v18 = vadd.f32 %v9877_v3, %v3179_v57  ;;  %v9947_v52 = vpop.xlane.xlu2 %2637  ;;  %v3282_v61 = vsel %vm9933_vm3, %v9863_v41, %v3278_v44  ;;  %v2490_v26 = vmul.f32 1.442695, %v2301_v45  ;;  %vm3181_vm5 = vweird.f32 %v9821_v0  ;;  %v9968_v57 = vpop.f32.mrf.mxu3  ;;  %14636 = vst [vmem:[#allocation47_spill] sm:$0xff] %v9974_v30 }
 0x252   : > { %v9945_v55 = vpop.xlane.xlu1 %2709  ;;  %v2444_v62 = vmul.f32 1.442695, %v2278_v11  ;;  %vm3183_vm6 = vmor %vm3181_vm5, %vm3182_vm4  ;;  %v3188_v5 = vor.u32 1.1754944e-38, %v3187_v1  ;;  %vm3284_vm7 = vcmp.eq.f32.partialorder %v3283_v53, 8.507059e+37  ;;  %vm3186_vm8 = vcmp.eq.f32.partialorder %v3185_v24, 8.507059e+37  ;;  %14635 = vst [vmem:[#allocation46_spill] sm:$0xff] %v9968_v57 }
 0x253   : > { %6968 = vrcp.f32 %v9945_v55  ;;  %v9954_v15 = vpop.xlane.xlu0 %2685  ;;  %v3287_v45 = vsel %vm3284_vm7, %v3286_v28, %v3282_v61  ;;  %v3184_v0 = vsel %vm3183_vm6, %v9877_v3, %v3180_v18  ;;  %v2476_v41 = vmul.f32 1.442695, %v2294_v2  ;;  %v14658_v57 = vld [vmem:[#allocation94_spill] sm:$0xff] }
 0x254   : > { %6970 = vrcp.f32 %v9947_v52  ;;  %v4819_v13 = vmul.f32 %v9055_v8, %v3287_v45  ;;  %v3189_v54 = vsel %vm3186_vm8, %v3188_v5, %v3184_v0  ;;  %v2774_v21 = vsel %vm431_vm0, %v9659_v20, 0.0  ;;  %v14640_v0 = vld [vmem:[#allocation48_spill] sm:$0xff] }
 0x255   : > { %6972 = vrcp.f32 %v9954_v15  ;;  %v4812_v11 = vmul.f32 %v9059_v14, %v3189_v54  ;;  %v9972_v3 = vsel %vm431_vm0, %v9697_v22, 0.0  ;;  %v9982_v8 = vsel %vm431_vm0, %v9729_v31, 0.0  ;;  %v9999_v1 = vpop.f32.mrf.mxu0  ;;  %v14648_v31 = vld [vmem:[#allocation50_spill] sm:$0xff] }
 0x256   : > { %6974 = vpow2.f32 %v2442_v25  ;;  %4947 = vst.msk [vmem:[%s9294_s20 + $0x98] sm:$0xff] %vm431_vm0, %v4819_v13  ;;  %6653 = vmatmul.msk.f32.gmra.mxu2 %vm431_vm0, %v4819_v13  ;;  %v9986_v14 = vsel %vm431_vm0, %v9709_v6, 0.0  ;;  %v10003_v44 = vsel %vm431_vm0, %v9781_v17, 0.0  ;;  %v10007_v53 = vsel %vm431_vm0, %v9748_v39, 0.0  ;;  %v10059_v39 = vpop.f32.mrf.mxu2 }
 0x257   : > { %6976 = vpow2.f32 %v2458_v38  ;;  %2799 = vadd.xlane.f32.xlu1 %v9827_v4  ;;  %2748 = vadd.xlane.f32.xlu2 %v9816_v56  ;;  %v9990_v4 = vsel %vm431_vm0, %v9722_v47, 0.0  ;;  %4940 = vst.msk [vmem:[%s9294_s20 + $0x60] sm:$0xff] %vm431_vm0, %v4812_v11  ;;  %v9997_v56 = vpop.f32.mrf.mxu1  ;;  %v10011_v25 = vsel %vm431_vm0, %v9832_v42, 0.0  ;;  %v10023_v32 = vsel %vm431_vm0, %v9838_v16, 0.0 }
 0x258   : > { %6978 = vpow2.f32 %v2490_v26  ;;  %6646 = vmatmul.msk.f32.gmra.mxu1 %vm431_vm0, %v4812_v11  ;;  %14637 = vst [vmem:[#allocation111_spill] sm:$0xff] %v9997_v56  ;;  %v10027_v2 = vsel %vm431_vm0, %v9844_v40, 0.0  ;;  %v10042_v5 = vsel %vm431_vm0, %v9974_v30, 0.0  ;;  %v2183_v11 = vsel %vm431_vm0, %v9997_v56, -inf  ;;  %v14642_v40 = vld [vmem:[#allocation49_spill] sm:$0xff] }
 0x259   : > { %v9992_v51 = vpop.eup %6968  ;;  %6980 = vpow2.f32 %v2444_v62  ;;  %2775 = vadd.xlane.f32.xlu0 %v2774_v21  ;;  %14638 = vst [vmem:[#allocation112_spill] sm:$0xff] %v9999_v1  ;;  %v10019_v38 = vpop.xlane.xlu2 %2133  ;;  %v10038_v62 = vsel %vm431_vm0, %v9854_v59, 0.0  ;;  %v2302_v42 = vsub.f32 %v14642_v40, %v9148_v36  ;;  %v3411_v30 = vand.u32 2147483648, %v9945_v55 }
 0x25a   : > { %v10013_v46 = vpop.eup %6970  ;;  %6982 = vpow2.f32 %v2476_v41  ;;  %v3401_v18 = vmul.f32 %v9992_v51, %v9945_v55  ;;  %v10017_v24 = vpop.xlane.xlu1 %2664  ;;  %v2286_v41 = vsub.f32 %v14640_v0, %v9146_v35  ;;  %v2162_v16 = vsel %vm431_vm0, %v9999_v1, -inf  ;;  %14643 = vst [vmem:[#allocation49_spill] sm:$0xff] %v10059_v39  ;;  %v14659_v39 = vld [vmem:[#allocation51_spill] sm:$0xff] }
 0x25b   : > { %v10029_v61 = vpop.eup %6972  ;;  %v3065_v26 = vmul.f32 %v10013_v46, %v9947_v52  ;;  %6984 = vrcp.f32 %v10017_v24  ;;  %v10034_v28 = vpop.xlane.xlu0 %2064  ;;  %vm3406_vm9 = vweird.f32 %v9992_v51  ;;  %v3409_v47 = vand.u32 2147483647, %v9945_v55 }
 0x25c   : > { %v10044_v45 = vpop.eup %6974  ;;  %v3402_v13 = vsub.f32 1.0, %v3401_v18  ;;  %v3289_v54 = vmul.f32 %v10029_v61, %v9954_v15  ;;  %vm3070_vm10 = vweird.f32 %v10013_v46  ;;  %v3075_v40 = vand.u32 2147483648, %v9947_v52 }
 0x25d   : > { %14639 = vst [vmem:[#allocation113_spill] sm:$0xff] %v10044_v45  ;;  %v10052_v21 = vpop.eup %6976  ;;  %v3066_v59 = vsub.f32 1.0, %v3065_v26  ;;  %v2159_v26 = vsel %vm431_vm0, %v9925_v43, -inf  ;;  %vm3405_vm11 = vweird.f32 %v9945_v55  ;;  %v3412_v43 = vor.u32 1.1754944e-38, %v3411_v30 }
 0x25e   : > { %14641 = vst [vmem:[#allocation48_spill] sm:$0xff] %v10052_v21  ;;  %v10061_v35 = vpop.eup %6978  ;;  %v3403_v18 = vmul.f32 %v9992_v51, %v3402_v13  ;;  %v3290_v0 = vsub.f32 1.0, %v3289_v54  ;;  %v14647_v13 = vld [vmem:[#allocation92_spill] sm:$0xff]  ;;  %v3073_v54 = vand.u32 2147483647, %v9947_v52  ;;  %vm10084_vm12 = vmor %vm3405_vm11, %vm3406_vm9  ;;  %vm3069_vm13 = vweird.f32 %v9947_v52 }
 0x25f   : > { %14644 = vst [vmem:[#allocation114_spill] sm:$0xff] %v10061_v35  ;;  %v10066_v17 = vpop.eup %6980  ;;  %v3067_v36 = vmul.f32 %v10013_v46, %v3066_v59  ;;  %2184 = vmax.xlane.f32.xlu1 %v2183_v11  ;;  %v2279_v22 = vsub.f32 %v14648_v31, %v14647_v13  ;;  %2160 = vmax.xlane.f32.xlu2 %v2159_v26  ;;  %v3299_v31 = vand.u32 2147483648, %v9954_v15  ;;  %v10091_v26 = vpop.f32.mrf.mxu3  ;;  %vm10095_vm14 = vmor %vm3069_vm13, %vm3070_vm10  ;;  %vm3410_vm15 = vcmp.eq.f32.partialorder %v3409_v47, 8.507059e+37 }
 0x260   : > { %14645 = vst [vmem:[#allocation115_spill] sm:$0xff] %v10066_v17  ;;  %v10073_v6 = vpop.eup %6982  ;;  %v3404_v59 = vadd.f32 %v9992_v51, %v3403_v18  ;;  %v3291_v13 = vmul.f32 %v10029_v61, %v3290_v0  ;;  %v3297_v60 = vand.u32 2147483647, %v9954_v15  ;;  %vm3294_vm1 = vweird.f32 %v10029_v61 }
 0x261   : > { %14646 = vst [vmem:[#allocation116_spill] sm:$0xff] %v10073_v6  ;;  %v10080_v1 = vpop.eup %6984  ;;  %2163 = vmax.xlane.f32.xlu0 %v2162_v16  ;;  %v3068_v55 = vadd.f32 %v10013_v46, %v3067_v36  ;;  %v10104_v52 = vpop.xlane.xlu2 %2088  ;;  %v3076_v36 = vor.u32 1.1754944e-38, %v3075_v40  ;;  %vm3074_vm2 = vcmp.eq.f32.partialorder %v3073_v54, 8.507059e+37  ;;  %v2460_v11 = vmul.f32 1.442695, %v2286_v41  ;;  %v14654_v40 = vld [vmem:[#allocation88_spill] sm:$0xff] }
 0x262   : > { %14651 = vst [vmem:[#allocation92_spill] sm:$0xff] %v10091_v26  ;;  %v3191_v30 = vmul.f32 %v10080_v1, %v10017_v24  ;;  %v10102_v56 = vpop.xlane.xlu1 %2112  ;;  %v3408_v16 = vsel %vm10084_vm12, %v9992_v51, %v3404_v59  ;;  %v2492_v51 = vmul.f32 1.442695, %v2302_v42  ;;  %vm3293_vm3 = vweird.f32 %v9954_v15  ;;  %v10148_v41 = vpop.f32.mrf.mxu0 }
 0x263   : > { %v10109_v26 = vpop.xlane.xlu0 %2640  ;;  %v3072_v20 = vsel %vm10095_vm14, %v10013_v46, %v3068_v55  ;;  %v3413_v0 = vsel %vm3410_vm15, %v3412_v43, %v3408_v16  ;;  %v14655_v43 = vld [vmem:[#allocation87_spill] sm:$0xff]  ;;  %v3292_v18 = vadd.f32 %v10029_v61, %v3291_v13  ;;  %v14656_v16 = vld [vmem:[#allocation93_spill] sm:$0xff]  ;;  %v2287_v54 = vsub.f32 %v14659_v39, %v14658_v57  ;;  %vm10126_vm4 = vmor %vm3293_vm3, %vm3294_vm1  ;;  %14663 = vst [vmem:[#allocation88_spill] sm:$0xff] %v10148_v41 }
 0x264   : > { %v3192_v23 = vsub.f32 1.0, %v3191_v30  ;;  %6986 = vrcp.f32 %v10109_v26  ;;  %v3077_v47 = vsel %vm3074_vm2, %v3076_v36, %v3072_v20  ;;  %v4828_v59 = vmul.f32 %v14654_v40, %v3413_v0  ;;  %v14657_v30 = vld [vmem:[#allocation52_spill] sm:$0xff]  ;;  %v14664_v36 = vld [vmem:[#allocation95_spill] sm:$0xff] }
 0x265   : > { %v4804_v55 = vmul.f32 %v14655_v43, %v3077_v47  ;;  %v2295_v27 = vsub.f32 %v14657_v30, %v14656_v16  ;;  %v3300_v20 = vor.u32 1.1754944e-38, %v3299_v31  ;;  %vm3196_vm5 = vweird.f32 %v10080_v1  ;;  %v14671_v16 = vld [vmem:[#allocation54_spill] sm:$0xff] }
 0x266   : > { %v3193_v46 = vmul.f32 %v10080_v1, %v3192_v23  ;;  %4956 = vst.msk [vmem:[%s9294_s20 + $0xe0] sm:$0xff] %vm431_vm0, %v4828_v59  ;;  %6662 = vmatmul.msk.f32.gmra.mxu3 %vm431_vm0, %v4828_v59  ;;  %v10135_v23 = vpop.f32.mrf.mxu2  ;;  %v3201_v15 = vand.u32 2147483648, %v10017_v24  ;;  %v3296_v39 = vsel %vm10126_vm4, %v10029_v61, %v3292_v18  ;;  %vm3298_vm6 = vcmp.eq.f32.partialorder %v3297_v60, 8.507059e+37  ;;  %v14665_v61 = vld [vmem:[#allocation53_spill] sm:$0xff]  ;;  %v14670_v18 = vld [vmem:[#allocation14_spill] sm:$0xff] }
 0x267   : > { %2778 = vadd.xlane.f32.xlu1 %v9982_v8  ;;  %14662 = vst [vmem:[#allocation50_spill] sm:$0xff] %v10135_v23  ;;  %6638 = vmatmul.msk.f32.gmra.mxu0 %vm431_vm0, %v4804_v55  ;;  %6988 = vpow2.f32 %v2460_v11  ;;  %vm3195_vm7 = vweird.f32 %v10017_v24  ;;  %v3301_v8 = vsel %vm3298_vm6, %v3300_v20, %v3296_v39  ;;  %v3199_v31 = vand.u32 2147483647, %v10017_v24  ;;  %v14668_v11 = vld [vmem:[#allocation89_spill] sm:$0xff]  ;;  %v14673_v20 = vld [vmem:[#allocation55_spill] sm:$0xff] }
 0x268   : > { %4932 = vst.msk [vmem:[%s9294_s20 + $0x20] sm:$0xff] %vm431_vm0, %v4804_v55  ;;  %2727 = vadd.xlane.f32.xlu2 %v9972_v3  ;;  %v3194_v57 = vadd.f32 %v10080_v1, %v3193_v46  ;;  %6990 = vpow2.f32 %v2492_v51  ;;  %v2446_v3 = vmul.f32 1.442695, %v2279_v22  ;;  %v2303_v60 = vsub.f32 %v14665_v61, %v14664_v36  ;;  %vm10157_vm8 = vmor %vm3195_vm7, %vm3196_vm5  ;;  %v10174_v46 = vpop.f32.mrf.mxu3 }
 0x269   : > { %2751 = vadd.xlane.f32.xlu0 %v9986_v14  ;;  %v4820_v14 = vmul.f32 %v14668_v11, %v3301_v8  ;;  %v10164_v40 = vpop.xlane.xlu2 %2712  ;;  %v2478_v24 = vmul.f32 1.442695, %v2295_v27  ;;  %14669 = vst [vmem:[#allocation87_spill] sm:$0xff] %v10174_v46  ;;  %v2462_v43 = vmul.f32 1.442695, %v2287_v54  ;;  %v3202_v55 = vor.u32 1.1754944e-38, %v3201_v15 }
 0x26a   : > { %v10151_v13 = vpop.eup %6986  ;;  %v10162_v47 = vpop.xlane.xlu1 %2688  ;;  %v3198_v59 = vsel %vm10157_vm8, %v10080_v1, %v3194_v57  ;;  %v2165_v27 = vsel %vm431_vm0, %v10148_v41, -inf  ;;  %v2304_v30 = vsub.f32 %v14671_v16, %v14670_v18  ;;  %vm3200_vm9 = vcmp.eq.f32.partialorder %v3199_v31, 8.507059e+37  ;;  %v14672_v54 = vld [vmem:[#allocation97_spill] sm:$0xff]  ;;  %v14679_v16 = vld [vmem:[#allocation19_spill] sm:$0xff] }
 0x26b   : > { %v3079_v51 = vmul.f32 %v10151_v13, %v10109_v26  ;;  %6992 = vrcp.f32 %v10162_v47  ;;  %v10169_v22 = vpop.xlane.xlu0 %2136  ;;  %4948 = vst.msk [vmem:[%s9294_s20 + $0xa0] sm:$0xff] %vm431_vm0, %v4820_v14  ;;  %6654 = vmatmul.msk.f32.gmra.mxu2 %vm431_vm0, %v4820_v14  ;;  %v10186_v1 = vsel %vm431_vm0, %v10044_v45, 0.0  ;;  %v2312_v15 = vsub.f32 %v14673_v20, %v14672_v54  ;;  %v10197_v31 = vpop.f32.mrf.mxu1  ;;  %v14677_v14 = vld [vmem:[#allocation91_spill] sm:$0xff]  ;;  %v14690_v45 = vld [vmem:[#allocation64_spill] sm:$0xff] }
 0x26c   : > { %6994 = vrcp.f32 %v10164_v40  ;;  %v3203_v39 = vsel %vm3200_vm9, %v3202_v55, %v3198_v59  ;;  %v10192_v57 = vsel %vm431_vm0, %v10052_v21, 0.0  ;;  %14675 = vst [vmem:[#allocation52_spill] sm:$0xff] %v10197_v31  ;;  %v10201_v61 = vsel %vm431_vm0, %v10061_v35, 0.0 }
 0x26d   : > { %v3080_v42 = vsub.f32 1.0, %v3079_v51  ;;  %6996 = vpow2.f32 %v2446_v3  ;;  %v10194_v8 = vpop.eup %6988  ;;  %v10205_v3 = vsel %vm431_vm0, %v10066_v17, 0.0  ;;  %v2494_v11 = vmul.f32 1.442695, %v2303_v60 }
 0x26e   : > { %14674 = vst [vmem:[#allocation93_spill] sm:$0xff] %v10194_v8  ;;  %6998 = vpow2.f32 %v2478_v24  ;;  %v10207_v0 = vpop.eup %6990  ;;  %v4813_v24 = vmul.f32 %v14677_v14, %v3203_v39  ;;  %v10213_v51 = vsel %vm431_vm0, %v10073_v6, 0.0  ;;  %v2496_v55 = vmul.f32 1.442695, %v2304_v30  ;;  %v10221_v60 = vpop.f32.mrf.mxu2 }
 0x26f   : > { %v3081_v36 = vmul.f32 %v10151_v13, %v3080_v42  ;;  %2166 = vmax.xlane.f32.xlu1 %v2165_v27  ;;  %14676 = vst [vmem:[#allocation94_spill] sm:$0xff] %v10207_v0  ;;  %7000 = vpow2.f32 %v2462_v43  ;;  %vm3084_vm10 = vweird.f32 %v10151_v13  ;;  %v3089_v27 = vand.u32 2147483648, %v10109_v26  ;;  %v14680_v42 = vld [vmem:[#allocation57_spill] sm:$0xff] }
 0x270   : > { %2802 = vadd.xlane.f32.xlu2 %v10003_v44  ;;  %14678 = vst [vmem:[#allocation51_spill] sm:$0xff] %v10221_v60  ;;  %v2512_v44 = vmul.f32 1.442695, %v2312_v15  ;;  %v2320_v54 = vsub.f32 %v14680_v42, %v14679_v16  ;;  %6647 = vmatmul.msk.f32.gmra.mxu1 %vm431_vm0, %v4813_v24  ;;  %v3087_v39 = vand.u32 2147483647, %v10109_v26  ;;  %vm3083_vm11 = vweird.f32 %v10109_v26  ;;  %v14682_v16 = vld [vmem:[#allocation21_spill] sm:$0xff] }
 0x271   : > { %v10215_v59 = vpop.eup %6992  ;;  %2730 = vadd.xlane.f32.xlu0 %v9990_v4  ;;  %v3082_v43 = vadd.f32 %v10151_v13, %v3081_v36  ;;  %4941 = vst.msk [vmem:[%s9294_s20 + $0x68] sm:$0xff] %vm431_vm0, %v4813_v24  ;;  %v10232_v30 = vpop.xlane.xlu2 %2667  ;;  %v10245_v14 = vsel %vm431_vm0, %v10194_v8, 0.0  ;;  %v14683_v42 = vld [vmem:[#allocation60_spill] sm:$0xff]  ;;  %vm10253_vm12 = vmor %vm3083_vm11, %vm3084_vm10  ;;  %v10259_v17 = vsel %vm431_vm0, %v10207_v0, 0.0  ;;  %v3090_v8 = vor.u32 1.1754944e-38, %v3089_v27  ;;  %v14694_v26 = vld [vmem:[#allocation102_spill] sm:$0xff] }
 0x272   : > { %v10223_v18 = vpop.eup %6994  ;;  %v3303_v20 = vmul.f32 %v10215_v59, %v10162_v47  ;;  %v10234_v4 = vpop.xlane.xlu1 %2067  ;;  %7002 = vrcp.f32 %v10232_v30  ;;  %v2328_v41 = vsub.f32 %v14683_v42, %v14682_v16  ;;  %v2528_v35 = vmul.f32 1.442695, %v2320_v54  ;;  %v14689_v0 = vld [vmem:[#allocation72_spill] sm:$0xff] }
 0x273   : > { %v3415_v15 = vmul.f32 %v10223_v18, %v10164_v40  ;;  %v10241_v36 = vpop.xlane.xlu0 %2091  ;;  %v10247_v24 = vpop.eup %6996  ;;  %7004 = vpow2.f32 %v2494_v11  ;;  %v3086_v11 = vsel %vm10253_vm12, %v10151_v13, %v3082_v43  ;;  %vm3088_vm13 = vcmp.eq.f32.partialorder %v3087_v39, 8.507059e+37 }
 0x274   : > { %14681 = vst [vmem:[#allocation95_spill] sm:$0xff] %v10247_v24  ;;  %v3304_v31 = vsub.f32 1.0, %v3303_v20  ;;  %v10261_v6 = vpop.eup %6998  ;;  %7006 = vpow2.f32 %v2496_v55  ;;  %v10266_v16 = vpop.f32.mrf.mxu3  ;;  %v2313_v46 = vsub.f32 %v14690_v45, %v14689_v0  ;;  %vm3308_vm14 = vweird.f32 %v10215_v59  ;;  %v14692_v45 = vld [vmem:[#allocation24_spill] sm:$0xff]  ;;  %v14693_v0 = vld [vmem:[#allocation63_spill] sm:$0xff] }
 0x275   : > { %14686 = vst [vmem:[#allocation53_spill] sm:$0xff] %v10261_v6  ;;  %v3416_v21 = vsub.f32 1.0, %v3415_v15  ;;  %v10268_v42 = vpop.eup %7000  ;;  %7008 = vpow2.f32 %v2512_v44  ;;  %v3091_v27 = vsel %vm3088_vm13, %v3090_v8, %v3086_v11  ;;  %v2544_v13 = vmul.f32 1.442695, %v2328_v41  ;;  %v10289_v41 = vpop.f32.mrf.mxu1 }
 0x276   : > { %14687 = vst [vmem:[#allocation89_spill] sm:$0xff] %v10266_v16  ;;  %v3305_v20 = vmul.f32 %v10215_v59, %v3304_v31  ;;  %v3313_v15 = vand.u32 2147483648, %v10162_v47  ;;  %v14691_v31 = vld [vmem:[#allocation96_spill] sm:$0xff]  ;;  %v2305_v39 = vsub.f32 %v14693_v0, %v14692_v45  ;;  %vm3307_vm15 = vweird.f32 %v10162_v47 }
 0x277   : > { %14688 = vst [vmem:[#allocation14_spill] sm:$0xff] %v10268_v42  ;;  %v3417_v55 = vmul.f32 %v10223_v18, %v3416_v21  ;;  %2754 = vadd.xlane.f32.xlu1 %v10007_v53  ;;  %v4805_v44 = vmul.f32 %v14691_v31, %v3091_v27  ;;  %v14695_v21 = vld [vmem:[#allocation65_spill] sm:$0xff]  ;;  %v3311_v53 = vand.u32 2147483647, %v10162_v47  ;;  %vm10295_vm1 = vmor %vm3307_vm15, %vm3308_vm14  ;;  %vm3420_vm2 = vweird.f32 %v10223_v18 }
 0x278   : > { %v3306_v43 = vadd.f32 %v10215_v59, %v3305_v20  ;;  %2781 = vadd.xlane.f32.xlu2 %v10023_v32  ;;  %v10280_v54 = vpop.eup %7002  ;;  %v2321_v16 = vsub.f32 %v14695_v21, %v14694_v26  ;;  %14696 = vst [vmem:[#allocation54_spill] sm:$0xff] %v10289_v41  ;;  %v3425_v20 = vand.u32 2147483648, %v10164_v40  ;;  %v2514_v45 = vmul.f32 1.442695, %v2313_v46  ;;  %v10320_v21 = vpop.f32.mrf.mxu2 }
 0x279   : > { %2805 = vadd.xlane.f32.xlu0 %v10038_v62  ;;  %v10291_v8 = vpop.eup %7004  ;;  %v3418_v11 = vadd.f32 %v10223_v18, %v3417_v55  ;;  %v3205_v47 = vmul.f32 %v10280_v54, %v10232_v30  ;;  %4933 = vst.msk [vmem:[%s9294_s20 + $0x28] sm:$0xff] %vm431_vm0, %v4805_v44  ;;  %6639 = vmatmul.msk.f32.gmra.mxu0 %vm431_vm0, %v4805_v44  ;;  %v10307_v62 = vpop.xlane.xlu2 %2115  ;;  %v3423_v55 = vand.u32 2147483647, %v10164_v40  ;;  %v3314_v41 = vor.u32 1.1754944e-38, %v3313_v15 }
 0x27a   : > { %v10309_v27 = vpop.xlane.xlu1 %2643  ;;  %v10311_v31 = vpop.eup %7006  ;;  %v3310_v26 = vsel %vm10295_vm1, %v10215_v59, %v3306_v43  ;;  %14700 = vst [vmem:[#allocation55_spill] sm:$0xff] %v10320_v21  ;;  %vm3419_vm3 = vweird.f32 %v10164_v40  ;;  %v2498_v46 = vmul.f32 1.442695, %v2305_v39  ;;  %v2530_v23 = vmul.f32 1.442695, %v2321_v16  ;;  %v14702_v40 = vld [vmem:[#allocation13_spill] sm:$0xff] }
 0x27b   : > { %14699 = vst [vmem:[#allocation97_spill] sm:$0xff] %v10311_v31  ;;  %7010 = vrcp.f32 %v10309_v27  ;;  %v10315_v0 = vpop.xlane.xlu0 %2715  ;;  %v10322_v44 = vpop.eup %7008  ;;  %v3206_v60 = vsub.f32 1.0, %v3205_v47  ;;  %vm3312_vm4 = vcmp.eq.f32.partialorder %v3311_v53, 8.507059e+37  ;;  %vm3421_vm5 = vmor %vm3419_vm3, %vm3420_vm2  ;;  %v3426_v29 = vor.u32 1.1754944e-38, %v3425_v20 }
 0x27c   : > { %14701 = vst [vmem:[#allocation91_spill] sm:$0xff] %v10322_v44  ;;  %7012 = vrcp.f32 %v10315_v0  ;;  %v3315_v43 = vsel %vm3312_vm4, %v3314_v41, %v3310_v26  ;;  %v3422_v32 = vsel %vm3421_vm5, %v10223_v18, %v3418_v11  ;;  %vm3424_vm6 = vcmp.eq.f32.partialorder %v3423_v55, 8.507059e+37  ;;  %v14706_v55 = vld [vmem:[#allocation69_spill] sm:$0xff] }
 0x27d   : > { %7014 = vpow2.f32 %v2528_v35  ;;  %v3207_v59 = vmul.f32 %v10280_v54, %v3206_v60  ;;  %v4821_v15 = vmul.f32 %v14702_v40, %v3315_v43  ;;  %v10332_v35 = vpop.f32.mrf.mxu3  ;;  %v10336_v16 = vsel %vm431_vm0, %v10247_v24, 0.0 }
 0x27e   : > { %7016 = vpow2.f32 %v2544_v13  ;;  %14703 = vst [vmem:[#allocation19_spill] sm:$0xff] %v10332_v35  ;;  %vm3210_vm7 = vweird.f32 %v10280_v54  ;;  %v3427_v60 = vsel %vm3424_vm6, %v3426_v29, %v3422_v32  ;;  %v3215_v13 = vand.u32 2147483648, %v10232_v30 }
 0x27f   : > { %2733 = vadd.xlane.f32.xlu1 %v10011_v25  ;;  %7018 = vpow2.f32 %v2514_v45  ;;  %v3208_v39 = vadd.f32 %v10280_v54, %v3207_v59  ;;  %4949 = vst.msk [vmem:[%s9294_s20 + $0xa8] sm:$0xff] %vm431_vm0, %v4821_v15  ;;  %6655 = vmatmul.msk.f32.gmra.mxu2 %vm431_vm0, %v4821_v15  ;;  %v14704_v25 = vld [vmem:[#allocation16_spill] sm:$0xff]  ;;  %v10351_v41 = vsel %vm431_vm0, %v10261_v6, 0.0  ;;  %vm3209_vm8 = vweird.f32 %v10232_v30  ;;  %v14708_v59 = vld [vmem:[#allocation70_spill] sm:$0xff] }
 0x280   : > { %2757 = vadd.xlane.f32.xlu2 %v10027_v2  ;;  %7020 = vpow2.f32 %v2498_v46  ;;  %v4829_v53 = vmul.f32 %v14704_v25, %v3427_v60  ;;  %v3213_v2 = vand.u32 2147483647, %v10232_v30  ;;  %v14705_v45 = vld [vmem:[#allocation28_spill] sm:$0xff]  ;;  %v14707_v46 = vld [vmem:[#allocation62_spill] sm:$0xff]  ;;  %vm10371_vm9 = vmor %vm3209_vm8, %vm3210_vm7  ;;  %v3216_v6 = vor.u32 1.1754944e-38, %v3215_v13 }
 0x281   : > { %v10341_v18 = vpop.eup %7010  ;;  %2784 = vadd.xlane.f32.xlu0 %v10042_v5  ;;  %7022 = vpow2.f32 %v2530_v23  ;;  %v10359_v20 = vpop.xlane.xlu2 %2691  ;;  %v2329_v26 = vsub.f32 %v14706_v55, %v14705_v45  ;;  %v2306_v23 = vsub.f32 %v14708_v59, %v14707_v46  ;;  %v14711_v15 = vld [vmem:[#allocation104_spill] sm:$0xff]  ;;  %v14713_v45 = vld [vmem:[#allocation105_spill] sm:$0xff]  ;;  %v14714_v55 = vld [vmem:[#allocation75_spill] sm:$0xff]  ;;  %v3103_v35 = vand.u32 2147483648, %v10309_v27 }
 0x282   : > { %v10353_v29 = vpop.eup %7012  ;;  %v3093_v11 = vmul.f32 %v10341_v18, %v10309_v27  ;;  %v10361_v47 = vpop.xlane.xlu1 %2139  ;;  %4957 = vst.msk [vmem:[%s9294_s20 + $0xe8] sm:$0xff] %vm431_vm0, %v4829_v53  ;;  %6663 = vmatmul.msk.f32.gmra.mxu3 %vm431_vm0, %v4829_v53  ;;  %7024 = vrcp.f32 %v10359_v20  ;;  %v14712_v60 = vld [vmem:[#allocation76_spill] sm:$0xff]  ;;  %v2314_v46 = vsub.f32 %v14714_v55, %v14713_v45  ;;  %v3212_v53 = vsel %vm10371_vm9, %v10280_v54, %v3208_v39  ;;  %v14717_v55 = vld [vmem:[#allocation98_spill] sm:$0xff] }
 0x283   : > { %v10363_v5 = vpop.eup %7014  ;;  %v3429_v43 = vmul.f32 %v10353_v29, %v10315_v0  ;;  %v5162_v32 = vpop.f32.mrf.mxu1  ;;  %v2322_v25 = vsub.f32 %v14712_v60, %v14711_v15  ;;  %vm3214_vm10 = vcmp.eq.f32.partialorder %v3213_v2, 8.507059e+37  ;;  %vm3098_vm11 = vweird.f32 %v10341_v18 }
 0x284   : > { %v10381_v40 = vpop.xlane.xlu0 %2670  ;;  %v3094_v59 = vsub.f32 1.0, %v3093_v11  ;;  %6104 = vst.msk [vmem:[%s10388_s29 + $0x40] sm:$0xff] %vm431_vm0, %v5162_v32  ;;  %v10395_v24 = vpop.eup %7016  ;;  %v3101_v30 = vand.u32 2147483647, %v10309_v27  ;;  %vm3434_vm12 = vweird.f32 %v10353_v29  ;;  %v3439_v13 = vand.u32 2147483648, %v10315_v0 }
 0x285   : > { %14715 = vst [vmem:[#allocation57_spill] sm:$0xff] %v10395_v24  ;;  %v3430_v21 = vsub.f32 1.0, %v3429_v43  ;;  %7026 = vrcp.f32 %v10381_v40  ;;  %v10399_v15 = vpop.f32.mrf.mxu2  ;;  %v10401_v11 = vpop.eup %7018  ;;  %v3217_v43 = vsel %vm3214_vm10, %v3216_v6, %v3212_v53  ;;  %vm3097_vm13 = vweird.f32 %v10309_v27 }
 0x286   : > { %14716 = vst [vmem:[#allocation21_spill] sm:$0xff] %v10399_v15  ;;  %v3095_v60 = vmul.f32 %v10341_v18, %v3094_v59  ;;  %v10406_v54 = vpop.eup %7020  ;;  %v3437_v45 = vand.u32 2147483647, %v10315_v0  ;;  %v4814_v59 = vmul.f32 %v14717_v55, %v3217_v43  ;;  %v2546_v15 = vmul.f32 1.442695, %v2329_v26  ;;  %vm10423_vm14 = vmor %vm3097_vm13, %vm3098_vm11  ;;  %v10430_v27 = vpop.f32.mrf.mxu3 }
 0x287   : > { %v3431_v39 = vmul.f32 %v10353_v29, %v3430_v21  ;;  %2808 = vadd.xlane.f32.xlu1 %v10201_v61  ;;  %v10412_v32 = vpop.eup %7022  ;;  %v3104_v61 = vor.u32 1.1754944e-38, %v3103_v35  ;;  %vm3433_vm15 = vweird.f32 %v10315_v0  ;;  %14720 = vst [vmem:[#allocation60_spill] sm:$0xff] %v10430_v27  ;;  %vm3102_vm1 = vcmp.eq.f32.partialorder %v3101_v30, 8.507059e+37 }
 0x288   : > { %v3096_v2 = vadd.f32 %v10341_v18, %v3095_v60  ;;  %2736 = vadd.xlane.f32.xlu2 %v10186_v1  ;;  %v10419_v21 = vpop.eup %7024  ;;  %v2500_v60 = vmul.f32 1.442695, %v2306_v23  ;;  %vm10434_vm2 = vmor %vm3433_vm15, %vm3434_vm12  ;;  %4942 = vst.msk [vmem:[%s9294_s20 + $0x70] sm:$0xff] %vm431_vm0, %v4814_v59  ;;  %6648 = vmatmul.msk.f32.gmra.mxu1 %vm431_vm0, %v4814_v59  ;;  %v2532_v30 = vmul.f32 1.442695, %v2322_v25  ;;  %vm3438_vm3 = vcmp.eq.f32.partialorder %v3437_v45, 8.507059e+37 }
 0x289   : > { %v3432_v53 = vadd.f32 %v10353_v29, %v3431_v39  ;;  %2760 = vadd.xlane.f32.xlu0 %v10192_v57  ;;  %v3317_v26 = vmul.f32 %v10419_v21, %v10359_v20  ;;  %v10445_v57 = vpop.xlane.xlu2 %2070  ;;  %v3440_v39 = vor.u32 1.1754944e-38, %v3439_v13  ;;  %v14727_v13 = vld [vmem:[#allocation80_spill] sm:$0xff]  ;;  %7028 = vpow2.f32 %v2546_v15  ;;  %v14729_v45 = vld [vmem:[#allocation101_spill] sm:$0xff] }
 0x28a   : > { %v10443_v0 = vpop.xlane.xlu1 %2094  ;;  %14724 = vst [vmem:[#allocation64_spill] sm:$0xff] %v10445_v57  ;;  %v3100_v35 = vsel %vm10423_vm14, %v10341_v18, %v3096_v2  ;;  %v5097_v43 = vpop.f32.mrf.mxu0  ;;  %v14726_v18 = vld [vmem:[#allocation78_spill] sm:$0xff]  ;;  %v2307_v2 = vsub.f32 %v14727_v13, %v9684_v34  ;;  %7030 = vpow2.f32 %v2500_v60  ;;  %v14730_v1 = vld [vmem:[#allocation81_spill] sm:$0xff]  ;;  %v2813_v34 = vsel %vm431_vm0, %v10291_v8, 0.0  ;;  %v14735_v13 = vld [vmem:[#allocation83_spill] sm:$0xff] }
 0x28b   : > { %14723 = vst [vmem:[#allocation72_spill] sm:$0xff] %v10443_v0  ;;  %v10450_v23 = vpop.eup %7026  ;;  %v3105_v27 = vsel %vm3102_vm1, %v3104_v61, %v3100_v35  ;;  %v3436_v59 = vsel %vm10434_vm2, %v10353_v29, %v3432_v53  ;;  %v2516_v0 = vmul.f32 1.442695, %v2314_v46  ;;  %v3318_v57 = vsub.f32 1.0, %v3317_v26  ;;  %v14728_v61 = vld [vmem:[#allocation99_spill] sm:$0xff] }
 0x28c   : > { %v10452_v55 = vpop.xlane.xlu0 %2118  ;;  %v3219_v6 = vmul.f32 %v10450_v23, %v10381_v40  ;;  %6096 = vst.msk [vmem:[%s10388_s29] sm:$0xff] %vm431_vm0, %v5097_v43  ;;  %v2330_v25 = vsub.f32 %v14726_v18, %v9636_v12  ;;  %v4806_v35 = vmul.f32 %v14728_v61, %v3105_v27  ;;  %v2315_v26 = vsub.f32 %v14730_v1, %v9693_v33 }
 0x28d   : > { %14725 = vst [vmem:[#allocation96_spill] sm:$0xff] %v10452_v55  ;;  %v3441_v55 = vsel %vm3438_vm3, %v3440_v39, %v3436_v59  ;;  %v3319_v29 = vmul.f32 %v10419_v21, %v3318_v57  ;;  %v10474_v12 = vpop.f32.mrf.mxu2  ;;  %v10480_v15 = vsel %vm431_vm0, %v10268_v42, 0.0  ;;  %7032 = vpow2.f32 %v2532_v30  ;;  %v14732_v30 = vld [vmem:[#allocation82_spill] sm:$0xff] }
 0x28e   : > { %v3220_v46 = vsub.f32 1.0, %v3219_v6  ;;  %v4830_v53 = vmul.f32 %v14729_v45, %v3441_v55  ;;  %4934 = vst.msk [vmem:[%s9294_s20 + $0x30] sm:$0xff] %vm431_vm0, %v4806_v35  ;;  %6640 = vmatmul.msk.f32.gmra.mxu0 %vm431_vm0, %v4806_v35  ;;  %vm3322_vm4 = vweird.f32 %v10419_v21  ;;  %7034 = vpow2.f32 %v2516_v0  ;;  %v14743_v0 = vld [vmem:[#allocation71_spill] sm:$0xff] }
 0x28f   : > { %2787 = vadd.xlane.f32.xlu1 %v10213_v51  ;;  %14731 = vst [vmem:[#allocation24_spill] sm:$0xff] %v10474_v12  ;;  %v3320_v27 = vadd.f32 %v10419_v21, %v3319_v29  ;;  %v2548_v51 = vmul.f32 1.442695, %v2330_v25  ;;  %v2502_v60 = vmul.f32 1.442695, %v2307_v2  ;;  %v3327_v57 = vand.u32 2147483648, %v10359_v20  ;;  %v10512_v18 = vpop.eup %7028 }
 0x290   : > { %v3221_v33 = vmul.f32 %v10450_v23, %v3220_v46  ;;  %2811 = vadd.xlane.f32.xlu2 %v10259_v17  ;;  %4958 = vst.msk [vmem:[%s9294_s20 + $0xf0] sm:$0xff] %vm431_vm0, %v4830_v53  ;;  %6664 = vmatmul.msk.f32.gmra.mxu3 %vm431_vm0, %v4830_v53  ;;  %v2323_v39 = vsub.f32 %v14732_v30, %v9755_v50  ;;  %vm3321_vm5 = vweird.f32 %v10359_v20  ;;  %v3325_v43 = vand.u32 2147483647, %v10359_v20  ;;  %v10522_v35 = vpop.eup %7030  ;;  %v14737_v29 = vld [vmem:[#allocation85_spill] sm:$0xff] }
 0x291   : > { %2739 = vadd.xlane.f32.xlu0 %v10205_v3  ;;  %v3229_v17 = vand.u32 2147483648, %v10381_v40  ;;  %v10498_v59 = vpop.xlane.xlu2 %2646  ;;  %vm10502_vm6 = vmor %vm3321_vm5, %vm3322_vm4  ;;  %vm3224_vm7 = vweird.f32 %v10450_v23  ;;  %v3227_v50 = vand.u32 2147483647, %v10381_v40  ;;  %v5292_v20 = vpop.f32.mrf.mxu3  ;;  %v2518_v25 = vmul.f32 1.442695, %v2315_v26  ;;  %14736 = vst [vmem:[#allocation63_spill] sm:$0xff] %v10522_v35 }
 0x292   : > { %v10496_v55 = vpop.xlane.xlu1 %2718  ;;  %v3222_v3 = vadd.f32 %v10450_v23, %v3221_v33  ;;  %v2331_v2 = vsub.f32 %v14735_v13, %v9809_v7  ;;  %6120 = vst.msk [vmem:[%s10388_s29 + $0xc0] sm:$0xff] %vm431_vm0, %v5292_v20  ;;  %v3324_v61 = vsel %vm10502_vm6, %v10419_v21, %v3320_v27  ;;  %v2316_v46 = vsub.f32 %v14737_v29, %v9882_v58  ;;  %v14740_v26 = vld [vmem:[#allocation84_spill] sm:$0xff] }
 0x293   : > { %7036 = vrcp.f32 %v10496_v55  ;;  %v3328_v45 = vor.u32 1.1754944e-38, %v3327_v57  ;;  %vm3223_vm8 = vweird.f32 %v10381_v40  ;;  %v10528_v7 = vpop.eup %7032  ;;  %v2534_v53 = vmul.f32 1.442695, %v2323_v39  ;;  %v14741_v57 = vld [vmem:[#allocation100_spill] sm:$0xff] }
 0x294   : > { %v10510_v6 = vpop.xlane.xlu0 %2694  ;;  %7038 = vrcp.f32 %v10498_v59  ;;  %14738 = vst [vmem:[#allocation102_spill] sm:$0xff] %v10528_v7  ;;  %vm3326_vm9 = vcmp.eq.f32.partialorder %v3325_v43, 8.507059e+37  ;;  %vm3225_vm10 = vmor %vm3223_vm8, %vm3224_vm7  ;;  %v3230_v21 = vor.u32 1.1754944e-38, %v3229_v17  ;;  %v10532_v1 = vpop.eup %7034  ;;  %v2308_v58 = vsub.f32 %v14740_v26, %v9884_v9  ;;  %v14742_v17 = vld [vmem:[#allocation86_spill] sm:$0xff] }
 0x295   : > { %7040 = vrcp.f32 %v10510_v6  ;;  %14739 = vst [vmem:[#allocation65_spill] sm:$0xff] %v10532_v1  ;;  %vm3228_vm11 = vcmp.eq.f32.partialorder %v3227_v50, 8.507059e+37  ;;  %v3329_v40 = vsel %vm3326_vm9, %v3328_v45, %v3324_v61  ;;  %v3226_v33 = vsel %vm3225_vm10, %v10450_v23, %v3222_v3 }
 0x296   : > { %7042 = vpow2.f32 %v2548_v51  ;;  %v5165_v27 = vpop.f32.mrf.mxu1  ;;  %v2550_v51 = vmul.f32 1.442695, %v2331_v2  ;;  %v4822_v30 = vmul.f32 %v14741_v57, %v3329_v40  ;;  %v3231_v39 = vsel %vm3228_vm11, %v3230_v21, %v3226_v33 }
 0x297   : > { %2763 = vadd.xlane.f32.xlu1 %v10245_v14  ;;  %7044 = vpow2.f32 %v2502_v60  ;;  %6105 = vst.msk [vmem:[%s10388_s29 + $0x48] sm:$0xff] %vm431_vm0, %v5165_v27  ;;  %v2520_v9 = vmul.f32 1.442695, %v2316_v46  ;;  %v2324_v14 = vsub.f32 %v14742_v17, %v9899_v48  ;;  %v4815_v23 = vmul.f32 %v14743_v0, %v3231_v39  ;;  %v14745_v46 = vld [vmem:[#allocation41_spill] sm:$0xff] }
 0x298   : > { %2790 = vadd.xlane.f32.xlu2 %v10351_v41  ;;  %7046 = vpow2.f32 %v2518_v25  ;;  %v5227_v60 = vpop.f32.mrf.mxu2  ;;  %4950 = vst.msk [vmem:[%s9294_s20 + $0xb0] sm:$0xff] %vm431_vm0, %v4822_v30  ;;  %6656 = vmatmul.msk.f32.gmra.mxu2 %vm431_vm0, %v4822_v30  ;;  %v10558_v48 = vsel %vm431_vm0, %v10311_v31, 0.0  ;;  %v2504_v25 = vmul.f32 1.442695, %v2308_v58  ;;  %v2864_v61 = vsel %vm431_vm0, %v10363_v5, 0.0 }
 0x299   : > { %v10542_v43 = vpop.eup %7036  ;;  %2814 = vadd.xlane.f32.xlu0 %v2813_v34  ;;  %7048 = vpow2.f32 %v2534_v53  ;;  %v10562_v34 = vsel %vm431_vm0, %v10322_v44, 0.0  ;;  %4943 = vst.msk [vmem:[%s9294_s20 + $0x78] sm:$0xff] %vm431_vm0, %v4815_v23  ;;  %6649 = vmatmul.msk.f32.gmra.mxu1 %vm431_vm0, %v4815_v23  ;;  %v10572_v2 = vpop.xlane.xlu2 %2142  ;;  %v2332_v45 = vsub.f32 %v14745_v46, %v10019_v38  ;;  %v10586_v58 = vmul.f32 1.442695, %v2324_v14 }
 0x29a   : > { %v10547_v3 = vpop.eup %7038  ;;  %v3443_v50 = vmul.f32 %v10542_v43, %v10496_v55  ;;  %v10554_v41 = vpop.xlane.xlu1 %2745  ;;  %6112 = vst.msk [vmem:[%s10388_s29 + $0x80] sm:$0xff] %vm431_vm0, %v5227_v60  ;;  %v2888_v40 = vsel %vm431_vm0, %v10395_v24, 0.0  ;;  %v3451_v38 = vand.u32 2147483647, %v10496_v55  ;;  %v3453_v57 = vand.u32 2147483648, %v10496_v55 }
 0x29b   : > { %v10564_v20 = vpop.eup %7040  ;;  %v3107_v13 = vmul.f32 %v10547_v3, %v10498_v59  ;;  %7050 = vrcp.f32 %v10554_v41  ;;  %vm3448_vm12 = vweird.f32 %v10542_v43  ;;  %v10604_v23 = vmul.f32 1.442695, %v2332_v45 }
 0x29c   : > { %v10576_v29 = vpop.eup %7042  ;;  %7052 = vpow2.f32 %v2550_v51  ;;  %v3444_v53 = vsub.f32 1.0, %v3443_v50  ;;  %v3331_v21 = vmul.f32 %v10564_v20, %v10510_v6  ;;  %v10584_v26 = vpop.xlane.xlu0 %2145  ;;  %vm3112_vm13 = vweird.f32 %v10547_v3 }
 0x29d   : > { %14744 = vst [vmem:[#allocation13_spill] sm:$0xff] %v10576_v29  ;;  %7054 = vpow2.f32 %v2520_v9  ;;  %v3108_v27 = vsub.f32 1.0, %v3107_v13  ;;  %v10590_v33 = vpop.eup %7044  ;;  %v14748_v9 = vld [vmem:[#allocation90_spill] sm:$0xff]  ;;  %vm3447_vm14 = vweird.f32 %v10496_v55  ;;  %vm3111_vm15 = vweird.f32 %v10498_v59 }
 0x29e   : > { %14746 = vst [vmem:[#allocation16_spill] sm:$0xff] %v10590_v33  ;;  %v3445_v51 = vmul.f32 %v10542_v43, %v3444_v53  ;;  %v3332_v30 = vsub.f32 1.0, %v3331_v21  ;;  %v10595_v39 = vpop.eup %7046  ;;  %7056 = vpow2.f32 %v2504_v25  ;;  %vm10620_vm1 = vmor %vm3447_vm14, %vm3448_vm12  ;;  %vm10624_vm2 = vcmp.eq.f32.partialorder %v3451_v38, 8.507059e+37 }
 0x29f   : > { %14747 = vst [vmem:[#allocation28_spill] sm:$0xff] %v10595_v39  ;;  %v3109_v14 = vmul.f32 %v10547_v3, %v3108_v27  ;;  %2742 = vadd.xlane.f32.xlu1 %v10336_v16  ;;  %v10602_v0 = vpop.eup %7048  ;;  %v3117_v16 = vand.u32 2147483648, %v10498_v59  ;;  %v3454_v55 = vor.u32 1.1754944e-38, %v3453_v57  ;;  %v3115_v53 = vand.u32 2147483647, %v10498_v59  ;;  %vm10637_vm3 = vmor %vm3111_vm15, %vm3112_vm13 }
 0x2a0   : > { %14749 = vst [vmem:[#allocation69_spill] sm:$0xff] %v10602_v0  ;;  %v3446_v60 = vadd.f32 %v10542_v43, %v3445_v51  ;;  %v3333_v50 = vmul.f32 %v10564_v20, %v3332_v30  ;;  %2766 = vadd.xlane.f32.xlu2 %v10480_v15  ;;  %vm3336_vm4 = vweird.f32 %v10564_v20  ;;  %v3341_v57 = vand.u32 2147483648, %v10510_v6  ;;  %v14762_v15 = vld [vmem:[#allocation25_spill] sm:$0xff] }
 0x2a1   : > { %v10610_v25 = vpop.eup %7050  ;;  %v3110_v13 = vadd.f32 %v10547_v3, %v3109_v14  ;;  %2865 = vadd.xlane.f32.xlu0 %v2864_v61  ;;  %v10645_v59 = vpop.xlane.xlu2 %2169  ;;  %v3339_v30 = vand.u32 2147483647, %v10510_v6  ;;  %v3118_v44 = vor.u32 1.1754944e-38, %v3117_v16  ;;  %vm3335_vm5 = vweird.f32 %v10510_v6 }
 0x2a2   : > { %v10616_v46 = vpop.eup %7052  ;;  %v3569_v21 = vmul.f32 %v10610_v25, %v10554_v41  ;;  %v10631_v27 = vpop.xlane.xlu1 %2769  ;;  %v3334_v38 = vadd.f32 %v10564_v20, %v3333_v50  ;;  %v3450_v50 = vsel %vm10620_vm1, %v10542_v43, %v3446_v60  ;;  %v3579_v24 = vand.u32 2147483648, %v10554_v41  ;;  %vm10663_vm7 = vmor %vm3335_vm5, %vm3336_vm4 }
 0x2a3   : > { %14750 = vst [vmem:[#allocation62_spill] sm:$0xff] %v10616_v46  ;;  %v10633_v61 = vpop.eup %7054  ;;  %7058 = vrcp.f32 %v10631_v27  ;;  %v3114_v12 = vsel %vm10637_vm3, %v10547_v3, %v3110_v13  ;;  %vm3116_vm6 = vcmp.eq.f32.partialorder %v3115_v53, 8.507059e+37  ;;  %vm3574_vm8 = vweird.f32 %v10610_v25 }
 0x2a4   : > { %14755 = vst [vmem:[#allocation70_spill] sm:$0xff] %v10633_v61  ;;  %v3570_v14 = vsub.f32 1.0, %v3569_v21  ;;  %v10648_v17 = vpop.xlane.xlu0 %2721  ;;  %v10656_v42 = vpop.eup %7056  ;;  %v3577_v43 = vand.u32 2147483647, %v10554_v41  ;;  %v3342_v6 = vor.u32 1.1754944e-38, %v3341_v57  ;;  %v3119_v60 = vsel %vm3116_vm6, %v3118_v44, %v3114_v12  ;;  %v14761_v12 = vld [vmem:[#allocation56_spill] sm:$0xff] }
 0x2a5   : > { %14758 = vst [vmem:[#allocation104_spill] sm:$0xff] %v10656_v42  ;;  %v5100_v31 = vpop.f32.mrf.mxu0  ;;  %7060 = vrcp.f32 %v10648_v17  ;;  %v3455_v13 = vsel %vm10624_vm2, %v3454_v55, %v3450_v50  ;;  %v3338_v16 = vsel %vm10663_vm7, %v10564_v20, %v3334_v38  ;;  %vm3340_vm9 = vcmp.eq.f32.partialorder %v3339_v30, 8.507059e+37  ;;  %v14766_v50 = vld [vmem:[#allocation61_spill] sm:$0xff] }
 0x2a6   : > { %v3571_v3 = vmul.f32 %v10610_v25, %v3570_v14  ;;  %6097 = vst.msk [vmem:[%s10388_s29 + $0x8] sm:$0xff] %vm431_vm0, %v5100_v31  ;;  %7062 = vpow2.f32 %v10586_v58  ;;  %vm3573_vm10 = vweird.f32 %v10554_v41  ;;  %v3580_v44 = vor.u32 1.1754944e-38, %v3579_v24  ;;  %v14763_v58 = vld [vmem:[#allocation22_spill] sm:$0xff]  ;;  %v14765_v14 = vld [vmem:[#allocation12_spill] sm:$0xff] }
 0x2a7   : > { %2889 = vadd.xlane.f32.xlu1 %v2888_v40  ;;  %vm3575_vm11 = vmor %vm3573_vm10, %vm3574_vm8  ;;  %v4807_v40 = vmul.f32 %v14761_v12, %v3119_v60  ;;  %v4831_v55 = vmul.f32 %v14762_v15, %v3455_v13  ;;  %v3343_v53 = vsel %vm3340_vm9, %v3342_v6, %v3338_v16  ;;  %vm3578_vm12 = vcmp.eq.f32.partialorder %v3577_v43, 8.507059e+37  ;;  %v14767_v6 = vld [vmem:[#allocation11_spill] sm:$0xff] }
 0x2a8   : > { %v3572_v45 = vadd.f32 %v10610_v25, %v3571_v3  ;;  %2817 = vadd.xlane.f32.xlu2 %v10558_v48  ;;  %v4823_v48 = vmul.f32 %v14763_v58, %v3343_v53  ;;  %7064 = vpow2.f32 %v10604_v23  ;;  %v14764_v24 = vsub.f32 %v14748_v9, %v10034_v28  ;;  %v7436_v53 = vld [vmem:[%s7710_s28 + $0x378] sm:$0xff] }
 0x2a9   : > { %v10681_v31 = vpop.eup %7058  ;;  %2841 = vadd.xlane.f32.xlu0 %v10562_v34  ;;  %4935 = vst.msk [vmem:[%s9294_s20 + $0x38] sm:$0xff] %vm431_vm0, %v4807_v40  ;;  %6641 = vmatmul.msk.f32.gmra.mxu0 %vm431_vm0, %v4807_v40  ;;  %v2867_v30 = vsel %vm431_vm0, %v10412_v32, 0.0  ;;  %v2325_v23 = vsub.f32 %v14765_v14, %v10102_v56  ;;  %v2317_v60 = vsub.f32 %v14767_v6, %v10104_v52  ;;  %v3691_v13 = vand.u32 2147483648, %v10631_v27 }
 0x2aa   : > { %v3576_v20 = vsel %vm3575_vm11, %v10610_v25, %v3572_v45  ;;  %v3681_v41 = vmul.f32 %v10681_v31, %v10631_v27  ;;  %v10690_v51 = vpop.xlane.xlu1 %2148  ;;  %v2506_v57 = vmul.f32 1.442695, %v14764_v24  ;;  %6665 = vmatmul.msk.f32.gmra.mxu3 %vm431_vm0, %v4831_v55  ;;  %v10702_v25 = vpop.xlane.xlu2 %2793  ;;  %4959 = vst.msk [vmem:[%s9294_s20 + $0xf8] sm:$0xff] %vm431_vm0, %v4831_v55  ;;  %6657 = vmatmul.msk.f32.gmra.mxu2 %vm431_vm0, %v4823_v48  ;;  %v2192_v16 = vsel %vm431_vm0, %v9875_v37, -inf }
 0x2ab   : > { %v10692_v38 = vpop.eup %7060  ;;  %v3581_v34 = vsel %vm3578_vm12, %v3580_v44, %v3576_v20  ;;  %v5295_v3 = vpop.f32.mrf.mxu3  ;;  %4951 = vst.msk [vmem:[%s9294_s20 + $0xb8] sm:$0xff] %vm431_vm0, %v4823_v48  ;;  %7066 = vrcp.f32 %v10702_v25  ;;  %vm3686_vm13 = vweird.f32 %v10681_v31  ;;  %v3689_v52 = vand.u32 2147483647, %v10631_v27 }
 0x2ac   : > { %v4840_v28 = vmul.f32 %v14766_v50, %v3581_v34  ;;  %v3682_v9 = vsub.f32 1.0, %v3681_v41  ;;  %v3457_v21 = vmul.f32 %v10692_v38, %v10648_v17  ;;  %v10714_v43 = vpop.xlane.xlu0 %2172  ;;  %v5168_v56 = vpop.f32.mrf.mxu1  ;;  %7068 = vpow2.f32 %v2506_v57  ;;  %6121 = vst.msk [vmem:[%s10388_s29 + $0xc8] sm:$0xff] %vm431_vm0, %v5295_v3  ;;  %v14770_v34 = vld [vmem:[#allocation15_spill] sm:$0xff]  ;;  %v7437_v50 = vld [vmem:[%s7710_s28 + $0x370] sm:$0xff] }
 0x2ad   : > { %v10724_v45 = vpop.eup %7062  ;;  %vm3685_vm14 = vweird.f32 %v10631_v27  ;;  %v3467_v40 = vand.u32 2147483648, %v10648_v17  ;;  %v2891_v55 = vsel %vm431_vm0, %v10512_v18, 0.0  ;;  %vm3462_vm15 = vweird.f32 %v10692_v38  ;;  %6106 = vst.msk [vmem:[%s10388_s29 + $0x50] sm:$0xff] %vm431_vm0, %v5168_v56 }
 0x2ae   : > { %14768 = vst [vmem:[#allocation76_spill] sm:$0xff] %v10724_v45  ;;  %v3683_v44 = vmul.f32 %v10681_v31, %v3682_v9  ;;  %v3458_v12 = vsub.f32 1.0, %v3457_v21  ;;  %6674 = vmatmul.msk.f32.vlgmr.msrb.gmra.mxu1 %vm431_vm0, %v4840_v28  ;;  %v5230_v15 = vpop.f32.mrf.mxu2  ;;  %v3465_v58 = vand.u32 2147483647, %v10648_v17  ;;  %v10745_v48 = vpop.eup %7064  ;;  %v2538_v24 = vmul.f32 1.442695, %v2325_v23  ;;  %vm3687_vm1 = vmor %vm3685_vm14, %vm3686_vm13 }
 0x2af   : > { %4968 = vst.msk [vmem:[%s9294_s20 + $0x140] sm:$0xff] %vm431_vm0, %v4840_v28  ;;  %2868 = vadd.xlane.f32.xlu1 %v2867_v30  ;;  %5933 = vmatpush.msrb.mxu1 %v7436_v53  ;;  %v2522_v57 = vmul.f32 1.442695, %v2317_v60  ;;  %v2333_v30 = vsub.f32 %v14770_v34, %v10169_v22  ;;  %v3692_v14 = vor.u32 1.1754944e-38, %v3691_v13  ;;  %vm3690_vm2 = vcmp.eq.f32.partialorder %v3689_v52, 8.507059e+37  ;;  %v14773_v60 = vld [vmem:[#allocation27_spill] sm:$0xff] }
 0x2b0   : > { %v3684_v20 = vadd.f32 %v10681_v31, %v3683_v44  ;;  %v3459_v41 = vmul.f32 %v10692_v38, %v3458_v12  ;;  %2892 = vadd.xlane.f32.xlu2 %v2891_v55  ;;  %14769 = vst [vmem:[#allocation105_spill] sm:$0xff] %v10745_v48  ;;  %vm3461_vm3 = vweird.f32 %v10648_v17  ;;  %v3468_v3 = vor.u32 1.1754944e-38, %v3467_v40  ;;  %v14775_v40 = vld [vmem:[#allocation18_spill] sm:$0xff]  ;;  %v7439_v53 = vld [vmem:[%s7710_s28 + $0x360] sm:$0xff] }
 0x2b1   : > { %6113 = vst.msk [vmem:[%s10388_s29 + $0x88] sm:$0xff] %vm431_vm0, %v5230_v15  ;;  %2193 = vmax.xlane.f32.xlu0 %v2192_v16  ;;  %5934 = vmatpush.msrb.mxu1 %v7437_v50  ;;  %v10761_v9 = vpop.eup %7066  ;;  %vm10765_vm4 = vmor %vm3461_vm3, %vm3462_vm15  ;;  %v2216_v17 = vsel %vm431_vm0, %v9823_v10, -inf  ;;  %vm3466_vm5 = vcmp.eq.f32.partialorder %v3465_v58, 8.507059e+37  ;;  %v2554_v12 = vmul.f32 1.442695, %v2333_v30  ;;  %v2310_v15 = vsub.f32 %v14775_v40, %v10234_v4  ;;  %v14778_v40 = vld [vmem:[#allocation20_spill] sm:$0xff] }
 0x2b2   : > { %v3688_v28 = vsel %vm3687_vm1, %v10681_v31, %v3684_v20  ;;  %v3460_v23 = vadd.f32 %v10692_v38, %v3459_v41  ;;  %v10759_v22 = vpop.xlane.xlu1 %2724  ;;  %v10769_v6 = vpop.xlane.xlu2 %2772  ;;  %v7438_v31 = vld [vmem:[%s7710_s28 + $0x368] sm:$0xff]  ;;  %v3793_v16 = vmul.f32 %v10761_v9, %v10702_v25  ;;  %v14777_v41 = vld [vmem:[#allocation26_spill] sm:$0xff]  ;;  %v3803_v4 = vand.u32 2147483648, %v10702_v25 }
 0x2b3   : > { %v3693_v27 = vsel %vm3690_vm2, %v3692_v14, %v3688_v28  ;;  %7070 = vrcp.f32 %v10759_v22  ;;  %5935 = vmatpush.msrb.mxu1 %v7438_v31  ;;  %v10783_v52 = vpop.eup %7068  ;;  %v2819_v14 = vsel %vm431_vm0, %v10406_v54, 0.0  ;;  %vm3798_vm6 = vweird.f32 %v10761_v9 }
 0x2b4   : > { %v4848_v13 = vmul.f32 %v14773_v60, %v3693_v27  ;;  %v3464_v56 = vsel %vm10765_vm4, %v10692_v38, %v3460_v23  ;;  %v10781_v44 = vpop.xlane.xlu0 %2796  ;;  %14774 = vst [vmem:[#allocation75_spill] sm:$0xff] %v10783_v52  ;;  %7072 = vrcp.f32 %v10769_v6  ;;  %v14776_v38 = vld [vmem:[#allocation17_spill] sm:$0xff]  ;;  %v3794_v34 = vsub.f32 1.0, %v3793_v16  ;;  %v7443_v16 = vld [vmem:[%s7710_s28 + $0x358] sm:$0xff] }
 0x2b5   : > { %v3469_v55 = vsel %vm3466_vm5, %v3468_v3, %v3464_v56  ;;  %5936 = vmatpush.msrb.mxu1 %v7439_v53  ;;  %7074 = vpow2.f32 %v2538_v24  ;;  %v2318_v20 = vsub.f32 %v14776_v38, %v10241_v36  ;;  %v2843_v36 = vsel %vm431_vm0, %v10401_v11, 0.0  ;;  %v7440_v24 = vld [vmem:[%s7710_s28 + $0x3b8] sm:$0xff]  ;;  %v7442_v56 = vld [vmem:[%s7710_s28 + $0x3b0] sm:$0xff] }
 0x2b6   : > { %4976 = vst.msk [vmem:[%s9294_s20 + $0x180] sm:$0xff] %vm431_vm0, %v4848_v13  ;;  %v4832_v58 = vmul.f32 %v14777_v41, %v3469_v55  ;;  %6682 = vmatmul.msk.f32.vlgmr.msrb.gmra.mxu2 %vm431_vm0, %v4848_v13  ;;  %7076 = vrcp.f32 %v10781_v44  ;;  %v5103_v30 = vpop.f32.mrf.mxu0  ;;  %v3795_v50 = vmul.f32 %v10761_v9, %v3794_v34  ;;  %v3801_v28 = vand.u32 2147483647, %v10702_v25  ;;  %v7441_v3 = vld [vmem:[%s7710_s28 + $0x338] sm:$0xff]  ;;  %v14779_v55 = vld [vmem:[#allocation23_spill] sm:$0xff] }
 0x2b7   : > { %2217 = vmax.xlane.f32.xlu1 %v2216_v17  ;;  %5998 = vmatpush.msrb.mxu2 %v7440_v24  ;;  %7078 = vpow2.f32 %v2522_v57  ;;  %v10810_v27 = vmul.f32 1.442695, %v2310_v15  ;;  %6098 = vst.msk [vmem:[%s10388_s29 + $0x10] sm:$0xff] %vm431_vm0, %v5103_v30  ;;  %v2894_v57 = vsel %vm431_vm0, %v10576_v29, 0.0  ;;  %v2870_v21 = vsel %vm431_vm0, %v10528_v7, 0.0  ;;  %v7445_v24 = vld [vmem:[%s7710_s28 + $0x3a8] sm:$0xff] }
 0x2b8   : > { %4960 = vst.msk [vmem:[%s9294_s20 + $0x100] sm:$0xff] %vm431_vm0, %v4832_v58  ;;  %2820 = vadd.xlane.f32.xlu2 %v2819_v14  ;;  %6666 = vmatmul.msk.f32.vlgmr.msrb.gmra.mxu0 %vm431_vm0, %v4832_v58  ;;  %7080 = vpow2.f32 %v2554_v12  ;;  %v10819_v17 = vmul.f32 1.442695, %v2318_v20  ;;  %v3796_v31 = vadd.f32 %v10761_v9, %v3795_v50  ;;  %vm3797_vm7 = vweird.f32 %v10702_v25  ;;  %v7444_v58 = vld [vmem:[%s7710_s28 + $0x330] sm:$0xff] }
 0x2b9   : > { %v10808_v23 = vpop.eup %7070  ;;  %2844 = vadd.xlane.f32.xlu0 %v2843_v36  ;;  %5868 = vmatpush.msrb.mxu0 %v7441_v3  ;;  %v2326_v15 = vsub.f32 %v14778_v40, %v10307_v62  ;;  %vm10837_vm8 = vmor %vm3797_vm7, %vm3798_vm6  ;;  %v3804_v38 = vor.u32 1.1754944e-38, %v3803_v4  ;;  %v2195_v41 = vsel %vm431_vm0, %v9956_v49, -inf  ;;  %vm3802_vm9 = vcmp.eq.f32.partialorder %v3801_v28, 8.507059e+37  ;;  %v7446_v50 = vld [vmem:[%s7710_s28 + $0x350] sm:$0xff]  ;;  %v7456_v62 = vld [vmem:[%s7710_s28 + $0x308] sm:$0xff] }
 0x2ba   : > { %v3471_v60 = vmul.f32 %v10808_v23, %v10759_v22  ;;  %v10825_v13 = vpop.xlane.xlu1 %2175  ;;  %5999 = vmatpush.msrb.mxu2 %v7442_v56  ;;  %5937 = vmatpush.msrb.mxu1 %v7443_v16  ;;  %v10829_v12 = vpop.eup %7072  ;;  %v3800_v30 = vsel %vm10837_vm8, %v10761_v9, %v3796_v31  ;;  %vm3476_vm10 = vweird.f32 %v10808_v23  ;;  %v3479_v9 = vand.u32 2147483647, %v10759_v22  ;;  %v7447_v31 = vld [vmem:[%s7710_s28 + $0x328] sm:$0xff]  ;;  %v7457_v40 = vld [vmem:[%s7710_s28 + $0x3f0] sm:$0xff] }
 0x2bb   : > { %v10841_v20 = vpop.xlane.xlu2 %2151  ;;  %5869 = vmatpush.msrb.mxu0 %v7444_v58  ;;  %v10846_v34 = vpop.eup %7074  ;;  %v3695_v14 = vmul.f32 %v10829_v12, %v10769_v6  ;;  %v3805_v56 = vsel %vm3802_vm9, %v3804_v38, %v3800_v30  ;;  %v3481_v28 = vand.u32 2147483648, %v10759_v22  ;;  %v7448_v30 = vld [vmem:[%s7710_s28 + $0x3a0] sm:$0xff]  ;;  %vm3699_vm11 = vweird.f32 %v10769_v6 }
 0x2bc   : > { %14782 = vst [vmem:[#allocation98_spill] sm:$0xff] %v10846_v34  ;;  %v3472_v36 = vsub.f32 1.0, %v3471_v60  ;;  %v10853_v4 = vpop.xlane.xlu0 %2154  ;;  %6000 = vmatpush.msrb.mxu2 %v7445_v24  ;;  %5938 = vmatpush.msrb.mxu1 %v7446_v50  ;;  %v10857_v3 = vpop.eup %7076  ;;  %v4856_v16 = vmul.f32 %v9504_v19, %v3805_v56  ;;  %v7449_v24 = vld [vmem:[%s7710_s28 + $0x348] sm:$0xff]  ;;  %v3705_v53 = vand.u32 2147483648, %v10769_v6  ;;  %vm3475_vm12 = vweird.f32 %v10759_v22  ;;  %v7450_v19 = vld [vmem:[%s7710_s28 + $0x320] sm:$0xff] }
 0x2bd   : > { %5870 = vmatpush.msrb.mxu0 %v7447_v31  ;;  %v10863_v60 = vpop.eup %7078  ;;  %v3696_v25 = vsub.f32 1.0, %v3695_v14  ;;  %v3807_v38 = vmul.f32 %v10857_v3, %v10781_v44  ;;  %v3703_v31 = vand.u32 2147483647, %v10769_v6  ;;  %vm3700_vm13 = vweird.f32 %v10829_v12  ;;  %vm10886_vm14 = vmor %vm3475_vm12, %vm3476_vm10  ;;  %v7454_v6 = vld [vmem:[%s7710_s28 + $0x310] sm:$0xff] }
 0x2be   : > { %14783 = vst [vmem:[#allocation78_spill] sm:$0xff] %v10863_v60  ;;  %v3473_v58 = vmul.f32 %v10808_v23, %v3472_v36  ;;  %6001 = vmatpush.msrb.mxu2 %v7448_v30  ;;  %5939 = vmatpush.msrb.mxu1 %v7449_v24  ;;  %v10871_v50 = vpop.eup %7080  ;;  %vm10890_vm15 = vcmp.eq.f32.partialorder %v3479_v9, 8.507059e+37  ;;  %v3815_v30 = vand.u32 2147483647, %v10781_v44  ;;  %vm3812_vm1 = vweird.f32 %v10857_v3  ;;  %v7452_v24 = vld [vmem:[%s7710_s28 + $0x3f8] sm:$0xff]  ;;  %vm10911_vm2 = vmor %vm3699_vm11, %vm3700_vm13 }
 0x2bf   : > { %14784 = vst [vmem:[#allocation80_spill] sm:$0xff] %v10871_v50  ;;  %2871 = vadd.xlane.f32.xlu1 %v2870_v21  ;;  %5871 = vmatpush.msrb.mxu0 %v7450_v19  ;;  %v3697_v14 = vmul.f32 %v10829_v12, %v3696_v25  ;;  %v3808_v56 = vsub.f32 1.0, %v3807_v38  ;;  %v3482_v25 = vor.u32 1.1754944e-38, %v3481_v28  ;;  %v7451_v38 = vld [vmem:[%s7710_s28 + $0x318] sm:$0xff]  ;;  %vm10915_vm3 = vcmp.eq.f32.partialorder %v3703_v31, 8.507059e+37  ;;  %v14793_v21 = vld [vmem:[#allocation29_spill] sm:$0xff] }
 0x2c0   : > { %4984 = vst.msk [vmem:[%s9294_s20 + $0x1c0] sm:$0xff] %vm431_vm0, %v4856_v16  ;;  %v3474_v36 = vadd.f32 %v10808_v23, %v3473_v58  ;;  %6690 = vmatmul.msk.f32.vlgmr.msrb.gmra.mxu3 %vm431_vm0, %v4856_v16  ;;  %2895 = vadd.xlane.f32.xlu2 %v2894_v57  ;;  %v3817_v58 = vand.u32 2147483648, %v10781_v44  ;;  %vm3811_vm4 = vweird.f32 %v10781_v44  ;;  %vm3816_vm6 = vcmp.eq.f32.partialorder %v3815_v30, 8.507059e+37 }
 0x2c1   : > { %2196 = vmax.xlane.f32.xlu0 %v2195_v41  ;;  %5872 = vmatpush.msrb.mxu0 %v7451_v38  ;;  %v3698_v57 = vadd.f32 %v10829_v12, %v3697_v14  ;;  %v3809_v16 = vmul.f32 %v10857_v3, %v3808_v56  ;;  %v7453_v41 = vld [vmem:[%s7710_s28 + $0x398] sm:$0xff]  ;;  %v3706_v56 = vor.u32 1.1754944e-38, %v3705_v53  ;;  %v2219_v38 = vsel %vm431_vm0, %v9911_v63, -inf  ;;  %vm10944_vm5 = vmor %vm3811_vm4, %vm3812_vm1 }
 0x2c2   : > { %v10900_v9 = vpop.xlane.xlu1 %2157  ;;  %v3478_v28 = vsel %vm10886_vm14, %v10808_v23, %v3474_v36  ;;  %6063 = vmatpush.msrb.mxu3 %v7452_v24  ;;  %6002 = vmatpush.msrb.mxu2 %v7453_v41  ;;  %v5233_v22 = vpop.f32.mrf.mxu2  ;;  %v7455_v24 = vld [vmem:[%s7710_s28 + $0x340] sm:$0xff]  ;;  %7082 = vpow2.f32 %v10810_v27  ;;  %v14804_v27 = vld [vmem:[#allocation33_spill] sm:$0xff] }
 0x2c3   : > { %v10919_v23 = vpop.xlane.xlu2 %2178  ;;  %v3483_v36 = vsel %vm10890_vm15, %v3482_v25, %v3478_v28  ;;  %5873 = vmatpush.msrb.mxu0 %v7454_v6  ;;  %5940 = vmatpush.msrb.mxu1 %v7455_v24  ;;  %v3810_v31 = vadd.f32 %v10857_v3, %v3809_v16  ;;  %6114 = vst.msk [vmem:[%s10388_s29 + $0x90] sm:$0xff] %vm431_vm0, %v5233_v22  ;;  %v5298_v53 = vpop.f32.mrf.mxu3  ;;  %v2540_v6 = vmul.f32 1.442695, %v2326_v15  ;;  %v14794_v16 = vld [vmem:[#allocation72_spill] sm:$0xff]  ;;  %v14795_v24 = vld [vmem:[#allocation58_spill] sm:$0xff]  ;;  %v3818_v22 = vor.u32 1.1754944e-38, %v3817_v58 }
 0x2c4   : > { %v10931_v41 = vpop.xlane.xlu0 %2181  ;;  %v4833_v25 = vmul.f32 %v14793_v21, %v3483_v36  ;;  %v3702_v28 = vsel %vm10911_vm2, %v10829_v12, %v3698_v57  ;;  %v2319_v29 = vsub.f32 %v14795_v24, %v14794_v16  ;;  %6122 = vst.msk [vmem:[%s10388_s29 + $0xd0] sm:$0xff] %vm431_vm0, %v5298_v53  ;;  %v5171_v36 = vpop.f32.mrf.mxu1  ;;  %6064 = vmatpush.msrb.mxu3 %v7457_v40  ;;  %v14799_v58 = vld [vmem:[#allocation79_spill] sm:$0xff]  ;;  %v14800_v53 = vld [vmem:[#allocation64_spill] sm:$0xff]  ;;  %7084 = vpow2.f32 %v10819_v17  ;;  %v14805_v24 = vld [vmem:[#allocation30_spill] sm:$0xff] }
 0x2c5   : > { %v3707_v12 = vsel %vm10915_vm3, %v3706_v56, %v3702_v28  ;;  %5874 = vmatpush.msrb.mxu0 %v7456_v62  ;;  %v14798_v15 = vsub.f32 %v14779_v55, %v10361_v47  ;;  %6107 = vst.msk [vmem:[%s10388_s29 + $0x58] sm:$0xff] %vm431_vm0, %v5171_v36  ;;  %v3814_v14 = vsel %vm10944_vm5, %v10857_v3, %v3810_v31  ;;  %v7458_v56 = vld [vmem:[%s7710_s28 + $0x390] sm:$0xff]  ;;  %v14801_v21 = vld [vmem:[#allocation59_spill] sm:$0xff]  ;;  %v2822_v55 = vsel %vm431_vm0, %v10522_v35, 0.0  ;;  %v14802_v3 = vld [vmem:[#allocation96_spill] sm:$0xff] }
 0x2c6   : > { %6667 = vmatmul.msk.f32.gmra.mxu0 %vm431_vm0, %v4833_v25  ;;  %v4849_v19 = vmul.f32 %v14799_v58, %v3707_v12  ;;  %6003 = vmatpush.msrb.mxu2 %v7458_v56  ;;  %v2311_v47 = vsub.f32 %v14801_v21, %v14800_v53  ;;  %4961 = vst.msk [vmem:[%s9294_s20 + $0x108] sm:$0xff] %vm431_vm0, %v4833_v25  ;;  %v7459_v28 = vld [vmem:[%s7710_s28 + $0x300] sm:$0xff]  ;;  %v14803_v31 = vld [vmem:[#allocation74_spill] sm:$0xff]  ;;  %7086 = vpow2.f32 %v2540_v6  ;;  %v7460_v17 = vld [vmem:[%s7710_s28 + $0x3e8] sm:$0xff]  ;;  %v11010_v56 = vsel %vm431_vm0, %v10595_v39, 0.0 }
 0x2c7   : > { %v2556_v57 = vmul.f32 1.442695, %v14798_v15  ;;  %2220 = vmax.xlane.f32.xlu1 %v2219_v38  ;;  %v3819_v30 = vsel %vm3816_vm6, %v3818_v22, %v3814_v14  ;;  %5875 = vmatpush.msrb.mxu0 %v7459_v28  ;;  %v2327_v16 = vsub.f32 %v14803_v31, %v14802_v3  ;;  %v2846_v38 = vsel %vm431_vm0, %v10532_v1, 0.0  ;;  %v14806_v36 = vld [vmem:[#allocation31_spill] sm:$0xff]  ;;  %v7461_v6 = vld [vmem:[%s7710_s28 + $0x388] sm:$0xff]  ;;  %v7464_v3 = vld [vmem:[%s7710_s28 + $0x3d8] sm:$0xff] }
 0x2c8   : > { %4977 = vst.msk [vmem:[%s9294_s20 + $0x188] sm:$0xff] %vm431_vm0, %v4849_v19  ;;  %6683 = vmatmul.msk.f32.gmra.mxu2 %vm431_vm0, %v4849_v19  ;;  %2823 = vadd.xlane.f32.xlu2 %v2822_v55  ;;  %v4857_v25 = vmul.f32 %v14804_v27, %v3819_v30  ;;  %v2335_v44 = vsub.f32 %v14805_v24, %v10572_v2  ;;  %v2526_v22 = vmul.f32 1.442695, %v2319_v29  ;;  %v2510_v40 = vmul.f32 1.442695, %v2311_v47  ;;  %v14807_v2 = vld [vmem:[#allocation66_spill] sm:$0xff]  ;;  %v11013_v21 = vpop.eup %7082 }
 0x2c9   : > { %2847 = vadd.xlane.f32.xlu0 %v2846_v38  ;;  %6065 = vmatpush.msrb.mxu3 %v7460_v17  ;;  %7088 = vpow2.f32 %v2556_v57  ;;  %v2336_v12 = vsub.f32 %v14806_v36, %v10584_v26  ;;  %v2344_v15 = vsub.f32 %v14807_v2, %v10645_v59  ;;  %v11000_v29 = vsel %vm431_vm0, %v10590_v33, 0.0  ;;  %v7462_v26 = vld [vmem:[%s7710_s28 + $0x3e0] sm:$0xff]  ;;  %14808 = vst [vmem:[#allocation99_spill] sm:$0xff] %v11013_v21  ;;  %v14811_v27 = vld [vmem:[#allocation32_spill] sm:$0xff]  ;;  %v14812_v38 = vld [vmem:[#allocation49_spill] sm:$0xff] }
 0x2ca   : > { %4985 = vst.msk [vmem:[%s9294_s20 + $0x1c8] sm:$0xff] %vm431_vm0, %v4857_v25  ;;  %6691 = vmatmul.msk.f32.gmra.mxu3 %vm431_vm0, %v4857_v25  ;;  %v10990_v62 = vpop.xlane.xlu1 %2799  ;;  %6004 = vmatpush.msrb.mxu2 %v7461_v6  ;;  %v2542_v57 = vmul.f32 1.442695, %v2327_v16  ;;  %v2873_v59 = vsel %vm431_vm0, %v10602_v0, 0.0  ;;  %v7463_v53 = vld [vmem:[%s7710_s28 + $0x380] sm:$0xff]  ;;  %v2897_v28 = vsel %vm431_vm0, %v10616_v46, 0.0  ;;  %v11023_v31 = vpop.eup %7084  ;;  %v2345_v25 = vsub.f32 %v14811_v27, %v10714_v43 }
 0x2cb   : > { %v10995_v58 = vpop.xlane.xlu2 %2748  ;;  %7090 = vrcp.f32 %v10990_v62  ;;  %6066 = vmatpush.msrb.mxu3 %v7462_v26  ;;  %v5106_v19 = vpop.f32.mrf.mxu0  ;;  %v2558_v47 = vmul.f32 1.442695, %v2335_v44  ;;  %v14809_v55 = vld [vmem:[#allocation67_spill] sm:$0xff]  ;;  %14810 = vst [vmem:[#allocation101_spill] sm:$0xff] %v11023_v31  ;;  %v2560_v16 = vmul.f32 1.442695, %v2336_v12  ;;  %vm3825_vm8 = vweird.f32 %v10990_v62 }
 0x2cc   : > { %7092 = vrcp.f32 %v10995_v58  ;;  %v11004_v14 = vpop.xlane.xlu0 %2775  ;;  %6005 = vmatpush.msrb.mxu2 %v7463_v53  ;;  %v2337_v30 = vsub.f32 %v14809_v55, %v10690_v51  ;;  %6099 = vst.msk [vmem:[%s10388_s29 + $0x18] sm:$0xff] %vm431_vm0, %v5106_v19  ;;  %v2198_v51 = vsel %vm431_vm0, %v14812_v38, -inf  ;;  %v11029_v24 = vpop.eup %7086  ;;  %v2576_v44 = vmul.f32 1.442695, %v2344_v15  ;;  %v14814_v17 = vld [vmem:[#allocation38_spill] sm:$0xff]  ;;  %v14816_v43 = vld [vmem:[#allocation68_spill] sm:$0xff] }
 0x2cd   : > { %7094 = vrcp.f32 %v11004_v14  ;;  %6067 = vmatpush.msrb.mxu3 %v7464_v3  ;;  %14813 = vst [vmem:[#allocation81_spill] sm:$0xff] %v11029_v24  ;;  %v2346_v36 = vsub.f32 %v14814_v17, %v10825_v13  ;;  %v11035_v6 = vsel %vm431_vm0, %v10724_v45, 0.0  ;;  %v2338_v2 = vsub.f32 %v14816_v43, %v10841_v20  ;;  %v7466_v19 = vld [vmem:[%s7710_s28 + $0x3c8] sm:$0xff]  ;;  %v7467_v17 = vld [vmem:[%s7710_s28 + $0x3c0] sm:$0xff] }
 0x2ce   : > { %7096 = vpow2.f32 %v2526_v22  ;;  %v7465_v22 = vld [vmem:[%s7710_s28 + $0x3d0] sm:$0xff]  ;;  %v11048_v13 = vsel %vm431_vm0, %v10633_v61, 0.0  ;;  %v2562_v26 = vmul.f32 1.442695, %v2337_v30  ;;  %v11058_v20 = vsel %vm431_vm0, %v10783_v52, 0.0  ;;  %v14817_v27 = vld [vmem:[#allocation40_spill] sm:$0xff] }
 0x2cf   : > { %7098 = vpow2.f32 %v2510_v40  ;;  %2874 = vadd.xlane.f32.xlu1 %v2873_v59  ;;  %6068 = vmatpush.msrb.mxu3 %v7465_v22  ;;  %v11038_v12 = vpop.eup %7088  ;;  %v11044_v40 = vsel %vm431_vm0, %v10656_v42, 0.0  ;;  %v2578_v53 = vmul.f32 1.442695, %v2345_v25  ;;  %v11069_v30 = vsel %vm431_vm0, %v10846_v34, 0.0  ;;  %v14819_v34 = vld [vmem:[#allocation46_spill] sm:$0xff]  ;;  %v14831_v0 = vld [vmem:[#allocation107_spill] sm:$0xff] }
 0x2d0   : > { %14815 = vst [vmem:[#allocation82_spill] sm:$0xff] %v11038_v12  ;;  %7100 = vpow2.f32 %v2542_v57  ;;  %2898 = vadd.xlane.f32.xlu2 %v2897_v28  ;;  %v11054_v57 = vsel %vm431_vm0, %v10745_v48, 0.0  ;;  %v2580_v3 = vmul.f32 1.442695, %v2346_v36  ;;  %v2564_v43 = vmul.f32 1.442695, %v2338_v2 }
 0x2d1   : > { %v11050_v15 = vpop.eup %7090  ;;  %7102 = vpow2.f32 %v2558_v47  ;;  %2199 = vmax.xlane.f32.xlu0 %v2198_v51  ;;  %6069 = vmatpush.msrb.mxu3 %v7466_v19  ;;  %v2339_v51 = vsub.f32 %v14817_v27, %v10853_v4  ;;  %v2222_v4 = vsel %vm431_vm0, %v14819_v34, -inf  ;;  %v11094_v2 = vsel %vm431_vm0, %v10871_v50, 0.0 }
 0x2d2   : > { %v11061_v59 = vpop.eup %7092  ;;  %7104 = vpow2.f32 %v2560_v16  ;;  %v3821_v47 = vmul.f32 %v11050_v15, %v10990_v62  ;;  %v11065_v55 = vpop.xlane.xlu1 %2184  ;;  %vm3826_vm7 = vweird.f32 %v11050_v15  ;;  %vm3587_vm12 = vweird.f32 %v10995_v58 }
 0x2d3   : > { %v11071_v28 = vpop.eup %7094  ;;  %7106 = vpow2.f32 %v2576_v44  ;;  %v3583_v16 = vmul.f32 %v11061_v59, %v10995_v58  ;;  %v11077_v25 = vpop.xlane.xlu2 %2160  ;;  %6070 = vmatpush.msrb.mxu3 %v7467_v17  ;;  %vm3588_vm9 = vweird.f32 %v11061_v59  ;;  %vm11141_vm10 = vmor %vm3825_vm8, %vm3826_vm7  ;;  %v2347_v1 = vsub.f32 %v14831_v0, %v10919_v23  ;;  %v14837_v23 = vld [vmem:[#allocation50_spill] sm:$0xff] }
 0x2d4   : > { %v11080_v22 = vpop.eup %7096  ;;  %v3822_v19 = vsub.f32 1.0, %v3821_v47  ;;  %v3709_v52 = vmul.f32 %v11071_v28, %v11004_v14  ;;  %v5301_v44 = vpop.f32.mrf.mxu3  ;;  %7108 = vpow2.f32 %v2562_v26  ;;  %v11098_v47 = vsel %vm431_vm0, %v10863_v60, 0.0  ;;  %vm11168_vm13 = vmor %vm3587_vm12, %vm3588_vm9 }
 0x2d5   : > { %14818 = vst [vmem:[#allocation83_spill] sm:$0xff] %v11080_v22  ;;  %v11084_v36 = vpop.xlane.xlu0 %2163  ;;  %v11088_v27 = vpop.eup %7098  ;;  %v3584_v61 = vsub.f32 1.0, %v3583_v16  ;;  %7110 = vpow2.f32 %v2578_v53  ;;  %v11105_v26 = vsel %vm431_vm0, %v11013_v21, 0.0  ;;  %v11114_v53 = vsel %vm431_vm0, %v11023_v31, 0.0 }
 0x2d6   : > { %14820 = vst [vmem:[#allocation85_spill] sm:$0xff] %v11088_v27  ;;  %v11100_v17 = vpop.eup %7100  ;;  %v3823_v42 = vmul.f32 %v11050_v15, %v3822_v19  ;;  %v3710_v48 = vsub.f32 1.0, %v3709_v52  ;;  %v5174_v45 = vpop.f32.mrf.mxu1  ;;  %7112 = vpow2.f32 %v2580_v3  ;;  %vm3714_vm11 = vweird.f32 %v11071_v28 }
 0x2d7   : > { %6123 = vst.msk [vmem:[%s10388_s29 + $0xd8] sm:$0xff] %vm431_vm0, %v5301_v44  ;;  %v11107_v16 = vpop.eup %7102  ;;  %v2566_v44 = vmul.f32 1.442695, %v2339_v51  ;;  %v3585_v50 = vmul.f32 %v11061_v59, %v3584_v61  ;;  %2223 = vmax.xlane.f32.xlu1 %v2222_v4  ;;  %7114 = vpow2.f32 %v2564_v43  ;;  %v14825_v61 = vld [vmem:[#allocation42_spill] sm:$0xff]  ;;  %v3829_v51 = vand.u32 2147483647, %v10990_v62 }
 0x2d8   : > { %14821 = vst [vmem:[#allocation84_spill] sm:$0xff] %v11100_v17  ;;  %v11116_v19 = vpop.eup %7104  ;;  %v3824_v52 = vadd.f32 %v11050_v15, %v3823_v42  ;;  %v3711_v21 = vmul.f32 %v11071_v28, %v3710_v48  ;;  %2826 = vadd.xlane.f32.xlu2 %v11000_v29  ;;  %v3831_v4 = vand.u32 2147483648, %v10990_v62  ;;  %v3591_v42 = vand.u32 2147483647, %v10995_v58 }
 0x2d9   : > { %14822 = vst [vmem:[#allocation100_spill] sm:$0xff] %v11107_v16  ;;  %v11122_v3 = vpop.eup %7106  ;;  %2850 = vadd.xlane.f32.xlu0 %v11010_v56  ;;  %v3593_v48 = vand.u32 2147483648, %v10995_v58  ;;  %v3719_v29 = vand.u32 2147483648, %v11004_v14  ;;  %v5236_v31 = vpop.f32.mrf.mxu2  ;;  %vm3713_vm14 = vweird.f32 %v11004_v14  ;;  %vm3830_vm1 = vcmp.eq.f32.partialorder %v3829_v51, 8.507059e+37  ;;  %v14839_v58 = vld [vmem:[#allocation44_spill] sm:$0xff] }
 0x2da   : > { %6108 = vst.msk [vmem:[%s10388_s29 + $0x60] sm:$0xff] %vm431_vm0, %v5174_v45  ;;  %v2340_v45 = vsub.f32 %v14825_v61, %v10900_v9  ;;  %v11134_v43 = vpop.xlane.xlu1 %2778  ;;  %v11136_v9 = vpop.eup %7108  ;;  %v3586_v61 = vadd.f32 %v11061_v59, %v3585_v50  ;;  %v3712_v56 = vadd.f32 %v11071_v28, %v3711_v21  ;;  %v3717_v50 = vand.u32 2147483647, %v11004_v14  ;;  %vm11178_vm2 = vmor %vm3713_vm14, %vm3714_vm11 }
 0x2db   : > { %14823 = vst [vmem:[#allocation86_spill] sm:$0xff] %v11116_v19  ;;  %7116 = vrcp.f32 %v11134_v43  ;;  %v11148_v60 = vpop.xlane.xlu2 %2727  ;;  %v11150_v39 = vpop.eup %7110  ;;  %v3828_v21 = vsel %vm11141_vm10, %v11050_v15, %v3824_v52  ;;  %vm3592_vm15 = vcmp.eq.f32.partialorder %v3591_v42, 8.507059e+37  ;;  %v3594_v15 = vor.u32 1.1754944e-38, %v3593_v48  ;;  %v14838_v48 = vld [vmem:[#allocation73_spill] sm:$0xff] }
 0x2dc   : > { %14824 = vst [vmem:[#allocation71_spill] sm:$0xff] %v11122_v3  ;;  %7118 = vrcp.f32 %v11148_v60  ;;  %v11162_v46 = vpop.eup %7112  ;;  %v2201_v52 = vsel %vm431_vm0, %v14837_v23, -inf  ;;  %v3720_v62 = vor.u32 1.1754944e-38, %v3719_v29  ;;  %v3590_v14 = vsel %vm11168_vm13, %v11061_v59, %v3586_v61  ;;  %v14840_v61 = vld [vmem:[#allocation103_spill] sm:$0xff] }
 0x2dd   : > { %14826 = vst [vmem:[#allocation41_spill] sm:$0xff] %v11136_v9  ;;  %v11157_v33 = vpop.xlane.xlu0 %2751  ;;  %v11174_v35 = vpop.eup %7114  ;;  %v3716_v51 = vsel %vm11178_vm2, %v11071_v28, %v3712_v56  ;;  %vm3718_vm3 = vcmp.eq.f32.partialorder %v3717_v50, 8.507059e+37  ;;  %v3595_v42 = vsel %vm3592_vm15, %v3594_v15, %v3590_v14  ;;  %v2348_v59 = vsub.f32 %v14839_v58, %v10931_v41  ;;  %v14841_v41 = vld [vmem:[#allocation34_spill] sm:$0xff] }
 0x2de   : > { %14829 = vst [vmem:[#allocation90_spill] sm:$0xff] %v11150_v39  ;;  %7120 = vrcp.f32 %v11157_v33  ;;  %v11200_v28 = vsel %vm431_vm0, %v11029_v24, 0.0  ;;  %v11218_v15 = vsel %vm431_vm0, %v11088_v27, 0.0  ;;  %vm3727_vm5 = vweird.f32 %v11134_v43 }
 0x2df   : > { %6115 = vst.msk [vmem:[%s10388_s29 + $0x98] sm:$0xff] %vm431_vm0, %v5236_v31  ;;  %v3832_v31 = vor.u32 1.1754944e-38, %v3831_v4  ;;  %2877 = vadd.xlane.f32.xlu1 %v11035_v6  ;;  %7122 = vpow2.f32 %v2566_v44  ;;  %v3721_v6 = vsel %vm3718_vm3, %v3720_v62, %v3716_v51  ;;  %v2568_v62 = vmul.f32 1.442695, %v2340_v45  ;;  %v14843_v45 = vld [vmem:[#allocation92_spill] sm:$0xff] }
 0x2e0   : > { %14830 = vst [vmem:[#allocation56_spill] sm:$0xff] %v11162_v46  ;;  %2901 = vadd.xlane.f32.xlu2 %v11054_v57  ;;  %v4850_v57 = vmul.f32 %v14841_v41, %v3721_v6  ;;  %v2584_v58 = vmul.f32 1.442695, %v2348_v59  ;;  %v11245_v6 = vsel %vm431_vm0, %v11107_v16, 0.0  ;;  %v11261_v59 = vsel %vm431_vm0, %v11116_v19, 0.0 }
 0x2e1   : > { %14834 = vst [vmem:[#allocation25_spill] sm:$0xff] %v11174_v35  ;;  %v3833_v4 = vsel %vm3830_vm1, %v3832_v31, %v3828_v21  ;;  %v11193_v29 = vpop.eup %7116  ;;  %v4841_v21 = vmul.f32 %v14840_v61, %v3595_v42  ;;  %2202 = vmax.xlane.f32.xlu0 %v2201_v52  ;;  %v11214_v31 = vsel %vm431_vm0, %v11038_v12, 0.0  ;;  %v2582_v52 = vmul.f32 1.442695, %v2347_v1 }
 0x2e2   : > { %v4858_v34 = vmul.f32 %v14838_v48, %v3833_v4  ;;  %v11202_v44 = vpop.eup %7118  ;;  %v3723_v56 = vmul.f32 %v11193_v29, %v11134_v43  ;;  %v11210_v50 = vpop.xlane.xlu1 %2166  ;;  %v11231_v4 = vsel %vm431_vm0, %v11100_v17, 0.0  ;;  %4978 = vst.msk [vmem:[%s9294_s20 + $0x190] sm:$0xff] %vm431_vm0, %v4850_v57  ;;  %6684 = vmatmul.msk.f32.gmra.mxu2 %vm431_vm0, %v4850_v57  ;;  %v2225_v48 = vsel %vm431_vm0, %v14843_v45, -inf  ;;  %v14845_v57 = vld [vmem:[#allocation111_spill] sm:$0xff] }
 0x2e3   : > { %14842 = vst [vmem:[#allocation22_spill] sm:$0xff] %v11210_v50  ;;  %v3485_v14 = vmul.f32 %v11202_v44, %v11148_v60  ;;  %6675 = vmatmul.msk.f32.gmra.mxu1 %vm431_vm0, %v4841_v21  ;;  %v2349_v27 = vsub.f32 %v14845_v57, %v11065_v55  ;;  %v11273_v55 = vsel %vm431_vm0, %v11150_v39, 0.0  ;;  %vm3728_vm4 = vweird.f32 %v11193_v29 }
 0x2e4   : > { %4986 = vst.msk [vmem:[%s9294_s20 + $0x1d0] sm:$0xff] %vm431_vm0, %v4858_v34  ;;  %6692 = vmatmul.msk.f32.gmra.mxu3 %vm431_vm0, %v4858_v34  ;;  %v11220_v0 = vpop.eup %7120  ;;  %v11227_v34 = vpop.xlane.xlu2 %2802  ;;  %v3724_v51 = vsub.f32 1.0, %v3723_v56  ;;  %v11249_v56 = vsel %vm431_vm0, %v11080_v22, 0.0  ;;  %v11269_v22 = vsel %vm431_vm0, %v11136_v9, 0.0  ;;  %v3495_v19 = vand.u32 2147483648, %v11148_v60  ;;  %vm11322_vm6 = vmor %vm3727_vm5, %vm3728_vm4 }
 0x2e5   : > { %4969 = vst.msk [vmem:[%s9294_s20 + $0x148] sm:$0xff] %vm431_vm0, %v4841_v21  ;;  %v3597_v42 = vmul.f32 %v11220_v0, %v11157_v33  ;;  %7124 = vrcp.f32 %v11227_v34  ;;  %v11239_v1 = vpop.xlane.xlu0 %2730  ;;  %v3486_v61 = vsub.f32 1.0, %v3485_v14  ;;  %v5109_v21 = vpop.f32.mrf.mxu0  ;;  %v11265_v14 = vsel %vm431_vm0, %v11122_v3, 0.0 }
 0x2e6   : > { %v11251_v41 = vpop.eup %7122  ;;  %v3725_v50 = vmul.f32 %v11193_v29, %v3724_v51  ;;  %6100 = vst.msk [vmem:[%s10388_s29 + $0x20] sm:$0xff] %vm431_vm0, %v5109_v21  ;;  %7126 = vrcp.f32 %v11239_v1  ;;  %v14851_v21 = vld [vmem:[#allocation45_spill] sm:$0xff]  ;;  %v3731_v3 = vand.u32 2147483647, %v11134_v43  ;;  %vm3490_vm7 = vweird.f32 %v11202_v44 }
 0x2e7   : > { %14844 = vst [vmem:[#allocation12_spill] sm:$0xff] %v11251_v41  ;;  %7128 = vpow2.f32 %v2568_v62  ;;  %2226 = vmax.xlane.f32.xlu1 %v2225_v48  ;;  %v3598_v51 = vsub.f32 1.0, %v3597_v42  ;;  %v11278_v62 = vsel %vm431_vm0, %v11174_v35, 0.0  ;;  %v11282_v48 = vsel %vm431_vm0, %v11162_v46, 0.0 }
 0x2e8   : > { %14846 = vst [vmem:[#allocation61_spill] sm:$0xff] %v11265_v14  ;;  %7130 = vpow2.f32 %v2582_v52  ;;  %2829 = vadd.xlane.f32.xlu2 %v11044_v40  ;;  %v2341_v57 = vsub.f32 %v14851_v21, %v11077_v25  ;;  %v3487_v39 = vmul.f32 %v11202_v44, %v3486_v61  ;;  %v11290_v40 = vsel %vm431_vm0, %v11251_v41, 0.0  ;;  %v14853_v25 = vld [vmem:[#allocation112_spill] sm:$0xff] }
 0x2e9   : > { %14847 = vst [vmem:[#allocation11_spill] sm:$0xff] %v11269_v22  ;;  %7132 = vpow2.f32 %v2584_v58  ;;  %2853 = vadd.xlane.f32.xlu0 %v11048_v13  ;;  %v2586_v42 = vmul.f32 1.442695, %v2349_v27  ;;  %v3726_v35 = vadd.f32 %v11193_v29, %v3725_v50  ;;  %v3733_v58 = vand.u32 2147483648, %v11134_v43  ;;  %v5304_v46 = vpop.f32.mrf.mxu3  ;;  %v14854_v50 = vld [vmem:[#allocation51_spill] sm:$0xff] }
 0x2ea   : > { %14848 = vst [vmem:[#allocation15_spill] sm:$0xff] %v11273_v55  ;;  %v11297_v9 = vpop.xlane.xlu1 %2754  ;;  %v2342_v61 = vsub.f32 %v14853_v25, %v11084_v36  ;;  %v2204_v21 = vsel %vm431_vm0, %v14854_v50, -inf  ;;  %v3599_v36 = vmul.f32 %v11220_v0, %v3598_v51  ;;  %v3488_v17 = vadd.f32 %v11202_v44, %v3487_v39 }
 0x2eb   : > { %14849 = vst [vmem:[#allocation27_spill] sm:$0xff] %v11278_v62  ;;  %v11292_v52 = vpop.eup %7124  ;;  %7134 = vrcp.f32 %v11297_v9  ;;  %v3734_v12 = vor.u32 1.1754944e-38, %v3733_v58  ;;  %vm3489_vm8 = vweird.f32 %v11148_v60  ;;  %v3493_v24 = vand.u32 2147483647, %v11148_v60 }
 0x2ec   : > { %14850 = vst [vmem:[#allocation18_spill] sm:$0xff] %v11282_v48  ;;  %v3835_v13 = vmul.f32 %v11292_v52, %v11227_v34  ;;  %v11306_v27 = vpop.xlane.xlu2 %2781  ;;  %v11310_v41 = vpop.eup %7126  ;;  %v3730_v50 = vsel %vm11322_vm6, %v11193_v29, %v3726_v35  ;;  %v3607_v45 = vand.u32 2147483648, %v11157_v33  ;;  %v2570_v58 = vmul.f32 1.442695, %v2341_v57  ;;  %vm11346_vm10 = vmor %vm3489_vm8, %vm3490_vm7 }
 0x2ed   : > { %14852 = vst [vmem:[#allocation17_spill] sm:$0xff] %v11290_v40  ;;  %v11316_v25 = vpop.xlane.xlu0 %2805  ;;  %v11318_v16 = vpop.eup %7128  ;;  %v3499_v43 = vmul.f32 %v11310_v41, %v11239_v1  ;;  %7136 = vrcp.f32 %v11306_v27  ;;  %v3605_v40 = vand.u32 2147483647, %v11157_v33  ;;  %vm3732_vm9 = vcmp.eq.f32.partialorder %v3731_v3, 8.507059e+37 }
 0x2ee   : > { %6124 = vst.msk [vmem:[%s10388_s29 + $0xe0] sm:$0xff] %vm431_vm0, %v5304_v46  ;;  %v11331_v51 = vpop.eup %7130  ;;  %v3836_v48 = vsub.f32 1.0, %v3835_v13  ;;  %v5177_v62 = vpop.f32.mrf.mxu1  ;;  %7138 = vrcp.f32 %v11316_v25  ;;  %v3600_v60 = vadd.f32 %v11220_v0, %v3599_v36  ;;  %vm3602_vm11 = vweird.f32 %v11220_v0  ;;  %v14863_v36 = vld [vmem:[#allocation87_spill] sm:$0xff] }
 0x2ef   : > { %v11338_v39 = vpop.eup %7132  ;;  %v5239_v23 = vpop.f32.mrf.mxu2  ;;  %2880 = vadd.xlane.f32.xlu1 %v11069_v30  ;;  %6109 = vst.msk [vmem:[%s10388_s29 + $0x68] sm:$0xff] %vm431_vm0, %v5177_v62  ;;  %v3496_v29 = vor.u32 1.1754944e-38, %v3495_v19  ;;  %v3500_v13 = vsub.f32 1.0, %v3499_v43  ;;  %v3492_v30 = vsel %vm11346_vm10, %v11202_v44, %v3488_v17  ;;  %v3735_v3 = vsel %vm3732_vm9, %v3734_v12, %v3730_v50 }
 0x2f0   : > { %2904 = vadd.xlane.f32.xlu2 %v11094_v2  ;;  %6116 = vst.msk [vmem:[%s10388_s29 + $0xa0] sm:$0xff] %vm431_vm0, %v5239_v23  ;;  %7140 = vpow2.f32 %v2586_v42  ;;  %v2572_v46 = vmul.f32 1.442695, %v2342_v61  ;;  %vm3494_vm12 = vcmp.eq.f32.partialorder %v3493_v24, 8.507059e+37  ;;  %vm3601_vm13 = vweird.f32 %v11157_v33  ;;  %v14861_v33 = vld [vmem:[#allocation35_spill] sm:$0xff] }
 0x2f1   : > { %v11360_v57 = vpop.eup %7134  ;;  %2205 = vmax.xlane.f32.xlu0 %v2204_v21  ;;  %vm11369_vm14 = vmor %vm3601_vm13, %vm3602_vm11  ;;  %vm3606_vm15 = vcmp.eq.f32.partialorder %v3605_v40, 8.507059e+37  ;;  %v3608_v12 = vor.u32 1.1754944e-38, %v3607_v45  ;;  %v3837_v17 = vmul.f32 %v11292_v52, %v3836_v48  ;;  %v3497_v23 = vsel %vm3494_vm12, %v3496_v29, %v3492_v30  ;;  %v14862_v42 = vld [vmem:[#allocation39_spill] sm:$0xff] }
 0x2f2   : > { %v11363_v62 = vpop.xlane.xlu1 %2733  ;;  %v4834_v44 = vmul.f32 %v14861_v33, %v3497_v23  ;;  %v4851_v61 = vmul.f32 %v14862_v42, %v3735_v3  ;;  %v3604_v50 = vsel %vm11369_vm14, %v11220_v0, %v3600_v60  ;;  %v2228_v45 = vsel %vm431_vm0, %v14863_v36, -inf }
 0x2f3   : > { %v11365_v2 = vpop.eup %7136  ;;  %7142 = vpow2.f32 %v2570_v58  ;;  %v3501_v48 = vmul.f32 %v11310_v41, %v3500_v13  ;;  %v3611_v43 = vmul.f32 %v11360_v57, %v11297_v9  ;;  %v3609_v35 = vsel %vm3606_vm15, %v3608_v12, %v3604_v50  ;;  %v14864_v13 = vld [vmem:[#allocation36_spill] sm:$0xff] }
 0x2f4   : > { %v11374_v24 = vpop.xlane.xlu2 %2757  ;;  %v11385_v40 = vpop.eup %7138  ;;  %v3845_v29 = vand.u32 2147483648, %v11227_v34  ;;  %v3737_v0 = vmul.f32 %v11365_v2, %v11306_v27  ;;  %4962 = vst.msk [vmem:[%s9294_s20 + $0x110] sm:$0xff] %vm431_vm0, %v4834_v44  ;;  %6668 = vmatmul.msk.f32.gmra.mxu0 %vm431_vm0, %v4834_v44  ;;  %6685 = vmatmul.msk.f32.gmra.mxu2 %vm431_vm0, %v4851_v61  ;;  %v3838_v58 = vadd.f32 %v11292_v52, %v3837_v17  ;;  %vm3840_vm1 = vweird.f32 %v11292_v52 }
 0x2f5   : > { %v11381_v21 = vpop.xlane.xlu0 %2784  ;;  %v3849_v60 = vmul.f32 %v11385_v40, %v11316_v25  ;;  %7144 = vrcp.f32 %v11374_v24  ;;  %4979 = vst.msk [vmem:[%s9294_s20 + $0x198] sm:$0xff] %vm431_vm0, %v4851_v61  ;;  %v4842_v30 = vmul.f32 %v14864_v13, %v3609_v35  ;;  %v3843_v12 = vand.u32 2147483647, %v11227_v34 }
 0x2f6   : > { %7146 = vrcp.f32 %v11363_v62  ;;  %v5112_v3 = vpop.f32.mrf.mxu0  ;;  %v11406_v19 = vpop.eup %7140  ;;  %v3507_v23 = vand.u32 2147483647, %v11239_v1  ;;  %v3509_v17 = vand.u32 2147483648, %v11239_v1  ;;  %vm3839_vm2 = vweird.f32 %v11227_v34 }
 0x2f7   : > { %2229 = vmax.xlane.f32.xlu1 %v2228_v45  ;;  %7148 = vpow2.f32 %v2572_v46  ;;  %6101 = vst.msk [vmem:[%s10388_s29 + $0x28] sm:$0xff] %vm431_vm0, %v5112_v3  ;;  %v3502_v33 = vadd.f32 %v11310_v41, %v3501_v48  ;;  %vm3504_vm3 = vweird.f32 %v11310_v41  ;;  %v3747_v44 = vand.u32 2147483648, %v11306_v27  ;;  %6676 = vmatmul.msk.f32.gmra.mxu1 %vm431_vm0, %v4842_v30  ;;  %vm11423_vm4 = vmor %vm3839_vm2, %vm3840_vm1  ;;  %v14871_v46 = vld [vmem:[#allocation106_spill] sm:$0xff] }
 0x2f8   : > { %2832 = vadd.xlane.f32.xlu2 %v11058_v20  ;;  %4970 = vst.msk [vmem:[%s9294_s20 + $0x150] sm:$0xff] %vm431_vm0, %v4842_v30  ;;  %v3738_v42 = vsub.f32 1.0, %v3737_v0  ;;  %v3612_v20 = vsub.f32 1.0, %v3611_v43  ;;  %v3850_v61 = vsub.f32 1.0, %v3849_v60  ;;  %7150 = vrcp.f32 %v11381_v21 }
 0x2f9   : > { %2856 = vadd.xlane.f32.xlu0 %v11098_v47  ;;  %v11431_v50 = vpop.eup %7142  ;;  %v3846_v45 = vor.u32 1.1754944e-38, %v3845_v29  ;;  %vm3503_vm5 = vweird.f32 %v11239_v1  ;;  %v3745_v48 = vand.u32 2147483647, %v11306_v27  ;;  %v3842_v35 = vsel %vm11423_vm4, %v11292_v52, %v3838_v58 }
 0x2fa   : > { %v11429_v34 = vpop.xlane.xlu1 %2808  ;;  %vm3844_vm6 = vcmp.eq.f32.partialorder %v3843_v12, 8.507059e+37  ;;  %vm11444_vm7 = vmor %vm3503_vm5, %vm3504_vm3  ;;  %vm11448_vm8 = vcmp.eq.f32.partialorder %v3507_v23, 8.507059e+37  ;;  %v3510_v1 = vor.u32 1.1754944e-38, %v3509_v17  ;;  %vm3741_vm9 = vweird.f32 %v11306_v27 }
 0x2fb   : > { %v11440_v43 = vpop.eup %7144  ;;  %v11457_v58 = vor.u32 1.1754944e-38, %v3747_v44  ;;  %vm3615_vm10 = vweird.f32 %v11297_v9  ;;  %v3847_v13 = vsel %vm3844_vm6, %v3846_v45, %v3842_v35  ;;  %v3506_v30 = vsel %vm11444_vm7, %v11310_v41, %v3502_v33  ;;  %v14889_v44 = vld [vmem:[#allocation110_spill] sm:$0xff] }
 0x2fc   : > { %v11438_v0 = vpop.xlane.xlu2 %2736  ;;  %v11455_v52 = vpop.eup %7146  ;;  %v3739_v12 = vmul.f32 %v11365_v2, %v3738_v42  ;;  %v3613_v23 = vmul.f32 %v11360_v57, %v3612_v20  ;;  %v3851_v17 = vmul.f32 %v11385_v40, %v3850_v61  ;;  %v4859_v36 = vmul.f32 %v14871_v46, %v3847_v13 }
 0x2fd   : > { %v11453_v60 = vpop.xlane.xlu0 %2760  ;;  %v11463_v3 = vpop.eup %7148  ;;  %vm11469_vm11 = vcmp.eq.f32.partialorder %v3745_v48, 8.507059e+37  ;;  %v3619_v45 = vand.u32 2147483647, %v11297_v9  ;;  %v3621_v35 = vand.u32 2147483648, %v11297_v9  ;;  %v3625_v41 = vmul.f32 %v11440_v43, %v11374_v24  ;;  %v14874_v48 = vld [vmem:[#allocation37_spill] sm:$0xff] }
 0x2fe   : > { %v3511_v33 = vsel %vm11448_vm8, %v3510_v1, %v3506_v30  ;;  %v11480_v42 = vpop.eup %7150  ;;  %vm3616_vm12 = vweird.f32 %v11360_v57  ;;  %v3857_v20 = vand.u32 2147483647, %v11316_v25  ;;  %v3513_v61 = vmul.f32 %v11455_v52, %v11363_v62  ;;  %4987 = vst.msk [vmem:[%s9294_s20 + $0x1d8] sm:$0xff] %vm431_vm0, %v4859_v36  ;;  %6693 = vmatmul.msk.f32.gmra.mxu3 %vm431_vm0, %v4859_v36 }
 0x2ff   : > { %2883 = vadd.xlane.f32.xlu1 %v11200_v28  ;;  %v4835_v47 = vmul.f32 %v14874_v48, %v3511_v33  ;;  %vm3742_vm13 = vweird.f32 %v11365_v2  ;;  %vm3854_vm14 = vweird.f32 %v11385_v40  ;;  %v3859_v28 = vand.u32 2147483648, %v11316_v25  ;;  %vm11508_vm15 = vmor %vm3615_vm10, %vm3616_vm12 }
 0x300   : > { %2907 = vadd.xlane.f32.xlu2 %v11214_v31  ;;  %7152 = vrcp.f32 %v11438_v0  ;;  %v3740_v29 = vadd.f32 %v11365_v2, %v3739_v12  ;;  %v3614_v1 = vadd.f32 %v11360_v57, %v3613_v23  ;;  %v3852_v13 = vadd.f32 %v11385_v40, %v3851_v17  ;;  %vm11525_vm3 = vmor %vm3741_vm9, %vm3742_vm13 }
 0x301   : > { %4963 = vst.msk [vmem:[%s9294_s20 + $0x118] sm:$0xff] %vm431_vm0, %v4835_v47  ;;  %6669 = vmatmul.msk.f32.gmra.mxu0 %vm431_vm0, %v4835_v47  ;;  %7154 = vrcp.f32 %v11429_v34  ;;  %vm11512_vm1 = vcmp.eq.f32.partialorder %v3619_v45, 8.507059e+37  ;;  %vm3853_vm2 = vweird.f32 %v11316_v25  ;;  %v3626_v12 = vsub.f32 1.0, %v3625_v41 }
 0x302   : > { %v11502_v31 = vpop.xlane.xlu1 %2787  ;;  %v3751_v23 = vmul.f32 %v11480_v42, %v11381_v21  ;;  %v3622_v46 = vor.u32 1.1754944e-38, %v3621_v35  ;;  %vm11529_vm4 = vcmp.eq.f32.partialorder %v3857_v20, 8.507059e+37  ;;  %v3633_v25 = vand.u32 2147483647, %v11374_v24  ;;  %v5242_v33 = vpop.f32.mrf.mxu2  ;;  %vm11538_vm5 = vmor %vm3853_vm2, %vm3854_vm14 }
 0x303   : > { %v3514_v41 = vsub.f32 1.0, %v3513_v61  ;;  %v3860_v27 = vor.u32 1.1754944e-38, %v3859_v28  ;;  %vm3629_vm6 = vweird.f32 %v11374_v24  ;;  %v3635_v35 = vand.u32 2147483648, %v11374_v24  ;;  %6117 = vst.msk [vmem:[%s10388_s29 + $0xa8] sm:$0xff] %vm431_vm0, %v5242_v33 }
 0x304   : > { %v11519_v17 = vpop.xlane.xlu2 %2811  ;;  %7156 = vrcp.f32 %v11453_v60  ;;  %vm3517_vm7 = vweird.f32 %v11363_v62  ;;  %v3618_v20 = vsel %vm11508_vm15, %v11360_v57, %v3614_v1  ;;  %v3744_v61 = vsel %vm11525_vm3, %v11365_v2, %v3740_v29 }
 0x305   : > { %v11534_v48 = vpop.xlane.xlu0 %2739  ;;  %v3856_v28 = vsel %vm11538_vm5, %v11385_v40, %v3852_v13  ;;  %v5307_v55 = vpop.f32.mrf.mxu3  ;;  %v3627_v33 = vmul.f32 %v11440_v43, %v3626_v12  ;;  %v3521_v7 = vand.u32 2147483647, %v11363_v62  ;;  %v3523_v38 = vand.u32 2147483648, %v11363_v62 }
 0x306   : > { %v11557_v22 = vpop.eup %7152  ;;  %v3752_v36 = vsub.f32 1.0, %v3751_v23  ;;  %6125 = vst.msk [vmem:[%s10388_s29 + $0xe8] sm:$0xff] %vm431_vm0, %v5307_v55  ;;  %v5180_v57 = vpop.f32.mrf.mxu1  ;;  %vm11566_vm8 = vcmp.eq.f32.partialorder %v3633_v25, 8.507059e+37  ;;  %v3515_v40 = vmul.f32 %v11455_v52, %v3514_v41  ;;  %v3759_v29 = vand.u32 2147483647, %v11381_v21  ;;  %v14887_v23 = vld [vmem:[#allocation77_spill] sm:$0xff] }
 0x307   : > { %v11564_v1 = vpop.eup %7154  ;;  %v3623_v13 = vsel %vm11512_vm1, %v3622_v46, %v3618_v20  ;;  %v3749_v12 = vsel %vm11469_vm11, %v11457_v58, %v3744_v61  ;;  %6110 = vst.msk [vmem:[%s10388_s29 + $0x70] sm:$0xff] %vm431_vm0, %v5180_v57  ;;  %v3761_v55 = vand.u32 2147483648, %v11381_v21  ;;  %v14888_v25 = vld [vmem:[#allocation108_spill] sm:$0xff]  ;;  %v3861_v47 = vsel %vm11529_vm4, %v3860_v27, %v3856_v28  ;;  %v14890_v27 = vld [vmem:[#allocation55_spill] sm:$0xff] }
 0x308   : > { %2835 = vadd.xlane.f32.xlu2 %v11105_v26  ;;  %v4843_v9 = vmul.f32 %v14887_v23, %v3623_v13  ;;  %v4852_v41 = vmul.f32 %v14888_v25, %v3749_v12  ;;  %vm3630_vm9 = vweird.f32 %v11440_v43  ;;  %vm3518_vm10 = vweird.f32 %v11455_v52 }
 0x309   : > { %v3527_v58 = vmul.f32 %v11557_v22, %v11438_v0  ;;  %v4860_v30 = vmul.f32 %v14889_v44, %v3861_v47  ;;  %v3753_v20 = vmul.f32 %v11480_v42, %v3752_v36  ;;  %v3863_v45 = vmul.f32 %v11564_v1, %v11429_v34  ;;  %vm11626_vm13 = vmor %vm3629_vm6, %vm3630_vm9 }
 0x30a   : > { %v11590_v26 = vpop.xlane.xlu1 %2763  ;;  %v11592_v46 = vpop.eup %7156  ;;  %4971 = vst.msk [vmem:[%s9294_s20 + $0x158] sm:$0xff] %vm431_vm0, %v4843_v9  ;;  %6677 = vmatmul.msk.f32.gmra.mxu1 %vm431_vm0, %v4843_v9  ;;  %6686 = vmatmul.msk.f32.gmra.mxu2 %vm431_vm0, %v4852_v41  ;;  %v2207_v61 = vsel %vm431_vm0, %v14890_v27, -inf  ;;  %7158 = vrcp.f32 %v11519_v17  ;;  %v3628_v57 = vadd.f32 %v11440_v43, %v3627_v33  ;;  %v3516_v36 = vadd.f32 %v11455_v52, %v3515_v40  ;;  %vm3519_vm1 = vmor %vm3517_vm7, %vm3518_vm10  ;;  %v14903_v40 = vld [vmem:[#allocation109_spill] sm:$0xff] }
 0x30b   : > { %v3537_v13 = vand.u32 2147483648, %v11438_v0  ;;  %4980 = vst.msk [vmem:[%s9294_s20 + $0x1a0] sm:$0xff] %vm431_vm0, %v4852_v41  ;;  %6694 = vmatmul.msk.f32.gmra.mxu3 %vm431_vm0, %v4860_v30  ;;  %2208 = vmax.xlane.f32.xlu0 %v2207_v61  ;;  %7160 = vrcp.f32 %v11502_v31  ;;  %v5115_v12 = vpop.f32.mrf.mxu0  ;;  %v3636_v9 = vor.u32 1.1754944e-38, %v3635_v35  ;;  %vm11615_vm11 = vcmp.eq.f32.partialorder %v3521_v7, 8.507059e+37 }
 0x30c   : > { %v11604_v28 = vpop.xlane.xlu2 %2790  ;;  %v3524_v33 = vor.u32 1.1754944e-38, %v3523_v38  ;;  %vm3755_vm12 = vweird.f32 %v11381_v21  ;;  %4988 = vst.msk [vmem:[%s9294_s20 + $0x1e0] sm:$0xff] %vm431_vm0, %v4860_v30  ;;  %vm3756_vm14 = vweird.f32 %v11480_v42  ;;  %vm11631_vm15 = vcmp.eq.f32.partialorder %v3759_v29, 8.507059e+37 }
 0x30d   : > { %v11613_v23 = vpop.xlane.xlu0 %2814  ;;  %v3535_v38 = vand.u32 2147483647, %v11438_v0  ;;  %v3639_v35 = vmul.f32 %v11592_v46, %v11453_v60  ;;  %6102 = vst.msk [vmem:[%s10388_s29 + $0x30] sm:$0xff] %vm431_vm0, %v5115_v12  ;;  %v3754_v24 = vadd.f32 %v11480_v42, %v3753_v20  ;;  %v3528_v41 = vsub.f32 1.0, %v3527_v58  ;;  %v14897_v20 = vld [vmem:[#allocation89_spill] sm:$0xff]  ;;  %vm11669_vm3 = vmor %vm3755_vm12, %vm3756_vm14 }
 0x30e   : > { %v3864_v47 = vsub.f32 1.0, %v3863_v45  ;;  %7162 = vrcp.f32 %v11534_v48  ;;  %v3762_v29 = vor.u32 1.1754944e-38, %v3761_v55  ;;  %v11646_v44 = vor.u32 1.1754944e-38, %v3537_v13 }
 0x30f   : > { %v3520_v30 = vsel %vm3519_vm1, %v11455_v52, %v3516_v36  ;;  %v3632_v61 = vsel %vm11626_vm13, %v11440_v43, %v3628_v57  ;;  %vm3531_vm2 = vweird.f32 %v11438_v0  ;;  %v3871_v62 = vand.u32 2147483647, %v11429_v34  ;;  %v14900_v36 = vld [vmem:[#allocation43_spill] sm:$0xff] }
 0x310   : > { %2910 = vadd.xlane.f32.xlu2 %v11245_v6  ;;  %v11653_v12 = vpop.eup %7158  ;;  %v3525_v58 = vsel %vm11615_vm11, %v3524_v33, %v3520_v30  ;;  %v3637_v55 = vsel %vm11566_vm8, %v3636_v9, %v3632_v61  ;;  %v2231_v52 = vsel %vm431_vm0, %v14897_v20, -inf  ;;  %vm3867_vm4 = vweird.f32 %v11429_v34 }
 0x311   : > { %v11663_v45 = vpop.eup %7160  ;;  %v3873_v43 = vand.u32 2147483648, %v11429_v34  ;;  %v3640_v2 = vsub.f32 1.0, %v3639_v35  ;;  %v3647_v57 = vand.u32 2147483647, %v11453_v60  ;;  %v4836_v13 = vmul.f32 %v14900_v36, %v3525_v58  ;;  %2232 = vmax.xlane.f32.xlu1 %v2231_v52 }
 0x312   : > { %v11677_v9 = vpop.xlane.xlu1 %2742  ;;  %v3529_v25 = vmul.f32 %v11557_v22, %v3528_v41  ;;  %vm11680_vm5 = vcmp.eq.f32.partialorder %v3535_v38, 8.507059e+37  ;;  %v3865_v33 = vmul.f32 %v11564_v1, %v3864_v47  ;;  %v4844_v30 = vmul.f32 %v14903_v40, %v3637_v55 }
 0x313   : > { %v3758_v35 = vsel %vm11669_vm3, %v11480_v42, %v3754_v24  ;;  %v5310_v58 = vpop.f32.mrf.mxu3  ;;  %vm3643_vm6 = vweird.f32 %v11453_v60  ;;  %v3649_v41 = vand.u32 2147483648, %v11453_v60  ;;  %v3877_v38 = vmul.f32 %v11653_v12, %v11519_v17  ;;  %4964 = vst.msk [vmem:[%s9294_s20 + $0x120] sm:$0xff] %vm431_vm0, %v4836_v13  ;;  %6670 = vmatmul.msk.f32.gmra.mxu0 %vm431_vm0, %v4836_v13  ;;  %2859 = vadd.xlane.f32.xlu0 %v11114_v53  ;;  %v14906_v53 = vld [vmem:[#allocation47_spill] sm:$0xff] }
 0x314   : > { %v11689_v61 = vpop.xlane.xlu2 %2766  ;;  %v3763_v47 = vsel %vm11631_vm15, %v3762_v29, %v3758_v35  ;;  %7164 = vrcp.f32 %v11604_v28  ;;  %v11704_v24 = vpop.eup %7162  ;;  %vm3532_vm7 = vweird.f32 %v11557_v22  ;;  %vm11707_vm8 = vcmp.eq.f32.partialorder %v3871_v62, 8.507059e+37  ;;  %4972 = vst.msk [vmem:[%s9294_s20 + $0x160] sm:$0xff] %vm431_vm0, %v4844_v30  ;;  %6678 = vmatmul.msk.f32.gmra.mxu1 %vm431_vm0, %v4844_v30 }
 0x315   : > { %v11702_v42 = vpop.xlane.xlu0 %2865  ;;  %v3765_v7 = vmul.f32 %v11663_v45, %v11502_v31  ;;  %v4853_v29 = vmul.f32 %v14906_v53, %v3763_v47  ;;  %v3641_v52 = vmul.f32 %v11592_v46, %v3640_v2  ;;  %v3887_v6 = vand.u32 2147483648, %v11519_v17  ;;  %6126 = vst.msk [vmem:[%s10388_s29 + $0xf0] sm:$0xff] %vm431_vm0, %v5310_v58  ;;  %vm11747_vm12 = vmor %vm3531_vm2, %vm3532_vm7 }
 0x316   : > { %v3775_v36 = vand.u32 2147483648, %v11502_v31  ;;  %7166 = vrcp.f32 %v11590_v26  ;;  %v3530_v62 = vadd.f32 %v11557_v22, %v3529_v25  ;;  %vm3868_vm9 = vweird.f32 %v11564_v1  ;;  %v5183_v25 = vpop.f32.mrf.mxu1 }
 0x317   : > { %v3874_v13 = vor.u32 1.1754944e-38, %v3873_v43  ;;  %vm11725_vm10 = vcmp.eq.f32.partialorder %v3647_v57, 8.507059e+37  ;;  %4981 = vst.msk [vmem:[%s9294_s20 + $0x1a8] sm:$0xff] %vm431_vm0, %v4853_v29  ;;  %6687 = vmatmul.msk.f32.gmra.mxu2 %vm431_vm0, %v4853_v29  ;;  %v3866_v2 = vadd.f32 %v11564_v1, %v3865_v33  ;;  %v3650_v30 = vor.u32 1.1754944e-38, %v3649_v41  ;;  %vm11764_vm13 = vmor %vm3867_vm4, %vm3868_vm9 }
 0x318   : > { %v3878_v35 = vsub.f32 1.0, %v3877_v38  ;;  %v3541_v58 = vmul.f32 %v11704_v24, %v11534_v48  ;;  %2838 = vadd.xlane.f32.xlu2 %v11218_v15  ;;  %vm3644_vm11 = vweird.f32 %v11592_v46  ;;  %v3885_v43 = vand.u32 2147483647, %v11519_v17  ;;  %6111 = vst.msk [vmem:[%s10388_s29 + $0x78] sm:$0xff] %vm431_vm0, %v5183_v25 }
 0x319   : > { %v3766_v57 = vsub.f32 1.0, %v3765_v7  ;;  %7168 = vrcp.f32 %v11613_v23  ;;  %v3642_v15 = vadd.f32 %v11592_v46, %v3641_v52  ;;  %v11752_v41 = vor.u32 1.1754944e-38, %v3887_v6  ;;  %2886 = vadd.xlane.f32.xlu1 %v11231_v4  ;;  %vm11794_vm1 = vmor %vm3643_vm6, %vm3644_vm11 }
 0x31a   : > { %v11741_v47 = vpop.eup %7164  ;;  %v3773_v38 = vand.u32 2147483647, %v11502_v31  ;;  %v11755_v7 = vor.u32 1.1754944e-38, %v3775_v36  ;;  %v11758_v53 = vpop.xlane.xlu1 %2889  ;;  %vm3881_vm14 = vweird.f32 %v11519_v17  ;;  %v3549_v29 = vand.u32 2147483647, %v11534_v48 }
 0x31b   : > { %v3551_v52 = vand.u32 2147483648, %v11534_v48  ;;  %v3779_v6 = vmul.f32 %v11741_v47, %v11604_v28  ;;  %v3534_v4 = vsel %vm11747_vm12, %v11557_v22, %v3530_v62  ;;  %v3879_v25 = vmul.f32 %v11653_v12, %v3878_v35  ;;  %v14915_v35 = vld [vmem:[#allocation113_spill] sm:$0xff]  ;;  %v14922_v22 = vld [vmem:[#allocation48_spill] sm:$0xff] }
 0x31c   : > { %v11776_v36 = vpop.xlane.xlu2 %2817  ;;  %v11778_v34 = vpop.eup %7166  ;;  %vm3769_vm15 = vweird.f32 %v11502_v31  ;;  %v3542_v20 = vsub.f32 1.0, %v3541_v58  ;;  %v3539_v27 = vsel %vm11680_vm5, %v11646_v44, %v3534_v4  ;;  %v3870_v14 = vsel %vm11764_vm13, %v11564_v1, %v3866_v2  ;;  %v14931_v2 = vld [vmem:[#allocation19_spill] sm:$0xff] }
 0x31d   : > { %v11788_v33 = vpop.xlane.xlu0 %2841  ;;  %v3767_v62 = vmul.f32 %v11663_v45, %v3766_v57  ;;  %v3780_v21 = vsub.f32 1.0, %v3779_v6  ;;  %v3653_v44 = vmul.f32 %v11778_v34, %v11590_v26  ;;  %v4837_v58 = vmul.f32 %v14915_v35, %v3539_v27  ;;  %v5245_v1 = vpop.f32.mrf.mxu2  ;;  %v14920_v6 = vld [vmem:[#allocation21_spill] sm:$0xff] }
 0x31e   : > { %vm11802_vm2 = vcmp.eq.f32.partialorder %v3885_v43, 8.507059e+37  ;;  %vm11806_vm3 = vcmp.eq.f32.partialorder %v3773_v38, 8.507059e+37  ;;  %v3875_v0 = vsel %vm11707_vm8, %v3874_v13, %v3870_v14  ;;  %v3646_v57 = vsel %vm11794_vm1, %v11592_v46, %v3642_v15  ;;  %6118 = vst.msk [vmem:[%s10388_s29 + $0xb0] sm:$0xff] %vm431_vm0, %v5245_v1  ;;  %v14921_v46 = vld [vmem:[#allocation114_spill] sm:$0xff] }
 0x31f   : > { %v2210_v4 = vsel %vm431_vm0, %v14920_v6, -inf  ;;  %7170 = vrcp.f32 %v11689_v61  ;;  %v11820_v27 = vpop.eup %7168  ;;  %vm3882_vm4 = vweird.f32 %v11653_v12  ;;  %vm3545_vm5 = vweird.f32 %v11534_v48  ;;  %4965 = vst.msk [vmem:[%s9294_s20 + $0x128] sm:$0xff] %vm431_vm0, %v4837_v58  ;;  %6671 = vmatmul.msk.f32.gmra.mxu0 %vm431_vm0, %v4837_v58 }
 0x320   : > { %v3789_v14 = vand.u32 2147483648, %v11604_v28  ;;  %v4861_v55 = vmul.f32 %v14921_v46, %v3875_v0  ;;  %v3651_v13 = vsel %vm11725_vm10, %v3650_v30, %v3646_v57  ;;  %v3543_v43 = vmul.f32 %v11704_v24, %v3542_v20  ;;  %2211 = vmax.xlane.f32.xlu0 %v2210_v4  ;;  %vm11869_vm9 = vmor %vm3881_vm14, %vm3882_vm4 }
 0x321   : > { %v11832_v15 = vor.u32 1.1754944e-38, %v3551_v52  ;;  %v3663_v38 = vand.u32 2147483648, %v11590_v26  ;;  %v4845_v35 = vmul.f32 %v14922_v22, %v3651_v13  ;;  %v3880_v1 = vadd.f32 %v11653_v12, %v3879_v25 }
 0x322   : > { %vm3770_vm6 = vweird.f32 %v11663_v45  ;;  %vm11838_vm7 = vcmp.eq.f32.partialorder %v3549_v29, 8.507059e+37  ;;  %v3781_v40 = vmul.f32 %v11741_v47, %v3780_v21  ;;  %v3901_v30 = vand.u32 2147483648, %v11613_v23  ;;  %4989 = vst.msk [vmem:[%s9294_s20 + $0x1e8] sm:$0xff] %vm431_vm0, %v4861_v55  ;;  %6695 = vmatmul.msk.f32.gmra.mxu3 %vm431_vm0, %v4861_v55  ;;  %v11854_v29 = vpop.xlane.xlu1 %2868 }
 0x323   : > { %v3768_v20 = vadd.f32 %v11663_v45, %v3767_v62  ;;  %v3654_v52 = vsub.f32 1.0, %v3653_v44  ;;  %v3891_v25 = vmul.f32 %v11820_v27, %v11613_v23  ;;  %4973 = vst.msk [vmem:[%s9294_s20 + $0x168] sm:$0xff] %vm431_vm0, %v4845_v35  ;;  %6679 = vmatmul.msk.f32.gmra.mxu1 %vm431_vm0, %v4845_v35  ;;  %7172 = vrcp.f32 %v11677_v9  ;;  %vm3771_vm10 = vmor %vm3769_vm15, %vm3770_vm6 }
 0x324   : > { %vm3546_vm8 = vweird.f32 %v11704_v24  ;;  %v3787_v21 = vand.u32 2147483647, %v11604_v28  ;;  %v11858_v0 = vor.u32 1.1754944e-38, %v3789_v14  ;;  %v3661_v62 = vand.u32 2147483647, %v11590_v26  ;;  %v11861_v44 = vpop.xlane.xlu2 %2892 }
 0x325   : > { %v11863_v57 = vpop.eup %7170  ;;  %v3544_v46 = vadd.f32 %v11704_v24, %v3543_v43  ;;  %v11874_v55 = vor.u32 1.1754944e-38, %v3663_v38  ;;  %v3899_v14 = vand.u32 2147483647, %v11613_v23  ;;  %7174 = vrcp.f32 %v11702_v42  ;;  %v11878_v13 = vpop.xlane.xlu0 %2193  ;;  %vm11914_vm15 = vmor %vm3545_vm5, %vm3546_vm8 }
 0x326   : > { %v11885_v17 = vadd.f32 %v11741_v47, %v3781_v40  ;;  %vm3783_vm11 = vweird.f32 %v11604_v28  ;;  %vm3784_vm12 = vweird.f32 %v11741_v47  ;;  %vm3658_vm13 = vweird.f32 %v11778_v34  ;;  %v5118_v48 = vpop.f32.mrf.mxu0 }
 0x327   : > { %v11890_v43 = vor.u32 1.1754944e-38, %v3901_v30  ;;  %v3655_v38 = vmul.f32 %v11778_v34, %v3654_v52  ;;  %vm3657_vm14 = vweird.f32 %v11590_v26  ;;  %v3892_v22 = vsub.f32 1.0, %v3891_v25  ;;  %6103 = vst.msk [vmem:[%s10388_s29 + $0x38] sm:$0xff] %vm431_vm0, %v5118_v48 }
 0x328   : > { %vm3896_vm1 = vweird.f32 %v11820_v27  ;;  %v3772_v31 = vsel %vm3771_vm10, %v11663_v45, %v3768_v20  ;;  %v3884_v35 = vsel %vm11869_vm9, %v11653_v12, %v3880_v1  ;;  %v3667_v40 = vmul.f32 %v11863_v57, %v11689_v61  ;;  %v14930_v1 = vld [vmem:[#allocation94_spill] sm:$0xff]  ;;  %2862 = vadd.xlane.f32.xlu0 %v11249_v56  ;;  %vm12002_vm9 = vmor %vm3657_vm14, %vm3658_vm13 }
 0x329   : > { %v3777_v30 = vsel %vm11806_vm3, %v11755_v7, %v3772_v31  ;;  %v3889_v52 = vsel %vm11802_vm2, %v11752_v41, %v3884_v35  ;;  %v11908_v25 = vpop.eup %7172  ;;  %vm3895_vm4 = vweird.f32 %v11613_v23  ;;  %v3677_v45 = vand.u32 2147483648, %v11689_v61  ;;  %v14929_v7 = vld [vmem:[#allocation116_spill] sm:$0xff] }
 0x32a   : > { %v4854_v60 = vmul.f32 %v14929_v7, %v3777_v30  ;;  %v4862_v41 = vmul.f32 %v14930_v1, %v3889_v52  ;;  %v2234_v20 = vsel %vm431_vm0, %v14931_v2, -inf  ;;  %vm11925_vm2 = vcmp.eq.f32.partialorder %v3787_v21, 8.507059e+37  ;;  %vm12031_vm13 = vmor %vm3895_vm4, %vm3896_vm1 }
 0x32b   : > { %vm11929_vm3 = vcmp.eq.f32.partialorder %v3661_v62, 8.507059e+37  ;;  %v3555_v35 = vmul.f32 %v11908_v25, %v11677_v9  ;;  %v3565_v52 = vand.u32 2147483648, %v11677_v9  ;;  %2235 = vmax.xlane.f32.xlu1 %v2234_v20  ;;  %v3548_v56 = vsel %vm11914_vm15, %v11704_v24, %v3544_v46  ;;  %v11942_v21 = vpop.eup %7174  ;;  %v11954_v46 = vpop.xlane.xlu1 %2217 }
 0x32c   : > { %v3893_v62 = vmul.f32 %v11820_v27, %v3892_v22  ;;  %v4137_v7 = vand.u32 2147483647, %v11702_v42  ;;  %4982 = vst.msk [vmem:[%s9294_s20 + $0x1b0] sm:$0xff] %vm431_vm0, %v4854_v60  ;;  %6688 = vmatmul.msk.f32.gmra.mxu2 %vm431_vm0, %v4854_v60  ;;  %6696 = vmatmul.msk.f32.gmra.mxu3 %vm431_vm0, %v4862_v41  ;;  %v3553_v24 = vsel %vm11838_vm7, %v11832_v15, %v3548_v56  ;;  %7176 = vrcp.f32 %v11776_v36  ;;  %v11966_v15 = vpop.xlane.xlu2 %2820  ;;  %v5422_v58 = vpop.f32.mrf.mxu1  ;;  %vm11984_vm7 = vmor %vm3783_vm11, %vm3784_vm12 }
 0x32d   : > { %v3656_v12 = vadd.f32 %v11778_v34, %v3655_v38  ;;  %vm11957_vm5 = vcmp.eq.f32.partialorder %v3899_v14, 8.507059e+37  ;;  %v3668_v1 = vsub.f32 1.0, %v3667_v40  ;;  %v4129_v60 = vmul.f32 %v11942_v21, %v11702_v42  ;;  %4990 = vst.msk [vmem:[%s9294_s20 + $0x1f0] sm:$0xff] %vm431_vm0, %v4862_v41  ;;  %v14938_v38 = vld [vmem:[#allocation115_spill] sm:$0xff]  ;;  %v11974_v40 = vpop.xlane.xlu0 %2844  ;;  %v5313_v28 = vpop.f32.mrf.mxu3 }
 0x32e   : > { %v4139_v20 = vand.u32 2147483648, %v11702_v42  ;;  %v11968_v48 = vor.u32 1.1754944e-38, %v3677_v45  ;;  %v3556_v56 = vsub.f32 1.0, %v3555_v35  ;;  %v4838_v14 = vmul.f32 %v14938_v38, %v3553_v24  ;;  %6136 = vst.msk [vmem:[%s10388_s29 + $0x140] sm:$0xff] %vm431_vm0, %v5422_v58  ;;  %v5248_v38 = vpop.f32.mrf.mxu2 }
 0x32f   : > { %7178 = vrcp.f32 %v11758_v53  ;;  %v11976_v6 = vor.u32 1.1754944e-38, %v3565_v52  ;;  %v4130_v30 = vsub.f32 1.0, %v4129_v60  ;;  %vm4133_vm6 = vweird.f32 %v11702_v42  ;;  %6127 = vst.msk [vmem:[%s10388_s29 + $0xf8] sm:$0xff] %vm431_vm0, %v5313_v28 }
 0x330   : > { %v3913_v41 = vand.u32 2147483647, %v11776_v36  ;;  %v3894_v35 = vadd.f32 %v11820_v27, %v3893_v62  ;;  %vm11989_vm8 = vcmp.eq.f32.partialorder %v4137_v7, 8.507059e+37  ;;  %4966 = vst.msk [vmem:[%s9294_s20 + $0x130] sm:$0xff] %vm431_vm0, %v4838_v14  ;;  %6672 = vmatmul.msk.f32.gmra.mxu0 %vm431_vm0, %v4838_v14  ;;  %v3915_v52 = vand.u32 2147483648, %v11776_v36 }
 0x331   : > { %7180 = vrcp.f32 %v11788_v33  ;;  %v12007_v7 = vmul.f32 %v11863_v57, %v3668_v1  ;;  %v4131_v60 = vmul.f32 %v11942_v21, %v4130_v30  ;;  %vm4134_vm10 = vweird.f32 %v11942_v21  ;;  %6119 = vst.msk [vmem:[%s10388_s29 + $0xb8] sm:$0xff] %vm431_vm0, %v5248_v38 }
 0x332   : > { %v4140_v58 = vor.u32 1.1754944e-38, %v4139_v20  ;;  %v12013_v14 = vpop.eup %7176  ;;  %v3557_v2 = vmul.f32 %v11908_v25, %v3556_v56  ;;  %vm3560_vm11 = vweird.f32 %v11908_v25  ;;  %vm3909_vm12 = vweird.f32 %v11776_v36 }
 0x333   : > { %v3660_v26 = vsel %vm12002_vm9, %v11778_v34, %v3656_v12  ;;  %v3786_v30 = vsel %vm11984_vm7, %v11741_v47, %v11885_v17  ;;  %v4132_v20 = vadd.f32 %v11942_v21, %v4131_v60  ;;  %v3905_v34 = vmul.f32 %v12013_v14, %v11776_v36  ;;  %vm4135_vm7 = vmor %vm4133_vm6, %vm4134_vm10  ;;  %v12061_v28 = vpop.xlane.xlu1 %2871  ;;  %v14957_v12 = vld [vmem:[#allocation97_spill] sm:$0xff] }
 0x334   : > { %vm12038_vm14 = vcmp.eq.f32.partialorder %v3913_v41, 8.507059e+37  ;;  %vm4245_vm15 = vweird.f32 %v11758_v53  ;;  %v4249_v47 = vand.u32 2147483647, %v11758_v53  ;;  %vm3672_vm1 = vweird.f32 %v11863_v57 }
 0x335   : > { %v12044_v17 = vpop.eup %7178  ;;  %vm3559_vm4 = vweird.f32 %v11677_v9  ;;  %v3916_v23 = vor.u32 1.1754944e-38, %v3915_v52  ;;  %v3665_v56 = vsel %vm11929_vm3, %v11874_v55, %v3660_v26  ;;  %v3791_v41 = vsel %vm11925_vm2, %v11858_v0, %v3786_v30  ;;  %v12067_v55 = vpop.xlane.xlu2 %2895  ;;  %v14949_v0 = vld [vmem:[#allocation93_spill] sm:$0xff] }
 0x336   : > { %v3898_v45 = vsel %vm12031_vm13, %v11820_v27, %v3894_v35  ;;  %v4136_v62 = vsel %vm4135_vm7, %v11942_v21, %v4132_v20  ;;  %v3906_v60 = vsub.f32 1.0, %v3905_v34  ;;  %vm3910_vm6 = vweird.f32 %v12013_v14  ;;  %v14950_v35 = vld [vmem:[#allocation53_spill] sm:$0xff]  ;;  %v12079_v38 = vpop.xlane.xlu0 %2196  ;;  %v14954_v34 = vld [vmem:[#allocation52_spill] sm:$0xff]  ;;  %vm12142_vm13 = vmor %vm3559_vm4, %vm3560_vm11 }
 0x337   : > { %v4241_v42 = vmul.f32 %v12044_v17, %v11758_v53  ;;  %v12069_v31 = vpop.eup %7180  ;;  %vm3671_vm2 = vweird.f32 %v11689_v61  ;;  %v4141_v27 = vsel %vm11989_vm8, %v4140_v58, %v4136_v62  ;;  %v4846_v4 = vmul.f32 %v14949_v0, %v3665_v56  ;;  %v5357_v62 = vpop.f32.mrf.mxu0  ;;  %vm3911_vm8 = vmor %vm3909_vm12, %vm3910_vm6 }
 0x338   : > { %v4855_v21 = vmul.f32 %v14950_v35, %v3791_v41  ;;  %v3903_v52 = vsel %vm11957_vm5, %v11890_v43, %v3898_v45  ;;  %v14951_v26 = vand.u32 2147483647, %v11677_v9  ;;  %v12088_v24 = vmul.f32 %v10363_v5, %v4141_v27  ;;  %6128 = vst.msk [vmem:[%s10388_s29 + $0x100] sm:$0xff] %vm431_vm0, %v5357_v62  ;;  %v14962_v62 = vld [vmem:[#allocation91_spill] sm:$0xff] }
 0x339   : > { %v3907_v58 = vmul.f32 %v12013_v14, %v3906_v60  ;;  %v4242_v1 = vsub.f32 1.0, %v4241_v42  ;;  %v4017_v20 = vmul.f32 %v12069_v31, %v11788_v33  ;;  %v4251_v22 = vand.u32 2147483648, %v11758_v53  ;;  %4974 = vst.msk [vmem:[%s9294_s20 + $0x170] sm:$0xff] %vm431_vm0, %v4846_v4  ;;  %6680 = vmatmul.msk.f32.gmra.mxu1 %vm431_vm0, %v4846_v4  ;;  %v5487_v36 = vpop.f32.mrf.mxu2 }
 0x33a   : > { %vm12083_vm3 = vcmp.eq.f32.partialorder %v14951_v26, 8.507059e+37  ;;  %6689 = vmatmul.msk.f32.gmra.mxu2 %vm431_vm0, %v4855_v21  ;;  %v4863_v43 = vmul.f32 %v10291_v8, %v3903_v52  ;;  %v2186_v5 = vsel %vm431_vm0, %v14954_v34, -inf  ;;  %7182 = vrcp.f32 %v11861_v44  ;;  %5008 = vst.msk [vmem:[%s9294_s20 + $0x280] sm:$0xff] %vm431_vm0, %v12088_v24 }
 0x33b   : > { %v3908_v56 = vadd.f32 %v12013_v14, %v3907_v58  ;;  %v4243_v41 = vmul.f32 %v12044_v17, %v4242_v1  ;;  %vm4246_vm5 = vweird.f32 %v12044_v17  ;;  %v4018_v45 = vsub.f32 1.0, %v4017_v20  ;;  %2187 = vmax.xlane.f32.xlu0 %v2186_v5  ;;  %4983 = vst.msk [vmem:[%s9294_s20 + $0x1b8] sm:$0xff] %vm431_vm0, %v4855_v21  ;;  %v12136_v21 = vpop.xlane.xlu1 %2220 }
 0x33c   : > { %v3558_v8 = vadd.f32 %v11908_v25, %v3557_v2  ;;  %v4025_v60 = vand.u32 2147483647, %v11788_v33  ;;  %v4027_v42 = vand.u32 2147483648, %v11788_v33  ;;  %6697 = vmatmul.msk.f32.gmra.mxu3 %vm431_vm0, %v4863_v43  ;;  %7184 = vrcp.f32 %v11854_v29  ;;  %4991 = vst.msk [vmem:[%s9294_s20 + $0x1f8] sm:$0xff] %vm431_vm0, %v4863_v43  ;;  %vm4247_vm10 = vmor %vm4245_vm15, %vm4246_vm5 }
 0x33d   : > { %v3912_v27 = vsel %vm3911_vm8, %v12013_v14, %v3908_v56  ;;  %v4244_v2 = vadd.f32 %v12044_v17, %v4243_v41  ;;  %v4019_v0 = vmul.f32 %v12069_v31, %v4018_v45  ;;  %vm4022_vm9 = vweird.f32 %v12069_v31  ;;  %6144 = vst.msk [vmem:[%s10388_s29 + $0x180] sm:$0xff] %vm431_vm0, %v5487_v36  ;;  %v12155_v26 = vpop.xlane.xlu2 %2823  ;;  %vm12172_vm15 = vmor %vm3671_vm2, %vm3672_vm1 }
 0x33e   : > { %v3670_v4 = vadd.f32 %v11863_v57, %v12007_v7  ;;  %v3917_v35 = vsel %vm12038_vm14, %v3916_v23, %v3912_v27  ;;  %v4252_v14 = vor.u32 1.1754944e-38, %v4251_v22  ;;  %vm4021_vm12 = vweird.f32 %v11788_v33  ;;  %v14960_v22 = vld [vmem:[#allocation57_spill] sm:$0xff]  ;;  %v14964_v27 = vld [vmem:[#allocation14_spill] sm:$0xff] }
 0x33f   : > { %v12147_v23 = vmul.f32 %v14957_v12, %v3917_v35  ;;  %v4248_v52 = vsel %vm4247_vm10, %v12044_v17, %v4244_v2  ;;  %vm4250_vm14 = vcmp.eq.f32.partialorder %v4249_v47, 8.507059e+37  ;;  %v4020_v33 = vadd.f32 %v12069_v31, %v4019_v0  ;;  %vm4023_vm11 = vmor %vm4021_vm12, %vm4022_vm9  ;;  %v12166_v47 = vpop.xlane.xlu0 %2847 }
 0x340   : > { %v12157_v9 = vpop.eup %7182  ;;  %v4253_v58 = vsel %vm4250_vm14, %v4252_v14, %v4248_v52  ;;  %v4028_v1 = vor.u32 1.1754944e-38, %v4027_v42  ;;  %v2352_v20 = vsub.f32 %v9875_v37, %v11878_v13  ;;  %v3562_v53 = vsel %vm12142_vm13, %v11908_v25, %v3558_v8 }
 0x341   : > { %4992 = vst.msk [vmem:[%s9294_s20 + $0x200] sm:$0xff] %vm431_vm0, %v12147_v23  ;;  %v4888_v37 = vmul.f32 %v14960_v22, %v4253_v58  ;;  %v4024_v13 = vsel %vm4023_vm11, %v12069_v31, %v4020_v33  ;;  %vm4026_vm4 = vcmp.eq.f32.partialorder %v4025_v60, 8.507059e+37  ;;  %v4255_v25 = vmul.f32 %v12157_v9, %v11861_v44 }
 0x342   : > { %v12183_v43 = vpop.eup %7184  ;;  %v4029_v5 = vsel %vm4026_vm4, %v4028_v1, %v4024_v13  ;;  %v2592_v56 = vmul.f32 1.442695, %v2352_v20  ;;  %v3567_v41 = vsel %vm12083_vm3, %v11976_v6, %v3562_v53  ;;  %v3674_v45 = vsel %vm12172_vm15, %v11863_v57, %v3670_v4  ;;  %6714 = vmatmul.msk.f32.vlgmr.msra.gmra.mxu2 %vm431_vm0, %v12088_v24  ;;  %v14963_v57 = vld [vmem:[#allocation95_spill] sm:$0xff] }
 0x343   : > { %v14961_v31 = vand.u32 2147483647, %v11689_v61  ;;  %5016 = vst.msk [vmem:[%s9294_s20 + $0x2c0] sm:$0xff] %vm431_vm0, %v4888_v37  ;;  %v12198_v8 = vmul.f32 %v14962_v62, %v4029_v5  ;;  %v4256_v60 = vsub.f32 1.0, %v4255_v25  ;;  %v4143_v6 = vmul.f32 %v12183_v43, %v11854_v29  ;;  %2913 = vadd.xlane.f32.xlu0 %v11261_v59  ;;  %v12226_v36 = vpop.xlane.xlu1 %2874  ;;  %v5552_v7 = vpop.f32.mrf.mxu3 }
 0x344   : > { %7186 = vpow2.f32 %v2592_v56  ;;  %v4839_v30 = vmul.f32 %v14963_v57, %v3567_v41  ;;  %6722 = vmatmul.msk.f32.vlgmr.msra.gmra.mxu3 %vm431_vm0, %v4888_v37  ;;  %v12208_v61 = vsel %vm431_vm0, %v11331_v51, 0.0  ;;  %v12217_v59 = vsel %vm431_vm0, %v11318_v16, 0.0  ;;  %6152 = vst.msk [vmem:[%s10388_s29 + $0x1c0] sm:$0xff] %vm431_vm0, %v5552_v7  ;;  %v5360_v1 = vpop.f32.mrf.mxu0 }
 0x345   : > { %vm3676_vm1 = vcmp.eq.f32.partialorder %v14961_v31, 8.507059e+37  ;;  %5000 = vst.msk [vmem:[%s9294_s20 + $0x240] sm:$0xff] %vm431_vm0, %v12198_v8  ;;  %v4144_v42 = vsub.f32 1.0, %v4143_v6  ;;  %7188 = vrcp.f32 %v11966_v15  ;;  %v2360_v0 = vsub.f32 %v9823_v10, %v11954_v46  ;;  %v12237_v12 = vpop.xlane.xlu2 %2898 }
 0x346   : > { %v3679_v24 = vsel %vm3676_vm1, %v11968_v48, %v3674_v45  ;;  %v4257_v48 = vmul.f32 %v12157_v9, %v4256_v60  ;;  %4967 = vst.msk [vmem:[%s9294_s20 + $0x138] sm:$0xff] %vm431_vm0, %v4839_v30  ;;  %6673 = vmatmul.msk.f32.gmra.mxu0 %vm431_vm0, %v4839_v30  ;;  %7190 = vrcp.f32 %v11974_v40  ;;  %v12230_v4 = vsel %vm431_vm0, %v11338_v39, 0.0 }
 0x347   : > { %v4847_v2 = vmul.f32 %v14964_v27, %v3679_v24  ;;  %v4263_v35 = vand.u32 2147483647, %v11861_v44  ;;  %v4145_v14 = vmul.f32 %v12183_v43, %v4144_v42  ;;  %v12241_v10 = vsel %vm431_vm0, %v11431_v50, 0.0  ;;  %v12251_v20 = vpop.xlane.xlu0 %2199  ;;  %6129 = vst.msk [vmem:[%s10388_s29 + $0x108] sm:$0xff] %vm431_vm0, %v5360_v1 }
 0x348   : > { %v12245_v46 = vsel %vm431_vm0, %v11406_v19, 0.0  ;;  %v4265_v52 = vand.u32 2147483648, %v11861_v44  ;;  %v4151_v33 = vand.u32 2147483647, %v11854_v29  ;;  %v2608_v58 = vmul.f32 1.442695, %v2360_v0 }
 0x349   : > { %4975 = vst.msk [vmem:[%s9294_s20 + $0x178] sm:$0xff] %vm431_vm0, %v4847_v2  ;;  %6681 = vmatmul.msk.f32.gmra.mxu1 %vm431_vm0, %v4847_v2  ;;  %vm4260_vm7 = vweird.f32 %v12157_v9  ;;  %v4153_v53 = vand.u32 2147483648, %v11854_v29  ;;  %7192 = vrcp.f32 %v12067_v55  ;;  %v12260_v17 = vsel %vm431_vm0, %v11463_v3, 0.0 }
 0x34a   : > { %v12262_v22 = vpop.eup %7186  ;;  %v4258_v37 = vadd.f32 %v12157_v9, %v4257_v48  ;;  %v4146_v13 = vadd.f32 %v12183_v43, %v4145_v14  ;;  %vm4148_vm6 = vweird.f32 %v12183_v43  ;;  %7194 = vpow2.f32 %v2608_v58 }
 0x34b   : > { %v12267_v25 = vpop.eup %7188  ;;  %vm4259_vm2 = vweird.f32 %v11861_v44  ;;  %vm4147_vm3 = vweird.f32 %v11854_v29  ;;  %v2960_v5 = vsel %vm431_vm0, %v12262_v22, 0.0  ;;  %7196 = vrcp.f32 %v12061_v28  ;;  %v5490_v0 = vpop.f32.mrf.mxu2 }
 0x34c   : > { %v12274_v56 = vpop.eup %7190  ;;  %vm12278_vm5 = vmor %vm4259_vm2, %vm4260_vm7  ;;  %vm12282_vm8 = vcmp.eq.f32.partialorder %v4263_v35, 8.507059e+37  ;;  %v4266_v44 = vor.u32 1.1754944e-38, %v4265_v52  ;;  %vm12286_vm9 = vcmp.eq.f32.partialorder %v4151_v33, 8.507059e+37  ;;  %v3919_v31 = vmul.f32 %v12267_v25, %v11966_v15  ;;  %2961 = vadd.xlane.f32.xlu1 %v2960_v5  ;;  %6145 = vst.msk [vmem:[%s10388_s29 + $0x188] sm:$0xff] %vm431_vm0, %v5490_v0  ;;  %v12322_v7 = vpop.xlane.xlu1 %2223  ;;  %v14976_v0 = vld [vmem:[#allocation60_spill] sm:$0xff] }
 0x34d   : > { %vm4149_vm10 = vmor %vm4147_vm3, %vm4148_vm6  ;;  %v4154_v62 = vor.u32 1.1754944e-38, %v4153_v53  ;;  %vm3923_vm12 = vweird.f32 %v11966_v15  ;;  %v3927_v60 = vand.u32 2147483647, %v11966_v15  ;;  %v4031_v6 = vmul.f32 %v12274_v56, %v11974_v40 }
 0x34e   : > { %v3920_v57 = vsub.f32 1.0, %v3919_v31  ;;  %v3929_v30 = vand.u32 2147483648, %v11966_v15  ;;  %6698 = vmatmul.msk.f32.vlgmr.msra.gmra.mxu0 %vm431_vm0, %v12147_v23  ;;  %v4150_v24 = vsel %vm4149_vm10, %v12183_v43, %v4146_v13  ;;  %v4262_v42 = vsel %vm12278_vm5, %v12157_v9, %v4258_v37  ;;  %v12331_v37 = vpop.xlane.xlu2 %2826  ;;  %v5555_v13 = vpop.f32.mrf.mxu3  ;;  %v14990_v31 = vld [vmem:[#allocation46_spill] sm:$0xff] }
 0x34f   : > { %v12303_v27 = vpop.eup %7192  ;;  %v4032_v2 = vsub.f32 1.0, %v4031_v6  ;;  %vm4035_vm13 = vweird.f32 %v11974_v40  ;;  %v4155_v48 = vsel %vm12286_vm9, %v4154_v62, %v4150_v24  ;;  %v4267_v23 = vsel %vm12282_vm8, %v4266_v44, %v4262_v42  ;;  %6153 = vst.msk [vmem:[%s10388_s29 + $0x1c8] sm:$0xff] %vm431_vm0, %v5555_v13  ;;  %v14973_v44 = vld [vmem:[#allocation24_spill] sm:$0xff] }
 0x350   : > { %v12312_v43 = vpop.eup %7194  ;;  %v3921_v35 = vmul.f32 %v12267_v25, %v3920_v57  ;;  %v4039_v9 = vand.u32 2147483647, %v11974_v40  ;;  %v4269_v14 = vmul.f32 %v12303_v27, %v12067_v55  ;;  %v4881_v58 = vmul.f32 %v10412_v32, %v4155_v48  ;;  %v12342_v32 = vpop.xlane.xlu0 %2850 }
 0x351   : > { %6706 = vmatmul.msk.f32.vlgmr.msra.gmra.mxu1 %vm431_vm0, %v12198_v8  ;;  %v2353_v8 = vsub.f32 %v9956_v49, %v12079_v38  ;;  %v12324_v52 = vpop.eup %7196  ;;  %v4033_v33 = vmul.f32 %v12274_v56, %v4032_v2  ;;  %v4889_v1 = vmul.f32 %v10512_v18, %v4267_v23  ;;  %v2984_v53 = vsel %vm431_vm0, %v12312_v43, 0.0 }
 0x352   : > { %vm12333_vm14 = vcmp.eq.f32.partialorder %v3927_v60, 8.507059e+37  ;;  %v3930_v38 = vor.u32 1.1754944e-38, %v3929_v30  ;;  %v4041_v5 = vand.u32 2147483648, %v11974_v40  ;;  %v4157_v41 = vmul.f32 %v12324_v52, %v12061_v28  ;;  %2985 = vadd.xlane.f32.xlu2 %v2984_v53  ;;  %5009 = vst.msk [vmem:[%s9294_s20 + $0x288] sm:$0xff] %vm431_vm0, %v4881_v58  ;;  %6715 = vmatmul.msk.f32.gmra.mxu2 %vm431_vm0, %v4881_v58 }
 0x353   : > { %v3922_v18 = vadd.f32 %v12267_v25, %v3921_v35  ;;  %vm3924_vm11 = vweird.f32 %v12267_v25  ;;  %v4270_v45 = vsub.f32 1.0, %v4269_v14  ;;  %6723 = vmatmul.msk.f32.gmra.mxu3 %vm431_vm0, %v4889_v1  ;;  %v2213_v29 = vsel %vm431_vm0, %v14973_v44, -inf  ;;  %5017 = vst.msk [vmem:[%s9294_s20 + $0x2c8] sm:$0xff] %vm431_vm0, %v4889_v1 }
 0x354   : > { %vm12352_vm15 = vcmp.eq.f32.partialorder %v4039_v9, 8.507059e+37  ;;  %v4158_v62 = vsub.f32 1.0, %v4157_v41  ;;  %v2594_v60 = vmul.f32 1.442695, %v2353_v8  ;;  %2214 = vmax.xlane.f32.xlu1 %v2213_v29  ;;  %7198 = vrcp.f32 %v12155_v26  ;;  %vm3925_vm1 = vmor %vm3923_vm12, %vm3924_vm11  ;;  %v12403_v13 = vpop.xlane.xlu1 %2877 }
 0x355   : > { %v4034_v6 = vadd.f32 %v12274_v56, %v4033_v33  ;;  %vm4036_vm4 = vweird.f32 %v12274_v56  ;;  %v2361_v57 = vsub.f32 %v9911_v63, %v12136_v21  ;;  %7200 = vrcp.f32 %v12166_v47 }
 0x356   : > { %v4042_v30 = vor.u32 1.1754944e-38, %v4041_v5  ;;  %vm4273_vm7 = vweird.f32 %v12067_v55  ;;  %v4277_v24 = vand.u32 2147483647, %v12067_v55  ;;  %v4159_v42 = vmul.f32 %v12324_v52, %v4158_v62  ;;  %vm4037_vm6 = vmor %vm4035_vm13, %vm4036_vm4  ;;  %v12401_v53 = vpop.xlane.xlu2 %2901  ;;  %v14979_v5 = vld [vmem:[#allocation61_spill] sm:$0xff] }
 0x357   : > { %v4271_v2 = vmul.f32 %v12303_v27, %v4270_v45  ;;  %v4279_v48 = vand.u32 2147483648, %v12067_v55  ;;  %v2610_v23 = vmul.f32 1.442695, %v2361_v57  ;;  %v3926_v63 = vsel %vm3925_vm1, %v12267_v25, %v3922_v18 }
 0x358   : > { %v4165_v15 = vand.u32 2147483647, %v12061_v28  ;;  %7202 = vpow2.f32 %v2594_v60  ;;  %v3931_v21 = vsel %vm12333_vm14, %v3930_v38, %v3926_v63  ;;  %v2237_v35 = vsel %vm431_vm0, %v14976_v0, -inf  ;;  %v12414_v41 = vpop.xlane.xlu0 %2202  ;;  %v14984_v60 = vld [vmem:[#allocation49_spill] sm:$0xff] }
 0x359   : > { %v4167_v9 = vand.u32 2147483648, %v12061_v28  ;;  %7204 = vpow2.f32 %v2610_v23  ;;  %v4865_v14 = vmul.f32 %v10406_v54, %v3931_v21  ;;  %v4038_v25 = vsel %vm4037_vm6, %v12274_v56, %v4034_v6 }
 0x35a   : > { %v12384_v8 = vpop.eup %7198  ;;  %v4160_v40 = vadd.f32 %v12324_v52, %v4159_v42  ;;  %vm4162_vm2 = vweird.f32 %v12324_v52  ;;  %2238 = vmax.xlane.f32.xlu2 %v2237_v35  ;;  %v4043_v33 = vsel %vm12352_vm15, %v4042_v30, %v4038_v25  ;;  %7206 = vrcp.f32 %v12237_v12  ;;  %v14986_v25 = vld [vmem:[#allocation13_spill] sm:$0xff] }
 0x35b   : > { %v12391_v58 = vpop.eup %7200  ;;  %v4272_v1 = vadd.f32 %v12303_v27, %v4271_v2  ;;  %vm4274_vm3 = vweird.f32 %v12303_v27  ;;  %v3933_v54 = vmul.f32 %v12384_v8, %v12155_v26  ;;  %4993 = vst.msk [vmem:[%s9294_s20 + $0x208] sm:$0xff] %vm431_vm0, %v4865_v14  ;;  %6699 = vmatmul.msk.f32.gmra.mxu0 %vm431_vm0, %v4865_v14  ;;  %v4873_v56 = vmul.f32 %v10401_v11, %v4043_v33 }
 0x35c   : > { %vm12405_vm5 = vcmp.eq.f32.partialorder %v4277_v24, 8.507059e+37  ;;  %vm4161_vm8 = vweird.f32 %v12061_v28  ;;  %v4045_v38 = vmul.f32 %v12391_v58, %v12166_v47  ;;  %2937 = vadd.xlane.f32.xlu1 %v14979_v5  ;;  %7208 = vrcp.f32 %v12226_v36  ;;  %vm12431_vm12 = vmor %vm4273_vm7, %vm4274_vm3  ;;  %v14987_v5 = vld [vmem:[#allocation54_spill] sm:$0xff] }
 0x35d   : > { %v4280_v11 = vor.u32 1.1754944e-38, %v4279_v48  ;;  %vm12418_vm9 = vmor %vm4161_vm8, %vm4162_vm2  ;;  %vm4166_vm10 = vcmp.eq.f32.partialorder %v4165_v15, 8.507059e+37  ;;  %v4168_v45 = vor.u32 1.1754944e-38, %v4167_v9  ;;  %v3934_v29 = vsub.f32 1.0, %v3933_v54  ;;  %5001 = vst.msk [vmem:[%s9294_s20 + $0x248] sm:$0xff] %vm431_vm0, %v4873_v56  ;;  %6707 = vmatmul.msk.f32.gmra.mxu1 %vm431_vm0, %v4873_v56 }
 0x35e   : > { %v12425_v28 = vpop.eup %7202  ;;  %vm3937_vm13 = vweird.f32 %v12155_v26  ;;  %v4046_v62 = vsub.f32 1.0, %v4045_v38  ;;  %v2354_v6 = vsub.f32 %v14984_v60, %v12251_v20  ;;  %v4164_v57 = vsel %vm12418_vm9, %v12324_v52, %v4160_v40  ;;  %v14985_v52 = vld [vmem:[#allocation102_spill] sm:$0xff]  ;;  %v12488_v60 = vpop.xlane.xlu2 %2829 }
 0x35f   : > { %v12441_v30 = vpop.eup %7204  ;;  %v3935_v24 = vmul.f32 %v12384_v8, %v3934_v29  ;;  %v3941_v55 = vand.u32 2147483647, %v12155_v26  ;;  %v4169_v42 = vsel %vm4166_vm10, %v4168_v45, %v4164_v57  ;;  %v4276_v2 = vsel %vm12431_vm12, %v12303_v27, %v4272_v1 }
 0x360   : > { %v12448_v48 = vpop.eup %7206  ;;  %v3943_v20 = vand.u32 2147483648, %v12155_v26  ;;  %v4047_v23 = vmul.f32 %v12391_v58, %v4046_v62  ;;  %v2596_v63 = vmul.f32 1.442695, %v2354_v6  ;;  %v4882_v15 = vmul.f32 %v14985_v52, %v4169_v42  ;;  %v5425_v18 = vpop.f32.mrf.mxu1 }
 0x361   : > { %v4053_v21 = vand.u32 2147483647, %v12166_v47  ;;  %v4055_v35 = vand.u32 2147483648, %v12166_v47  ;;  %v4283_v9 = vmul.f32 %v12448_v48, %v12237_v12  ;;  %v4281_v27 = vsel %vm12405_vm5, %v4280_v11, %v4276_v2  ;;  %v12490_v6 = vpop.xlane.xlu1 %2226  ;;  %6137 = vst.msk [vmem:[%s10388_s29 + $0x148] sm:$0xff] %vm431_vm0, %v5425_v18 }
 0x362   : > { %v12459_v14 = vpop.eup %7208  ;;  %vm3938_vm14 = vweird.f32 %v12384_v8  ;;  %7210 = vpow2.f32 %v2596_v63  ;;  %5010 = vst.msk [vmem:[%s9294_s20 + $0x290] sm:$0xff] %vm431_vm0, %v4882_v15  ;;  %6716 = vmatmul.msk.f32.gmra.mxu2 %vm431_vm0, %v4882_v15  ;;  %v4890_v40 = vmul.f32 %v14986_v25, %v4281_v27  ;;  %v2963_v33 = vsel %vm431_vm0, %v12425_v28, 0.0 }
 0x363   : > { %v3936_v1 = vadd.f32 %v12384_v8, %v3935_v24  ;;  %vm4050_vm11 = vweird.f32 %v12391_v58  ;;  %v4171_v54 = vmul.f32 %v12459_v14, %v12226_v36  ;;  %2964 = vadd.xlane.f32.xlu2 %v2963_v33  ;;  %v2987_v56 = vsel %vm431_vm0, %v12441_v30, 0.0  ;;  %vm12498_vm1 = vmor %vm3937_vm13, %vm3938_vm14  ;;  %v14995_v33 = vld [vmem:[#allocation63_spill] sm:$0xff] }
 0x364   : > { %v4048_v49 = vadd.f32 %v12391_v58, %v4047_v23  ;;  %v4284_v38 = vsub.f32 1.0, %v4283_v9  ;;  %5018 = vst.msk [vmem:[%s9294_s20 + $0x2d0] sm:$0xff] %vm431_vm0, %v4890_v40  ;;  %6724 = vmatmul.msk.f32.gmra.mxu3 %vm431_vm0, %v4890_v40  ;;  %2988 = vadd.xlane.f32.xlu0 %v2987_v56  ;;  %v2189_v11 = vsel %vm431_vm0, %v14987_v5, -inf  ;;  %7212 = vrcp.f32 %v12331_v37 }
 0x365   : > { %vm12481_vm15 = vcmp.eq.f32.partialorder %v3941_v55, 8.507059e+37  ;;  %vm4049_vm4 = vweird.f32 %v12166_v47  ;;  %v4172_v29 = vsub.f32 1.0, %v4171_v54  ;;  %2190 = vmax.xlane.f32.xlu1 %v2189_v11  ;;  %v2362_v62 = vsub.f32 %v14990_v31, %v12322_v7  ;;  %v12507_v55 = vpop.xlane.xlu0 %2853  ;;  %v5493_v11 = vpop.f32.mrf.mxu2  ;;  %v14998_v31 = vld [vmem:[#allocation15_spill] sm:$0xff] }
 0x366   : > { %v3944_v47 = vor.u32 1.1754944e-38, %v3943_v20  ;;  %vm12502_vm7 = vcmp.eq.f32.partialorder %v4053_v21, 8.507059e+37  ;;  %v4056_v7 = vor.u32 1.1754944e-38, %v4055_v35  ;;  %7214 = vrcp.f32 %v12342_v32  ;;  %vm4051_vm6 = vmor %vm4049_vm4, %vm4050_vm11  ;;  %6146 = vst.msk [vmem:[%s10388_s29 + $0x190] sm:$0xff] %vm431_vm0, %v5493_v11  ;;  %v15009_v11 = vld [vmem:[#allocation62_spill] sm:$0xff] }
 0x367   : > { %vm4287_vm2 = vweird.f32 %v12237_v12  ;;  %v4291_v26 = vand.u32 2147483647, %v12237_v12  ;;  %v4173_v42 = vmul.f32 %v12459_v14, %v4172_v29  ;;  %v2612_v2 = vmul.f32 1.442695, %v2362_v62  ;;  %v5558_v25 = vpop.f32.mrf.mxu3 }
 0x368   : > { %v12514_v20 = vpop.eup %7210  ;;  %v4285_v23 = vmul.f32 %v12448_v48, %v4284_v38  ;;  %v4293_v63 = vand.u32 2147483648, %v12237_v12  ;;  %v3940_v52 = vsel %vm12498_vm1, %v12384_v8, %v3936_v1  ;;  %v4052_v15 = vsel %vm4051_vm6, %v12391_v58, %v4048_v49  ;;  %v14996_v8 = vld [vmem:[#allocation65_spill] sm:$0xff]  ;;  %6154 = vst.msk [vmem:[%s10388_s29 + $0x1d0] sm:$0xff] %vm431_vm0, %v5558_v25  ;;  %v14997_v38 = vld [vmem:[#allocation11_spill] sm:$0xff] }
 0x369   : > { %v4179_v21 = vand.u32 2147483647, %v12226_v36  ;;  %v4181_v35 = vand.u32 2147483648, %v12226_v36  ;;  %v3945_v9 = vsel %vm12481_vm15, %v3944_v47, %v3940_v52  ;;  %v4057_v27 = vsel %vm12502_vm7, %v4056_v7, %v4052_v15  ;;  %v12587_v15 = vpop.xlane.xlu1 %2880 }
 0x36a   : > { %v12528_v40 = vpop.eup %7212  ;;  %7216 = vpow2.f32 %v2612_v2  ;;  %v4866_v54 = vmul.f32 %v14995_v33, %v3945_v9  ;;  %v4874_v1 = vmul.f32 %v14996_v8, %v4057_v27  ;;  %v2966_v58 = vsel %vm431_vm0, %v12514_v20, 0.0 }
 0x36b   : > { %v4174_v56 = vadd.f32 %v12459_v14, %v4173_v42  ;;  %vm4176_vm3 = vweird.f32 %v12459_v14  ;;  %v3947_v49 = vmul.f32 %v12528_v40, %v12331_v37  ;;  %2916 = vadd.xlane.f32.xlu2 %v14997_v38  ;;  %7218 = vrcp.f32 %v12401_v53 }
 0x36c   : > { %v12542_v18 = vpop.eup %7214  ;;  %v4286_v45 = vadd.f32 %v12448_v48, %v4285_v23  ;;  %vm4288_vm5 = vweird.f32 %v12448_v48  ;;  %v3955_v29 = vand.u32 2147483647, %v12331_v37  ;;  %4994 = vst.msk [vmem:[%s9294_s20 + $0x210] sm:$0xff] %vm431_vm0, %v4866_v54  ;;  %6700 = vmatmul.msk.f32.gmra.mxu0 %vm431_vm0, %v4866_v54  ;;  %2940 = vadd.xlane.f32.xlu0 %v14998_v31  ;;  %7220 = vrcp.f32 %v12403_v13 }
 0x36d   : > { %vm12552_vm8 = vcmp.eq.f32.partialorder %v4291_v26, 8.507059e+37  ;;  %vm4175_vm9 = vweird.f32 %v12226_v36  ;;  %v3948_v57 = vsub.f32 1.0, %v3947_v49  ;;  %v4059_v47 = vmul.f32 %v12542_v18, %v12342_v32  ;;  %5002 = vst.msk [vmem:[%s9294_s20 + $0x250] sm:$0xff] %vm431_vm0, %v4874_v1  ;;  %6708 = vmatmul.msk.f32.gmra.mxu1 %vm431_vm0, %v4874_v1  ;;  %2967 = vadd.xlane.f32.xlu1 %v2966_v58  ;;  %v15003_v36 = vld [vmem:[#allocation50_spill] sm:$0xff]  ;;  %vm12576_vm13 = vmor %vm4287_vm2, %vm4288_vm5  ;;  %v15008_v1 = vld [vmem:[#allocation69_spill] sm:$0xff] }
 0x36e   : > { %v4294_v24 = vor.u32 1.1754944e-38, %v4293_v63  ;;  %vm12564_vm10 = vmor %vm4175_vm9, %vm4176_vm3  ;;  %vm4180_vm12 = vcmp.eq.f32.partialorder %v4179_v21, 8.507059e+37  ;;  %v4182_v26 = vor.u32 1.1754944e-38, %v4181_v35  ;;  %v2355_v42 = vsub.f32 %v15003_v36, %v12414_v41  ;;  %v12585_v41 = vpop.xlane.xlu2 %2904  ;;  %v15012_v36 = vld [vmem:[#allocation92_spill] sm:$0xff] }
 0x36f   : > { %vm3951_vm14 = vweird.f32 %v12331_v37  ;;  %v3957_v23 = vand.u32 2147483648, %v12331_v37  ;;  %v4060_v63 = vsub.f32 1.0, %v4059_v47  ;;  %v4178_v52 = vsel %vm12564_vm10, %v12459_v14, %v4174_v56  ;;  %v12599_v14 = vpop.xlane.xlu0 %2205 }
 0x370   : > { %v12589_v21 = vpop.eup %7216  ;;  %v3949_v12 = vmul.f32 %v12528_v40, %v3948_v57  ;;  %vm12592_vm11 = vcmp.eq.f32.partialorder %v3955_v29, 8.507059e+37  ;;  %v2598_v9 = vmul.f32 1.442695, %v2355_v42  ;;  %v4183_v27 = vsel %vm4180_vm12, %v4182_v26, %v4178_v52  ;;  %v15011_v26 = vld [vmem:[#allocation18_spill] sm:$0xff] }
 0x371   : > { %v4290_v25 = vsel %vm12576_vm13, %v12448_v48, %v4286_v45  ;;  %v12601_v33 = vpop.eup %7218  ;;  %v4061_v54 = vmul.f32 %v12542_v18, %v4060_v63  ;;  %v4067_v8 = vand.u32 2147483647, %v12342_v32  ;;  %v4883_v58 = vmul.f32 %v15008_v1, %v4183_v27  ;;  %v5363_v27 = vpop.f32.mrf.mxu0 }
 0x372   : > { %v4295_v56 = vsel %vm12552_vm8, %v4294_v24, %v4290_v25  ;;  %v12608_v49 = vpop.eup %7220  ;;  %v4069_v38 = vand.u32 2147483648, %v12342_v32  ;;  %v4297_v48 = vmul.f32 %v12601_v33, %v12401_v53  ;;  %7222 = vpow2.f32 %v2598_v9  ;;  %v15010_v24 = vld [vmem:[#allocation27_spill] sm:$0xff]  ;;  %6130 = vst.msk [vmem:[%s10388_s29 + $0x110] sm:$0xff] %vm431_vm0, %v5363_v27 }
 0x373   : > { %v4891_v45 = vmul.f32 %v15009_v11, %v4295_v56  ;;  %vm3952_vm15 = vweird.f32 %v12528_v40  ;;  %vm4064_vm4 = vweird.f32 %v12542_v18  ;;  %v4185_v29 = vmul.f32 %v12608_v49, %v12403_v13  ;;  %5011 = vst.msk [vmem:[%s9294_s20 + $0x298] sm:$0xff] %vm431_vm0, %v4883_v58  ;;  %6717 = vmatmul.msk.f32.gmra.mxu2 %vm431_vm0, %v4883_v58  ;;  %v12675_v11 = vpop.xlane.xlu1 %2229 }
 0x374   : > { %v2990_v31 = vsel %vm431_vm0, %v12589_v21, 0.0  ;;  %v3950_v62 = vadd.f32 %v12528_v40, %v3949_v12  ;;  %v4062_v57 = vadd.f32 %v12542_v18, %v4061_v54  ;;  %v4298_v47 = vsub.f32 1.0, %v4297_v48  ;;  %2919 = vadd.xlane.f32.xlu0 %v15010_v24  ;;  %vm12639_vm7 = vmor %vm3951_vm14, %vm3952_vm15  ;;  %v5428_v35 = vpop.f32.mrf.mxu1  ;;  %v15020_v24 = vld [vmem:[#allocation28_spill] sm:$0xff] }
 0x375   : > { %5019 = vst.msk [vmem:[%s9294_s20 + $0x2d8] sm:$0xff] %vm431_vm0, %v4891_v45  ;;  %6725 = vmatmul.msk.f32.gmra.mxu3 %vm431_vm0, %v4891_v45  ;;  %7224 = vrcp.f32 %v12488_v60  ;;  %vm4063_vm1 = vweird.f32 %v12342_v32  ;;  %v4186_v7 = vsub.f32 1.0, %v4185_v29  ;;  %2991 = vadd.xlane.f32.xlu2 %v2990_v31  ;;  %v2363_v42 = vsub.f32 %v15012_v36, %v12490_v6  ;;  %v15023_v6 = vld [vmem:[#allocation17_spill] sm:$0xff] }
 0x376   : > { %2943 = vadd.xlane.f32.xlu1 %v15011_v26  ;;  %7226 = vrcp.f32 %v12507_v55  ;;  %v3958_v63 = vor.u32 1.1754944e-38, %v3957_v23  ;;  %vm12643_vm6 = vcmp.eq.f32.partialorder %v4067_v8, 8.507059e+37  ;;  %v4070_v52 = vor.u32 1.1754944e-38, %v4069_v38  ;;  %vm12650_vm3 = vmor %vm4063_vm1, %vm4064_vm4  ;;  %v12673_v48 = vpop.xlane.xlu2 %2832  ;;  %6138 = vst.msk [vmem:[%s10388_s29 + $0x150] sm:$0xff] %vm431_vm0, %v5428_v35 }
 0x377   : > { %vm4301_vm2 = vweird.f32 %v12401_v53  ;;  %v4305_v37 = vand.u32 2147483647, %v12401_v53  ;;  %v4307_v12 = vand.u32 2147483648, %v12401_v53  ;;  %v4187_v9 = vmul.f32 %v12608_v49, %v4186_v7  ;;  %v12684_v31 = vpop.xlane.xlu0 %2856 }
 0x378   : > { %v2614_v23 = vmul.f32 1.442695, %v2363_v42  ;;  %v12657_v25 = vpop.eup %7222  ;;  %v4299_v54 = vmul.f32 %v12601_v33, %v4298_v47  ;;  %vm4189_vm5 = vweird.f32 %v12403_v13  ;;  %v3954_v8 = vsel %vm12639_vm7, %v12528_v40, %v3950_v62 }
 0x379   : > { %v4066_v1 = vsel %vm12650_vm3, %v12542_v18, %v4062_v57  ;;  %v4193_v58 = vand.u32 2147483647, %v12403_v13  ;;  %v4195_v56 = vand.u32 2147483648, %v12403_v13  ;;  %v3959_v38 = vsel %vm12592_vm11, %v3958_v63, %v3954_v8  ;;  %v15019_v18 = vld [vmem:[#allocation16_spill] sm:$0xff] }
 0x37a   : > { %7228 = vpow2.f32 %v2614_v23  ;;  %vm4190_vm8 = vweird.f32 %v12608_v49  ;;  %v4867_v45 = vmul.f32 %v15019_v18, %v3959_v38  ;;  %v4071_v29 = vsel %vm12643_vm6, %v4070_v52, %v4066_v1 }
 0x37b   : > { %v12677_v40 = vpop.eup %7224  ;;  %7230 = vrcp.f32 %v12585_v41  ;;  %v4188_v57 = vadd.f32 %v12608_v49, %v4187_v9  ;;  %v4875_v7 = vmul.f32 %v15020_v24, %v4071_v29  ;;  %v2969_v26 = vsel %vm431_vm0, %v12657_v25, 0.0  ;;  %v5496_v9 = vpop.f32.mrf.mxu2  ;;  %vm12717_vm12 = vmor %vm4189_vm5, %vm4190_vm8  ;;  %v15033_v24 = vld [vmem:[#allocation76_spill] sm:$0xff] }
 0x37c   : > { %v12686_v62 = vpop.eup %7226  ;;  %v3961_v47 = vmul.f32 %v12677_v40, %v12488_v60  ;;  %v4300_v36 = vadd.f32 %v12601_v33, %v4299_v54  ;;  %vm4302_vm9 = vweird.f32 %v12601_v33  ;;  %v3969_v42 = vand.u32 2147483647, %v12488_v60  ;;  %4995 = vst.msk [vmem:[%s9294_s20 + $0x218] sm:$0xff] %vm431_vm0, %v4867_v45  ;;  %6701 = vmatmul.msk.f32.gmra.mxu0 %vm431_vm0, %v4867_v45 }
 0x37d   : > { %v4073_v2 = vmul.f32 %v12686_v62, %v12507_v55  ;;  %vm12704_vm10 = vcmp.eq.f32.partialorder %v4305_v37, 8.507059e+37  ;;  %v4308_v32 = vor.u32 1.1754944e-38, %v4307_v12  ;;  %5003 = vst.msk [vmem:[%s9294_s20 + $0x258] sm:$0xff] %vm431_vm0, %v4875_v7  ;;  %6709 = vmatmul.msk.f32.gmra.mxu1 %vm431_vm0, %v4875_v7  ;;  %7232 = vrcp.f32 %v12587_v15  ;;  %2970 = vadd.xlane.f32.xlu2 %v2969_v26  ;;  %vm12734_vm11 = vmor %vm4301_vm2, %vm4302_vm9 }
 0x37e   : > { %v3962_v52 = vsub.f32 1.0, %v3961_v47  ;;  %2922 = vadd.xlane.f32.xlu1 %v15023_v6  ;;  %vm12721_vm13 = vcmp.eq.f32.partialorder %v4193_v58, 8.507059e+37  ;;  %v4196_v23 = vor.u32 1.1754944e-38, %v4195_v56  ;;  %vm3965_vm14 = vweird.f32 %v12488_v60  ;;  %6147 = vst.msk [vmem:[%s10388_s29 + $0x198] sm:$0xff] %vm431_vm0, %v5496_v9  ;;  %v15030_v58 = vld [vmem:[#allocation51_spill] sm:$0xff]  ;;  %v12773_v9 = vpop.xlane.xlu2 %2907  ;;  %v5366_v37 = vpop.f32.mrf.mxu0 }
 0x37f   : > { %v4074_v27 = vsub.f32 1.0, %v4073_v2  ;;  %v3971_v1 = vand.u32 2147483648, %v12488_v60  ;;  %v2356_v56 = vsub.f32 %v15030_v58, %v12599_v14  ;;  %v4192_v38 = vsel %vm12717_vm12, %v12608_v49, %v4188_v57  ;;  %6131 = vst.msk [vmem:[%s10388_s29 + $0x118] sm:$0xff] %vm431_vm0, %v5366_v37 }
 0x380   : > { %v12728_v54 = vpop.eup %7228  ;;  %v3963_v8 = vmul.f32 %v12677_v40, %v3962_v52  ;;  %vm12747_vm15 = vcmp.eq.f32.partialorder %v3969_v42, 8.507059e+37  ;;  %v4081_v29 = vand.u32 2147483647, %v12507_v55  ;;  %v4197_v35 = vsel %vm12721_vm13, %v4196_v23, %v4192_v38  ;;  %v15034_v52 = vld [vmem:[#allocation105_spill] sm:$0xff]  ;;  %v12782_v23 = vpop.xlane.xlu1 %2883 }
 0x381   : > { %v12745_v18 = vpop.eup %7230  ;;  %v4075_v53 = vmul.f32 %v12686_v62, %v4074_v27  ;;  %v4304_v14 = vsel %vm12734_vm11, %v12601_v33, %v4300_v36  ;;  %vm3966_vm4 = vweird.f32 %v12677_v40  ;;  %v4083_v49 = vand.u32 2147483648, %v12507_v55  ;;  %v12784_v27 = vpop.xlane.xlu0 %2208 }
 0x382   : > { %v4311_v57 = vmul.f32 %v12745_v18, %v12585_v41  ;;  %v2600_v47 = vmul.f32 1.442695, %v2356_v56  ;;  %vm4078_vm1 = vweird.f32 %v12686_v62  ;;  %v4884_v7 = vmul.f32 %v15033_v24, %v4197_v35  ;;  %vm12797_vm6 = vmor %vm3965_vm14, %vm3966_vm4  ;;  %v5561_v35 = vpop.f32.mrf.mxu3 }
 0x383   : > { %v4309_v26 = vsel %vm12704_vm10, %v4308_v32, %v4304_v14  ;;  %v2993_v42 = vsel %vm431_vm0, %v12728_v54, 0.0  ;;  %v12768_v33 = vpop.eup %7232  ;;  %v3964_v36 = vadd.f32 %v12677_v40, %v3963_v8  ;;  %v4319_v2 = vand.u32 2147483647, %v12585_v41  ;;  %v15035_v8 = vld [vmem:[#allocation87_spill] sm:$0xff]  ;;  %6155 = vst.msk [vmem:[%s10388_s29 + $0x1d8] sm:$0xff] %vm431_vm0, %v5561_v35 }
 0x384   : > { %7234 = vpow2.f32 %v2600_v47  ;;  %v4892_v6 = vmul.f32 %v15034_v52, %v4309_v26  ;;  %2994 = vadd.xlane.f32.xlu0 %v2993_v42  ;;  %v4076_v63 = vadd.f32 %v12686_v62, %v4075_v53  ;;  %v4312_v32 = vsub.f32 1.0, %v4311_v57  ;;  %5012 = vst.msk [vmem:[%s9294_s20 + $0x2a0] sm:$0xff] %vm431_vm0, %v4884_v7  ;;  %6718 = vmatmul.msk.f32.gmra.mxu2 %vm431_vm0, %v4884_v7 }
 0x385   : > { %v4199_v12 = vmul.f32 %v12768_v33, %v12587_v15  ;;  %7236 = vrcp.f32 %v12673_v48  ;;  %v3972_v13 = vor.u32 1.1754944e-38, %v3971_v1  ;;  %vm4077_vm7 = vweird.f32 %v12507_v55  ;;  %2946 = vadd.xlane.f32.xlu2 %v12208_v61 }
 0x386   : > { %5020 = vst.msk [vmem:[%s9294_s20 + $0x2e0] sm:$0xff] %vm431_vm0, %v4892_v6  ;;  %6726 = vmatmul.msk.f32.gmra.mxu3 %vm431_vm0, %v4892_v6  ;;  %v2364_v58 = vsub.f32 %v15035_v8, %v12675_v11  ;;  %7238 = vrcp.f32 %v12684_v31  ;;  %vm12801_vm2 = vcmp.eq.f32.partialorder %v4081_v29, 8.507059e+37  ;;  %v4084_v55 = vor.u32 1.1754944e-38, %v4083_v49  ;;  %vm12811_vm5 = vmor %vm4077_vm7, %vm4078_vm1 }
 0x387   : > { %vm4315_vm3 = vweird.f32 %v12585_v41  ;;  %v4200_v38 = vsub.f32 1.0, %v4199_v12  ;;  %v4321_v11 = vand.u32 2147483648, %v12585_v41  ;;  %vm4203_vm8 = vweird.f32 %v12587_v15 }
 0x388   : > { %v4207_v53 = vand.u32 2147483647, %v12587_v15  ;;  %v2616_v29 = vmul.f32 1.442695, %v2364_v58  ;;  %v4313_v14 = vmul.f32 %v12745_v18, %v4312_v32  ;;  %vm12819_vm9 = vcmp.eq.f32.partialorder %v4319_v2, 8.507059e+37  ;;  %v15045_v2 = vld [vmem:[#allocation70_spill] sm:$0xff]  ;;  %v5431_v58 = vpop.f32.mrf.mxu1  ;;  %v2233_v35 = vpop.xlane.xlu1 %2232 }
 0x389   : > { %v4201_v49 = vmul.f32 %v12768_v33, %v4200_v38  ;;  %v3968_v57 = vsel %vm12797_vm6, %v12677_v40, %v3964_v36  ;;  %v4080_v47 = vsel %vm12811_vm5, %v12686_v62, %v4076_v63  ;;  %vm4204_vm10 = vweird.f32 %v12768_v33  ;;  %v15044_v36 = vld [vmem:[#allocation104_spill] sm:$0xff]  ;;  %v12869_v38 = vpop.xlane.xlu2 %2835  ;;  %6139 = vst.msk [vmem:[%s10388_s29 + $0x158] sm:$0xff] %vm431_vm0, %v5431_v58 }
 0x38a   : > { %v12832_v24 = vpop.eup %7234  ;;  %v4209_v7 = vand.u32 2147483648, %v12587_v15  ;;  %v3973_v26 = vsel %vm12747_vm15, %v3972_v13, %v3968_v57  ;;  %v4085_v42 = vsel %vm12801_vm2, %v4084_v55, %v4080_v47  ;;  %7240 = vpow2.f32 %v2616_v29  ;;  %vm12875_vm14 = vmor %vm4203_vm8, %vm4204_vm10 }
 0x38b   : > { %v12840_v40 = vpop.eup %7236  ;;  %v4868_v62 = vmul.f32 %v15044_v36, %v3973_v26  ;;  %v4876_v52 = vmul.f32 %v15045_v2, %v4085_v42  ;;  %v2972_v6 = vsel %vm431_vm0, %v12832_v24, 0.0  ;;  %v4202_v63 = vadd.f32 %v12768_v33, %v4201_v49 }
 0x38c   : > { %v12846_v37 = vpop.eup %7238  ;;  %v3975_v45 = vmul.f32 %v12840_v40, %v12673_v48  ;;  %v3983_v32 = vand.u32 2147483647, %v12673_v48  ;;  %2973 = vadd.xlane.f32.xlu0 %v2972_v6  ;;  %7242 = vrcp.f32 %v12773_v9  ;;  %v4314_v12 = vadd.f32 %v12745_v18, %v4313_v14  ;;  %v12884_v14 = vpop.xlane.xlu0 %2859  ;;  %v15055_v6 = vld [vmem:[#allocation98_spill] sm:$0xff] }
 0x38d   : > { %vm4316_vm12 = vweird.f32 %v12745_v18  ;;  %v3985_v13 = vand.u32 2147483648, %v12673_v48  ;;  %v4087_v8 = vmul.f32 %v12846_v37, %v12684_v31  ;;  %4996 = vst.msk [vmem:[%s9294_s20 + $0x220] sm:$0xff] %vm431_vm0, %v4868_v62  ;;  %6702 = vmatmul.msk.f32.gmra.mxu0 %vm431_vm0, %v4868_v62  ;;  %6710 = vmatmul.msk.f32.gmra.mxu1 %vm431_vm0, %v4876_v52  ;;  %v4322_v56 = vor.u32 1.1754944e-38, %v4321_v11 }
 0x38e   : > { %vm12862_vm13 = vcmp.eq.f32.partialorder %v4207_v53, 8.507059e+37  ;;  %v3976_v55 = vsub.f32 1.0, %v3975_v45  ;;  %5004 = vst.msk [vmem:[%s9294_s20 + $0x260] sm:$0xff] %vm431_vm0, %v4876_v52  ;;  %7244 = vrcp.f32 %v12782_v23  ;;  %v4210_v11 = vor.u32 1.1754944e-38, %v4209_v7  ;;  %2925 = vadd.xlane.f32.xlu2 %v12217_v59  ;;  %vm12890_vm15 = vmor %vm4315_vm3, %vm4316_vm12  ;;  %v15054_v59 = vld [vmem:[#allocation55_spill] sm:$0xff]  ;;  %v5564_v15 = vpop.f32.mrf.mxu3 }
 0x38f   : > { %vm3979_vm11 = vweird.f32 %v12673_v48  ;;  %v4088_v53 = vsub.f32 1.0, %v4087_v8  ;;  %v4095_v29 = vand.u32 2147483647, %v12684_v31  ;;  %vm12895_vm4 = vcmp.eq.f32.partialorder %v3983_v32, 8.507059e+37  ;;  %v15058_v32 = vld [vmem:[#allocation80_spill] sm:$0xff]  ;;  %6156 = vst.msk [vmem:[%s10388_s29 + $0x1e0] sm:$0xff] %vm431_vm0, %v5564_v15 }
 0x390   : > { %v3977_v49 = vmul.f32 %v12840_v40, %v3976_v55  ;;  %vm4091_vm1 = vweird.f32 %v12684_v31  ;;  %v2357_v47 = vsub.f32 %v15054_v59, %v12784_v27  ;;  %v4206_v7 = vsel %vm12875_vm14, %v12768_v33, %v4202_v63  ;;  %v12905_v41 = vpop.eup %7240 }
 0x391   : > { %v3986_v26 = vor.u32 1.1754944e-38, %v3985_v13  ;;  %v4097_v42 = vand.u32 2147483648, %v12684_v31  ;;  %v4211_v36 = vsel %vm12862_vm13, %v4210_v11, %v4206_v7  ;;  %v4318_v62 = vsel %vm12890_vm15, %v12745_v18, %v4314_v12  ;;  %v5499_v13 = vpop.f32.mrf.mxu2 }
 0x392   : > { %v12913_v2 = vpop.eup %7242  ;;  %v4089_v27 = vmul.f32 %v12846_v37, %v4088_v53  ;;  %v2602_v52 = vmul.f32 1.442695, %v2357_v47  ;;  %v4885_v33 = vmul.f32 %v15055_v6, %v4211_v36  ;;  %v4323_v63 = vsel %vm12819_vm9, %v4322_v56, %v4318_v62  ;;  %v15059_v53 = vld [vmem:[#allocation89_spill] sm:$0xff]  ;;  %6148 = vst.msk [vmem:[%s10388_s29 + $0x1a0] sm:$0xff] %vm431_vm0, %v5499_v13 }
 0x393   : > { %vm3980_vm7 = vweird.f32 %v12840_v40  ;;  %vm12920_vm6 = vcmp.eq.f32.partialorder %v4095_v29, 8.507059e+37  ;;  %v4325_v18 = vmul.f32 %v12913_v2, %v12773_v9  ;;  %v4893_v12 = vmul.f32 %v15058_v32, %v4323_v63  ;;  %v5369_v29 = vpop.f32.mrf.mxu0  ;;  %v12985_v63 = vpop.xlane.xlu1 %2886 }
 0x394   : > { %v12927_v8 = vpop.eup %7244  ;;  %v3978_v58 = vadd.f32 %v12840_v40, %v3977_v49  ;;  %v4335_v61 = vand.u32 2147483648, %v12773_v9  ;;  %7246 = vpow2.f32 %v2602_v52  ;;  %5013 = vst.msk [vmem:[%s9294_s20 + $0x2a8] sm:$0xff] %vm431_vm0, %v4885_v33  ;;  %6719 = vmatmul.msk.f32.gmra.mxu2 %vm431_vm0, %v4885_v33  ;;  %v2996_v56 = vsel %vm431_vm0, %v12905_v41, 0.0  ;;  %2949 = vadd.xlane.f32.xlu0 %v12230_v4  ;;  %vm12954_vm3 = vmor %vm3979_vm11, %vm3980_vm7 }
 0x395   : > { %vm4092_vm2 = vweird.f32 %v12846_v37  ;;  %v4326_v1 = vsub.f32 1.0, %v4325_v18  ;;  %v4213_v55 = vmul.f32 %v12927_v8, %v12782_v23  ;;  %5021 = vst.msk [vmem:[%s9294_s20 + $0x2e8] sm:$0xff] %vm431_vm0, %v4893_v12  ;;  %6727 = vmatmul.msk.f32.gmra.mxu3 %vm431_vm0, %v4893_v12  ;;  %2997 = vadd.xlane.f32.xlu1 %v2996_v56  ;;  %7248 = vrcp.f32 %v12869_v38  ;;  %v2212_v18 = vpop.xlane.xlu0 %2211  ;;  %v15066_v12 = vld [vmem:[#allocation75_spill] sm:$0xff] }
 0x396   : > { %v4090_v60 = vadd.f32 %v12846_v37, %v4089_v27  ;;  %v4333_v11 = vand.u32 2147483647, %v12773_v9  ;;  %v2365_v4 = vsub.f32 %v15059_v53, %v2233_v35  ;;  %7250 = vrcp.f32 %v12884_v14  ;;  %6132 = vst.msk [vmem:[%s10388_s29 + $0x120] sm:$0xff] %vm431_vm0, %v5369_v29  ;;  %v5434_v35 = vpop.f32.mrf.mxu1  ;;  %v12968_v27 = vpop.xlane.xlu2 %2910  ;;  %vm12976_vm9 = vmor %vm4091_vm1, %vm4092_vm2 }
 0x397   : > { %v4098_v59 = vor.u32 1.1754944e-38, %v4097_v42  ;;  %vm4329_vm5 = vweird.f32 %v12773_v9  ;;  %v4214_v47 = vsub.f32 1.0, %v4213_v55  ;;  %vm4217_vm8 = vweird.f32 %v12782_v23  ;;  %6140 = vst.msk [vmem:[%s10388_s29 + $0x160] sm:$0xff] %vm431_vm0, %v5434_v35  ;;  %v15067_v55 = vld [vmem:[#allocation78_spill] sm:$0xff]  ;;  %v15074_v42 = vld [vmem:[#allocation21_spill] sm:$0xff] }
 0x398   : > { %v12962_v7 = vor.u32 1.1754944e-38, %v4335_v61  ;;  %v4221_v36 = vand.u32 2147483647, %v12782_v23  ;;  %v2618_v62 = vmul.f32 1.442695, %v2365_v4  ;;  %v3982_v48 = vsel %vm12954_vm3, %v12840_v40, %v3978_v58 }
 0x399   : > { %v4327_v52 = vmul.f32 %v12913_v2, %v4326_v1  ;;  %v4215_v6 = vmul.f32 %v12927_v8, %v4214_v47  ;;  %v4223_v33 = vand.u32 2147483648, %v12782_v23  ;;  %v3987_v40 = vsel %vm12895_vm4, %v3986_v26, %v3982_v48 }
 0x39a   : > { %v12989_v31 = vpop.eup %7246  ;;  %vm4330_vm10 = vweird.f32 %v12913_v2  ;;  %vm12992_vm12 = vcmp.eq.f32.partialorder %v4333_v11, 8.507059e+37  ;;  %7252 = vpow2.f32 %v2618_v62  ;;  %v4869_v13 = vmul.f32 %v15066_v12, %v3987_v40  ;;  %v5502_v62 = vpop.f32.mrf.mxu2 }
 0x39b   : > { %v4094_v57 = vsel %vm12976_vm9, %v12846_v37, %v4090_v60  ;;  %v13000_v26 = vpop.eup %7248  ;;  %vm4218_vm13 = vweird.f32 %v12927_v8  ;;  %v2975_v61 = vsel %vm431_vm0, %v12989_v31, 0.0  ;;  %7254 = vrcp.f32 %v12968_v27  ;;  %vm13048_vm4 = vmor %vm4329_vm5, %vm4330_vm10  ;;  %6149 = vst.msk [vmem:[%s10388_s29 + $0x1a8] sm:$0xff] %vm431_vm0, %v5502_v62  ;;  %v15081_v62 = vld [vmem:[#allocation19_spill] sm:$0xff] }
 0x39c   : > { %v4099_v58 = vsel %vm12920_vm6, %v4098_v59, %v4094_v57  ;;  %v13008_v56 = vpop.eup %7250  ;;  %v4216_v1 = vadd.f32 %v12927_v8, %v4215_v6  ;;  %v3989_v37 = vmul.f32 %v13000_v26, %v12869_v38  ;;  %4997 = vst.msk [vmem:[%s9294_s20 + $0x228] sm:$0xff] %vm431_vm0, %v4869_v13  ;;  %6703 = vmatmul.msk.f32.gmra.mxu0 %vm431_vm0, %v4869_v13  ;;  %v3997_v11 = vand.u32 2147483647, %v12869_v38  ;;  %vm13033_vm14 = vmor %vm4217_vm8, %vm4218_vm13  ;;  %v5372_v57 = vpop.f32.mrf.mxu0 }
 0x39d   : > { %v4877_v45 = vmul.f32 %v15067_v55, %v4099_v58  ;;  %2928 = vadd.xlane.f32.xlu0 %v12241_v10  ;;  %v4328_v60 = vadd.f32 %v12913_v2, %v4327_v52  ;;  %v3999_v53 = vand.u32 2147483648, %v12869_v38  ;;  %v4101_v4 = vmul.f32 %v13008_v56, %v12884_v14  ;;  %2976 = vadd.xlane.f32.xlu1 %v2975_v61  ;;  %v15079_v55 = vld [vmem:[#allocation81_spill] sm:$0xff] }
 0x39e   : > { %v3990_v29 = vsub.f32 1.0, %v3989_v37  ;;  %v4109_v15 = vand.u32 2147483647, %v12884_v14  ;;  %v4111_v49 = vand.u32 2147483648, %v12884_v14  ;;  %7256 = vrcp.f32 %v12985_v63  ;;  %v13078_v37 = vpop.xlane.xlu2 %2838  ;;  %6133 = vst.msk [vmem:[%s10388_s29 + $0x128] sm:$0xff] %vm431_vm0, %v5372_v57 }
 0x39f   : > { %5005 = vst.msk [vmem:[%s9294_s20 + $0x268] sm:$0xff] %vm431_vm0, %v4877_v45  ;;  %6711 = vmatmul.msk.f32.gmra.mxu1 %vm431_vm0, %v4877_v45  ;;  %vm13037_vm11 = vcmp.eq.f32.partialorder %v4221_v36, 8.507059e+37  ;;  %v4224_v47 = vor.u32 1.1754944e-38, %v4223_v33  ;;  %vm3993_vm15 = vweird.f32 %v12869_v38  ;;  %v4102_v35 = vsub.f32 1.0, %v4101_v4 }
 0x3a0   : > { %v13042_v48 = vpop.eup %7252  ;;  %v3991_v36 = vmul.f32 %v13000_v26, %v3990_v29  ;;  %vm4105_vm1 = vweird.f32 %v12884_v14  ;;  %v2358_v52 = vsub.f32 %v15074_v42, %v2212_v18  ;;  %v4220_v6 = vsel %vm13033_vm14, %v12927_v8, %v4216_v1  ;;  %v5437_v59 = vpop.f32.mrf.mxu1 }
 0x3a1   : > { %v13060_v33 = vpop.eup %7254  ;;  %vm13062_vm7 = vcmp.eq.f32.partialorder %v3997_v11, 8.507059e+37  ;;  %v4000_v40 = vor.u32 1.1754944e-38, %v3999_v53  ;;  %v4103_v12 = vmul.f32 %v13008_v56, %v4102_v35  ;;  %v4225_v13 = vsel %vm13037_vm11, %v4224_v47, %v4220_v6  ;;  %v2236_v11 = vpop.xlane.xlu1 %2235  ;;  %6141 = vst.msk [vmem:[%s10388_s29 + $0x168] sm:$0xff] %vm431_vm0, %v5437_v59 }
 0x3a2   : > { %v4332_v18 = vsel %vm13048_vm4, %v12913_v2, %v4328_v60  ;;  %vm13072_vm6 = vcmp.eq.f32.partialorder %v4109_v15, 8.507059e+37  ;;  %v4112_v58 = vor.u32 1.1754944e-38, %v4111_v49  ;;  %v4339_v61 = vmul.f32 %v13060_v33, %v12968_v27  ;;  %v13089_v53 = vpop.xlane.xlu0 %2862  ;;  %v15080_v49 = vld [vmem:[#allocation82_spill] sm:$0xff] }
 0x3a3   : > { %v2604_v1 = vmul.f32 1.442695, %v2358_v52  ;;  %vm3994_vm2 = vweird.f32 %v13000_v26  ;;  %v4886_v45 = vmul.f32 %v15079_v55, %v4225_v13  ;;  %v4337_v2 = vsel %vm12992_vm12, %v12962_v7, %v4332_v18 }
 0x3a4   : > { %v2999_v60 = vsel %vm431_vm0, %v13042_v48, 0.0  ;;  %v13091_v4 = vpop.eup %7256  ;;  %v3992_v29 = vadd.f32 %v13000_v26, %v3991_v36  ;;  %v4340_v15 = vsub.f32 1.0, %v4339_v61  ;;  %v4894_v10 = vmul.f32 %v15080_v49, %v4337_v2  ;;  %vm13115_vm5 = vmor %vm3993_vm15, %vm3994_vm2 }
 0x3a5   : > { %7258 = vpow2.f32 %v2604_v1  ;;  %3000 = vadd.xlane.f32.xlu2 %v2999_v60  ;;  %v4104_v32 = vadd.f32 %v13008_v56, %v4103_v12  ;;  %vm4106_vm3 = vweird.f32 %v13008_v56  ;;  %v4227_v7 = vmul.f32 %v13091_v4, %v12985_v63  ;;  %5014 = vst.msk [vmem:[%s9294_s20 + $0x2b0] sm:$0xff] %vm431_vm0, %v4886_v45  ;;  %6720 = vmatmul.msk.f32.gmra.mxu2 %vm431_vm0, %v4886_v45  ;;  %v5567_v14 = vpop.f32.mrf.mxu3 }
 0x3a6   : > { %2952 = vadd.xlane.f32.xlu1 %v12245_v46  ;;  %7260 = vrcp.f32 %v13078_v37  ;;  %v4341_v47 = vmul.f32 %v13060_v33, %v4340_v15  ;;  %v4347_v35 = vand.u32 2147483647, %v12968_v27  ;;  %5022 = vst.msk [vmem:[%s9294_s20 + $0x2f0] sm:$0xff] %vm431_vm0, %v4894_v10  ;;  %6728 = vmatmul.msk.f32.gmra.mxu3 %vm431_vm0, %v4894_v10  ;;  %v2366_v23 = vsub.f32 %v15081_v62, %v2236_v11  ;;  %vm4107_vm9 = vmor %vm4105_vm1, %vm4106_vm3 }
 0x3a7   : > { %7262 = vrcp.f32 %v13089_v53  ;;  %vm4343_vm8 = vweird.f32 %v12968_v27  ;;  %v4349_v36 = vand.u32 2147483648, %v12968_v27  ;;  %v4228_v42 = vsub.f32 1.0, %v4227_v7  ;;  %6157 = vst.msk [vmem:[%s10388_s29 + $0x1e8] sm:$0xff] %vm431_vm0, %v5567_v14  ;;  %v15093_v14 = vld [vmem:[#allocation88_spill] sm:$0xff] }
 0x3a8   : > { %v4235_v52 = vand.u32 2147483647, %v12985_v63  ;;  %v4342_v38 = vadd.f32 %v13060_v33, %v4341_v47  ;;  %vm4344_vm10 = vweird.f32 %v13060_v33  ;;  %v4237_v6 = vand.u32 2147483648, %v12985_v63 }
 0x3a9   : > { %v2620_v12 = vmul.f32 1.442695, %v2366_v23  ;;  %v4229_v13 = vmul.f32 %v13091_v4, %v4228_v42  ;;  %vm4232_vm12 = vweird.f32 %v13091_v4  ;;  %v3996_v18 = vsel %vm13115_vm5, %v13000_v26, %v3992_v29  ;;  %vm13152_vm14 = vmor %vm4343_vm8, %vm4344_vm10  ;;  %v15090_v23 = vld [vmem:[#allocation84_spill] sm:$0xff] }
 0x3aa   : > { %v4108_v57 = vsel %vm4107_vm9, %v13008_v56, %v4104_v32  ;;  %vm4231_vm13 = vweird.f32 %v12985_v63  ;;  %v4001_v1 = vsel %vm13062_vm7, %v4000_v40, %v3996_v18  ;;  %v15086_v56 = vld [vmem:[#allocation99_spill] sm:$0xff]  ;;  %v15087_v40 = vld [vmem:[#allocation101_spill] sm:$0xff]  ;;  %v4350_v60 = vor.u32 1.1754944e-38, %v4349_v36  ;;  %v15091_v36 = vld [vmem:[#allocation100_spill] sm:$0xff] }
 0x3ab   : > { %v13137_v61 = vpop.eup %7258  ;;  %7264 = vpow2.f32 %v2620_v12  ;;  %v4113_v55 = vsel %vm13072_vm6, %v4112_v58, %v4108_v57  ;;  %v4230_v63 = vadd.f32 %v13091_v4, %v4229_v13  ;;  %v4870_v9 = vmul.f32 %v15086_v56, %v4001_v1  ;;  %vm13165_vm11 = vmor %vm4231_vm13, %vm4232_vm12  ;;  %v15092_v57 = vld [vmem:[#allocation22_spill] sm:$0xff] }
 0x3ac   : > { %v13146_v45 = vpop.eup %7260  ;;  %v4878_v8 = vmul.f32 %v15087_v40, %v4113_v55  ;;  %v2978_v58 = vsel %vm431_vm0, %v13137_v61, 0.0  ;;  %v4238_v11 = vor.u32 1.1754944e-38, %v4237_v6  ;;  %v4346_v15 = vsel %vm13152_vm14, %v13060_v33, %v4342_v38 }
 0x3ad   : > { %v13161_v2 = vpop.eup %7262  ;;  %v4003_v29 = vmul.f32 %v13146_v45, %v13078_v37  ;;  %2979 = vadd.xlane.f32.xlu2 %v2978_v58  ;;  %vm4348_vm15 = vcmp.eq.f32.partialorder %v4347_v35, 8.507059e+37  ;;  %vm4236_vm4 = vcmp.eq.f32.partialorder %v4235_v52, 8.507059e+37  ;;  %4998 = vst.msk [vmem:[%s9294_s20 + $0x230] sm:$0xff] %vm431_vm0, %v4870_v9  ;;  %6704 = vmatmul.msk.f32.gmra.mxu0 %vm431_vm0, %v4870_v9  ;;  %v4234_v10 = vsel %vm13165_vm11, %v13091_v4, %v4230_v63  ;;  %v5375_v6 = vpop.f32.mrf.mxu0 }
 0x3ae   : > { %v4115_v49 = vmul.f32 %v13161_v2, %v13089_v53  ;;  %6712 = vmatmul.msk.f32.gmra.mxu1 %vm431_vm0, %v4878_v8  ;;  %v4011_v32 = vand.u32 2147483647, %v13078_v37  ;;  %5006 = vst.msk [vmem:[%s9294_s20 + $0x270] sm:$0xff] %vm431_vm0, %v4878_v8  ;;  %2931 = vadd.xlane.f32.xlu1 %v12260_v17  ;;  %v4239_v33 = vsel %vm4236_vm4, %v4238_v11, %v4234_v10  ;;  %v4013_v47 = vand.u32 2147483648, %v13078_v37  ;;  %v2188_v62 = vpop.xlane.xlu0 %2187 }
 0x3af   : > { %v4004_v59 = vsub.f32 1.0, %v4003_v29  ;;  %v4351_v7 = vsel %vm4348_vm15, %v4350_v60, %v4346_v15  ;;  %v4887_v46 = vmul.f32 %v15090_v23, %v4239_v33  ;;  %vm4008_vm1 = vweird.f32 %v13146_v45  ;;  %6134 = vst.msk [vmem:[%s10388_s29 + $0x130] sm:$0xff] %vm431_vm0, %v5375_v6  ;;  %v5505_v26 = vpop.f32.mrf.mxu2  ;;  %v5570_v63 = vpop.f32.mrf.mxu3  ;;  %v15094_v60 = vld [vmem:[#allocation85_spill] sm:$0xff]  ;;  %v15095_v15 = vld [vmem:[#allocation83_spill] sm:$0xff] }
 0x3b0   : > { %v4116_v35 = vsub.f32 1.0, %v4115_v49  ;;  %v4895_v42 = vmul.f32 %v15091_v36, %v4351_v7  ;;  %v4125_v17 = vand.u32 2147483648, %v13089_v53  ;;  %v2350_v38 = vsub.f32 %v14954_v34, %v2188_v62  ;;  %6150 = vst.msk [vmem:[%s10388_s29 + $0x1b0] sm:$0xff] %vm431_vm0, %v5505_v26  ;;  %v15096_v26 = vld [vmem:[#allocation86_spill] sm:$0xff] }
 0x3b1   : > { %v13190_v52 = vpop.eup %7264  ;;  %v4005_v4 = vmul.f32 %v13146_v45, %v4004_v59  ;;  %vm4120_vm7 = vweird.f32 %v13161_v2  ;;  %v4123_v13 = vand.u32 2147483647, %v13089_v53  ;;  %6721 = vmatmul.msk.f32.gmra.mxu2 %vm431_vm0, %v4887_v46  ;;  %v2343_v34 = vsub.f32 %v15093_v14, %v15092_v57  ;;  %5015 = vst.msk [vmem:[%s9294_s20 + $0x2b8] sm:$0xff] %vm431_vm0, %v4887_v46 }
 0x3b2   : > { %v4117_v12 = vmul.f32 %v13161_v2, %v4116_v35  ;;  %6729 = vmatmul.msk.f32.gmra.mxu3 %vm431_vm0, %v4895_v42  ;;  %v3002_v18 = vsel %vm431_vm0, %v13190_v52, 0.0  ;;  %vm4007_vm6 = vweird.f32 %v13078_v37  ;;  %v2588_v55 = vmul.f32 1.442695, %v2350_v38  ;;  %5023 = vst.msk [vmem:[%s9294_s20 + $0x2f8] sm:$0xff] %vm431_vm0, %v4895_v42 }
 0x3b3   : > { %v4006_v1 = vadd.f32 %v13146_v45, %v4005_v4  ;;  %3003 = vadd.xlane.f32.xlu0 %v3002_v18  ;;  %vm4009_vm2 = vmor %vm4007_vm6, %vm4008_vm1  ;;  %v4014_v56 = vor.u32 1.1754944e-38, %v4013_v47  ;;  %vm4119_vm3 = vweird.f32 %v13089_v53  ;;  %vm4012_vm5 = vcmp.eq.f32.partialorder %v4011_v32, 8.507059e+37  ;;  %6158 = vst.msk [vmem:[%s10388_s29 + $0x1f0] sm:$0xff] %vm431_vm0, %v5570_v63 }
 0x3b4   : > { %v4118_v9 = vadd.f32 %v13161_v2, %v4117_v12  ;;  %vm4121_vm8 = vmor %vm4119_vm3, %vm4120_vm7  ;;  %v4126_v37 = vor.u32 1.1754944e-38, %v4125_v17  ;;  %7266 = vpow2.f32 %v2588_v55  ;;  %vm4124_vm9 = vcmp.eq.f32.partialorder %v4123_v13, 8.507059e+37 }
 0x3b5   : > { %v4010_v40 = vsel %vm4009_vm2, %v13146_v45, %v4006_v1  ;;  %v2574_v58 = vmul.f32 1.442695, %v2343_v34 }
 0x3b6   : > { %v4015_v8 = vsel %vm4012_vm5, %v4014_v56, %v4010_v40  ;;  %v4122_v53 = vsel %vm4121_vm8, %v13161_v2, %v4118_v9  ;;  %v2914_v29 = vpop.xlane.xlu0 %2913  ;;  %v5440_v10 = vpop.f32.mrf.mxu1 }
 0x3b7   : > { %v4871_v27 = vmul.f32 %v15094_v60, %v4015_v8  ;;  %v4127_v11 = vsel %vm4124_vm9, %v4126_v37, %v4122_v53  ;;  %7268 = vrcp.f32 %v2914_v29  ;;  %6142 = vst.msk [vmem:[%s10388_s29 + $0x170] sm:$0xff] %vm431_vm0, %v5440_v10  ;;  %v4363_v23 = vand.u32 2147483648, %v2914_v29 }
 0x3b8   : > { %v4879_v49 = vmul.f32 %v15095_v15, %v4127_v11  ;;  %7270 = vpow2.f32 %v2574_v58  ;;  %v4361_v36 = vand.u32 2147483647, %v2914_v29  ;;  %vm4357_vm12 = vweird.f32 %v2914_v29 }
 0x3b9   : > { %4999 = vst.msk [vmem:[%s9294_s20 + $0x238] sm:$0xff] %vm431_vm0, %v4871_v27  ;;  %6705 = vmatmul.msk.f32.gmra.mxu0 %vm431_vm0, %v4871_v27  ;;  %v4364_v6 = vor.u32 1.1754944e-38, %v4363_v23 }
 0x3ba   : > { %6713 = vmatmul.msk.f32.gmra.mxu1 %vm431_vm0, %v4879_v49  ;;  %v13233_v45 = vpop.eup %7266  ;;  %5007 = vst.msk [vmem:[%s9294_s20 + $0x278] sm:$0xff] %vm431_vm0, %v4879_v49  ;;  %vm4362_vm14 = vcmp.eq.f32.partialorder %v4361_v36, 8.507059e+37 }
 0x3bb   : > { %v2954_v2 = vsel %vm431_vm0, %v13233_v45, 0.0 }
 0x3bc   : > { %2955 = vadd.xlane.f32.xlu2 %v2954_v2 }
 0x3bd   : > { %v7269_v59 = vpop.eup %7268  ;;  %v5508_v32 = vpop.f32.mrf.mxu2 }
 0x3be   : > { %v4353_v33 = vmul.f32 %v7269_v59, %v2914_v29  ;;  %6151 = vst.msk [vmem:[%s10388_s29 + $0x1b8] sm:$0xff] %vm431_vm0, %v5508_v32  ;;  %v13241_v7 = vpop.eup %7270  ;;  %vm4358_vm10 = vweird.f32 %v7269_v59 }
 0x3bf   : > { %v5573_v47 = vpop.f32.mrf.mxu3  ;;  %v2962_v35 = vpop.xlane.xlu1 %2961  ;;  %v2933_v42 = vsel %vm431_vm0, %v13241_v7, 0.0  ;;  %vm4359_vm13 = vmor %vm4357_vm12, %vm4358_vm10 }
 0x3c0   : > { %v4354_v62 = vsub.f32 1.0, %v4353_v33  ;;  %6159 = vst.msk [vmem:[%s10388_s29 + $0x1f8] sm:$0xff] %vm431_vm0, %v5573_v47  ;;  %7272 = vrcp.f32 %v2962_v35  ;;  %v4587_v37 = vand.u32 2147483648, %v2962_v35  ;;  %v4585_v53 = vand.u32 2147483647, %v2962_v35 }
 0x3c1   : > { %vm4581_vm15 = vweird.f32 %v2962_v35 }
 0x3c2   : > { %v4355_v46 = vmul.f32 %v7269_v59, %v4354_v62  ;;  %v4588_v15 = vor.u32 1.1754944e-38, %v4587_v37  ;;  %vm4586_vm1 = vcmp.eq.f32.partialorder %v4585_v53, 8.507059e+37 }
 0x3c3   : > { %v5378_v4 = vpop.f32.mrf.mxu0 }
 0x3c4   : > { %2934 = vadd.xlane.f32.xlu2 %v2933_v42  ;;  %v4356_v17 = vadd.f32 %v7269_v59, %v4355_v46  ;;  %6135 = vst.msk [vmem:[%s10388_s29 + $0x138] sm:$0xff] %vm431_vm0, %v5378_v4 }
 0x3c5   : > { %v2986_v12 = vpop.xlane.xlu2 %2985  ;;  %v5747_v13 = vpop.f32.mrf.mxu2 }
 0x3c6   : > { %v5443_v38 = vpop.f32.mrf.mxu1  ;;  %v7273_v18 = vpop.eup %7272  ;;  %v4360_v57 = vsel %vm4359_vm13, %v7269_v59, %v4356_v17  ;;  %7274 = vrcp.f32 %v2986_v12  ;;  %6176 = vst.msk [vmem:[%s10388_s29 + $0x280] sm:$0xff] %vm431_vm0, %v5747_v13  ;;  %v4699_v33 = vand.u32 2147483648, %v2986_v12  ;;  %v4697_v23 = vand.u32 2147483647, %v2986_v12 }
 0x3c7   : > { %6143 = vst.msk [vmem:[%s10388_s29 + $0x178] sm:$0xff] %vm431_vm0, %v5443_v38  ;;  %v4365_v14 = vsel %vm4362_vm14, %v4364_v6, %v4360_v57  ;;  %v4577_v34 = vmul.f32 %v7273_v18, %v2962_v35  ;;  %v2215_v1 = vpop.xlane.xlu1 %2214  ;;  %v5812_v55 = vpop.f32.mrf.mxu3  ;;  %vm4582_vm11 = vweird.f32 %v7273_v18  ;;  %vm4693_vm6 = vweird.f32 %v2986_v12 }
 0x3c8   : > { %v4896_v63 = vmul.f32 %v15096_v26, %v4365_v14  ;;  %v2359_v56 = vsub.f32 %v14973_v44, %v2215_v1  ;;  %6184 = vst.msk [vmem:[%s10388_s29 + $0x2c0] sm:$0xff] %vm431_vm0, %v5812_v55  ;;  %vm4583_vm4 = vmor %vm4581_vm15, %vm4582_vm11  ;;  %v4700_v42 = vor.u32 1.1754944e-38, %v4699_v33  ;;  %vm4698_vm3 = vcmp.eq.f32.partialorder %v4697_v23, 8.507059e+37 }
 0x3c9   : > { %v4578_v9 = vsub.f32 1.0, %v4577_v34 }
 0x3ca   : > { %5024 = vst.msk [vmem:[%s9294_s20 + $0x300] sm:$0xff] %vm431_vm0, %v4896_v63  ;;  %v2606_v40 = vmul.f32 1.442695, %v2359_v56  ;;  %6730 = vmatmul.msk.f32.vlgmr.msrb.gmra.mxu0 %vm431_vm0, %v4896_v63 }
 0x3cb   : > { %v4579_v8 = vmul.f32 %v7273_v18, %v4578_v9  ;;  %v5617_v58 = vpop.f32.mrf.mxu0 }
 0x3cc   : > { %v7275_v60 = vpop.eup %7274  ;;  %6160 = vst.msk [vmem:[%s10388_s29 + $0x200] sm:$0xff] %vm431_vm0, %v5617_v58  ;;  %7276 = vpow2.f32 %v2606_v40 }
 0x3cd   : > { %v4580_v44 = vadd.f32 %v7273_v18, %v4579_v8  ;;  %v4689_v11 = vmul.f32 %v7275_v60, %v2986_v12  ;;  %v2239_v29 = vpop.xlane.xlu2 %2238  ;;  %vm4694_vm7 = vweird.f32 %v7275_v60 }
 0x3ce   : > { %v5682_v27 = vpop.f32.mrf.mxu1  ;;  %v2367_v49 = vsub.f32 %v14976_v0, %v2239_v29  ;;  %vm4695_vm2 = vmor %vm4693_vm6, %vm4694_vm7 }
 0x3cf   : > { %6168 = vst.msk [vmem:[%s10388_s29 + $0x240] sm:$0xff] %vm431_vm0, %v5682_v27  ;;  %v4584_v10 = vsel %vm4583_vm4, %v7273_v18, %v4580_v44  ;;  %v4690_v2 = vsub.f32 1.0, %v4689_v11  ;;  %v2938_v59 = vpop.xlane.xlu1 %2937 }
 0x3d0   : > { %v4589_v32 = vsel %vm4586_vm1, %v4588_v15, %v4584_v10  ;;  %v2622_v47 = vmul.f32 1.442695, %v2367_v49  ;;  %7278 = vrcp.f32 %v2938_v59  ;;  %v4473_v9 = vand.u32 2147483647, %v2938_v59  ;;  %v15097_v10 = vld [vmem:[#allocation71_spill] sm:$0xff] }
 0x3d1   : > { %v4912_v62 = vmul.f32 %v12262_v22, %v4589_v32  ;;  %v4691_v35 = vmul.f32 %v7275_v60, %v4690_v2  ;;  %vm4469_vm8 = vweird.f32 %v2938_v59 }
 0x3d2   : > { %v13266_v46 = vpop.eup %7276  ;;  %7280 = vpow2.f32 %v2622_v47  ;;  %vm4474_vm10 = vcmp.eq.f32.partialorder %v4473_v9, 8.507059e+37 }
 0x3d3   : > { %5040 = vst.msk [vmem:[%s9294_s20 + $0x380] sm:$0xff] %vm431_vm0, %v4912_v62  ;;  %v4692_v0 = vadd.f32 %v7275_v60, %v4691_v35  ;;  %6746 = vmatmul.msk.f32.vlgmr.msrb.gmra.mxu2 %vm431_vm0, %v4912_v62  ;;  %v2981_v36 = vsel %vm431_vm0, %v13266_v46, 0.0 }
 0x3d4   : > { %2982 = vadd.xlane.f32.xlu0 %v2981_v36 }
 0x3d5   : > { %v4696_v22 = vsel %vm4695_vm2, %v7275_v60, %v4692_v0  ;;  %v5750_v38 = vpop.f32.mrf.mxu2 }
 0x3d6   : > { %v7279_v4 = vpop.eup %7278  ;;  %v4701_v17 = vsel %vm4698_vm3, %v4700_v42, %v4696_v22  ;;  %v5815_v6 = vpop.f32.mrf.mxu3  ;;  %6177 = vst.msk [vmem:[%s10388_s29 + $0x288] sm:$0xff] %vm431_vm0, %v5750_v38 }
 0x3d7   : > { %v4920_v13 = vmul.f32 %v12312_v43, %v4701_v17  ;;  %v4465_v12 = vmul.f32 %v7279_v4, %v2938_v59  ;;  %v13276_v18 = vpop.xlane.xlu2 %2964  ;;  %v13278_v57 = vpop.xlane.xlu0 %2988  ;;  %6185 = vst.msk [vmem:[%s10388_s29 + $0x2c8] sm:$0xff] %vm431_vm0, %v5815_v6  ;;  %v4475_v43 = vand.u32 2147483648, %v2938_v59  ;;  %vm4470_vm5 = vweird.f32 %v7279_v4 }
 0x3d8   : > { %v13280_v14 = vpop.eup %7280  ;;  %7282 = vrcp.f32 %v13276_v18  ;;  %v5620_v34 = vpop.f32.mrf.mxu0  ;;  %vm4471_vm9 = vmor %vm4469_vm8, %vm4470_vm5  ;;  %v4599_v47 = vand.u32 2147483647, %v13276_v18  ;;  %v4601_v35 = vand.u32 2147483648, %v13276_v18  ;;  %vm4595_vm12 = vweird.f32 %v13276_v18 }
 0x3d9   : > { %v2191_v1 = vpop.xlane.xlu1 %2190  ;;  %5048 = vst.msk [vmem:[%s9294_s20 + $0x3c0] sm:$0xff] %vm431_vm0, %v4920_v13  ;;  %v4466_v55 = vsub.f32 1.0, %v4465_v12  ;;  %7284 = vrcp.f32 %v13278_v57  ;;  %6754 = vmatmul.msk.f32.vlgmr.msrb.gmra.mxu3 %vm431_vm0, %v4920_v13  ;;  %v3005_v37 = vsel %vm431_vm0, %v13280_v14, 0.0  ;;  %v4476_v58 = vor.u32 1.1754944e-38, %v4475_v43 }
 0x3da   : > { %6161 = vst.msk [vmem:[%s10388_s29 + $0x208] sm:$0xff] %vm431_vm0, %v5620_v34  ;;  %v2351_v26 = vsub.f32 %v14987_v5, %v2191_v1  ;;  %v5685_v63 = vpop.f32.mrf.mxu1  ;;  %3006 = vadd.xlane.f32.xlu1 %v3005_v37  ;;  %vm4707_vm14 = vweird.f32 %v13278_v57  ;;  %vm13338_vm11 = vcmp.eq.f32.partialorder %v4599_v47, 8.507059e+37  ;;  %v4711_v12 = vand.u32 2147483647, %v13278_v57 }
 0x3db   : > { %v4467_v56 = vmul.f32 %v7279_v4, %v4466_v55  ;;  %6169 = vst.msk [vmem:[%s10388_s29 + $0x248] sm:$0xff] %vm431_vm0, %v5685_v63  ;;  %v4602_v55 = vor.u32 1.1754944e-38, %v4601_v35  ;;  %v4713_v43 = vand.u32 2147483648, %v13278_v57 }
 0x3dc   : > { %v2590_v40 = vmul.f32 1.442695, %v2351_v26  ;;  %vm13380_vm1 = vcmp.eq.f32.partialorder %v4711_v12, 8.507059e+37 }
 0x3dd   : > { %v4468_v8 = vadd.f32 %v7279_v4, %v4467_v56 }
 0x3de   : > { %v13296_v53 = vpop.eup %7282  ;;  %7286 = vpow2.f32 %v2590_v40 }
 0x3df   : > { %v13298_v5 = vpop.eup %7284  ;;  %v4472_v60 = vsel %vm4471_vm9, %v7279_v4, %v4468_v8  ;;  %v4591_v27 = vmul.f32 %v13296_v53, %v13276_v18  ;;  %v13302_v44 = vpop.xlane.xlu2 %2916  ;;  %vm4596_vm13 = vweird.f32 %v13296_v53 }
 0x3e0   : > { %v13304_v11 = vpop.xlane.xlu0 %2940  ;;  %v4477_v29 = vsel %vm4474_vm10, %v4476_v58, %v4472_v60  ;;  %v4703_v15 = vmul.f32 %v13298_v5, %v13278_v57  ;;  %7288 = vrcp.f32 %v13302_v44  ;;  %v4375_v26 = vand.u32 2147483647, %v13302_v44  ;;  %vm13361_vm15 = vmor %vm4595_vm12, %vm4596_vm13 }
 0x3e1   : > { %v13309_v49 = vpop.xlane.xlu1 %2967  ;;  %v4904_v2 = vmul.f32 %v15097_v10, %v4477_v29  ;;  %v4592_v59 = vsub.f32 1.0, %v4591_v27  ;;  %7290 = vrcp.f32 %v13304_v11  ;;  %v4377_v8 = vand.u32 2147483648, %v13302_v44 }
 0x3e2   : > { %v4704_v62 = vsub.f32 1.0, %v4703_v15  ;;  %7292 = vrcp.f32 %v13309_v49  ;;  %v4487_v58 = vand.u32 2147483647, %v13304_v11  ;;  %v4489_v29 = vand.u32 2147483648, %v13304_v11 }
 0x3e3   : > { %5032 = vst.msk [vmem:[%s9294_s20 + $0x340] sm:$0xff] %vm431_vm0, %v4904_v2  ;;  %v4593_v32 = vmul.f32 %v13296_v53, %v4592_v59  ;;  %6738 = vmatmul.msk.f32.vlgmr.msrb.gmra.mxu1 %vm431_vm0, %v4904_v2  ;;  %vm4708_vm4 = vweird.f32 %v13298_v5  ;;  %v4714_v59 = vor.u32 1.1754944e-38, %v4713_v43  ;;  %vm4371_vm7 = vweird.f32 %v13302_v44 }
 0x3e4   : > { %v13317_v33 = vpop.eup %7286  ;;  %v4705_v13 = vmul.f32 %v13298_v5, %v4704_v62  ;;  %vm4483_vm6 = vweird.f32 %v13304_v11  ;;  %vm13390_vm2 = vcmp.eq.f32.partialorder %v4375_v26, 8.507059e+37  ;;  %v4378_v35 = vor.u32 1.1754944e-38, %v4377_v8  ;;  %vm13399_vm3 = vmor %vm4707_vm14, %vm4708_vm4 }
 0x3e5   : > { %v5753_v23 = vpop.f32.mrf.mxu2  ;;  %v2957_v36 = vsel %vm431_vm0, %v13317_v33, 0.0  ;;  %v4594_v42 = vadd.f32 %v13296_v53, %v4593_v32  ;;  %vm13404_vm5 = vcmp.eq.f32.partialorder %v4487_v58, 8.507059e+37  ;;  %v4615_v12 = vand.u32 2147483648, %v13309_v49 }
 0x3e6   : > { %v13322_v0 = vpop.eup %7288  ;;  %6178 = vst.msk [vmem:[%s10388_s29 + $0x290] sm:$0xff] %vm431_vm0, %v5753_v23  ;;  %2958 = vadd.xlane.f32.xlu0 %v2957_v36  ;;  %v4706_v10 = vadd.f32 %v13298_v5, %v4705_v13  ;;  %v4613_v23 = vand.u32 2147483647, %v13309_v49  ;;  %v4490_v13 = vor.u32 1.1754944e-38, %v4489_v29  ;;  %vm4609_vm9 = vweird.f32 %v13309_v49 }
 0x3e7   : > { %v4367_v22 = vmul.f32 %v13322_v0, %v13302_v44  ;;  %v5818_v4 = vpop.f32.mrf.mxu3  ;;  %v13336_v38 = vpop.eup %7290  ;;  %v4598_v15 = vsel %vm13361_vm15, %v13296_v53, %v4594_v42  ;;  %vm4372_vm8 = vweird.f32 %v13322_v0 }
 0x3e8   : > { %v13334_v17 = vpop.xlane.xlu0 %2919  ;;  %6186 = vst.msk [vmem:[%s10388_s29 + $0x2d0] sm:$0xff] %vm431_vm0, %v5818_v4  ;;  %v13347_v34 = vpop.xlane.xlu2 %2991  ;;  %v4479_v63 = vmul.f32 %v13336_v38, %v13304_v11  ;;  %v4603_v36 = vsel %vm13338_vm11, %v4602_v55, %v4598_v15  ;;  %v4710_v26 = vsel %vm13399_vm3, %v13298_v5, %v4706_v10  ;;  %vm4484_vm10 = vweird.f32 %v13336_v38  ;;  %vm13453_vm14 = vmor %vm4371_vm7, %vm4372_vm8  ;;  %v15123_v4 = vld [vmem:[#allocation90_spill] sm:$0xff] }
 0x3e9   : > { %7294 = vrcp.f32 %v13334_v17  ;;  %v13349_v1 = vpop.xlane.xlu1 %2943  ;;  %v5623_v56 = vpop.f32.mrf.mxu0  ;;  %v4368_v40 = vsub.f32 1.0, %v4367_v22  ;;  %v4389_v57 = vand.u32 2147483647, %v13334_v17  ;;  %v4913_v55 = vmul.f32 %v12425_v28, %v4603_v36  ;;  %vm13464_vm4 = vmor %vm4483_vm6, %vm4484_vm10 }
 0x3ea   : > { %v13355_v9 = vpop.eup %7292  ;;  %7296 = vrcp.f32 %v13347_v34  ;;  %6162 = vst.msk [vmem:[%s10388_s29 + $0x210] sm:$0xff] %vm431_vm0, %v5623_v56  ;;  %v5688_v60 = vpop.f32.mrf.mxu1  ;;  %v4480_v27 = vsub.f32 1.0, %v4479_v63  ;;  %v4391_v56 = vand.u32 2147483648, %v13334_v17  ;;  %vm13432_vm12 = vcmp.eq.f32.partialorder %v4613_v23, 8.507059e+37 }
 0x3eb   : > { %v4605_v18 = vmul.f32 %v13355_v9, %v13309_v49  ;;  %6170 = vst.msk [vmem:[%s10388_s29 + $0x250] sm:$0xff] %vm431_vm0, %v5688_v60  ;;  %7298 = vrcp.f32 %v13349_v1  ;;  %v4369_v53 = vmul.f32 %v13322_v0, %v4368_v40  ;;  %6747 = vmatmul.msk.f32.gmra.mxu2 %vm431_vm0, %v4913_v55  ;;  %v4725_v15 = vand.u32 2147483647, %v13347_v34 }
 0x3ec   : > { %v4481_v22 = vmul.f32 %v13336_v38, %v4480_v27  ;;  %5041 = vst.msk [vmem:[%s9294_s20 + $0x388] sm:$0xff] %vm431_vm0, %v4913_v55  ;;  %v4715_v27 = vsel %vm13380_vm1, %v4714_v59, %v4710_v26  ;;  %vm4385_vm13 = vweird.f32 %v13334_v17  ;;  %vm4610_vm11 = vweird.f32 %v13355_v9 }
 0x3ed   : > { %v4606_v32 = vsub.f32 1.0, %v4605_v18  ;;  %v4370_v28 = vadd.f32 %v13322_v0, %v4369_v53  ;;  %v4921_v53 = vmul.f32 %v12441_v30, %v4715_v27  ;;  %vm4721_vm15 = vweird.f32 %v13347_v34  ;;  %v15120_v27 = vld [vmem:[#allocation41_spill] sm:$0xff]  ;;  %vm13510_vm6 = vmor %vm4609_vm9, %vm4610_vm11 }
 0x3ee   : > { %v4482_v29 = vadd.f32 %v13336_v38, %v4481_v22  ;;  %vm13469_vm1 = vcmp.eq.f32.partialorder %v4389_v57, 8.507059e+37  ;;  %v13473_v42 = vor.u32 1.1754944e-38, %v4391_v56  ;;  %vm13484_vm7 = vcmp.eq.f32.partialorder %v4725_v15, 8.507059e+37 }
 0x3ef   : > { %v13387_v47 = vpop.eup %7294  ;;  %v4607_v63 = vmul.f32 %v13355_v9, %v4606_v32  ;;  %v4616_v32 = vor.u32 1.1754944e-38, %v4615_v12  ;;  %5049 = vst.msk [vmem:[%s9294_s20 + $0x3c8] sm:$0xff] %vm431_vm0, %v4921_v53  ;;  %6755 = vmatmul.msk.f32.gmra.mxu3 %vm431_vm0, %v4921_v53  ;;  %v4374_v11 = vsel %vm13453_vm14, %v13322_v0, %v4370_v28  ;;  %v4727_v55 = vand.u32 2147483648, %v13347_v34 }
 0x3f0   : > { %v4381_v43 = vmul.f32 %v13387_v47, %v13334_v17  ;;  %v13411_v6 = vpop.eup %7296  ;;  %v13425_v40 = vpop.xlane.xlu2 %2970  ;;  %v4501_v26 = vand.u32 2147483647, %v13349_v1  ;;  %v4486_v56 = vsel %vm13464_vm4, %v13336_v38, %v4482_v29 }
 0x3f1   : > { %v4717_v37 = vmul.f32 %v13411_v6, %v13347_v34  ;;  %v13427_v8 = vpop.xlane.xlu1 %2922  ;;  %v13429_v58 = vpop.eup %7298  ;;  %7300 = vrcp.f32 %v13425_v40  ;;  %v4608_v59 = vadd.f32 %v13355_v9, %v4607_v63  ;;  %v4379_v63 = vsel %vm13390_vm2, %v4378_v35, %v4374_v11 }
 0x3f2   : > { %v4382_v5 = vsub.f32 1.0, %v4381_v43  ;;  %v4493_v10 = vmul.f32 %v13429_v58, %v13349_v1  ;;  %7302 = vrcp.f32 %v13427_v8  ;;  %v4491_v62 = vsel %vm13404_vm5, %v4490_v13, %v4486_v56 }
 0x3f3   : > { %v4718_v18 = vsub.f32 1.0, %v4717_v37  ;;  %vm4386_vm2 = vweird.f32 %v13387_v47  ;;  %vm4722_vm3 = vweird.f32 %v13411_v6  ;;  %v4905_v13 = vmul.f32 %v15123_v4, %v4491_v62 }
 0x3f4   : > { %v4494_v23 = vsub.f32 1.0, %v4493_v10  ;;  %v4383_v44 = vmul.f32 %v13387_v47, %v4382_v5  ;;  %v4503_v5 = vand.u32 2147483648, %v13349_v1  ;;  %v4612_v2 = vsel %vm13510_vm6, %v13355_v9, %v4608_v59  ;;  %vm13544_vm8 = vmor %vm4385_vm13, %vm4386_vm2 }
 0x3f5   : > { %v4719_v22 = vmul.f32 %v13411_v6, %v4718_v18  ;;  %v4897_v18 = vmul.f32 %v15120_v27, %v4379_v63  ;;  %vm4497_vm5 = vweird.f32 %v13349_v1  ;;  %5033 = vst.msk [vmem:[%s9294_s20 + $0x348] sm:$0xff] %vm431_vm0, %v4905_v13  ;;  %6739 = vmatmul.msk.f32.gmra.mxu1 %vm431_vm0, %v4905_v13  ;;  %vm4498_vm9 = vweird.f32 %v13429_v58  ;;  %vm13558_vm10 = vmor %vm4721_vm15, %vm4722_vm3  ;;  %v15132_v1 = vld [vmem:[#allocation25_spill] sm:$0xff] }
 0x3f6   : > { %v5756_v12 = vpop.f32.mrf.mxu2  ;;  %v4495_v28 = vmul.f32 %v13429_v58, %v4494_v23  ;;  %v4384_v49 = vadd.f32 %v13387_v47, %v4383_v44  ;;  %v4728_v60 = vor.u32 1.1754944e-38, %v4727_v55  ;;  %v4627_v56 = vand.u32 2147483647, %v13425_v40  ;;  %vm13585_vm13 = vmor %vm4497_vm5, %vm4498_vm9 }
 0x3f7   : > { %v13482_v43 = vpop.xlane.xlu0 %2994  ;;  %6179 = vst.msk [vmem:[%s10388_s29 + $0x298] sm:$0xff] %vm431_vm0, %v5756_v12  ;;  %v13497_v37 = vpop.eup %7300  ;;  %v4720_v53 = vadd.f32 %v13411_v6, %v4719_v22  ;;  %6731 = vmatmul.msk.f32.gmra.mxu0 %vm431_vm0, %v4897_v18  ;;  %v4617_v22 = vsel %vm13432_vm12, %v4616_v32, %v4612_v2  ;;  %vm13562_vm12 = vcmp.eq.f32.partialorder %v4501_v26, 8.507059e+37  ;;  %v4504_v12 = vor.u32 1.1754944e-38, %v4503_v5 }
 0x3f8   : > { %v5821_v0 = vpop.f32.mrf.mxu3  ;;  %v4619_v35 = vmul.f32 %v13497_v37, %v13425_v40  ;;  %v13519_v15 = vpop.xlane.xlu2 %2946  ;;  %5025 = vst.msk [vmem:[%s9294_s20 + $0x308] sm:$0xff] %vm431_vm0, %v4897_v18  ;;  %7304 = vrcp.f32 %v13482_v43  ;;  %v4496_v59 = vadd.f32 %v13429_v58, %v4495_v28  ;;  %v4914_v11 = vmul.f32 %v12514_v20, %v4617_v22 }
 0x3f9   : > { %6187 = vst.msk [vmem:[%s10388_s29 + $0x2d8] sm:$0xff] %vm431_vm0, %v5821_v0  ;;  %v5626_v29 = vpop.f32.mrf.mxu0  ;;  %v13521_v10 = vpop.eup %7302  ;;  %7306 = vrcp.f32 %v13519_v15  ;;  %v4388_v34 = vsel %vm13544_vm8, %v13387_v47, %v4384_v49  ;;  %v4724_v55 = vsel %vm13558_vm10, %v13411_v6, %v4720_v53  ;;  %v4629_v28 = vand.u32 2147483648, %v13425_v40  ;;  %v15133_v53 = vld [vmem:[#allocation56_spill] sm:$0xff] }
 0x3fa   : > { %v5691_v23 = vpop.f32.mrf.mxu1  ;;  %v4620_v30 = vsub.f32 1.0, %v4619_v35  ;;  %v4395_v44 = vmul.f32 %v13521_v10, %v13427_v8  ;;  %6163 = vst.msk [vmem:[%s10388_s29 + $0x218] sm:$0xff] %vm431_vm0, %v5626_v29  ;;  %6748 = vmatmul.msk.f32.gmra.mxu2 %vm431_vm0, %v4914_v11  ;;  %v4403_v47 = vand.u32 2147483647, %v13427_v8  ;;  %v4393_v6 = vsel %vm13469_vm1, %v13473_v42, %v4388_v34 }
 0x3fb   : > { %6171 = vst.msk [vmem:[%s10388_s29 + $0x258] sm:$0xff] %vm431_vm0, %v5691_v23  ;;  %v4405_v18 = vand.u32 2147483648, %v13427_v8  ;;  %v4898_v62 = vmul.f32 %v15132_v1, %v4393_v6  ;;  %v4729_v38 = vsel %vm13484_vm7, %v4728_v60, %v4724_v55  ;;  %v4500_v35 = vsel %vm13585_vm13, %v13429_v58, %v4496_v59 }
 0x3fc   : > { %v4396_v63 = vsub.f32 1.0, %v4395_v44  ;;  %v4621_v20 = vmul.f32 %v13497_v37, %v4620_v30  ;;  %5042 = vst.msk [vmem:[%s9294_s20 + $0x390] sm:$0xff] %vm431_vm0, %v4914_v11  ;;  %vm4624_vm14 = vweird.f32 %v13497_v37  ;;  %vm4400_vm11 = vweird.f32 %v13521_v10 }
 0x3fd   : > { %v4922_v42 = vmul.f32 %v12589_v21, %v4729_v38  ;;  %5026 = vst.msk [vmem:[%s9294_s20 + $0x310] sm:$0xff] %vm431_vm0, %v4898_v62  ;;  %v4505_v58 = vsel %vm13562_vm12, %v4504_v12, %v4500_v35  ;;  %vm4623_vm15 = vweird.f32 %v13425_v40  ;;  %vm13634_vm1 = vcmp.eq.f32.partialorder %v4627_v56, 8.507059e+37 }
 0x3fe   : > { %v4397_v5 = vmul.f32 %v13521_v10, %v4396_v63  ;;  %v13595_v27 = vpop.eup %7304  ;;  %v4622_v57 = vadd.f32 %v13497_v37, %v4621_v20  ;;  %v4906_v2 = vmul.f32 %v15133_v53, %v4505_v58  ;;  %vm13630_vm4 = vmor %vm4623_vm15, %vm4624_vm14  ;;  %v4630_v40 = vor.u32 1.1754944e-38, %v4629_v28 }
 0x3ff   : > { %v13579_v26 = vpop.xlane.xlu0 %2973  ;;  %v4731_v36 = vmul.f32 %v13595_v27, %v13482_v43  ;;  %v13611_v13 = vpop.eup %7306  ;;  %6732 = vmatmul.msk.f32.gmra.mxu0 %vm431_vm0, %v4898_v62  ;;  %5050 = vst.msk [vmem:[%s9294_s20 + $0x3d0] sm:$0xff] %vm431_vm0, %v4922_v42  ;;  %6756 = vmatmul.msk.f32.gmra.mxu3 %vm431_vm0, %v4922_v42  ;;  %vm4399_vm7 = vweird.f32 %v13427_v8  ;;  %vm13646_vm2 = vcmp.eq.f32.partialorder %v4403_v47, 8.507059e+37  ;;  %v4406_v9 = vor.u32 1.1754944e-38, %v4405_v18  ;;  %v15142_v18 = vld [vmem:[#allocation12_spill] sm:$0xff] }
 0x400   : > { %v4398_v29 = vadd.f32 %v13521_v10, %v4397_v5  ;;  %v4507_v49 = vmul.f32 %v13611_v13, %v13519_v15  ;;  %vm13642_vm6 = vmor %vm4399_vm7, %vm4400_vm11  ;;  %5034 = vst.msk [vmem:[%s9294_s20 + $0x350] sm:$0xff] %vm431_vm0, %v4906_v2  ;;  %6740 = vmatmul.msk.f32.gmra.mxu1 %vm431_vm0, %v4906_v2  ;;  %v4739_v8 = vand.u32 2147483647, %v13482_v43  ;;  %v4741_v17 = vand.u32 2147483648, %v13482_v43 }
 0x401   : > { %v13609_v4 = vpop.xlane.xlu2 %2925  ;;  %v4732_v21 = vsub.f32 1.0, %v4731_v36  ;;  %v4626_v32 = vsel %vm13630_vm4, %v13497_v37, %v4622_v57  ;;  %vm4736_vm3 = vweird.f32 %v13595_v27  ;;  %v4515_v20 = vand.u32 2147483647, %v13519_v15 }
 0x402   : > { %7308 = vrcp.f32 %v13609_v4  ;;  %v4508_v11 = vsub.f32 1.0, %v4507_v49  ;;  %v4402_v60 = vsel %vm13642_vm6, %v13521_v10, %v4398_v29  ;;  %v4517_v56 = vand.u32 2147483648, %v13519_v15 }
 0x403   : > { %7310 = vrcp.f32 %v13579_v26  ;;  %v4733_v59 = vmul.f32 %v13595_v27, %v4732_v21  ;;  %vm4512_vm5 = vweird.f32 %v13611_v13  ;;  %v4407_v37 = vsel %vm13646_vm2, %v4406_v9, %v4402_v60 }
 0x404   : > { %v4509_v63 = vmul.f32 %v13611_v13, %v4508_v11  ;;  %v4631_v10 = vsel %vm13634_vm1, %v4630_v40, %v4626_v32  ;;  %v4899_v1 = vmul.f32 %v15142_v18, %v4407_v37  ;;  %vm4735_vm8 = vweird.f32 %v13482_v43 }
 0x405   : > { %v4734_v5 = vadd.f32 %v13595_v27, %v4733_v59  ;;  %vm13690_vm9 = vcmp.eq.f32.partialorder %v4739_v8, 8.507059e+37  ;;  %v4915_v36 = vmul.f32 %v12657_v25, %v4631_v10  ;;  %vm13700_vm10 = vmor %vm4735_vm8, %vm4736_vm3  ;;  %v4742_v43 = vor.u32 1.1754944e-38, %v4741_v17 }
 0x406   : > { %v4510_v47 = vadd.f32 %v13611_v13, %v4509_v63  ;;  %vm4511_vm12 = vweird.f32 %v13519_v15  ;;  %5027 = vst.msk [vmem:[%s9294_s20 + $0x318] sm:$0xff] %vm431_vm0, %v4899_v1  ;;  %vm4516_vm14 = vcmp.eq.f32.partialorder %v4515_v20, 8.507059e+37  ;;  %v4518_v21 = vor.u32 1.1754944e-38, %v4517_v56 }
 0x407   : > { %v13662_v12 = vpop.xlane.xlu0 %2949  ;;  %v5759_v34 = vpop.f32.mrf.mxu2  ;;  %6733 = vmatmul.msk.f32.gmra.mxu0 %vm431_vm0, %v4899_v1  ;;  %vm13712_vm13 = vmor %vm4511_vm12, %vm4512_vm5  ;;  %v4417_v49 = vand.u32 2147483647, %v13609_v4  ;;  %v4419_v15 = vand.u32 2147483648, %v13609_v4  ;;  %5043 = vst.msk [vmem:[%s9294_s20 + $0x398] sm:$0xff] %vm431_vm0, %v4915_v36  ;;  %6749 = vmatmul.msk.f32.gmra.mxu2 %vm431_vm0, %v4915_v36  ;;  %v4738_v23 = vsel %vm13700_vm10, %v13595_v27, %v4734_v5  ;;  %v4641_v44 = vand.u32 2147483647, %v13579_v26 }
 0x408   : > { %v13668_v55 = vpop.xlane.xlu1 %2997  ;;  %v13670_v0 = vpop.eup %7308  ;;  %6180 = vst.msk [vmem:[%s10388_s29 + $0x2a0] sm:$0xff] %vm431_vm0, %v5759_v34  ;;  %v4514_v30 = vsel %vm13712_vm13, %v13611_v13, %v4510_v47  ;;  %v4643_v22 = vand.u32 2147483648, %v13579_v26  ;;  %v4743_v9 = vsel %vm13690_vm9, %v4742_v43, %v4738_v23  ;;  %vm4413_vm4 = vweird.f32 %v13609_v4 }
 0x409   : > { %v5824_v28 = vpop.f32.mrf.mxu3  ;;  %7312 = vrcp.f32 %v13668_v55  ;;  %v4409_v6 = vmul.f32 %v13670_v0, %v13609_v4  ;;  %v13687_v38 = vpop.eup %7310  ;;  %v4519_v59 = vsel %vm4516_vm14, %v4518_v21, %v4514_v30  ;;  %vm4414_vm11 = vweird.f32 %v13670_v0 }
 0x40a   : > { %6188 = vst.msk [vmem:[%s10388_s29 + $0x2e0] sm:$0xff] %vm431_vm0, %v5824_v28  ;;  %v5629_v62 = vpop.f32.mrf.mxu0  ;;  %7314 = vrcp.f32 %v13662_v12  ;;  %v5694_v42 = vpop.f32.mrf.mxu1  ;;  %v4633_v25 = vmul.f32 %v13687_v38, %v13579_v26  ;;  %vm4638_vm15 = vweird.f32 %v13687_v38  ;;  %v4923_v32 = vmul.f32 %v12728_v54, %v4743_v9  ;;  %vm13755_vm1 = vmor %vm4413_vm4, %vm4414_vm11 }
 0x40b   : > { %6164 = vst.msk [vmem:[%s10388_s29 + $0x220] sm:$0xff] %vm431_vm0, %v5629_v62  ;;  %v4410_v29 = vsub.f32 1.0, %v4409_v6  ;;  %v4907_v63 = vmul.f32 %v11331_v51, %v4519_v59  ;;  %vm4637_vm7 = vweird.f32 %v13579_v26  ;;  %vm13765_vm6 = vcmp.eq.f32.partialorder %v4417_v49, 8.507059e+37 }
 0x40c   : > { %v4634_v2 = vsub.f32 1.0, %v4633_v25  ;;  %6172 = vst.msk [vmem:[%s10388_s29 + $0x260] sm:$0xff] %vm431_vm0, %v5694_v42  ;;  %6757 = vmatmul.msk.f32.gmra.mxu3 %vm431_vm0, %v4923_v32  ;;  %v4420_v54 = vor.u32 1.1754944e-38, %v4419_v15  ;;  %vm13771_vm2 = vmor %vm4637_vm7, %vm4638_vm15  ;;  %vm4642_vm3 = vcmp.eq.f32.partialorder %v4641_v44, 8.507059e+37  ;;  %v4644_v10 = vor.u32 1.1754944e-38, %v4643_v22 }
 0x40d   : > { %v4411_v53 = vmul.f32 %v13670_v0, %v4410_v29  ;;  %5051 = vst.msk [vmem:[%s9294_s20 + $0x3d8] sm:$0xff] %vm431_vm0, %v4923_v32  ;;  %6741 = vmatmul.msk.f32.gmra.mxu1 %vm431_vm0, %v4907_v63  ;;  %vm4749_vm5 = vweird.f32 %v13668_v55  ;;  %v4753_v6 = vand.u32 2147483647, %v13668_v55  ;;  %v4755_v18 = vand.u32 2147483648, %v13668_v55 }
 0x40e   : > { %v4635_v27 = vmul.f32 %v13687_v38, %v4634_v2  ;;  %5035 = vst.msk [vmem:[%s9294_s20 + $0x358] sm:$0xff] %vm431_vm0, %v4907_v63  ;;  %v4529_v35 = vand.u32 2147483647, %v13662_v12  ;;  %v4531_v36 = vand.u32 2147483648, %v13662_v12  ;;  %vm4525_vm12 = vweird.f32 %v13662_v12 }
 0x40f   : > { %v13730_v40 = vpop.eup %7312  ;;  %v4412_v60 = vadd.f32 %v13670_v0, %v4411_v53  ;;  %vm13813_vm10 = vcmp.eq.f32.partialorder %v4753_v6, 8.507059e+37  ;;  %v4756_v44 = vor.u32 1.1754944e-38, %v4755_v18 }
 0x410   : > { %v13736_v11 = vpop.xlane.xlu0 %2928  ;;  %v4745_v13 = vmul.f32 %v13730_v40, %v13668_v55  ;;  %v13743_v8 = vpop.xlane.xlu1 %2976  ;;  %v4636_v20 = vadd.f32 %v13687_v38, %v4635_v27  ;;  %vm4750_vm8 = vweird.f32 %v13730_v40  ;;  %vm13831_vm14 = vcmp.eq.f32.partialorder %v4529_v35, 8.507059e+37 }
 0x411   : > { %v13745_v17 = vpop.eup %7314  ;;  %7316 = vrcp.f32 %v13736_v11  ;;  %v4416_v5 = vsel %vm13755_vm1, %v13670_v0, %v4412_v60  ;;  %vm13827_vm13 = vmor %vm4749_vm5, %vm4750_vm8  ;;  %v4431_v22 = vand.u32 2147483647, %v13736_v11  ;;  %v4532_v59 = vor.u32 1.1754944e-38, %v4531_v36 }
 0x412   : > { %v4746_v56 = vsub.f32 1.0, %v4745_v13  ;;  %v4521_v34 = vmul.f32 %v13745_v17, %v13662_v12  ;;  %7318 = vrcp.f32 %v13743_v8  ;;  %v4640_v47 = vsel %vm13771_vm2, %v13687_v38, %v4636_v20 }
 0x413   : > { %v4421_v0 = vsel %vm13765_vm6, %v4420_v54, %v4416_v5  ;;  %v4645_v38 = vsel %vm4642_vm3, %v4644_v10, %v4640_v47  ;;  %vm4526_vm9 = vweird.f32 %v13745_v17  ;;  %vm4427_vm15 = vweird.f32 %v13736_v11 }
 0x414   : > { %v4522_v26 = vsub.f32 1.0, %v4521_v34  ;;  %v4747_v28 = vmul.f32 %v13730_v40, %v4746_v56  ;;  %v4900_v29 = vmul.f32 %v11318_v16, %v4421_v0  ;;  %v4916_v53 = vmul.f32 %v12832_v24, %v4645_v38  ;;  %vm13842_vm11 = vmor %vm4525_vm12, %vm4526_vm9 }
 0x415   : > { %v4433_v60 = vand.u32 2147483648, %v13736_v11  ;;  %vm4651_vm4 = vweird.f32 %v13743_v8  ;;  %v4655_v56 = vand.u32 2147483647, %v13743_v8  ;;  %v4657_v34 = vand.u32 2147483648, %v13743_v8 }
 0x416   : > { %v4523_v1 = vmul.f32 %v13745_v17, %v4522_v26  ;;  %v4748_v49 = vadd.f32 %v13730_v40, %v4747_v28  ;;  %5028 = vst.msk [vmem:[%s9294_s20 + $0x320] sm:$0xff] %vm431_vm0, %v4900_v29  ;;  %6734 = vmatmul.msk.f32.gmra.mxu0 %vm431_vm0, %v4900_v29  ;;  %6750 = vmatmul.msk.f32.gmra.mxu2 %vm431_vm0, %v4916_v53  ;;  %vm13867_vm1 = vcmp.eq.f32.partialorder %v4431_v22, 8.507059e+37 }
 0x417   : > { %v13788_v62 = vpop.eup %7316  ;;  %v5762_v42 = vpop.f32.mrf.mxu2  ;;  %5044 = vst.msk [vmem:[%s9294_s20 + $0x3a0] sm:$0xff] %vm431_vm0, %v4916_v53  ;;  %v4434_v6 = vor.u32 1.1754944e-38, %v4433_v60  ;;  %vm13892_vm2 = vcmp.eq.f32.partialorder %v4655_v56, 8.507059e+37  ;;  %v4658_v36 = vor.u32 1.1754944e-38, %v4657_v34 }
 0x418   : > { %v13794_v57 = vpop.xlane.xlu2 %3000  ;;  %v4423_v43 = vmul.f32 %v13788_v62, %v13736_v11  ;;  %6181 = vst.msk [vmem:[%s10388_s29 + $0x2a8] sm:$0xff] %vm431_vm0, %v5762_v42  ;;  %v5827_v25 = vpop.f32.mrf.mxu3  ;;  %v4524_v15 = vadd.f32 %v13745_v17, %v4523_v1  ;;  %v4752_v32 = vsel %vm13827_vm13, %v13730_v40, %v4748_v49  ;;  %vm4428_vm7 = vweird.f32 %v13788_v62 }
 0x419   : > { %v13803_v58 = vpop.xlane.xlu1 %2952  ;;  %v13805_v21 = vpop.eup %7318  ;;  %6189 = vst.msk [vmem:[%s10388_s29 + $0x2e8] sm:$0xff] %vm431_vm0, %v5827_v25  ;;  %7320 = vrcp.f32 %v13794_v57  ;;  %v4757_v37 = vsel %vm13813_vm10, %v4756_v44, %v4752_v32  ;;  %v4767_v40 = vand.u32 2147483647, %v13794_v57  ;;  %vm4429_vm3 = vmor %vm4427_vm15, %vm4428_vm7  ;;  %vm4763_vm5 = vweird.f32 %v13794_v57 }
 0x41a   : > { %v5632_v2 = vpop.f32.mrf.mxu0  ;;  %v4424_v23 = vsub.f32 1.0, %v4423_v43  ;;  %v4647_v30 = vmul.f32 %v13805_v21, %v13743_v8  ;;  %7322 = vrcp.f32 %v13803_v58  ;;  %v4528_v63 = vsel %vm13842_vm11, %v13745_v17, %v4524_v15 }
 0x41b   : > { %6165 = vst.msk [vmem:[%s10388_s29 + $0x228] sm:$0xff] %vm431_vm0, %v5632_v2  ;;  %v4924_v17 = vmul.f32 %v12905_v41, %v4757_v37  ;;  %v4533_v4 = vsel %vm13831_vm14, %v4532_v59, %v4528_v63  ;;  %vm4652_vm6 = vweird.f32 %v13805_v21  ;;  %vm13907_vm8 = vcmp.eq.f32.partialorder %v4767_v40, 8.507059e+37 }
 0x41c   : > { %v5697_v9 = vpop.f32.mrf.mxu1  ;;  %v4425_v27 = vmul.f32 %v13788_v62, %v4424_v23  ;;  %v4648_v13 = vsub.f32 1.0, %v4647_v30  ;;  %v4908_v5 = vmul.f32 %v11338_v39, %v4533_v4  ;;  %v4769_v38 = vand.u32 2147483648, %v13794_v57  ;;  %vm13916_vm9 = vmor %vm4651_vm4, %vm4652_vm6 }
 0x41d   : > { %6173 = vst.msk [vmem:[%s10388_s29 + $0x268] sm:$0xff] %vm431_vm0, %v5697_v9  ;;  %6758 = vmatmul.msk.f32.gmra.mxu3 %vm431_vm0, %v4924_v17  ;;  %v4543_v29 = vand.u32 2147483647, %v13803_v58  ;;  %v4545_v49 = vand.u32 2147483648, %v13803_v58  ;;  %vm4539_vm13 = vweird.f32 %v13803_v58 }
 0x41e   : > { %v4649_v20 = vmul.f32 %v13805_v21, %v4648_v13  ;;  %v4426_v10 = vadd.f32 %v13788_v62, %v4425_v27  ;;  %5052 = vst.msk [vmem:[%s9294_s20 + $0x3e0] sm:$0xff] %vm431_vm0, %v4924_v17  ;;  %6742 = vmatmul.msk.f32.gmra.mxu1 %vm431_vm0, %v4908_v5  ;;  %v4770_v30 = vor.u32 1.1754944e-38, %v4769_v38 }
 0x41f   : > { %v13865_v51 = vpop.eup %7320  ;;  %5036 = vst.msk [vmem:[%s9294_s20 + $0x360] sm:$0xff] %vm431_vm0, %v4908_v5  ;;  %vm13953_vm11 = vcmp.eq.f32.partialorder %v4543_v29, 8.507059e+37  ;;  %v4546_v55 = vor.u32 1.1754944e-38, %v4545_v49 }
 0x420   : > { %v13875_v26 = vpop.xlane.xlu2 %2979  ;;  %v4759_v28 = vmul.f32 %v13865_v51, %v13794_v57  ;;  %v13882_v47 = vpop.eup %7322  ;;  %v4650_v41 = vadd.f32 %v13805_v21, %v4649_v20  ;;  %v4430_v25 = vsel %vm4429_vm3, %v13788_v62, %v4426_v10  ;;  %vm4764_vm10 = vweird.f32 %v13865_v51 }
 0x421   : > { %7324 = vrcp.f32 %v13875_v26  ;;  %v13890_v18 = vpop.xlane.xlu1 %2931  ;;  %v4535_v35 = vmul.f32 %v13882_v47, %v13803_v58  ;;  %v4435_v15 = vsel %vm13867_vm1, %v4434_v6, %v4430_v25  ;;  %vm4540_vm12 = vweird.f32 %v13882_v47  ;;  %vm13948_vm14 = vmor %vm4763_vm5, %vm4764_vm10 }
 0x422   : > { %v4760_v39 = vsub.f32 1.0, %v4759_v28  ;;  %7326 = vrcp.f32 %v13890_v18  ;;  %v4654_v8 = vsel %vm13916_vm9, %v13805_v21, %v4650_v41  ;;  %v4901_v62 = vmul.f32 %v11431_v50, %v4435_v15  ;;  %vm13965_vm15 = vmor %vm4539_vm13, %vm4540_vm12 }
 0x423   : > { %v4536_v43 = vsub.f32 1.0, %v4535_v35  ;;  %v4659_v24 = vsel %vm13892_vm2, %v4658_v36, %v4654_v8  ;;  %v4669_v59 = vand.u32 2147483647, %v13875_v26  ;;  %v4671_v27 = vand.u32 2147483648, %v13875_v26 }
 0x424   : > { %v4761_v11 = vmul.f32 %v13865_v51, %v4760_v39  ;;  %5029 = vst.msk [vmem:[%s9294_s20 + $0x328] sm:$0xff] %vm431_vm0, %v4901_v62  ;;  %6735 = vmatmul.msk.f32.gmra.mxu0 %vm431_vm0, %v4901_v62  ;;  %v4917_v57 = vmul.f32 %v12989_v31, %v4659_v24  ;;  %v4445_v32 = vand.u32 2147483647, %v13890_v18  ;;  %v4447_v54 = vand.u32 2147483648, %v13890_v18 }
 0x425   : > { %v4537_v16 = vmul.f32 %v13882_v47, %v4536_v43  ;;  %vm4665_vm7 = vweird.f32 %v13875_v26  ;;  %vm14013_vm2 = vcmp.eq.f32.partialorder %v4669_v59, 8.507059e+37  ;;  %v4672_v41 = vor.u32 1.1754944e-38, %v4671_v27 }
 0x426   : > { %v13930_v53 = vpop.xlane.xlu0 %3003  ;;  %v4762_v2 = vadd.f32 %v13865_v51, %v4761_v11  ;;  %5045 = vst.msk [vmem:[%s9294_s20 + $0x3a8] sm:$0xff] %vm431_vm0, %v4917_v57  ;;  %6751 = vmatmul.msk.f32.gmra.mxu2 %vm431_vm0, %v4917_v57  ;;  %vm4441_vm3 = vweird.f32 %v13890_v18  ;;  %v4448_v39 = vor.u32 1.1754944e-38, %v4447_v54 }
 0x427   : > { %v13936_v23 = vpop.eup %7324  ;;  %7328 = vrcp.f32 %v13930_v53  ;;  %v4538_v50 = vadd.f32 %v13882_v47, %v4537_v16  ;;  %v4781_v36 = vand.u32 2147483647, %v13930_v53  ;;  %v4783_v0 = vand.u32 2147483648, %v13930_v53 }
 0x428   : > { %v13942_v21 = vpop.eup %7326  ;;  %v4661_v12 = vmul.f32 %v13936_v23, %v13875_v26  ;;  %v5765_v22 = vpop.f32.mrf.mxu2  ;;  %v4766_v56 = vsel %vm13948_vm14, %v13865_v51, %v4762_v2  ;;  %vm4666_vm4 = vweird.f32 %v13936_v23  ;;  %vm4777_vm10 = vweird.f32 %v13930_v53 }
 0x429   : > { %v4437_v13 = vmul.f32 %v13942_v21, %v13890_v18  ;;  %6182 = vst.msk [vmem:[%s10388_s29 + $0x2b0] sm:$0xff] %vm431_vm0, %v5765_v22  ;;  %v5830_v60 = vpop.f32.mrf.mxu3  ;;  %v4542_v34 = vsel %vm13965_vm15, %v13882_v47, %v4538_v50  ;;  %v4771_v40 = vsel %vm13907_vm8, %v4770_v30, %v4766_v56  ;;  %vm4442_vm1 = vweird.f32 %v13942_v21  ;;  %vm14009_vm6 = vmor %vm4665_vm7, %vm4666_vm4 }
 0x42a   : > { %v4662_v31 = vsub.f32 1.0, %v4661_v12  ;;  %v5635_v63 = vpop.f32.mrf.mxu0  ;;  %6190 = vst.msk [vmem:[%s10388_s29 + $0x2f0] sm:$0xff] %vm431_vm0, %v5830_v60  ;;  %v4547_v17 = vsel %vm13953_vm11, %v4546_v55, %v4542_v34  ;;  %v4925_v51 = vmul.f32 %v13042_v48, %v4771_v40  ;;  %vm4443_vm5 = vmor %vm4441_vm3, %vm4442_vm1  ;;  %vm4446_vm8 = vcmp.eq.f32.partialorder %v4445_v32, 8.507059e+37 }
 0x42b   : > { %v5700_v20 = vpop.f32.mrf.mxu1  ;;  %v4438_v37 = vsub.f32 1.0, %v4437_v13  ;;  %6166 = vst.msk [vmem:[%s10388_s29 + $0x230] sm:$0xff] %vm431_vm0, %v5635_v63  ;;  %v4909_v10 = vmul.f32 %v11406_v19, %v4547_v17  ;;  %v4784_v2 = vor.u32 1.1754944e-38, %v4783_v0  ;;  %vm4782_vm13 = vcmp.eq.f32.partialorder %v4781_v36, 8.507059e+37 }
 0x42c   : > { %v4663_v4 = vmul.f32 %v13936_v23, %v4662_v31  ;;  %6174 = vst.msk [vmem:[%s10388_s29 + $0x270] sm:$0xff] %vm431_vm0, %v5700_v20  ;;  %6759 = vmatmul.msk.f32.gmra.mxu3 %vm431_vm0, %v4925_v51 }
 0x42d   : > { %v7329_v28 = vpop.eup %7328  ;;  %v4439_v5 = vmul.f32 %v13942_v21, %v4438_v37  ;;  %5053 = vst.msk [vmem:[%s9294_s20 + $0x3e8] sm:$0xff] %vm431_vm0, %v4925_v51  ;;  %6743 = vmatmul.msk.f32.gmra.mxu1 %vm431_vm0, %v4909_v10 }
 0x42e   : > { %v4664_v47 = vadd.f32 %v13936_v23, %v4663_v4  ;;  %v4773_v6 = vmul.f32 %v7329_v28, %v13930_v53  ;;  %5037 = vst.msk [vmem:[%s9294_s20 + $0x368] sm:$0xff] %vm431_vm0, %v4909_v10  ;;  %vm4778_vm9 = vweird.f32 %v7329_v28 }
 0x42f   : > { %v4440_v1 = vadd.f32 %v13942_v21, %v4439_v5  ;;  %v2956_v26 = vpop.xlane.xlu2 %2955  ;;  %vm14034_vm12 = vmor %vm4777_vm10, %vm4778_vm9 }
 0x430   : > { %v4774_v35 = vsub.f32 1.0, %v4773_v6  ;;  %7330 = vrcp.f32 %v2956_v26  ;;  %v4668_v18 = vsel %vm14009_vm6, %v13936_v23, %v4664_v47  ;;  %v4559_v50 = vand.u32 2147483648, %v2956_v26 }
 0x431   : > { %v4444_v38 = vsel %vm4443_vm5, %v13942_v21, %v4440_v1  ;;  %v4673_v43 = vsel %vm14013_vm2, %v4672_v41, %v4668_v18  ;;  %v4557_v12 = vand.u32 2147483647, %v2956_v26  ;;  %vm4553_vm11 = vweird.f32 %v2956_v26 }
 0x432   : > { %v4775_v42 = vmul.f32 %v7329_v28, %v4774_v35  ;;  %v4449_v11 = vsel %vm4446_vm8, %v4448_v39, %v4444_v38  ;;  %v4918_v25 = vmul.f32 %v13137_v61, %v4673_v43  ;;  %v4560_v9 = vor.u32 1.1754944e-38, %v4559_v50 }
 0x433   : > { %v4902_v29 = vmul.f32 %v11463_v3, %v4449_v11  ;;  %vm4558_vm4 = vcmp.eq.f32.partialorder %v4557_v12, 8.507059e+37 }
 0x434   : > { %v4776_v49 = vadd.f32 %v7329_v28, %v4775_v42  ;;  %v5768_v15 = vpop.f32.mrf.mxu2  ;;  %6752 = vmatmul.msk.f32.gmra.mxu2 %vm431_vm0, %v4918_v25  ;;  %5046 = vst.msk [vmem:[%s9294_s20 + $0x3b0] sm:$0xff] %vm431_vm0, %v4918_v25 }
 0x435   : > { %5030 = vst.msk [vmem:[%s9294_s20 + $0x330] sm:$0xff] %vm431_vm0, %v4902_v29  ;;  %6736 = vmatmul.msk.f32.gmra.mxu0 %vm431_vm0, %v4902_v29  ;;  %v5833_v3 = vpop.f32.mrf.mxu3 }
 0x436   : > { %v7331_v61 = vpop.eup %7330  ;;  %v5638_v53 = vpop.f32.mrf.mxu0  ;;  %v4780_v16 = vsel %vm14034_vm12, %v7329_v28, %v4776_v49  ;;  %6183 = vst.msk [vmem:[%s10388_s29 + $0x2b8] sm:$0xff] %vm431_vm0, %v5768_v15 }
 0x437   : > { %v4549_v62 = vmul.f32 %v7331_v61, %v2956_v26  ;;  %v2935_v23 = vpop.xlane.xlu2 %2934  ;;  %v5703_v30 = vpop.f32.mrf.mxu1  ;;  %v4785_v24 = vsel %vm4782_vm13, %v4784_v2, %v4780_v16  ;;  %6191 = vst.msk [vmem:[%s10388_s29 + $0x2f8] sm:$0xff] %vm431_vm0, %v5833_v3  ;;  %vm4554_vm14 = vweird.f32 %v7331_v61 }
 0x438   : > { %7332 = vrcp.f32 %v2935_v23  ;;  %6167 = vst.msk [vmem:[%s10388_s29 + $0x238] sm:$0xff] %vm431_vm0, %v5638_v53  ;;  %v4926_v44 = vmul.f32 %v13190_v52, %v4785_v24  ;;  %vm4555_vm15 = vmor %vm4553_vm11, %vm4554_vm14  ;;  %v4461_v60 = vand.u32 2147483648, %v2935_v23  ;;  %v4459_v32 = vand.u32 2147483647, %v2935_v23 }
 0x439   : > { %v4550_v21 = vsub.f32 1.0, %v4549_v62  ;;  %6175 = vst.msk [vmem:[%s10388_s29 + $0x278] sm:$0xff] %vm431_vm0, %v5703_v30  ;;  %vm4455_vm7 = vweird.f32 %v2935_v23 }
 0x43a   : > { %5054 = vst.msk [vmem:[%s9294_s20 + $0x3f0] sm:$0xff] %vm431_vm0, %v4926_v44  ;;  %6760 = vmatmul.msk.f32.gmra.mxu3 %vm431_vm0, %v4926_v44  ;;  %v4462_v20 = vor.u32 1.1754944e-38, %v4461_v60  ;;  %vm4460_vm2 = vcmp.eq.f32.partialorder %v4459_v32, 8.507059e+37 }
 0x43b   : > { %v4551_v58 = vmul.f32 %v7331_v61, %v4550_v21 }
 0x43d   : > { %v4552_v57 = vadd.f32 %v7331_v61, %v4551_v58 }
 0x43e   : > { %v7333_v22 = vpop.eup %7332 }
 0x43f   : > { %v4451_v55 = vmul.f32 %v7333_v22, %v2935_v23  ;;  %v4556_v59 = vsel %vm4555_vm15, %v7331_v61, %v4552_v57  ;;  %vm4456_vm1 = vweird.f32 %v7333_v22 }
 0x440   : > { %v4561_v52 = vsel %vm4558_vm4, %v4560_v9, %v4556_v59  ;;  %vm4457_vm6 = vmor %vm4455_vm7, %vm4456_vm1 }
 0x441   : > { %v4452_v27 = vsub.f32 1.0, %v4451_v55  ;;  %v4910_v13 = vmul.f32 %v13233_v45, %v4561_v52 }
 0x443   : > { %v4453_v31 = vmul.f32 %v7333_v22, %v4452_v27  ;;  %5038 = vst.msk [vmem:[%s9294_s20 + $0x370] sm:$0xff] %vm431_vm0, %v4910_v13  ;;  %6744 = vmatmul.msk.f32.gmra.mxu1 %vm431_vm0, %v4910_v13 }
 0x445   : > { %v4454_v63 = vadd.f32 %v7333_v22, %v4453_v31 }
 0x447   : > { %v4458_v56 = vsel %vm4457_vm6, %v7333_v22, %v4454_v63  ;;  %v2983_v34 = vpop.xlane.xlu0 %2982  ;;  %v5877_v37 = vpop.f32.mrf.mxu0 }
 0x448   : > { %v4463_v54 = vsel %vm4460_vm2, %v4462_v20, %v4458_v56  ;;  %7334 = vrcp.f32 %v2983_v34  ;;  %6192 = vst.msk [vmem:[%s10388_s29 + $0x300] sm:$0xff] %vm431_vm0, %v5877_v37  ;;  %v4685_v10 = vand.u32 2147483648, %v2983_v34  ;;  %v4683_v5 = vand.u32 2147483647, %v2983_v34 }
 0x449   : > { %v4903_v45 = vmul.f32 %v13241_v7, %v4463_v54  ;;  %vm4679_vm5 = vweird.f32 %v2983_v34 }
 0x44a   : > { %v4686_v7 = vor.u32 1.1754944e-38, %v4685_v10  ;;  %vm4684_vm9 = vcmp.eq.f32.partialorder %v4683_v5, 8.507059e+37 }
 0x44b   : > { %5031 = vst.msk [vmem:[%s9294_s20 + $0x338] sm:$0xff] %vm431_vm0, %v4903_v45  ;;  %6737 = vmatmul.msk.f32.gmra.mxu0 %vm431_vm0, %v4903_v45 }
 0x44d   : > { %v3007_v4 = vpop.xlane.xlu1 %3006 }
 0x44e   : > { %v7335_v40 = vpop.eup %7334  ;;  %7336 = vrcp.f32 %v3007_v4  ;;  %v4797_v35 = vand.u32 2147483648, %v3007_v4  ;;  %v4795_v38 = vand.u32 2147483647, %v3007_v4  ;;  %vm4791_vm12 = vweird.f32 %v3007_v4 }
 0x44f   : > { %v4675_v17 = vmul.f32 %v7335_v40, %v2983_v34  ;;  %vm4680_vm3 = vweird.f32 %v7335_v40 }
 0x450   : > { %vm4681_vm8 = vmor %vm4679_vm5, %vm4680_vm3  ;;  %v4798_v11 = vor.u32 1.1754944e-38, %v4797_v35  ;;  %vm4796_vm14 = vcmp.eq.f32.partialorder %v4795_v38, 8.507059e+37 }
 0x451   : > { %v4676_v51 = vsub.f32 1.0, %v4675_v17 }
 0x453   : > { %v4677_v28 = vmul.f32 %v7335_v40, %v4676_v51 }
 0x454   : > { %v7337_v6 = vpop.eup %7336 }
 0x455   : > { %v4678_v47 = vadd.f32 %v7335_v40, %v4677_v28  ;;  %v4787_v48 = vmul.f32 %v7337_v6, %v3007_v4  ;;  %vm4792_vm10 = vweird.f32 %v7337_v6 }
 0x456   : > { %v6007_v19 = vpop.f32.mrf.mxu2  ;;  %vm4793_vm13 = vmor %vm4791_vm12, %vm4792_vm10 }
 0x457   : > { %6208 = vst.msk [vmem:[%s10388_s29 + $0x380] sm:$0xff] %vm431_vm0, %v6007_v19  ;;  %v4682_v41 = vsel %vm4681_vm8, %v7335_v40, %v4678_v47  ;;  %v4788_v26 = vsub.f32 1.0, %v4787_v48 }
 0x458   : > { %v4687_v1 = vsel %vm4684_vm9, %v4686_v7, %v4682_v41 }
 0x459   : > { %v4919_v39 = vmul.f32 %v13266_v46, %v4687_v1  ;;  %v2959_v36 = vpop.xlane.xlu0 %2958  ;;  %v4789_v0 = vmul.f32 %v7337_v6, %v4788_v26 }
 0x45a   : > { %7338 = vrcp.f32 %v2959_v36  ;;  %v4573_v2 = vand.u32 2147483648, %v2959_v36  ;;  %v4571_v61 = vand.u32 2147483647, %v2959_v36  ;;  %vm4567_vm15 = vweird.f32 %v2959_v36 }
 0x45b   : > { %5047 = vst.msk [vmem:[%s9294_s20 + $0x3b8] sm:$0xff] %vm431_vm0, %v4919_v39  ;;  %6753 = vmatmul.msk.f32.gmra.mxu2 %vm431_vm0, %v4919_v39  ;;  %v4790_v42 = vadd.f32 %v7337_v6, %v4789_v0 }
 0x45c   : > { %v6072_v18 = vpop.f32.mrf.mxu3  ;;  %v4574_v16 = vor.u32 1.1754944e-38, %v4573_v2  ;;  %vm4572_vm1 = vcmp.eq.f32.partialorder %v4571_v61, 8.507059e+37 }
 0x45d   : > { %6216 = vst.msk [vmem:[%s10388_s29 + $0x3c0] sm:$0xff] %vm431_vm0, %v6072_v18  ;;  %v4794_v46 = vsel %vm4793_vm13, %v7337_v6, %v4790_v42 }
 0x45e   : > { %v4799_v29 = vsel %vm4796_vm14, %v4798_v11, %v4794_v46 }
 0x45f   : > { %v4927_v49 = vmul.f32 %v13280_v14, %v4799_v29 }
 0x460   : > { %v5942_v43 = vpop.f32.mrf.mxu1  ;;  %v7339_v25 = vpop.eup %7338 }
 0x461   : > { %6200 = vst.msk [vmem:[%s10388_s29 + $0x340] sm:$0xff] %vm431_vm0, %v5942_v43  ;;  %v4563_v15 = vmul.f32 %v7339_v25, %v2959_v36  ;;  %6761 = vmatmul.msk.f32.gmra.mxu3 %vm431_vm0, %v4927_v49  ;;  %vm4568_vm11 = vweird.f32 %v7339_v25 }
 0x462   : > { %5055 = vst.msk [vmem:[%s9294_s20 + $0x3f8] sm:$0xff] %vm431_vm0, %v4927_v49  ;;  %vm4569_vm4 = vmor %vm4567_vm15, %vm4568_vm11 }
 0x463   : > { %v4564_v8 = vsub.f32 1.0, %v4563_v15 }
 0x465   : > { %v4565_v3 = vmul.f32 %v7339_v25, %v4564_v8 }
 0x467   : > { %v4566_v53 = vadd.f32 %v7339_v25, %v4565_v3 }
 0x469   : > { %v4570_v14 = vsel %vm4569_vm4, %v7339_v25, %v4566_v53 }
 0x46a   : > { %v4575_v62 = vsel %vm4572_vm1, %v4574_v16, %v4570_v14 }
 0x46b   : > { %v4911_v23 = vmul.f32 %v13317_v33, %v4575_v62 }
 0x46d   : > { %5039 = vst.msk [vmem:[%s9294_s20 + $0x378] sm:$0xff] %vm431_vm0, %v4911_v23  ;;  %6745 = vmatmul.msk.f32.gmra.mxu1 %vm431_vm0, %v4911_v23 }
 0x46e   : > { %7525 = shalt.err (!%p7522_p4)
}
 0x46f   : > { %s7600_s27 = smov 128   ;;  %s7601_s28 = smov 8   ;;  %v6010_v33 = vpop.f32.mrf.mxu2 }
 0x470   : > { %6776 = dma.vmem_to_hbm [thread:$0]  (%p7667_p11), %s6260_s6, 16384, %s6262_s7, %s6230_s8, %s7600_s27, %s7600_s27, %s7601_s28  }
 0x471   : > { %6209 = vst.msk [vmem:[%s10388_s29 + $0x388] sm:$0xff] %vm431_vm0, %v6010_v33  ;;  %s6241_s4 = scalar_lea.hbm %s14202_s1, %s6771_s30  ;;  %s6242_s5 = sshll.u32 %s10388_s29, 4  ;;  %s6243_s5 = int_to_ptr.vmem [resolvable:$true] %s6242_s5 }
 0x472   : > { %v5945_v24 = vpop.f32.mrf.mxu1  ;;  %v6075_v21 = vpop.f32.mrf.mxu3  ;;  %s6244_s6 = sshll.u32 %s6241_s4, 4  ;;  %s6225_s7 = scalar_lea.sflag [#allocation4], %s7703_s25  ;;  %s6245_s6 = int_to_ptr.hbm [resolvable:$true] %s6244_s6 }
 0x473   : > { %6201 = vst.msk [vmem:[%s10388_s29 + $0x348] sm:$0xff] %vm431_vm0, %v5945_v24  ;;  %s7540_s8 = sshra.s32 %s6245_s6, 4  ;;  %s7546_s16 = scalar_lea.hbm %s14202_s1, 2048  ;;  %s7541_s8 = int_to_ptr.hbm [resolvable:$true] %s7540_s8 }
 0x474   : > { %v5880_v30 = vpop.f32.mrf.mxu0  ;;  %6217 = vst.msk [vmem:[%s10388_s29 + $0x3c8] sm:$0xff] %vm431_vm0, %v6075_v21  ;;  %s7542_s14 = scalar_lea.hbm %s7541_s8, 1024  ;;  %p7547_p10 = scmp.lt.s32.totalorder %s7541_s8, %s14202_s1 }
 0x475   : > { %6193 = vst.msk [vmem:[%s10388_s29 + $0x308] sm:$0xff] %vm431_vm0, %v5880_v30  ;;  %p7543_p7 = scmp.ne.s32.totalorder %s7541_s8, %s7542_s14  ;;  %p7548_p2 = scmp.lt.s32.totalorder %s7546_s16, %s7542_s14 }
 0x477   : > { %p7544_p5 = pnand %p7543_p7, %p7667_p11  ;;  %p7549_p6 = por %p7548_p2, %p7547_p10 }
 0x479   : > { %p7545_p8 = pneg %p7544_p5 }
 0x47b   : > { %p7550_p9 = pnand %p7549_p6, %p7545_p8 }
 0x47c   : > { %v5883_v44 = vpop.f32.mrf.mxu0 }
 0x47d   : > { %6194 = vst.msk [vmem:[%s10388_s29 + $0x310] sm:$0xff] %vm431_vm0, %v5883_v44  ;;  %v6013_v50 = vpop.f32.mrf.mxu2  ;;  %v5948_v58 = vpop.f32.mrf.mxu1 }
 0x47e   : > { %6210 = vst.msk [vmem:[%s10388_s29 + $0x390] sm:$0xff] %vm431_vm0, %v6013_v50 }
 0x47f   : > { %6202 = vst.msk [vmem:[%s10388_s29 + $0x350] sm:$0xff] %vm431_vm0, %v5948_v58 }
 0x482   : > { %v6078_v12 = vpop.f32.mrf.mxu3 }
 0x483   : > { %6218 = vst.msk [vmem:[%s10388_s29 + $0x3d0] sm:$0xff] %vm431_vm0, %v6078_v12 }
 0x484   : > { %v5886_v57 = vpop.f32.mrf.mxu0 }
 0x485   : > { %6195 = vst.msk [vmem:[%s10388_s29 + $0x318] sm:$0xff] %vm431_vm0, %v5886_v57 }
 0x48a   : > { %v6016_v22 = vpop.f32.mrf.mxu2  ;;  %v5951_v9 = vpop.f32.mrf.mxu1 }
 0x48b   : > { %6211 = vst.msk [vmem:[%s10388_s29 + $0x398] sm:$0xff] %vm431_vm0, %v6016_v22 }
 0x48c   : > { %6203 = vst.msk [vmem:[%s10388_s29 + $0x358] sm:$0xff] %vm431_vm0, %v5951_v9 }
 0x48f   : > { %v6081_v55 = vpop.f32.mrf.mxu3 }
 0x490   : > { %6219 = vst.msk [vmem:[%s10388_s29 + $0x3d8] sm:$0xff] %vm431_vm0, %v6081_v55 }
 0x493   : > { %v5889_v59 = vpop.f32.mrf.mxu0 }
 0x494   : > { %6196 = vst.msk [vmem:[%s10388_s29 + $0x320] sm:$0xff] %vm431_vm0, %v5889_v59 }
 0x499   : > { %v6019_v52 = vpop.f32.mrf.mxu2 }
 0x49a   : > { %6212 = vst.msk [vmem:[%s10388_s29 + $0x3a0] sm:$0xff] %vm431_vm0, %v6019_v52 }
 0x49b   : > { %v5954_v27 = vpop.f32.mrf.mxu1 }
 0x49c   : > { %6204 = vst.msk [vmem:[%s10388_s29 + $0x360] sm:$0xff] %vm431_vm0, %v5954_v27 }
 0x4a0   : > { %v6084_v13 = vpop.f32.mrf.mxu3 }
 0x4a1   : > { %6220 = vst.msk [vmem:[%s10388_s29 + $0x3e0] sm:$0xff] %vm431_vm0, %v6084_v13  ;;  %v5892_v60 = vpop.f32.mrf.mxu0 }
 0x4a2   : > { %6197 = vst.msk [vmem:[%s10388_s29 + $0x328] sm:$0xff] %vm431_vm0, %v5892_v60 }
 0x4a9   : > { %v6022_v32 = vpop.f32.mrf.mxu2 }
 0x4aa   : > { %v5957_v31 = vpop.f32.mrf.mxu1  ;;  %6213 = vst.msk [vmem:[%s10388_s29 + $0x3a8] sm:$0xff] %vm431_vm0, %v6022_v32 }
 0x4ab   : > { %6205 = vst.msk [vmem:[%s10388_s29 + $0x368] sm:$0xff] %vm431_vm0, %v5957_v31 }
 0x4af   : > { %v6087_v63 = vpop.f32.mrf.mxu3 }
 0x4b0   : > { %6221 = vst.msk [vmem:[%s10388_s29 + $0x3e8] sm:$0xff] %vm431_vm0, %v6087_v63 }
 0x4b2   : > { %v5895_v20 = vpop.f32.mrf.mxu0 }
 0x4b3   : > { %6198 = vst.msk [vmem:[%s10388_s29 + $0x330] sm:$0xff] %vm431_vm0, %v5895_v20 }
 0x4b7   : > { %v6025_v56 = vpop.f32.mrf.mxu2 }
 0x4b8   : > { %6214 = vst.msk [vmem:[%s10388_s29 + $0x3b0] sm:$0xff] %vm431_vm0, %v6025_v56 }
 0x4bd   : > { %v6090_v34 = vpop.f32.mrf.mxu3 }
 0x4be   : > { %6222 = vst.msk [vmem:[%s10388_s29 + $0x3f0] sm:$0xff] %vm431_vm0, %v6090_v34 }
 0x4c0   : > { %v5960_v37 = vpop.f32.mrf.mxu1 }
 0x4c1   : > { %6206 = vst.msk [vmem:[%s10388_s29 + $0x370] sm:$0xff] %vm431_vm0, %v5960_v37 }
 0x4c8   : > { %v5898_v54 = vpop.f32.mrf.mxu0 }
 0x4c9   : > { %6199 = vst.msk [vmem:[%s10388_s29 + $0x338] sm:$0xff] %vm431_vm0, %v5898_v54 }
 0x4de   : > { %v6028_v45 = vpop.f32.mrf.mxu2 }
 0x4df   : > { %6215 = vst.msk [vmem:[%s10388_s29 + $0x3b8] sm:$0xff] %vm431_vm0, %v6028_v45 }
 0x4e4   : > { %v6093_v40 = vpop.f32.mrf.mxu3 }
 0x4e5   : > { %6223 = vst.msk [vmem:[%s10388_s29 + $0x3f8] sm:$0xff] %vm431_vm0, %v6093_v40 }
 0x4ea   : > { %v5963_v17 = vpop.f32.mrf.mxu1 }
 0x4eb   : > { %6207 = vst.msk [vmem:[%s10388_s29 + $0x378] sm:$0xff] %vm431_vm0, %v5963_v17 }
 0x4ec   : > { %7553 = shalt.err (!%p7550_p9)
}
 0x4ed   : > { %6775 = dma.vmem_to_hbm [thread:$0]  (%p7667_p11), %s6243_s5, 16384, %s6245_s6, %s6225_s7, %s7600_s27, %s7600_s27, %s7601_s28  }
 0x4ee PF: > { %s6276_s25 = sand.u32 1, %s7584_s9   ;;  %p15183_p13 = scmp.ge.s32.totalorder %s7596_s12, 2 }
 0x4ef   : > { %s6277_s29 = scalar_lea.sflag [#allocation4], %s6276_s25 }
 0x4f0   : > { %p6784_p0 = pnand %p15183_p13, %p7671_p12 }
 0x4f2   : > { %p6785_p1 = pneg %p6784_p0 }
 0x4f4   : > { %7575 = dma.done.wait (%p6785_p1), %s6277_s29, 16384  }
 0x4f5   : > { %7577 = vsyncadd (%p6785_p1), %s6277_s29, 4294950912  ;;  %s6287_s23 = scalar_lea.sflag [#allocation7], %s6276_s25 }
 0x4f6   : > { %7579 = dma.done.wait (%p6785_p1), %s6287_s23, 16384  }
 0x4f7   : > { %7581 = vsyncadd (%p6785_p1), %s6287_s23, 4294950912  ;;  %p19_p11 = scmp.ge.s32.totalorder %s7642_s15, 4   ;;  %s15184_s9 = smov %s7588_s10 }
 0x4f8   : > { %s15185_s10 = smov %s7592_s11  ;;  %s15186_s11 = smov %s7654_s18 }
 0x4f9   : > { %s15187_s12 = smov %s7642_s15  ;;  %21 = sbr.rel (!%p19_p11) target bundleno = 7 (0x7), region = 86 }
 0x4fe   :  { %6293 = vsyncpa [#allocation3], 1 }
 0x4ff   :  { %6295 = vsyncpa [#allocation3 + $0x1], 1 }
 0x500   :  { %6296 = vsyncpa [#allocation4], 1 }
 0x501   :  { %6298 = vsyncpa [#allocation4 + $0x1], 1 }
 0x502   :  { %6299 = vsyncpa [#allocation7], 1 }
 0x503   :  { %6301 = vsyncpa [#allocation7 + $0x1], 1 }

</bundles_post_ra>
